<compile_context>
chip_gen: v7x
topology: tpu7x:2x2x1
jax: 0.10.0
libtpu: 0.0.40
codegen_flags: <defaults>
</compile_context>

<pallas_src>
import functools
from typing import NamedTuple

import jax
import jax.numpy as jnp
import numpy as np
from jax.experimental import pallas as pl
from jax.experimental.pallas import tpu as pltpu

_NEG = jnp.float32(-1e30)   # "-inf" bias for padded softmax lanes


def _round_up(x, m):
    return (x + m - 1) // m * m


class DecoderConfig(NamedTuple):
    H: int
    L: int
    ML: int
    ML_pad: int
    V: int
    V_pad: int


def _fused_decoder_kernel(embpre_ref, hid0_ref, enc_ref, wah_ref, wch_ref,
                          wgru_ref, wout_ref, b_ref,
                          logp_ref, attn_ref, hid_ref,
                          *, H, L, ML_pad, V_pad, T):
    f32 = jnp.float32
    bf16 = jnp.bfloat16
    boff = ML_pad + H                       # bias offset of the GRU gate biases
    ob = boff + L * 4 * H                   # bias offset of the output bias

    # hidden state carried across steps in vregs (L rows of (1, H) f32)
    h = [hid0_ref[l:l + 1, :] for l in range(L)]

    for t in range(T):                      # fully unrolled serial decode loop
        epre = embpre_ref[t:t + 1, :]       # precomputed emb-side terms (1, ML_pad+H)

        # --- attention: softmax(attn(cat(emb, h[0]))) over ML_pad lanes ---
        scores = (epre[:, 0:ML_pad] + b_ref[:, 0:ML_pad]
                  + jnp.dot(h[0].astype(bf16), wah_ref[...],
                            preferred_element_type=f32))
        scores = scores - jnp.max(scores, axis=1, keepdims=True)
        e = jnp.exp(scores)
        denom = jnp.sum(e, axis=1, keepdims=True)
        inv = pl.reciprocal(denom, approx=True)      # EUP slot (effectively free)
        inv = inv * (2.0 - denom * inv)              # one Newton step -> ~f32 accuracy
        attn_w = e * inv                             # (1, ML_pad); padded lanes are 0

        # --- attn_applied = attn_w @ encoder_outputs; attn_combine + ReLU ---
        attn_applied = jnp.dot(attn_w.astype(bf16), enc_ref[...],
                               preferred_element_type=f32)
        x = (epre[:, ML_pad:ML_pad + H] + b_ref[:, ML_pad:ML_pad + H]
             + jnp.dot(attn_applied.astype(bf16), wch_ref[...],
                       preferred_element_type=f32))
        x = jnp.maximum(x, 0.0)
        # TODO(synk): nn.Dropout(0.1) on the embedding is training-only; eval = identity.

        # --- multi-layer GRU: one fused (1,2H)x(2H,4H) bf16 dot per layer ---
        # columns of the fused weight: [r|z (ih+hh summed), gi_n, gh_n]
        for l in range(L):
            bg = boff + l * 4 * H
            lhs = jnp.concatenate([x, h[l]], axis=1).astype(bf16)        # (1, 2H)
            g = jnp.dot(lhs, wgru_ref[l * 2 * H:(l + 1) * 2 * H, :],
                        preferred_element_type=f32)                      # (1, 4H)
            rz = jax.nn.sigmoid(g[:, 0:2 * H] + b_ref[:, bg:bg + 2 * H])  # one sigmoid for r,z
            r = rz[:, 0:H]
            z = rz[:, H:2 * H]
            n = jnp.tanh(g[:, 2 * H:3 * H] + b_ref[:, bg + 2 * H:bg + 3 * H]
                         + r * (g[:, 3 * H:4 * H] + b_ref[:, bg + 3 * H:bg + 4 * H]))
            h_new = (1.0 - z) * n + z * h[l]
            h[l] = h_new
            x = h_new

        # --- output projection + log_softmax (padded vocab lanes carry -1e30) ---
        logits = (jnp.dot(x.astype(bf16), wout_ref[...], preferred_element_type=f32)
                  + b_ref[:, ob:ob + V_pad])
        m = jnp.max(logits, axis=1, keepdims=True)
        s = logits - m
        logp = s - jnp.log(jnp.sum(jnp.exp(s), axis=1, keepdims=True))

        # direct lane-dense stores (each row is a multiple of 128 lanes)
        logp_ref[t:t + 1, :] = logp
        attn_ref[t:t + 1, :] = attn_w

    for l in range(L):
        hid_ref[l:l + 1, :] = h[l]


def prepare_params(params):
    """One-time packing of the module parameters into lane-padded bf16/f32 slabs."""
    f32 = jnp.float32
    bf16 = jnp.bfloat16
    H = params["hidden_size"]
    L = params["num_layers"]
    ML = params["attn_w"].shape[1]
    V = params["out_w"].shape[1]
    assert H % 128 == 0, "hidden_size must be a multiple of 128 lanes"
    ML_pad = _round_up(ML, 128)
    V_pad = _round_up(V, 128)

    # emb-side weights used by the hoisted (T,H) precompute matmul (f32, off critical path)
    attn_w_e = jnp.zeros((H, ML_pad), f32).at[:, :ML].set(params["attn_w"][:H].astype(f32))
    w_emb = jnp.concatenate([attn_w_e, params["comb_w"][:H].astype(f32)], axis=1)  # (H, ML_pad+H)

    # hidden-side / in-kernel weights (bf16, resident in VMEM)
    w_attn_h = (jnp.zeros((H, ML_pad), f32)
                .at[:, :ML].set(params["attn_w"][H:2 * H].astype(f32))).astype(bf16)
    w_comb_h = params["comb_w"][H:2 * H].astype(bf16)                               # (H, H)

    rows = []
    for l in range(L):
        wih = params["gru_wih"][l].astype(f32)
        whh = params["gru_whh"][l].astype(f32)
        zH = jnp.zeros((H, H), f32)
        rows.append(jnp.concatenate([wih[:, :2 * H], wih[:, 2 * H:], zH], axis=1))  # x rows
        rows.append(jnp.concatenate([whh[:, :2 * H], zH, whh[:, 2 * H:]], axis=1))  # h rows
    w_gru = jnp.concatenate(rows, axis=0).astype(bf16)                              # (L*2H, 4H)

    w_out = (jnp.zeros((H, V_pad), f32)
             .at[:, :V].set(params["out_w"].astype(f32))).astype(bf16)              # (H, V_pad)

    # bias slab (f32); padded softmax lanes carry -1e30; GRU r|z biases pre-summed
    b_attn = jnp.full((1, ML_pad), _NEG, f32).at[:, :ML].set(
        params["attn_b"].reshape(1, ML).astype(f32))
    b_comb = params["comb_b"].reshape(1, H).astype(f32)
    gbias = []
    for l in range(L):
        bih = params["gru_bih"][l].reshape(1, 3 * H).astype(f32)
        bhh = params["gru_bhh"][l].reshape(1, 3 * H).astype(f32)
        gbias.append(jnp.concatenate(
            [bih[:, :2 * H] + bhh[:, :2 * H], bih[:, 2 * H:], bhh[:, 2 * H:]], axis=1))
    b_out = jnp.full((1, V_pad), _NEG, f32).at[:, :V].set(
        params["out_b"].reshape(1, V).astype(f32))
    bias = jnp.concatenate([b_attn, b_comb] + gbias + [b_out], axis=1)  # (1, ML_pad+H+L*4H+V_pad)

    cfg = DecoderConfig(H=H, L=L, ML=ML, ML_pad=ML_pad, V=V, V_pad=V_pad)
    packed = {
        "embedding": params["embedding"].astype(f32),
        "w_emb": w_emb, "w_attn_h": w_attn_h, "w_comb_h": w_comb_h,
        "w_gru": w_gru, "w_out": w_out, "bias": bias,
    }
    return cfg, packed


@functools.partial(jax.jit, static_argnums=(0,))
def _decode_impl(cfg, packed, tokens, hidden, encoder_outputs):
    f32 = jnp.float32
    bf16 = jnp.bfloat16
    H, L, ML, ML_pad, V, V_pad = cfg
    T = int(tokens.shape[0])

    # glue outside the kernel: embedding gather + hoisted emb-side matmul (one (T,H) dot)
    emb_seq = packed["embedding"][tokens].astype(f32)                 # (T, H)
    embpre = emb_seq @ packed["w_emb"]                                # (T, ML_pad+H)
    hid0 = hidden.reshape(L, H).astype(f32)
    enc = (jnp.zeros((ML_pad, H), f32)
           .at[:ML, :].set(encoder_outputs.astype(f32))).astype(bf16)

    kernel = functools.partial(_fused_decoder_kernel, H=H, L=L,
                               ML_pad=ML_pad, V_pad=V_pad, T=T)

    grid_spec = pltpu.PrefetchScalarGridSpec(
        num_scalar_prefetch=0,
        grid=(1,),                                                    # whole decode in one step
        in_specs=[
            pl.BlockSpec((T, ML_pad + H), lambda i: (0, 0)),          # precomputed emb terms
            pl.BlockSpec((L, H), lambda i: (0, 0)),                   # initial hidden
            pl.BlockSpec((ML_pad, H), lambda i: (0, 0)),              # encoder outputs (bf16)
            pl.BlockSpec((H, ML_pad), lambda i: (0, 0)),              # attn h-side weight
            pl.BlockSpec((H, H), lambda i: (0, 0)),                   # combine h-side weight
            pl.BlockSpec((L * 2 * H, 4 * H), lambda i: (0, 0)),       # fused GRU weights
            pl.BlockSpec((H, V_pad), lambda i: (0, 0)),               # output projection
            pl.BlockSpec(packed["bias"].shape, lambda i: (0, 0)),     # all biases
        ],
        out_specs=[
            pl.BlockSpec((T, V_pad), lambda i: (0, 0)),               # log-probs per step
            pl.BlockSpec((T, ML_pad), lambda i: (0, 0)),              # attention weights per step
            pl.BlockSpec((L, H), lambda i: (0, 0)),                   # final hidden
        ],
    )

    logp_pad, attn_pad, hid_fin = pl.pallas_call(
        kernel,
        out_shape=(jax.ShapeDtypeStruct((T, V_pad), f32),
                   jax.ShapeDtypeStruct((T, ML_pad), f32),
                   jax.ShapeDtypeStruct((L, H), f32)),
        grid_spec=grid_spec,
        compiler_params=pltpu.CompilerParams(dimension_semantics=("arbitrary",)),
    )(embpre, hid0, enc, packed["w_attn_h"], packed["w_comb_h"],
      packed["w_gru"], packed["w_out"], packed["bias"])

    return logp_pad[:, :V], hid_fin.reshape(L, 1, H), attn_pad[:, :ML]


def attn_decoder_decode(prepared, tokens, hidden, encoder_outputs):
    """Run T teacher-forced decode steps of AttnDecoderRNN.forward (eval mode).

    Returns (log_probs (T, V), hidden (L, 1, H), attn_weights (T, max_length)).
    """
    cfg, packed = prepared
    return _decode_impl(cfg, packed, jnp.asarray(tokens, jnp.int32).reshape(-1),
                        hidden, encoder_outputs)


def attn_decoder_forward(prepared, input_idx, hidden, encoder_outputs):
    """Single-step analogue of AttnDecoderRNN.forward (T=1)."""
    tokens = jnp.asarray(input_idx, jnp.int32).reshape(1)
    return attn_decoder_decode(prepared, tokens, hidden, encoder_outputs)


def _reference_step(params, token, h, encoder_outputs):
    """Pure-JAX f32 reference matching PyTorch AttnDecoderRNN.forward (eval mode)."""
    H = params["hidden_size"]
    L = params["num_layers"]
    emb = params["embedding"][token].reshape(1, H)
    scores = jnp.concatenate([emb, h[0:1]], axis=1) @ params["attn_w"] + params["attn_b"]
    attn_w = jax.nn.softmax(scores, axis=1)
    attn_applied = attn_w @ encoder_outputs
    x = jnp.concatenate([emb, attn_applied], axis=1) @ params["comb_w"] + params["comb_b"]
    x = jnp.maximum(x, 0.0)
    h_new = []
    for l in range(L):
        gi = x @ params["gru_wih"][l] + params["gru_bih"][l].reshape(1, -1)
        gh = h[l:l + 1] @ params["gru_whh"][l] + params["gru_bhh"][l].reshape(1, -1)
        r = jax.nn.sigmoid(gi[:, 0:H] + gh[:, 0:H])
        z = jax.nn.sigmoid(gi[:, H:2 * H] + gh[:, H:2 * H])
        n = jnp.tanh(gi[:, 2 * H:] + r * gh[:, 2 * H:])
        hl = (1.0 - z) * n + z * h[l:l + 1]
        h_new.append(hl)
        x = hl
    logits = x @ params["out_w"] + params["out_b"]
    return jax.nn.log_softmax(logits, axis=1), jnp.concatenate(h_new, axis=0), attn_w


def make_params(key, hidden_size, output_size, max_length, num_layers):
    ks = jax.random.split(key, 12)
    s = 0.1
    f32 = jnp.float32
    return {
        "hidden_size": hidden_size,
        "num_layers": num_layers,
        "embedding": (jax.random.normal(ks[0], (output_size, hidden_size)) * s).astype(f32),
        "attn_w": (jax.random.normal(ks[1], (2 * hidden_size, max_length)) * s).astype(f32),
        "attn_b": (jax.random.normal(ks[2], (1, max_length)) * s).astype(f32),
        "comb_w": (jax.random.normal(ks[3], (2 * hidden_size, hidden_size)) * s).astype(f32),
        "comb_b": (jax.random.normal(ks[4], (1, hidden_size)) * s).astype(f32),
        "gru_wih": (jax.random.normal(ks[5], (num_layers, hidden_size, 3 * hidden_size)) * s).astype(f32),
        "gru_whh": (jax.random.normal(ks[6], (num_layers, hidden_size, 3 * hidden_size)) * s).astype(f32),
        "gru_bih": (jax.random.normal(ks[7], (num_layers, 3 * hidden_size)) * s).astype(f32),
        "gru_bhh": (jax.random.normal(ks[8], (num_layers, 3 * hidden_size)) * s).astype(f32),
        "out_w": (jax.random.normal(ks[9], (hidden_size, output_size)) * s).astype(f32),
        "out_b": (jax.random.normal(ks[10], (1, output_size)) * s).astype(f32),
    }


if __name__ == "__main__":
    hidden_size = 128   # matches the reference script's hidden_size
    output_size = 40    # small vocab
    max_length = 20     # MAX_LENGTH in the reference script
    num_layers = 2
    T = 6               # decode steps fused into one kernel invocation

    key = jax.random.PRNGKey(0)
    kp, kh, ke, kt = jax.random.split(key, 4)
    params = make_params(kp, hidden_size, output_size, max_length, num_layers)
    prepared = prepare_params(params)          # one-time packing (hoisted out of decode)

    tokens = jax.random.randint(kt, (T,), 0, output_size, dtype=jnp.int32)
    hidden = (jax.random.normal(kh, (num_layers, 1, hidden_size)) * 0.1).astype(jnp.float32)
    encoder_outputs = (jax.random.normal(ke, (max_length, hidden_size)) * 0.1).astype(jnp.float32)

    # fused multi-step decode (single pallas_call)
    logp_seq, hid_fin, attn_seq = attn_decoder_decode(prepared, tokens, hidden, encoder_outputs)
    jax.block_until_ready((logp_seq, hid_fin, attn_seq))

    # reference: T applications of the single-step forward in f32
    h = hidden.reshape(num_layers, hidden_size)
    logp_ref, attn_ref = [], []
    for t in range(T):
        lp, h, aw = _reference_step(params, tokens[t], h, encoder_outputs)
        logp_ref.append(lp)
        attn_ref.append(aw)
    logp_ref = jnp.concatenate(logp_ref, axis=0)
    attn_ref = jnp.concatenate(attn_ref, axis=0)

    # bf16 matmul operands with f32 accumulation -> loosened tolerance
    TOL = dict(atol=2e-2, rtol=2e-2)
    assert np.allclose(np.asarray(logp_seq), np.asarray(logp_ref), **TOL)
    assert np.allclose(np.asarray(attn_seq), np.asarray(attn_ref), **TOL)
    assert np.allclose(np.asarray(hid_fin).reshape(num_layers, hidden_size),
                       np.asarray(h), **TOL)

    # single-step (module-equivalent) forward also works and matches step 0
    lp1, h1, aw1 = attn_decoder_forward(prepared, tokens[0], hidden, encoder_outputs)
    jax.block_until_ready((lp1, h1, aw1))
    assert np.allclose(np.asarray(lp1), np.asarray(logp_ref[0:1]), **TOL)
    assert np.allclose(np.asarray(aw1), np.asarray(attn_ref[0:1]), **TOL)

    print("KERNEL_OK")
</pallas_src>

<mosaic_0001>
module attributes {stable_mosaic.version = 11 : i64} {
  func.func @_fused_decoder_kernel(%arg0: i32, %arg1: memref<6x256xf32, #tpu.memory_space<vmem>>, %arg2: memref<2x128xf32, #tpu.memory_space<vmem>>, %arg3: memref<128x128xbf16, #tpu.memory_space<vmem>>, %arg4: memref<128x128xbf16, #tpu.memory_space<vmem>>, %arg5: memref<128x128xbf16, #tpu.memory_space<vmem>>, %arg6: memref<512x512xbf16, #tpu.memory_space<vmem>>, %arg7: memref<128x128xbf16, #tpu.memory_space<vmem>>, %arg8: memref<1x1408xf32, #tpu.memory_space<vmem>>, %arg9: memref<6x128xf32, #tpu.memory_space<vmem>>, %arg10: memref<6x128xf32, #tpu.memory_space<vmem>>, %arg11: memref<2x128xf32, #tpu.memory_space<vmem>>) attributes {dimension_semantics = [#tpu.dimension_semantics<arbitrary>], iteration_bounds = array<i64: 1>, scalar_prefetch = 0 : i64, scratch_operands = 0 : i64, tpu.core_type = #tpu.core_type<tc>, window_params = [{pipeline_mode = #tpu.pipeline_mode<synchronous>, transform_indices = @transform_0, window_bounds = array<i64: 6, 256>}, {pipeline_mode = #tpu.pipeline_mode<synchronous>, transform_indices = @transform_1, window_bounds = array<i64: 2, 128>}, {pipeline_mode = #tpu.pipeline_mode<synchronous>, transform_indices = @transform_2, window_bounds = array<i64: 128, 128>}, {pipeline_mode = #tpu.pipeline_mode<synchronous>, transform_indices = @transform_3, window_bounds = array<i64: 128, 128>}, {pipeline_mode = #tpu.pipeline_mode<synchronous>, transform_indices = @transform_4, window_bounds = array<i64: 128, 128>}, {pipeline_mode = #tpu.pipeline_mode<synchronous>, transform_indices = @transform_5, window_bounds = array<i64: 512, 512>}, {pipeline_mode = #tpu.pipeline_mode<synchronous>, transform_indices = @transform_6, window_bounds = array<i64: 128, 128>}, {pipeline_mode = #tpu.pipeline_mode<synchronous>, transform_indices = @transform_7, window_bounds = array<i64: 1, 1408>}, {pipeline_mode = #tpu.pipeline_mode<synchronous>, transform_indices = @transform_8, window_bounds = array<i64: 6, 128>}, {pipeline_mode = #tpu.pipeline_mode<synchronous>, transform_indices = @transform_9, window_bounds = array<i64: 6, 128>}, {pipeline_mode = #tpu.pipeline_mode<synchronous>, transform_indices = @transform_10, window_bounds = array<i64: 2, 128>}]} {
    %c0 = arith.constant 0 : index
    %c0_0 = arith.constant 0 : index
    %0 = vector.load %arg2[%c0, %c0_0] : memref<2x128xf32, #tpu.memory_space<vmem>>, vector<1x128xf32>
    %c1 = arith.constant 1 : index
    %c0_1 = arith.constant 0 : index
    %1 = vector.load %arg2[%c1, %c0_1] : memref<2x128xf32, #tpu.memory_space<vmem>>, vector<1x128xf32>
    %c0_2 = arith.constant 0 : index
    %c0_3 = arith.constant 0 : index
    %2 = vector.load %arg1[%c0_2, %c0_3] : memref<6x256xf32, #tpu.memory_space<vmem>>, vector<1x256xf32>
    %3 = vector.extract_strided_slice %2 {offsets = [0, 0], sizes = [1, 128], strides = [1, 1]} : vector<1x256xf32> to vector<1x128xf32>
    %c0_4 = arith.constant 0 : index
    %c0_5 = arith.constant 0 : index
    %4 = vector.load %arg8[%c0_4, %c0_5] : memref<1x1408xf32, #tpu.memory_space<vmem>>, vector<1x128xf32>
    %5 = arith.addf %3, %4 : vector<1x128xf32>
    %6 = arith.truncf %0 : vector<1x128xf32> to vector<1x128xbf16>
    %c0_6 = arith.constant 0 : index
    %c0_7 = arith.constant 0 : index
    %7 = vector.load %arg4[%c0_6, %c0_7] : memref<128x128xbf16, #tpu.memory_space<vmem>>, vector<128x128xbf16>
    %cst = arith.constant dense<0.000000e+00> : vector<1x128xf32>
    %8 = tpu.matmul %6, %7, %cst {dimension_numbers = #tpu.dot_dimension_numbers<[1], [0], [0], [1], [0, 0, 1, 1], [], []>} : vector<1x128xbf16>, vector<128x128xbf16>, vector<1x128xf32> -> vector<1x128xf32>
    %9 = arith.addf %5, %8 : vector<1x128xf32>
    %cst_8 = arith.constant dense<0xFF800000> : vector<1xf32>
    %10 = vector.multi_reduction <maximumf>, %9, %cst_8 [1] : vector<1x128xf32> to vector<1xf32>
    %11 = vector.shape_cast %10 : vector<1xf32> to vector<1x1xf32>
    %12 = vector.broadcast %11 : vector<1x1xf32> to vector<1x128xf32>
    %13 = arith.subf %9, %12 : vector<1x128xf32>
    %14 = math.exp %13 : vector<1x128xf32>
    %cst_9 = arith.constant dense<0.000000e+00> : vector<1xf32>
    %15 = vector.multi_reduction <add>, %14, %cst_9 [1] : vector<1x128xf32> to vector<1xf32>
    %16 = vector.shape_cast %15 : vector<1xf32> to vector<1x1xf32>
    %17 = tpu.reciprocal %16 {approx = true} : vector<1x1xf32> -> vector<1x1xf32>
    %18 = arith.mulf %16, %17 : vector<1x1xf32>
    %cst_10 = arith.constant 2.000000e+00 : f32
    %19 = vector.broadcast %cst_10 : f32 to vector<1x1xf32>
    %20 = arith.subf %19, %18 : vector<1x1xf32>
    %21 = arith.mulf %17, %20 : vector<1x1xf32>
    %22 = vector.broadcast %21 : vector<1x1xf32> to vector<1x128xf32>
    %23 = arith.mulf %14, %22 : vector<1x128xf32>
    %24 = arith.truncf %23 : vector<1x128xf32> to vector<1x128xbf16>
    %c0_11 = arith.constant 0 : index
    %c0_12 = arith.constant 0 : index
    %25 = vector.load %arg3[%c0_11, %c0_12] : memref<128x128xbf16, #tpu.memory_space<vmem>>, vector<128x128xbf16>
    %cst_13 = arith.constant dense<0.000000e+00> : vector<1x128xf32>
    %26 = tpu.matmul %24, %25, %cst_13 {dimension_numbers = #tpu.dot_dimension_numbers<[1], [0], [0], [1], [0, 0, 1, 1], [], []>} : vector<1x128xbf16>, vector<128x128xbf16>, vector<1x128xf32> -> vector<1x128xf32>
    %27 = vector.extract_strided_slice %2 {offsets = [0, 128], sizes = [1, 128], strides = [1, 1]} : vector<1x256xf32> to vector<1x128xf32>
    %c0_14 = arith.constant 0 : index
    %c128 = arith.constant 128 : index
    %28 = vector.load %arg8[%c0_14, %c128] : memref<1x1408xf32, #tpu.memory_space<vmem>>, vector<1x128xf32>
    %29 = arith.addf %27, %28 : vector<1x128xf32>
    %30 = arith.truncf %26 : vector<1x128xf32> to vector<1x128xbf16>
    %c0_15 = arith.constant 0 : index
    %c0_16 = arith.constant 0 : index
    %31 = vector.load %arg5[%c0_15, %c0_16] : memref<128x128xbf16, #tpu.memory_space<vmem>>, vector<128x128xbf16>
    %cst_17 = arith.constant dense<0.000000e+00> : vector<1x128xf32>
    %32 = tpu.matmul %30, %31, %cst_17 {dimension_numbers = #tpu.dot_dimension_numbers<[1], [0], [0], [1], [0, 0, 1, 1], [], []>} : vector<1x128xbf16>, vector<128x128xbf16>, vector<1x128xf32> -> vector<1x128xf32>
    %33 = arith.addf %29, %32 : vector<1x128xf32>
    %cst_18 = arith.constant 0.000000e+00 : f32
    %34 = vector.broadcast %cst_18 : f32 to vector<1x128xf32>
    %35 = arith.maximumf %33, %34 : vector<1x128xf32>
    %36 = tpu.concatenate %35, %0 in 1 : vector<1x128xf32>, vector<1x128xf32> -> vector<1x256xf32>
    %37 = arith.truncf %36 : vector<1x256xf32> to vector<1x256xbf16>
    %c0_19 = arith.constant 0 : index
    %c0_20 = arith.constant 0 : index
    %38 = vector.load %arg6[%c0_19, %c0_20] : memref<512x512xbf16, #tpu.memory_space<vmem>>, vector<256x512xbf16>
    %cst_21 = arith.constant dense<0.000000e+00> : vector<1x512xf32>
    %39 = tpu.matmul %37, %38, %cst_21 {dimension_numbers = #tpu.dot_dimension_numbers<[1], [0], [0], [1], [0, 0, 1, 1], [], []>} : vector<1x256xbf16>, vector<256x512xbf16>, vector<1x512xf32> -> vector<1x512xf32>
    %40 = vector.extract_strided_slice %39 {offsets = [0, 0], sizes = [1, 256], strides = [1, 1]} : vector<1x512xf32> to vector<1x256xf32>
    %c0_22 = arith.constant 0 : index
    %c256 = arith.constant 256 : index
    %41 = vector.load %arg8[%c0_22, %c256] : memref<1x1408xf32, #tpu.memory_space<vmem>>, vector<1x256xf32>
    %42 = arith.addf %40, %41 : vector<1x256xf32>
    %43 = arith.negf %42 : vector<1x256xf32>
    %44 = math.exp %43 : vector<1x256xf32>
    %cst_23 = arith.constant 1.000000e+00 : f32
    %45 = vector.broadcast %cst_23 : f32 to vector<1x256xf32>
    %46 = arith.addf %45, %44 : vector<1x256xf32>
    %47 = arith.divf %45, %46 : vector<1x256xf32>
    %48 = vector.extract_strided_slice %47 {offsets = [0, 0], sizes = [1, 128], strides = [1, 1]} : vector<1x256xf32> to vector<1x128xf32>
    %49 = vector.extract_strided_slice %47 {offsets = [0, 128], sizes = [1, 128], strides = [1, 1]} : vector<1x256xf32> to vector<1x128xf32>
    %50 = vector.extract_strided_slice %39 {offsets = [0, 256], sizes = [1, 128], strides = [1, 1]} : vector<1x512xf32> to vector<1x128xf32>
    %c0_24 = arith.constant 0 : index
    %c512 = arith.constant 512 : index
    %51 = vector.load %arg8[%c0_24, %c512] : memref<1x1408xf32, #tpu.memory_space<vmem>>, vector<1x128xf32>
    %52 = arith.addf %50, %51 : vector<1x128xf32>
    %53 = vector.extract_strided_slice %39 {offsets = [0, 384], sizes = [1, 128], strides = [1, 1]} : vector<1x512xf32> to vector<1x128xf32>
    %c0_25 = arith.constant 0 : index
    %c640 = arith.constant 640 : index
    %54 = vector.load %arg8[%c0_25, %c640] : memref<1x1408xf32, #tpu.memory_space<vmem>>, vector<1x128xf32>
    %55 = arith.addf %53, %54 : vector<1x128xf32>
    %56 = arith.mulf %48, %55 : vector<1x128xf32>
    %57 = arith.addf %52, %56 : vector<1x128xf32>
    %58 = math.tanh %57 : vector<1x128xf32>
    %cst_26 = arith.constant 1.000000e+00 : f32
    %59 = vector.broadcast %cst_26 : f32 to vector<1x128xf32>
    %60 = arith.subf %59, %49 : vector<1x128xf32>
    %61 = arith.mulf %60, %58 : vector<1x128xf32>
    %62 = arith.mulf %49, %0 : vector<1x128xf32>
    %63 = arith.addf %61, %62 : vector<1x128xf32>
    %64 = tpu.concatenate %63, %1 in 1 : vector<1x128xf32>, vector<1x128xf32> -> vector<1x256xf32>
    %65 = arith.truncf %64 : vector<1x256xf32> to vector<1x256xbf16>
    %c256_27 = arith.constant 256 : index
    %c0_28 = arith.constant 0 : index
    %66 = vector.load %arg6[%c256_27, %c0_28] : memref<512x512xbf16, #tpu.memory_space<vmem>>, vector<256x512xbf16>
    %cst_29 = arith.constant dense<0.000000e+00> : vector<1x512xf32>
    %67 = tpu.matmul %65, %66, %cst_29 {dimension_numbers = #tpu.dot_dimension_numbers<[1], [0], [0], [1], [0, 0, 1, 1], [], []>} : vector<1x256xbf16>, vector<256x512xbf16>, vector<1x512xf32> -> vector<1x512xf32>
    %68 = vector.extract_strided_slice %67 {offsets = [0, 0], sizes = [1, 256], strides = [1, 1]} : vector<1x512xf32> to vector<1x256xf32>
    %c0_30 = arith.constant 0 : index
    %c768 = arith.constant 768 : index
    %69 = vector.load %arg8[%c0_30, %c768] : memref<1x1408xf32, #tpu.memory_space<vmem>>, vector<1x256xf32>
    %70 = arith.addf %68, %69 : vector<1x256xf32>
    %71 = arith.negf %70 : vector<1x256xf32>
    %72 = math.exp %71 : vector<1x256xf32>
    %cst_31 = arith.constant 1.000000e+00 : f32
    %73 = vector.broadcast %cst_31 : f32 to vector<1x256xf32>
    %74 = arith.addf %73, %72 : vector<1x256xf32>
    %75 = arith.divf %73, %74 : vector<1x256xf32>
    %76 = vector.extract_strided_slice %75 {offsets = [0, 0], sizes = [1, 128], strides = [1, 1]} : vector<1x256xf32> to vector<1x128xf32>
    %77 = vector.extract_strided_slice %75 {offsets = [0, 128], sizes = [1, 128], strides = [1, 1]} : vector<1x256xf32> to vector<1x128xf32>
    %78 = vector.extract_strided_slice %67 {offsets = [0, 256], sizes = [1, 128], strides = [1, 1]} : vector<1x512xf32> to vector<1x128xf32>
    %c0_32 = arith.constant 0 : index
    %c1024 = arith.constant 1024 : index
    %79 = vector.load %arg8[%c0_32, %c1024] : memref<1x1408xf32, #tpu.memory_space<vmem>>, vector<1x128xf32>
    %80 = arith.addf %78, %79 : vector<1x128xf32>
    %81 = vector.extract_strided_slice %67 {offsets = [0, 384], sizes = [1, 128], strides = [1, 1]} : vector<1x512xf32> to vector<1x128xf32>
    %c0_33 = arith.constant 0 : index
    %c1152 = arith.constant 1152 : index
    %82 = vector.load %arg8[%c0_33, %c1152] : memref<1x1408xf32, #tpu.memory_space<vmem>>, vector<1x128xf32>
    %83 = arith.addf %81, %82 : vector<1x128xf32>
    %84 = arith.mulf %76, %83 : vector<1x128xf32>
    %85 = arith.addf %80, %84 : vector<1x128xf32>
    %86 = math.tanh %85 : vector<1x128xf32>
    %cst_34 = arith.constant 1.000000e+00 : f32
    %87 = vector.broadcast %cst_34 : f32 to vector<1x128xf32>
    %88 = arith.subf %87, %77 : vector<1x128xf32>
    %89 = arith.mulf %88, %86 : vector<1x128xf32>
    %90 = arith.mulf %77, %1 : vector<1x128xf32>
    %91 = arith.addf %89, %90 : vector<1x128xf32>
    %92 = arith.truncf %91 : vector<1x128xf32> to vector<1x128xbf16>
    %c0_35 = arith.constant 0 : index
    %c0_36 = arith.constant 0 : index
    %93 = vector.load %arg7[%c0_35, %c0_36] : memref<128x128xbf16, #tpu.memory_space<vmem>>, vector<128x128xbf16>
    %cst_37 = arith.constant dense<0.000000e+00> : vector<1x128xf32>
    %94 = tpu.matmul %92, %93, %cst_37 {dimension_numbers = #tpu.dot_dimension_numbers<[1], [0], [0], [1], [0, 0, 1, 1], [], []>} : vector<1x128xbf16>, vector<128x128xbf16>, vector<1x128xf32> -> vector<1x128xf32>
    %c0_38 = arith.constant 0 : index
    %c1280 = arith.constant 1280 : index
    %95 = vector.load %arg8[%c0_38, %c1280] : memref<1x1408xf32, #tpu.memory_space<vmem>>, vector<1x128xf32>
    %96 = arith.addf %94, %95 : vector<1x128xf32>
    %cst_39 = arith.constant dense<0xFF800000> : vector<1xf32>
    %97 = vector.multi_reduction <maximumf>, %96, %cst_39 [1] : vector<1x128xf32> to vector<1xf32>
    %98 = vector.shape_cast %97 : vector<1xf32> to vector<1x1xf32>
    %99 = vector.broadcast %98 : vector<1x1xf32> to vector<1x128xf32>
    %100 = arith.subf %96, %99 : vector<1x128xf32>
    %101 = math.exp %100 : vector<1x128xf32>
    %cst_40 = arith.constant dense<0.000000e+00> : vector<1xf32>
    %102 = vector.multi_reduction <add>, %101, %cst_40 [1] : vector<1x128xf32> to vector<1xf32>
    %103 = vector.shape_cast %102 : vector<1xf32> to vector<1x1xf32>
    %104 = math.log %103 : vector<1x1xf32>
    %105 = vector.broadcast %104 : vector<1x1xf32> to vector<1x128xf32>
    %106 = arith.subf %100, %105 : vector<1x128xf32>
    %c0_41 = arith.constant 0 : index
    %c0_42 = arith.constant 0 : index
    %107 = vector.load %arg9[%c0_41, %c0_42] : memref<6x128xf32, #tpu.memory_space<vmem>>, vector<1x128xf32>
    tpu.vector_store %arg9[%c0_41, %c0_42], %106 {strides = array<i32>} : memref<6x128xf32, #tpu.memory_space<vmem>>, vector<1x128xf32>,
    %c0_43 = arith.constant 0 : index
    %c0_44 = arith.constant 0 : index
    %108 = vector.load %arg10[%c0_43, %c0_44] : memref<6x128xf32, #tpu.memory_space<vmem>>, vector<1x128xf32>
    tpu.vector_store %arg10[%c0_43, %c0_44], %23 {strides = array<i32>} : memref<6x128xf32, #tpu.memory_space<vmem>>, vector<1x128xf32>,
    %c1_45 = arith.constant 1 : index
    %c0_46 = arith.constant 0 : index
    %109 = vector.load %arg1[%c1_45, %c0_46] : memref<6x256xf32, #tpu.memory_space<vmem>>, vector<1x256xf32>
    %110 = vector.extract_strided_slice %109 {offsets = [0, 0], sizes = [1, 128], strides = [1, 1]} : vector<1x256xf32> to vector<1x128xf32>
    %c0_47 = arith.constant 0 : index
    %c0_48 = arith.constant 0 : index
    %111 = vector.load %arg8[%c0_47, %c0_48] : memref<1x1408xf32, #tpu.memory_space<vmem>>, vector<1x128xf32>
    %112 = arith.addf %110, %111 : vector<1x128xf32>
    %113 = arith.truncf %63 : vector<1x128xf32> to vector<1x128xbf16>
    %c0_49 = arith.constant 0 : index
    %c0_50 = arith.constant 0 : index
    %114 = vector.load %arg4[%c0_49, %c0_50] : memref<128x128xbf16, #tpu.memory_space<vmem>>, vector<128x128xbf16>
    %cst_51 = arith.constant dense<0.000000e+00> : vector<1x128xf32>
    %115 = tpu.matmul %113, %114, %cst_51 {dimension_numbers = #tpu.dot_dimension_numbers<[1], [0], [0], [1], [0, 0, 1, 1], [], []>} : vector<1x128xbf16>, vector<128x128xbf16>, vector<1x128xf32> -> vector<1x128xf32>
    %116 = arith.addf %112, %115 : vector<1x128xf32>
    %cst_52 = arith.constant dense<0xFF800000> : vector<1xf32>
    %117 = vector.multi_reduction <maximumf>, %116, %cst_52 [1] : vector<1x128xf32> to vector<1xf32>
    %118 = vector.shape_cast %117 : vector<1xf32> to vector<1x1xf32>
    %119 = vector.broadcast %118 : vector<1x1xf32> to vector<1x128xf32>
    %120 = arith.subf %116, %119 : vector<1x128xf32>
    %121 = math.exp %120 : vector<1x128xf32>
    %cst_53 = arith.constant dense<0.000000e+00> : vector<1xf32>
    %122 = vector.multi_reduction <add>, %121, %cst_53 [1] : vector<1x128xf32> to vector<1xf32>
    %123 = vector.shape_cast %122 : vector<1xf32> to vector<1x1xf32>
    %124 = tpu.reciprocal %123 {approx = true} : vector<1x1xf32> -> vector<1x1xf32>
    %125 = arith.mulf %123, %124 : vector<1x1xf32>
    %cst_54 = arith.constant 2.000000e+00 : f32
    %126 = vector.broadcast %cst_54 : f32 to vector<1x1xf32>
    %127 = arith.subf %126, %125 : vector<1x1xf32>
    %128 = arith.mulf %124, %127 : vector<1x1xf32>
    %129 = vector.broadcast %128 : vector<1x1xf32> to vector<1x128xf32>
    %130 = arith.mulf %121, %129 : vector<1x128xf32>
    %131 = arith.truncf %130 : vector<1x128xf32> to vector<1x128xbf16>
    %c0_55 = arith.constant 0 : index
    %c0_56 = arith.constant 0 : index
    %132 = vector.load %arg3[%c0_55, %c0_56] : memref<128x128xbf16, #tpu.memory_space<vmem>>, vector<128x128xbf16>
    %cst_57 = arith.constant dense<0.000000e+00> : vector<1x128xf32>
    %133 = tpu.matmul %131, %132, %cst_57 {dimension_numbers = #tpu.dot_dimension_numbers<[1], [0], [0], [1], [0, 0, 1, 1], [], []>} : vector<1x128xbf16>, vector<128x128xbf16>, vector<1x128xf32> -> vector<1x128xf32>
    %134 = vector.extract_strided_slice %109 {offsets = [0, 128], sizes = [1, 128], strides = [1, 1]} : vector<1x256xf32> to vector<1x128xf32>
    %c0_58 = arith.constant 0 : index
    %c128_59 = arith.constant 128 : index
    %135 = vector.load %arg8[%c0_58, %c128_59] : memref<1x1408xf32, #tpu.memory_space<vmem>>, vector<1x128xf32>
    %136 = arith.addf %134, %135 : vector<1x128xf32>
    %137 = arith.truncf %133 : vector<1x128xf32> to vector<1x128xbf16>
    %c0_60 = arith.constant 0 : index
    %c0_61 = arith.constant 0 : index
    %138 = vector.load %arg5[%c0_60, %c0_61] : memref<128x128xbf16, #tpu.memory_space<vmem>>, vector<128x128xbf16>
    %cst_62 = arith.constant dense<0.000000e+00> : vector<1x128xf32>
    %139 = tpu.matmul %137, %138, %cst_62 {dimension_numbers = #tpu.dot_dimension_numbers<[1], [0], [0], [1], [0, 0, 1, 1], [], []>} : vector<1x128xbf16>, vector<128x128xbf16>, vector<1x128xf32> -> vector<1x128xf32>
    %140 = arith.addf %136, %139 : vector<1x128xf32>
    %cst_63 = arith.constant 0.000000e+00 : f32
    %141 = vector.broadcast %cst_63 : f32 to vector<1x128xf32>
    %142 = arith.maximumf %140, %141 : vector<1x128xf32>
    %143 = tpu.concatenate %142, %63 in 1 : vector<1x128xf32>, vector<1x128xf32> -> vector<1x256xf32>
    %144 = arith.truncf %143 : vector<1x256xf32> to vector<1x256xbf16>
    %c0_64 = arith.constant 0 : index
    %c0_65 = arith.constant 0 : index
    %145 = vector.load %arg6[%c0_64, %c0_65] : memref<512x512xbf16, #tpu.memory_space<vmem>>, vector<256x512xbf16>
    %cst_66 = arith.constant dense<0.000000e+00> : vector<1x512xf32>
    %146 = tpu.matmul %144, %145, %cst_66 {dimension_numbers = #tpu.dot_dimension_numbers<[1], [0], [0], [1], [0, 0, 1, 1], [], []>} : vector<1x256xbf16>, vector<256x512xbf16>, vector<1x512xf32> -> vector<1x512xf32>
    %147 = vector.extract_strided_slice %146 {offsets = [0, 0], sizes = [1, 256], strides = [1, 1]} : vector<1x512xf32> to vector<1x256xf32>
    %c0_67 = arith.constant 0 : index
    %c256_68 = arith.constant 256 : index
    %148 = vector.load %arg8[%c0_67, %c256_68] : memref<1x1408xf32, #tpu.memory_space<vmem>>, vector<1x256xf32>
    %149 = arith.addf %147, %148 : vector<1x256xf32>
    %150 = arith.negf %149 : vector<1x256xf32>
    %151 = math.exp %150 : vector<1x256xf32>
    %cst_69 = arith.constant 1.000000e+00 : f32
    %152 = vector.broadcast %cst_69 : f32 to vector<1x256xf32>
    %153 = arith.addf %152, %151 : vector<1x256xf32>
    %154 = arith.divf %152, %153 : vector<1x256xf32>
    %155 = vector.extract_strided_slice %154 {offsets = [0, 0], sizes = [1, 128], strides = [1, 1]} : vector<1x256xf32> to vector<1x128xf32>
    %156 = vector.extract_strided_slice %154 {offsets = [0, 128], sizes = [1, 128], strides = [1, 1]} : vector<1x256xf32> to vector<1x128xf32>
    %157 = vector.extract_strided_slice %146 {offsets = [0, 256], sizes = [1, 128], strides = [1, 1]} : vector<1x512xf32> to vector<1x128xf32>
    %c0_70 = arith.constant 0 : index
    %c512_71 = arith.constant 512 : index
    %158 = vector.load %arg8[%c0_70, %c512_71] : memref<1x1408xf32, #tpu.memory_space<vmem>>, vector<1x128xf32>
    %159 = arith.addf %157, %158 : vector<1x128xf32>
    %160 = vector.extract_strided_slice %146 {offsets = [0, 384], sizes = [1, 128], strides = [1, 1]} : vector<1x512xf32> to vector<1x128xf32>
    %c0_72 = arith.constant 0 : index
    %c640_73 = arith.constant 640 : index
    %161 = vector.load %arg8[%c0_72, %c640_73] : memref<1x1408xf32, #tpu.memory_space<vmem>>, vector<1x128xf32>
    %162 = arith.addf %160, %161 : vector<1x128xf32>
    %163 = arith.mulf %155, %162 : vector<1x128xf32>
    %164 = arith.addf %159, %163 : vector<1x128xf32>
    %165 = math.tanh %164 : vector<1x128xf32>
    %cst_74 = arith.constant 1.000000e+00 : f32
    %166 = vector.broadcast %cst_74 : f32 to vector<1x128xf32>
    %167 = arith.subf %166, %156 : vector<1x128xf32>
    %168 = arith.mulf %167, %165 : vector<1x128xf32>
    %169 = arith.mulf %156, %63 : vector<1x128xf32>
    %170 = arith.addf %168, %169 : vector<1x128xf32>
    %171 = tpu.concatenate %170, %91 in 1 : vector<1x128xf32>, vector<1x128xf32> -> vector<1x256xf32>
    %172 = arith.truncf %171 : vector<1x256xf32> to vector<1x256xbf16>
    %c256_75 = arith.constant 256 : index
    %c0_76 = arith.constant 0 : index
    %173 = vector.load %arg6[%c256_75, %c0_76] : memref<512x512xbf16, #tpu.memory_space<vmem>>, vector<256x512xbf16>
    %cst_77 = arith.constant dense<0.000000e+00> : vector<1x512xf32>
    %174 = tpu.matmul %172, %173, %cst_77 {dimension_numbers = #tpu.dot_dimension_numbers<[1], [0], [0], [1], [0, 0, 1, 1], [], []>} : vector<1x256xbf16>, vector<256x512xbf16>, vector<1x512xf32> -> vector<1x512xf32>
    %175 = vector.extract_strided_slice %174 {offsets = [0, 0], sizes = [1, 256], strides = [1, 1]} : vector<1x512xf32> to vector<1x256xf32>
    %c0_78 = arith.constant 0 : index
    %c768_79 = arith.constant 768 : index
    %176 = vector.load %arg8[%c0_78, %c768_79] : memref<1x1408xf32, #tpu.memory_space<vmem>>, vector<1x256xf32>
    %177 = arith.addf %175, %176 : vector<1x256xf32>
    %178 = arith.negf %177 : vector<1x256xf32>
    %179 = math.exp %178 : vector<1x256xf32>
    %cst_80 = arith.constant 1.000000e+00 : f32
    %180 = vector.broadcast %cst_80 : f32 to vector<1x256xf32>
    %181 = arith.addf %180, %179 : vector<1x256xf32>
    %182 = arith.divf %180, %181 : vector<1x256xf32>
    %183 = vector.extract_strided_slice %182 {offsets = [0, 0], sizes = [1, 128], strides = [1, 1]} : vector<1x256xf32> to vector<1x128xf32>
    %184 = vector.extract_strided_slice %182 {offsets = [0, 128], sizes = [1, 128], strides = [1, 1]} : vector<1x256xf32> to vector<1x128xf32>
    %185 = vector.extract_strided_slice %174 {offsets = [0, 256], sizes = [1, 128], strides = [1, 1]} : vector<1x512xf32> to vector<1x128xf32>
    %c0_81 = arith.constant 0 : index
    %c1024_82 = arith.constant 1024 : index
    %186 = vector.load %arg8[%c0_81, %c1024_82] : memref<1x1408xf32, #tpu.memory_space<vmem>>, vector<1x128xf32>
    %187 = arith.addf %185, %186 : vector<1x128xf32>
    %188 = vector.extract_strided_slice %174 {offsets = [0, 384], sizes = [1, 128], strides = [1, 1]} : vector<1x512xf32> to vector<1x128xf32>
    %c0_83 = arith.constant 0 : index
    %c1152_84 = arith.constant 1152 : index
    %189 = vector.load %arg8[%c0_83, %c1152_84] : memref<1x1408xf32, #tpu.memory_space<vmem>>, vector<1x128xf32>
    %190 = arith.addf %188, %189 : vector<1x128xf32>
    %191 = arith.mulf %183, %190 : vector<1x128xf32>
    %192 = arith.addf %187, %191 : vector<1x128xf32>
    %193 = math.tanh %192 : vector<1x128xf32>
    %cst_85 = arith.constant 1.000000e+00 : f32
    %194 = vector.broadcast %cst_85 : f32 to vector<1x128xf32>
    %195 = arith.subf %194, %184 : vector<1x128xf32>
    %196 = arith.mulf %195, %193 : vector<1x128xf32>
    %197 = arith.mulf %184, %91 : vector<1x128xf32>
    %198 = arith.addf %196, %197 : vector<1x128xf32>
    %199 = arith.truncf %198 : vector<1x128xf32> to vector<1x128xbf16>
    %c0_86 = arith.constant 0 : index
    %c0_87 = arith.constant 0 : index
    %200 = vector.load %arg7[%c0_86, %c0_87] : memref<128x128xbf16, #tpu.memory_space<vmem>>, vector<128x128xbf16>
    %cst_88 = arith.constant dense<0.000000e+00> : vector<1x128xf32>
    %201 = tpu.matmul %199, %200, %cst_88 {dimension_numbers = #tpu.dot_dimension_numbers<[1], [0], [0], [1], [0, 0, 1, 1], [], []>} : vector<1x128xbf16>, vector<128x128xbf16>, vector<1x128xf32> -> vector<1x128xf32>
    %c0_89 = arith.constant 0 : index
    %c1280_90 = arith.constant 1280 : index
    %202 = vector.load %arg8[%c0_89, %c1280_90] : memref<1x1408xf32, #tpu.memory_space<vmem>>, vector<1x128xf32>
    %203 = arith.addf %201, %202 : vector<1x128xf32>
    %cst_91 = arith.constant dense<0xFF800000> : vector<1xf32>
    %204 = vector.multi_reduction <maximumf>, %203, %cst_91 [1] : vector<1x128xf32> to vector<1xf32>
    %205 = vector.shape_cast %204 : vector<1xf32> to vector<1x1xf32>
    %206 = vector.broadcast %205 : vector<1x1xf32> to vector<1x128xf32>
    %207 = arith.subf %203, %206 : vector<1x128xf32>
    %208 = math.exp %207 : vector<1x128xf32>
    %cst_92 = arith.constant dense<0.000000e+00> : vector<1xf32>
    %209 = vector.multi_reduction <add>, %208, %cst_92 [1] : vector<1x128xf32> to vector<1xf32>
    %210 = vector.shape_cast %209 : vector<1xf32> to vector<1x1xf32>
    %211 = math.log %210 : vector<1x1xf32>
    %212 = vector.broadcast %211 : vector<1x1xf32> to vector<1x128xf32>
    %213 = arith.subf %207, %212 : vector<1x128xf32>
    %c1_93 = arith.constant 1 : index
    %c0_94 = arith.constant 0 : index
    %214 = vector.load %arg9[%c1_93, %c0_94] : memref<6x128xf32, #tpu.memory_space<vmem>>, vector<1x128xf32>
    tpu.vector_store %arg9[%c1_93, %c0_94], %213 {strides = array<i32>} : memref<6x128xf32, #tpu.memory_space<vmem>>, vector<1x128xf32>,
    %c1_95 = arith.constant 1 : index
    %c0_96 = arith.constant 0 : index
    %215 = vector.load %arg10[%c1_95, %c0_96] : memref<6x128xf32, #tpu.memory_space<vmem>>, vector<1x128xf32>
    tpu.vector_store %arg10[%c1_95, %c0_96], %130 {strides = array<i32>} : memref<6x128xf32, #tpu.memory_space<vmem>>, vector<1x128xf32>,
    %c2 = arith.constant 2 : index
    %c0_97 = arith.constant 0 : index
    %216 = vector.load %arg1[%c2, %c0_97] : memref<6x256xf32, #tpu.memory_space<vmem>>, vector<1x256xf32>
    %217 = vector.extract_strided_slice %216 {offsets = [0, 0], sizes = [1, 128], strides = [1, 1]} : vector<1x256xf32> to vector<1x128xf32>
    %c0_98 = arith.constant 0 : index
    %c0_99 = arith.constant 0 : index
    %218 = vector.load %arg8[%c0_98, %c0_99] : memref<1x1408xf32, #tpu.memory_space<vmem>>, vector<1x128xf32>
    %219 = arith.addf %217, %218 : vector<1x128xf32>
    %220 = arith.truncf %170 : vector<1x128xf32> to vector<1x128xbf16>
    %c0_100 = arith.constant 0 : index
    %c0_101 = arith.constant 0 : index
    %221 = vector.load %arg4[%c0_100, %c0_101] : memref<128x128xbf16, #tpu.memory_space<vmem>>, vector<128x128xbf16>
    %cst_102 = arith.constant dense<0.000000e+00> : vector<1x128xf32>
    %222 = tpu.matmul %220, %221, %cst_102 {dimension_numbers = #tpu.dot_dimension_numbers<[1], [0], [0], [1], [0, 0, 1, 1], [], []>} : vector<1x128xbf16>, vector<128x128xbf16>, vector<1x128xf32> -> vector<1x128xf32>
    %223 = arith.addf %219, %222 : vector<1x128xf32>
    %cst_103 = arith.constant dense<0xFF800000> : vector<1xf32>
    %224 = vector.multi_reduction <maximumf>, %223, %cst_103 [1] : vector<1x128xf32> to vector<1xf32>
    %225 = vector.shape_cast %224 : vector<1xf32> to vector<1x1xf32>
    %226 = vector.broadcast %225 : vector<1x1xf32> to vector<1x128xf32>
    %227 = arith.subf %223, %226 : vector<1x128xf32>
    %228 = math.exp %227 : vector<1x128xf32>
    %cst_104 = arith.constant dense<0.000000e+00> : vector<1xf32>
    %229 = vector.multi_reduction <add>, %228, %cst_104 [1] : vector<1x128xf32> to vector<1xf32>
    %230 = vector.shape_cast %229 : vector<1xf32> to vector<1x1xf32>
    %231 = tpu.reciprocal %230 {approx = true} : vector<1x1xf32> -> vector<1x1xf32>
    %232 = arith.mulf %230, %231 : vector<1x1xf32>
    %cst_105 = arith.constant 2.000000e+00 : f32
    %233 = vector.broadcast %cst_105 : f32 to vector<1x1xf32>
    %234 = arith.subf %233, %232 : vector<1x1xf32>
    %235 = arith.mulf %231, %234 : vector<1x1xf32>
    %236 = vector.broadcast %235 : vector<1x1xf32> to vector<1x128xf32>
    %237 = arith.mulf %228, %236 : vector<1x128xf32>
    %238 = arith.truncf %237 : vector<1x128xf32> to vector<1x128xbf16>
    %c0_106 = arith.constant 0 : index
    %c0_107 = arith.constant 0 : index
    %239 = vector.load %arg3[%c0_106, %c0_107] : memref<128x128xbf16, #tpu.memory_space<vmem>>, vector<128x128xbf16>
    %cst_108 = arith.constant dense<0.000000e+00> : vector<1x128xf32>
    %240 = tpu.matmul %238, %239, %cst_108 {dimension_numbers = #tpu.dot_dimension_numbers<[1], [0], [0], [1], [0, 0, 1, 1], [], []>} : vector<1x128xbf16>, vector<128x128xbf16>, vector<1x128xf32> -> vector<1x128xf32>
    %241 = vector.extract_strided_slice %216 {offsets = [0, 128], sizes = [1, 128], strides = [1, 1]} : vector<1x256xf32> to vector<1x128xf32>
    %c0_109 = arith.constant 0 : index
    %c128_110 = arith.constant 128 : index
    %242 = vector.load %arg8[%c0_109, %c128_110] : memref<1x1408xf32, #tpu.memory_space<vmem>>, vector<1x128xf32>
    %243 = arith.addf %241, %242 : vector<1x128xf32>
    %244 = arith.truncf %240 : vector<1x128xf32> to vector<1x128xbf16>
    %c0_111 = arith.constant 0 : index
    %c0_112 = arith.constant 0 : index
    %245 = vector.load %arg5[%c0_111, %c0_112] : memref<128x128xbf16, #tpu.memory_space<vmem>>, vector<128x128xbf16>
    %cst_113 = arith.constant dense<0.000000e+00> : vector<1x128xf32>
    %246 = tpu.matmul %244, %245, %cst_113 {dimension_numbers = #tpu.dot_dimension_numbers<[1], [0], [0], [1], [0, 0, 1, 1], [], []>} : vector<1x128xbf16>, vector<128x128xbf16>, vector<1x128xf32> -> vector<1x128xf32>
    %247 = arith.addf %243, %246 : vector<1x128xf32>
    %cst_114 = arith.constant 0.000000e+00 : f32
    %248 = vector.broadcast %cst_114 : f32 to vector<1x128xf32>
    %249 = arith.maximumf %247, %248 : vector<1x128xf32>
    %250 = tpu.concatenate %249, %170 in 1 : vector<1x128xf32>, vector<1x128xf32> -> vector<1x256xf32>
    %251 = arith.truncf %250 : vector<1x256xf32> to vector<1x256xbf16>
    %c0_115 = arith.constant 0 : index
    %c0_116 = arith.constant 0 : index
    %252 = vector.load %arg6[%c0_115, %c0_116] : memref<512x512xbf16, #tpu.memory_space<vmem>>, vector<256x512xbf16>
    %cst_117 = arith.constant dense<0.000000e+00> : vector<1x512xf32>
    %253 = tpu.matmul %251, %252, %cst_117 {dimension_numbers = #tpu.dot_dimension_numbers<[1], [0], [0], [1], [0, 0, 1, 1], [], []>} : vector<1x256xbf16>, vector<256x512xbf16>, vector<1x512xf32> -> vector<1x512xf32>
    %254 = vector.extract_strided_slice %253 {offsets = [0, 0], sizes = [1, 256], strides = [1, 1]} : vector<1x512xf32> to vector<1x256xf32>
    %c0_118 = arith.constant 0 : index
    %c256_119 = arith.constant 256 : index
    %255 = vector.load %arg8[%c0_118, %c256_119] : memref<1x1408xf32, #tpu.memory_space<vmem>>, vector<1x256xf32>
    %256 = arith.addf %254, %255 : vector<1x256xf32>
    %257 = arith.negf %256 : vector<1x256xf32>
    %258 = math.exp %257 : vector<1x256xf32>
    %cst_120 = arith.constant 1.000000e+00 : f32
    %259 = vector.broadcast %cst_120 : f32 to vector<1x256xf32>
    %260 = arith.addf %259, %258 : vector<1x256xf32>
    %261 = arith.divf %259, %260 : vector<1x256xf32>
    %262 = vector.extract_strided_slice %261 {offsets = [0, 0], sizes = [1, 128], strides = [1, 1]} : vector<1x256xf32> to vector<1x128xf32>
    %263 = vector.extract_strided_slice %261 {offsets = [0, 128], sizes = [1, 128], strides = [1, 1]} : vector<1x256xf32> to vector<1x128xf32>
    %264 = vector.extract_strided_slice %253 {offsets = [0, 256], sizes = [1, 128], strides = [1, 1]} : vector<1x512xf32> to vector<1x128xf32>
    %c0_121 = arith.constant 0 : index
    %c512_122 = arith.constant 512 : index
    %265 = vector.load %arg8[%c0_121, %c512_122] : memref<1x1408xf32, #tpu.memory_space<vmem>>, vector<1x128xf32>
    %266 = arith.addf %264, %265 : vector<1x128xf32>
    %267 = vector.extract_strided_slice %253 {offsets = [0, 384], sizes = [1, 128], strides = [1, 1]} : vector<1x512xf32> to vector<1x128xf32>
    %c0_123 = arith.constant 0 : index
    %c640_124 = arith.constant 640 : index
    %268 = vector.load %arg8[%c0_123, %c640_124] : memref<1x1408xf32, #tpu.memory_space<vmem>>, vector<1x128xf32>
    %269 = arith.addf %267, %268 : vector<1x128xf32>
    %270 = arith.mulf %262, %269 : vector<1x128xf32>
    %271 = arith.addf %266, %270 : vector<1x128xf32>
    %272 = math.tanh %271 : vector<1x128xf32>
    %cst_125 = arith.constant 1.000000e+00 : f32
    %273 = vector.broadcast %cst_125 : f32 to vector<1x128xf32>
    %274 = arith.subf %273, %263 : vector<1x128xf32>
    %275 = arith.mulf %274, %272 : vector<1x128xf32>
    %276 = arith.mulf %263, %170 : vector<1x128xf32>
    %277 = arith.addf %275, %276 : vector<1x128xf32>
    %278 = tpu.concatenate %277, %198 in 1 : vector<1x128xf32>, vector<1x128xf32> -> vector<1x256xf32>
    %279 = arith.truncf %278 : vector<1x256xf32> to vector<1x256xbf16>
    %c256_126 = arith.constant 256 : index
    %c0_127 = arith.constant 0 : index
    %280 = vector.load %arg6[%c256_126, %c0_127] : memref<512x512xbf16, #tpu.memory_space<vmem>>, vector<256x512xbf16>
    %cst_128 = arith.constant dense<0.000000e+00> : vector<1x512xf32>
    %281 = tpu.matmul %279, %280, %cst_128 {dimension_numbers = #tpu.dot_dimension_numbers<[1], [0], [0], [1], [0, 0, 1, 1], [], []>} : vector<1x256xbf16>, vector<256x512xbf16>, vector<1x512xf32> -> vector<1x512xf32>
    %282 = vector.extract_strided_slice %281 {offsets = [0, 0], sizes = [1, 256], strides = [1, 1]} : vector<1x512xf32> to vector<1x256xf32>
    %c0_129 = arith.constant 0 : index
    %c768_130 = arith.constant 768 : index
    %283 = vector.load %arg8[%c0_129, %c768_130] : memref<1x1408xf32, #tpu.memory_space<vmem>>, vector<1x256xf32>
    %284 = arith.addf %282, %283 : vector<1x256xf32>
    %285 = arith.negf %284 : vector<1x256xf32>
    %286 = math.exp %285 : vector<1x256xf32>
    %cst_131 = arith.constant 1.000000e+00 : f32
    %287 = vector.broadcast %cst_131 : f32 to vector<1x256xf32>
    %288 = arith.addf %287, %286 : vector<1x256xf32>
    %289 = arith.divf %287, %288 : vector<1x256xf32>
    %290 = vector.extract_strided_slice %289 {offsets = [0, 0], sizes = [1, 128], strides = [1, 1]} : vector<1x256xf32> to vector<1x128xf32>
    %291 = vector.extract_strided_slice %289 {offsets = [0, 128], sizes = [1, 128], strides = [1, 1]} : vector<1x256xf32> to vector<1x128xf32>
    %292 = vector.extract_strided_slice %281 {offsets = [0, 256], sizes = [1, 128], strides = [1, 1]} : vector<1x512xf32> to vector<1x128xf32>
    %c0_132 = arith.constant 0 : index
    %c1024_133 = arith.constant 1024 : index
    %293 = vector.load %arg8[%c0_132, %c1024_133] : memref<1x1408xf32, #tpu.memory_space<vmem>>, vector<1x128xf32>
    %294 = arith.addf %292, %293 : vector<1x128xf32>
    %295 = vector.extract_strided_slice %281 {offsets = [0, 384], sizes = [1, 128], strides = [1, 1]} : vector<1x512xf32> to vector<1x128xf32>
    %c0_134 = arith.constant 0 : index
    %c1152_135 = arith.constant 1152 : index
    %296 = vector.load %arg8[%c0_134, %c1152_135] : memref<1x1408xf32, #tpu.memory_space<vmem>>, vector<1x128xf32>
    %297 = arith.addf %295, %296 : vector<1x128xf32>
    %298 = arith.mulf %290, %297 : vector<1x128xf32>
    %299 = arith.addf %294, %298 : vector<1x128xf32>
    %300 = math.tanh %299 : vector<1x128xf32>
    %cst_136 = arith.constant 1.000000e+00 : f32
    %301 = vector.broadcast %cst_136 : f32 to vector<1x128xf32>
    %302 = arith.subf %301, %291 : vector<1x128xf32>
    %303 = arith.mulf %302, %300 : vector<1x128xf32>
    %304 = arith.mulf %291, %198 : vector<1x128xf32>
    %305 = arith.addf %303, %304 : vector<1x128xf32>
    %306 = arith.truncf %305 : vector<1x128xf32> to vector<1x128xbf16>
    %c0_137 = arith.constant 0 : index
    %c0_138 = arith.constant 0 : index
    %307 = vector.load %arg7[%c0_137, %c0_138] : memref<128x128xbf16, #tpu.memory_space<vmem>>, vector<128x128xbf16>
    %cst_139 = arith.constant dense<0.000000e+00> : vector<1x128xf32>
    %308 = tpu.matmul %306, %307, %cst_139 {dimension_numbers = #tpu.dot_dimension_numbers<[1], [0], [0], [1], [0, 0, 1, 1], [], []>} : vector<1x128xbf16>, vector<128x128xbf16>, vector<1x128xf32> -> vector<1x128xf32>
    %c0_140 = arith.constant 0 : index
    %c1280_141 = arith.constant 1280 : index
    %309 = vector.load %arg8[%c0_140, %c1280_141] : memref<1x1408xf32, #tpu.memory_space<vmem>>, vector<1x128xf32>
    %310 = arith.addf %308, %309 : vector<1x128xf32>
    %cst_142 = arith.constant dense<0xFF800000> : vector<1xf32>
    %311 = vector.multi_reduction <maximumf>, %310, %cst_142 [1] : vector<1x128xf32> to vector<1xf32>
    %312 = vector.shape_cast %311 : vector<1xf32> to vector<1x1xf32>
    %313 = vector.broadcast %312 : vector<1x1xf32> to vector<1x128xf32>
    %314 = arith.subf %310, %313 : vector<1x128xf32>
    %315 = math.exp %314 : vector<1x128xf32>
    %cst_143 = arith.constant dense<0.000000e+00> : vector<1xf32>
    %316 = vector.multi_reduction <add>, %315, %cst_143 [1] : vector<1x128xf32> to vector<1xf32>
    %317 = vector.shape_cast %316 : vector<1xf32> to vector<1x1xf32>
    %318 = math.log %317 : vector<1x1xf32>
    %319 = vector.broadcast %318 : vector<1x1xf32> to vector<1x128xf32>
    %320 = arith.subf %314, %319 : vector<1x128xf32>
    %c2_144 = arith.constant 2 : index
    %c0_145 = arith.constant 0 : index
    %321 = vector.load %arg9[%c2_144, %c0_145] : memref<6x128xf32, #tpu.memory_space<vmem>>, vector<1x128xf32>
    tpu.vector_store %arg9[%c2_144, %c0_145], %320 {strides = array<i32>} : memref<6x128xf32, #tpu.memory_space<vmem>>, vector<1x128xf32>,
    %c2_146 = arith.constant 2 : index
    %c0_147 = arith.constant 0 : index
    %322 = vector.load %arg10[%c2_146, %c0_147] : memref<6x128xf32, #tpu.memory_space<vmem>>, vector<1x128xf32>
    tpu.vector_store %arg10[%c2_146, %c0_147], %237 {strides = array<i32>} : memref<6x128xf32, #tpu.memory_space<vmem>>, vector<1x128xf32>,
    %c3 = arith.constant 3 : index
    %c0_148 = arith.constant 0 : index
    %323 = vector.load %arg1[%c3, %c0_148] : memref<6x256xf32, #tpu.memory_space<vmem>>, vector<1x256xf32>
    %324 = vector.extract_strided_slice %323 {offsets = [0, 0], sizes = [1, 128], strides = [1, 1]} : vector<1x256xf32> to vector<1x128xf32>
    %c0_149 = arith.constant 0 : index
    %c0_150 = arith.constant 0 : index
    %325 = vector.load %arg8[%c0_149, %c0_150] : memref<1x1408xf32, #tpu.memory_space<vmem>>, vector<1x128xf32>
    %326 = arith.addf %324, %325 : vector<1x128xf32>
    %327 = arith.truncf %277 : vector<1x128xf32> to vector<1x128xbf16>
    %c0_151 = arith.constant 0 : index
    %c0_152 = arith.constant 0 : index
    %328 = vector.load %arg4[%c0_151, %c0_152] : memref<128x128xbf16, #tpu.memory_space<vmem>>, vector<128x128xbf16>
    %cst_153 = arith.constant dense<0.000000e+00> : vector<1x128xf32>
    %329 = tpu.matmul %327, %328, %cst_153 {dimension_numbers = #tpu.dot_dimension_numbers<[1], [0], [0], [1], [0, 0, 1, 1], [], []>} : vector<1x128xbf16>, vector<128x128xbf16>, vector<1x128xf32> -> vector<1x128xf32>
    %330 = arith.addf %326, %329 : vector<1x128xf32>
    %cst_154 = arith.constant dense<0xFF800000> : vector<1xf32>
    %331 = vector.multi_reduction <maximumf>, %330, %cst_154 [1] : vector<1x128xf32> to vector<1xf32>
    %332 = vector.shape_cast %331 : vector<1xf32> to vector<1x1xf32>
    %333 = vector.broadcast %332 : vector<1x1xf32> to vector<1x128xf32>
    %334 = arith.subf %330, %333 : vector<1x128xf32>
    %335 = math.exp %334 : vector<1x128xf32>
    %cst_155 = arith.constant dense<0.000000e+00> : vector<1xf32>
    %336 = vector.multi_reduction <add>, %335, %cst_155 [1] : vector<1x128xf32> to vector<1xf32>
    %337 = vector.shape_cast %336 : vector<1xf32> to vector<1x1xf32>
    %338 = tpu.reciprocal %337 {approx = true} : vector<1x1xf32> -> vector<1x1xf32>
    %339 = arith.mulf %337, %338 : vector<1x1xf32>
    %cst_156 = arith.constant 2.000000e+00 : f32
    %340 = vector.broadcast %cst_156 : f32 to vector<1x1xf32>
    %341 = arith.subf %340, %339 : vector<1x1xf32>
    %342 = arith.mulf %338, %341 : vector<1x1xf32>
    %343 = vector.broadcast %342 : vector<1x1xf32> to vector<1x128xf32>
    %344 = arith.mulf %335, %343 : vector<1x128xf32>
    %345 = arith.truncf %344 : vector<1x128xf32> to vector<1x128xbf16>
    %c0_157 = arith.constant 0 : index
    %c0_158 = arith.constant 0 : index
    %346 = vector.load %arg3[%c0_157, %c0_158] : memref<128x128xbf16, #tpu.memory_space<vmem>>, vector<128x128xbf16>
    %cst_159 = arith.constant dense<0.000000e+00> : vector<1x128xf32>
    %347 = tpu.matmul %345, %346, %cst_159 {dimension_numbers = #tpu.dot_dimension_numbers<[1], [0], [0], [1], [0, 0, 1, 1], [], []>} : vector<1x128xbf16>, vector<128x128xbf16>, vector<1x128xf32> -> vector<1x128xf32>
    %348 = vector.extract_strided_slice %323 {offsets = [0, 128], sizes = [1, 128], strides = [1, 1]} : vector<1x256xf32> to vector<1x128xf32>
    %c0_160 = arith.constant 0 : index
    %c128_161 = arith.constant 128 : index
    %349 = vector.load %arg8[%c0_160, %c128_161] : memref<1x1408xf32, #tpu.memory_space<vmem>>, vector<1x128xf32>
    %350 = arith.addf %348, %349 : vector<1x128xf32>
    %351 = arith.truncf %347 : vector<1x128xf32> to vector<1x128xbf16>
    %c0_162 = arith.constant 0 : index
    %c0_163 = arith.constant 0 : index
    %352 = vector.load %arg5[%c0_162, %c0_163] : memref<128x128xbf16, #tpu.memory_space<vmem>>, vector<128x128xbf16>
    %cst_164 = arith.constant dense<0.000000e+00> : vector<1x128xf32>
    %353 = tpu.matmul %351, %352, %cst_164 {dimension_numbers = #tpu.dot_dimension_numbers<[1], [0], [0], [1], [0, 0, 1, 1], [], []>} : vector<1x128xbf16>, vector<128x128xbf16>, vector<1x128xf32> -> vector<1x128xf32>
    %354 = arith.addf %350, %353 : vector<1x128xf32>
    %cst_165 = arith.constant 0.000000e+00 : f32
    %355 = vector.broadcast %cst_165 : f32 to vector<1x128xf32>
    %356 = arith.maximumf %354, %355 : vector<1x128xf32>
    %357 = tpu.concatenate %356, %277 in 1 : vector<1x128xf32>, vector<1x128xf32> -> vector<1x256xf32>
    %358 = arith.truncf %357 : vector<1x256xf32> to vector<1x256xbf16>
    %c0_166 = arith.constant 0 : index
    %c0_167 = arith.constant 0 : index
    %359 = vector.load %arg6[%c0_166, %c0_167] : memref<512x512xbf16, #tpu.memory_space<vmem>>, vector<256x512xbf16>
    %cst_168 = arith.constant dense<0.000000e+00> : vector<1x512xf32>
    %360 = tpu.matmul %358, %359, %cst_168 {dimension_numbers = #tpu.dot_dimension_numbers<[1], [0], [0], [1], [0, 0, 1, 1], [], []>} : vector<1x256xbf16>, vector<256x512xbf16>, vector<1x512xf32> -> vector<1x512xf32>
    %361 = vector.extract_strided_slice %360 {offsets = [0, 0], sizes = [1, 256], strides = [1, 1]} : vector<1x512xf32> to vector<1x256xf32>
    %c0_169 = arith.constant 0 : index
    %c256_170 = arith.constant 256 : index
    %362 = vector.load %arg8[%c0_169, %c256_170] : memref<1x1408xf32, #tpu.memory_space<vmem>>, vector<1x256xf32>
    %363 = arith.addf %361, %362 : vector<1x256xf32>
    %364 = arith.negf %363 : vector<1x256xf32>
    %365 = math.exp %364 : vector<1x256xf32>
    %cst_171 = arith.constant 1.000000e+00 : f32
    %366 = vector.broadcast %cst_171 : f32 to vector<1x256xf32>
    %367 = arith.addf %366, %365 : vector<1x256xf32>
    %368 = arith.divf %366, %367 : vector<1x256xf32>
    %369 = vector.extract_strided_slice %368 {offsets = [0, 0], sizes = [1, 128], strides = [1, 1]} : vector<1x256xf32> to vector<1x128xf32>
    %370 = vector.extract_strided_slice %368 {offsets = [0, 128], sizes = [1, 128], strides = [1, 1]} : vector<1x256xf32> to vector<1x128xf32>
    %371 = vector.extract_strided_slice %360 {offsets = [0, 256], sizes = [1, 128], strides = [1, 1]} : vector<1x512xf32> to vector<1x128xf32>
    %c0_172 = arith.constant 0 : index
    %c512_173 = arith.constant 512 : index
    %372 = vector.load %arg8[%c0_172, %c512_173] : memref<1x1408xf32, #tpu.memory_space<vmem>>, vector<1x128xf32>
    %373 = arith.addf %371, %372 : vector<1x128xf32>
    %374 = vector.extract_strided_slice %360 {offsets = [0, 384], sizes = [1, 128], strides = [1, 1]} : vector<1x512xf32> to vector<1x128xf32>
    %c0_174 = arith.constant 0 : index
    %c640_175 = arith.constant 640 : index
    %375 = vector.load %arg8[%c0_174, %c640_175] : memref<1x1408xf32, #tpu.memory_space<vmem>>, vector<1x128xf32>
    %376 = arith.addf %374, %375 : vector<1x128xf32>
    %377 = arith.mulf %369, %376 : vector<1x128xf32>
    %378 = arith.addf %373, %377 : vector<1x128xf32>
    %379 = math.tanh %378 : vector<1x128xf32>
    %cst_176 = arith.constant 1.000000e+00 : f32
    %380 = vector.broadcast %cst_176 : f32 to vector<1x128xf32>
    %381 = arith.subf %380, %370 : vector<1x128xf32>
    %382 = arith.mulf %381, %379 : vector<1x128xf32>
    %383 = arith.mulf %370, %277 : vector<1x128xf32>
    %384 = arith.addf %382, %383 : vector<1x128xf32>
    %385 = tpu.concatenate %384, %305 in 1 : vector<1x128xf32>, vector<1x128xf32> -> vector<1x256xf32>
    %386 = arith.truncf %385 : vector<1x256xf32> to vector<1x256xbf16>
    %c256_177 = arith.constant 256 : index
    %c0_178 = arith.constant 0 : index
    %387 = vector.load %arg6[%c256_177, %c0_178] : memref<512x512xbf16, #tpu.memory_space<vmem>>, vector<256x512xbf16>
    %cst_179 = arith.constant dense<0.000000e+00> : vector<1x512xf32>
    %388 = tpu.matmul %386, %387, %cst_179 {dimension_numbers = #tpu.dot_dimension_numbers<[1], [0], [0], [1], [0, 0, 1, 1], [], []>} : vector<1x256xbf16>, vector<256x512xbf16>, vector<1x512xf32> -> vector<1x512xf32>
    %389 = vector.extract_strided_slice %388 {offsets = [0, 0], sizes = [1, 256], strides = [1, 1]} : vector<1x512xf32> to vector<1x256xf32>
    %c0_180 = arith.constant 0 : index
    %c768_181 = arith.constant 768 : index
    %390 = vector.load %arg8[%c0_180, %c768_181] : memref<1x1408xf32, #tpu.memory_space<vmem>>, vector<1x256xf32>
    %391 = arith.addf %389, %390 : vector<1x256xf32>
    %392 = arith.negf %391 : vector<1x256xf32>
    %393 = math.exp %392 : vector<1x256xf32>
    %cst_182 = arith.constant 1.000000e+00 : f32
    %394 = vector.broadcast %cst_182 : f32 to vector<1x256xf32>
    %395 = arith.addf %394, %393 : vector<1x256xf32>
    %396 = arith.divf %394, %395 : vector<1x256xf32>
    %397 = vector.extract_strided_slice %396 {offsets = [0, 0], sizes = [1, 128], strides = [1, 1]} : vector<1x256xf32> to vector<1x128xf32>
    %398 = vector.extract_strided_slice %396 {offsets = [0, 128], sizes = [1, 128], strides = [1, 1]} : vector<1x256xf32> to vector<1x128xf32>
    %399 = vector.extract_strided_slice %388 {offsets = [0, 256], sizes = [1, 128], strides = [1, 1]} : vector<1x512xf32> to vector<1x128xf32>
    %c0_183 = arith.constant 0 : index
    %c1024_184 = arith.constant 1024 : index
    %400 = vector.load %arg8[%c0_183, %c1024_184] : memref<1x1408xf32, #tpu.memory_space<vmem>>, vector<1x128xf32>
    %401 = arith.addf %399, %400 : vector<1x128xf32>
    %402 = vector.extract_strided_slice %388 {offsets = [0, 384], sizes = [1, 128], strides = [1, 1]} : vector<1x512xf32> to vector<1x128xf32>
    %c0_185 = arith.constant 0 : index
    %c1152_186 = arith.constant 1152 : index
    %403 = vector.load %arg8[%c0_185, %c1152_186] : memref<1x1408xf32, #tpu.memory_space<vmem>>, vector<1x128xf32>
    %404 = arith.addf %402, %403 : vector<1x128xf32>
    %405 = arith.mulf %397, %404 : vector<1x128xf32>
    %406 = arith.addf %401, %405 : vector<1x128xf32>
    %407 = math.tanh %406 : vector<1x128xf32>
    %cst_187 = arith.constant 1.000000e+00 : f32
    %408 = vector.broadcast %cst_187 : f32 to vector<1x128xf32>
    %409 = arith.subf %408, %398 : vector<1x128xf32>
    %410 = arith.mulf %409, %407 : vector<1x128xf32>
    %411 = arith.mulf %398, %305 : vector<1x128xf32>
    %412 = arith.addf %410, %411 : vector<1x128xf32>
    %413 = arith.truncf %412 : vector<1x128xf32> to vector<1x128xbf16>
    %c0_188 = arith.constant 0 : index
    %c0_189 = arith.constant 0 : index
    %414 = vector.load %arg7[%c0_188, %c0_189] : memref<128x128xbf16, #tpu.memory_space<vmem>>, vector<128x128xbf16>
    %cst_190 = arith.constant dense<0.000000e+00> : vector<1x128xf32>
    %415 = tpu.matmul %413, %414, %cst_190 {dimension_numbers = #tpu.dot_dimension_numbers<[1], [0], [0], [1], [0, 0, 1, 1], [], []>} : vector<1x128xbf16>, vector<128x128xbf16>, vector<1x128xf32> -> vector<1x128xf32>
    %c0_191 = arith.constant 0 : index
    %c1280_192 = arith.constant 1280 : index
    %416 = vector.load %arg8[%c0_191, %c1280_192] : memref<1x1408xf32, #tpu.memory_space<vmem>>, vector<1x128xf32>
    %417 = arith.addf %415, %416 : vector<1x128xf32>
    %cst_193 = arith.constant dense<0xFF800000> : vector<1xf32>
    %418 = vector.multi_reduction <maximumf>, %417, %cst_193 [1] : vector<1x128xf32> to vector<1xf32>
    %419 = vector.shape_cast %418 : vector<1xf32> to vector<1x1xf32>
    %420 = vector.broadcast %419 : vector<1x1xf32> to vector<1x128xf32>
    %421 = arith.subf %417, %420 : vector<1x128xf32>
    %422 = math.exp %421 : vector<1x128xf32>
    %cst_194 = arith.constant dense<0.000000e+00> : vector<1xf32>
    %423 = vector.multi_reduction <add>, %422, %cst_194 [1] : vector<1x128xf32> to vector<1xf32>
    %424 = vector.shape_cast %423 : vector<1xf32> to vector<1x1xf32>
    %425 = math.log %424 : vector<1x1xf32>
    %426 = vector.broadcast %425 : vector<1x1xf32> to vector<1x128xf32>
    %427 = arith.subf %421, %426 : vector<1x128xf32>
    %c3_195 = arith.constant 3 : index
    %c0_196 = arith.constant 0 : index
    %428 = vector.load %arg9[%c3_195, %c0_196] : memref<6x128xf32, #tpu.memory_space<vmem>>, vector<1x128xf32>
    tpu.vector_store %arg9[%c3_195, %c0_196], %427 {strides = array<i32>} : memref<6x128xf32, #tpu.memory_space<vmem>>, vector<1x128xf32>,
    %c3_197 = arith.constant 3 : index
    %c0_198 = arith.constant 0 : index
    %429 = vector.load %arg10[%c3_197, %c0_198] : memref<6x128xf32, #tpu.memory_space<vmem>>, vector<1x128xf32>
    tpu.vector_store %arg10[%c3_197, %c0_198], %344 {strides = array<i32>} : memref<6x128xf32, #tpu.memory_space<vmem>>, vector<1x128xf32>,
    %c4 = arith.constant 4 : index
    %c0_199 = arith.constant 0 : index
    %430 = vector.load %arg1[%c4, %c0_199] : memref<6x256xf32, #tpu.memory_space<vmem>>, vector<1x256xf32>
    %431 = vector.extract_strided_slice %430 {offsets = [0, 0], sizes = [1, 128], strides = [1, 1]} : vector<1x256xf32> to vector<1x128xf32>
    %c0_200 = arith.constant 0 : index
    %c0_201 = arith.constant 0 : index
    %432 = vector.load %arg8[%c0_200, %c0_201] : memref<1x1408xf32, #tpu.memory_space<vmem>>, vector<1x128xf32>
    %433 = arith.addf %431, %432 : vector<1x128xf32>
    %434 = arith.truncf %384 : vector<1x128xf32> to vector<1x128xbf16>
    %c0_202 = arith.constant 0 : index
    %c0_203 = arith.constant 0 : index
    %435 = vector.load %arg4[%c0_202, %c0_203] : memref<128x128xbf16, #tpu.memory_space<vmem>>, vector<128x128xbf16>
    %cst_204 = arith.constant dense<0.000000e+00> : vector<1x128xf32>
    %436 = tpu.matmul %434, %435, %cst_204 {dimension_numbers = #tpu.dot_dimension_numbers<[1], [0], [0], [1], [0, 0, 1, 1], [], []>} : vector<1x128xbf16>, vector<128x128xbf16>, vector<1x128xf32> -> vector<1x128xf32>
    %437 = arith.addf %433, %436 : vector<1x128xf32>
    %cst_205 = arith.constant dense<0xFF800000> : vector<1xf32>
    %438 = vector.multi_reduction <maximumf>, %437, %cst_205 [1] : vector<1x128xf32> to vector<1xf32>
    %439 = vector.shape_cast %438 : vector<1xf32> to vector<1x1xf32>
    %440 = vector.broadcast %439 : vector<1x1xf32> to vector<1x128xf32>
    %441 = arith.subf %437, %440 : vector<1x128xf32>
    %442 = math.exp %441 : vector<1x128xf32>
    %cst_206 = arith.constant dense<0.000000e+00> : vector<1xf32>
    %443 = vector.multi_reduction <add>, %442, %cst_206 [1] : vector<1x128xf32> to vector<1xf32>
    %444 = vector.shape_cast %443 : vector<1xf32> to vector<1x1xf32>
    %445 = tpu.reciprocal %444 {approx = true} : vector<1x1xf32> -> vector<1x1xf32>
    %446 = arith.mulf %444, %445 : vector<1x1xf32>
    %cst_207 = arith.constant 2.000000e+00 : f32
    %447 = vector.broadcast %cst_207 : f32 to vector<1x1xf32>
    %448 = arith.subf %447, %446 : vector<1x1xf32>
    %449 = arith.mulf %445, %448 : vector<1x1xf32>
    %450 = vector.broadcast %449 : vector<1x1xf32> to vector<1x128xf32>
    %451 = arith.mulf %442, %450 : vector<1x128xf32>
    %452 = arith.truncf %451 : vector<1x128xf32> to vector<1x128xbf16>
    %c0_208 = arith.constant 0 : index
    %c0_209 = arith.constant 0 : index
    %453 = vector.load %arg3[%c0_208, %c0_209] : memref<128x128xbf16, #tpu.memory_space<vmem>>, vector<128x128xbf16>
    %cst_210 = arith.constant dense<0.000000e+00> : vector<1x128xf32>
    %454 = tpu.matmul %452, %453, %cst_210 {dimension_numbers = #tpu.dot_dimension_numbers<[1], [0], [0], [1], [0, 0, 1, 1], [], []>} : vector<1x128xbf16>, vector<128x128xbf16>, vector<1x128xf32> -> vector<1x128xf32>
    %455 = vector.extract_strided_slice %430 {offsets = [0, 128], sizes = [1, 128], strides = [1, 1]} : vector<1x256xf32> to vector<1x128xf32>
    %c0_211 = arith.constant 0 : index
    %c128_212 = arith.constant 128 : index
    %456 = vector.load %arg8[%c0_211, %c128_212] : memref<1x1408xf32, #tpu.memory_space<vmem>>, vector<1x128xf32>
    %457 = arith.addf %455, %456 : vector<1x128xf32>
    %458 = arith.truncf %454 : vector<1x128xf32> to vector<1x128xbf16>
    %c0_213 = arith.constant 0 : index
    %c0_214 = arith.constant 0 : index
    %459 = vector.load %arg5[%c0_213, %c0_214] : memref<128x128xbf16, #tpu.memory_space<vmem>>, vector<128x128xbf16>
    %cst_215 = arith.constant dense<0.000000e+00> : vector<1x128xf32>
    %460 = tpu.matmul %458, %459, %cst_215 {dimension_numbers = #tpu.dot_dimension_numbers<[1], [0], [0], [1], [0, 0, 1, 1], [], []>} : vector<1x128xbf16>, vector<128x128xbf16>, vector<1x128xf32> -> vector<1x128xf32>
    %461 = arith.addf %457, %460 : vector<1x128xf32>
    %cst_216 = arith.constant 0.000000e+00 : f32
    %462 = vector.broadcast %cst_216 : f32 to vector<1x128xf32>
    %463 = arith.maximumf %461, %462 : vector<1x128xf32>
    %464 = tpu.concatenate %463, %384 in 1 : vector<1x128xf32>, vector<1x128xf32> -> vector<1x256xf32>
    %465 = arith.truncf %464 : vector<1x256xf32> to vector<1x256xbf16>
    %c0_217 = arith.constant 0 : index
    %c0_218 = arith.constant 0 : index
    %466 = vector.load %arg6[%c0_217, %c0_218] : memref<512x512xbf16, #tpu.memory_space<vmem>>, vector<256x512xbf16>
    %cst_219 = arith.constant dense<0.000000e+00> : vector<1x512xf32>
    %467 = tpu.matmul %465, %466, %cst_219 {dimension_numbers = #tpu.dot_dimension_numbers<[1], [0], [0], [1], [0, 0, 1, 1], [], []>} : vector<1x256xbf16>, vector<256x512xbf16>, vector<1x512xf32> -> vector<1x512xf32>
    %468 = vector.extract_strided_slice %467 {offsets = [0, 0], sizes = [1, 256], strides = [1, 1]} : vector<1x512xf32> to vector<1x256xf32>
    %c0_220 = arith.constant 0 : index
    %c256_221 = arith.constant 256 : index
    %469 = vector.load %arg8[%c0_220, %c256_221] : memref<1x1408xf32, #tpu.memory_space<vmem>>, vector<1x256xf32>
    %470 = arith.addf %468, %469 : vector<1x256xf32>
    %471 = arith.negf %470 : vector<1x256xf32>
    %472 = math.exp %471 : vector<1x256xf32>
    %cst_222 = arith.constant 1.000000e+00 : f32
    %473 = vector.broadcast %cst_222 : f32 to vector<1x256xf32>
    %474 = arith.addf %473, %472 : vector<1x256xf32>
    %475 = arith.divf %473, %474 : vector<1x256xf32>
    %476 = vector.extract_strided_slice %475 {offsets = [0, 0], sizes = [1, 128], strides = [1, 1]} : vector<1x256xf32> to vector<1x128xf32>
    %477 = vector.extract_strided_slice %475 {offsets = [0, 128], sizes = [1, 128], strides = [1, 1]} : vector<1x256xf32> to vector<1x128xf32>
    %478 = vector.extract_strided_slice %467 {offsets = [0, 256], sizes = [1, 128], strides = [1, 1]} : vector<1x512xf32> to vector<1x128xf32>
    %c0_223 = arith.constant 0 : index
    %c512_224 = arith.constant 512 : index
    %479 = vector.load %arg8[%c0_223, %c512_224] : memref<1x1408xf32, #tpu.memory_space<vmem>>, vector<1x128xf32>
    %480 = arith.addf %478, %479 : vector<1x128xf32>
    %481 = vector.extract_strided_slice %467 {offsets = [0, 384], sizes = [1, 128], strides = [1, 1]} : vector<1x512xf32> to vector<1x128xf32>
    %c0_225 = arith.constant 0 : index
    %c640_226 = arith.constant 640 : index
    %482 = vector.load %arg8[%c0_225, %c640_226] : memref<1x1408xf32, #tpu.memory_space<vmem>>, vector<1x128xf32>
    %483 = arith.addf %481, %482 : vector<1x128xf32>
    %484 = arith.mulf %476, %483 : vector<1x128xf32>
    %485 = arith.addf %480, %484 : vector<1x128xf32>
    %486 = math.tanh %485 : vector<1x128xf32>
    %cst_227 = arith.constant 1.000000e+00 : f32
    %487 = vector.broadcast %cst_227 : f32 to vector<1x128xf32>
    %488 = arith.subf %487, %477 : vector<1x128xf32>
    %489 = arith.mulf %488, %486 : vector<1x128xf32>
    %490 = arith.mulf %477, %384 : vector<1x128xf32>
    %491 = arith.addf %489, %490 : vector<1x128xf32>
    %492 = tpu.concatenate %491, %412 in 1 : vector<1x128xf32>, vector<1x128xf32> -> vector<1x256xf32>
    %493 = arith.truncf %492 : vector<1x256xf32> to vector<1x256xbf16>
    %c256_228 = arith.constant 256 : index
    %c0_229 = arith.constant 0 : index
    %494 = vector.load %arg6[%c256_228, %c0_229] : memref<512x512xbf16, #tpu.memory_space<vmem>>, vector<256x512xbf16>
    %cst_230 = arith.constant dense<0.000000e+00> : vector<1x512xf32>
    %495 = tpu.matmul %493, %494, %cst_230 {dimension_numbers = #tpu.dot_dimension_numbers<[1], [0], [0], [1], [0, 0, 1, 1], [], []>} : vector<1x256xbf16>, vector<256x512xbf16>, vector<1x512xf32> -> vector<1x512xf32>
    %496 = vector.extract_strided_slice %495 {offsets = [0, 0], sizes = [1, 256], strides = [1, 1]} : vector<1x512xf32> to vector<1x256xf32>
    %c0_231 = arith.constant 0 : index
    %c768_232 = arith.constant 768 : index
    %497 = vector.load %arg8[%c0_231, %c768_232] : memref<1x1408xf32, #tpu.memory_space<vmem>>, vector<1x256xf32>
    %498 = arith.addf %496, %497 : vector<1x256xf32>
    %499 = arith.negf %498 : vector<1x256xf32>
    %500 = math.exp %499 : vector<1x256xf32>
    %cst_233 = arith.constant 1.000000e+00 : f32
    %501 = vector.broadcast %cst_233 : f32 to vector<1x256xf32>
    %502 = arith.addf %501, %500 : vector<1x256xf32>
    %503 = arith.divf %501, %502 : vector<1x256xf32>
    %504 = vector.extract_strided_slice %503 {offsets = [0, 0], sizes = [1, 128], strides = [1, 1]} : vector<1x256xf32> to vector<1x128xf32>
    %505 = vector.extract_strided_slice %503 {offsets = [0, 128], sizes = [1, 128], strides = [1, 1]} : vector<1x256xf32> to vector<1x128xf32>
    %506 = vector.extract_strided_slice %495 {offsets = [0, 256], sizes = [1, 128], strides = [1, 1]} : vector<1x512xf32> to vector<1x128xf32>
    %c0_234 = arith.constant 0 : index
    %c1024_235 = arith.constant 1024 : index
    %507 = vector.load %arg8[%c0_234, %c1024_235] : memref<1x1408xf32, #tpu.memory_space<vmem>>, vector<1x128xf32>
    %508 = arith.addf %506, %507 : vector<1x128xf32>
    %509 = vector.extract_strided_slice %495 {offsets = [0, 384], sizes = [1, 128], strides = [1, 1]} : vector<1x512xf32> to vector<1x128xf32>
    %c0_236 = arith.constant 0 : index
    %c1152_237 = arith.constant 1152 : index
    %510 = vector.load %arg8[%c0_236, %c1152_237] : memref<1x1408xf32, #tpu.memory_space<vmem>>, vector<1x128xf32>
    %511 = arith.addf %509, %510 : vector<1x128xf32>
    %512 = arith.mulf %504, %511 : vector<1x128xf32>
    %513 = arith.addf %508, %512 : vector<1x128xf32>
    %514 = math.tanh %513 : vector<1x128xf32>
    %cst_238 = arith.constant 1.000000e+00 : f32
    %515 = vector.broadcast %cst_238 : f32 to vector<1x128xf32>
    %516 = arith.subf %515, %505 : vector<1x128xf32>
    %517 = arith.mulf %516, %514 : vector<1x128xf32>
    %518 = arith.mulf %505, %412 : vector<1x128xf32>
    %519 = arith.addf %517, %518 : vector<1x128xf32>
    %520 = arith.truncf %519 : vector<1x128xf32> to vector<1x128xbf16>
    %c0_239 = arith.constant 0 : index
    %c0_240 = arith.constant 0 : index
    %521 = vector.load %arg7[%c0_239, %c0_240] : memref<128x128xbf16, #tpu.memory_space<vmem>>, vector<128x128xbf16>
    %cst_241 = arith.constant dense<0.000000e+00> : vector<1x128xf32>
    %522 = tpu.matmul %520, %521, %cst_241 {dimension_numbers = #tpu.dot_dimension_numbers<[1], [0], [0], [1], [0, 0, 1, 1], [], []>} : vector<1x128xbf16>, vector<128x128xbf16>, vector<1x128xf32> -> vector<1x128xf32>
    %c0_242 = arith.constant 0 : index
    %c1280_243 = arith.constant 1280 : index
    %523 = vector.load %arg8[%c0_242, %c1280_243] : memref<1x1408xf32, #tpu.memory_space<vmem>>, vector<1x128xf32>
    %524 = arith.addf %522, %523 : vector<1x128xf32>
    %cst_244 = arith.constant dense<0xFF800000> : vector<1xf32>
    %525 = vector.multi_reduction <maximumf>, %524, %cst_244 [1] : vector<1x128xf32> to vector<1xf32>
    %526 = vector.shape_cast %525 : vector<1xf32> to vector<1x1xf32>
    %527 = vector.broadcast %526 : vector<1x1xf32> to vector<1x128xf32>
    %528 = arith.subf %524, %527 : vector<1x128xf32>
    %529 = math.exp %528 : vector<1x128xf32>
    %cst_245 = arith.constant dense<0.000000e+00> : vector<1xf32>
    %530 = vector.multi_reduction <add>, %529, %cst_245 [1] : vector<1x128xf32> to vector<1xf32>
    %531 = vector.shape_cast %530 : vector<1xf32> to vector<1x1xf32>
    %532 = math.log %531 : vector<1x1xf32>
    %533 = vector.broadcast %532 : vector<1x1xf32> to vector<1x128xf32>
    %534 = arith.subf %528, %533 : vector<1x128xf32>
    %c4_246 = arith.constant 4 : index
    %c0_247 = arith.constant 0 : index
    %535 = vector.load %arg9[%c4_246, %c0_247] : memref<6x128xf32, #tpu.memory_space<vmem>>, vector<1x128xf32>
    tpu.vector_store %arg9[%c4_246, %c0_247], %534 {strides = array<i32>} : memref<6x128xf32, #tpu.memory_space<vmem>>, vector<1x128xf32>,
    %c4_248 = arith.constant 4 : index
    %c0_249 = arith.constant 0 : index
    %536 = vector.load %arg10[%c4_248, %c0_249] : memref<6x128xf32, #tpu.memory_space<vmem>>, vector<1x128xf32>
    tpu.vector_store %arg10[%c4_248, %c0_249], %451 {strides = array<i32>} : memref<6x128xf32, #tpu.memory_space<vmem>>, vector<1x128xf32>,
    %c5 = arith.constant 5 : index
    %c0_250 = arith.constant 0 : index
    %537 = vector.load %arg1[%c5, %c0_250] : memref<6x256xf32, #tpu.memory_space<vmem>>, vector<1x256xf32>
    %538 = vector.extract_strided_slice %537 {offsets = [0, 0], sizes = [1, 128], strides = [1, 1]} : vector<1x256xf32> to vector<1x128xf32>
    %c0_251 = arith.constant 0 : index
    %c0_252 = arith.constant 0 : index
    %539 = vector.load %arg8[%c0_251, %c0_252] : memref<1x1408xf32, #tpu.memory_space<vmem>>, vector<1x128xf32>
    %540 = arith.addf %538, %539 : vector<1x128xf32>
    %541 = arith.truncf %491 : vector<1x128xf32> to vector<1x128xbf16>
    %c0_253 = arith.constant 0 : index
    %c0_254 = arith.constant 0 : index
    %542 = vector.load %arg4[%c0_253, %c0_254] : memref<128x128xbf16, #tpu.memory_space<vmem>>, vector<128x128xbf16>
    %cst_255 = arith.constant dense<0.000000e+00> : vector<1x128xf32>
    %543 = tpu.matmul %541, %542, %cst_255 {dimension_numbers = #tpu.dot_dimension_numbers<[1], [0], [0], [1], [0, 0, 1, 1], [], []>} : vector<1x128xbf16>, vector<128x128xbf16>, vector<1x128xf32> -> vector<1x128xf32>
    %544 = arith.addf %540, %543 : vector<1x128xf32>
    %cst_256 = arith.constant dense<0xFF800000> : vector<1xf32>
    %545 = vector.multi_reduction <maximumf>, %544, %cst_256 [1] : vector<1x128xf32> to vector<1xf32>
    %546 = vector.shape_cast %545 : vector<1xf32> to vector<1x1xf32>
    %547 = vector.broadcast %546 : vector<1x1xf32> to vector<1x128xf32>
    %548 = arith.subf %544, %547 : vector<1x128xf32>
    %549 = math.exp %548 : vector<1x128xf32>
    %cst_257 = arith.constant dense<0.000000e+00> : vector<1xf32>
    %550 = vector.multi_reduction <add>, %549, %cst_257 [1] : vector<1x128xf32> to vector<1xf32>
    %551 = vector.shape_cast %550 : vector<1xf32> to vector<1x1xf32>
    %552 = tpu.reciprocal %551 {approx = true} : vector<1x1xf32> -> vector<1x1xf32>
    %553 = arith.mulf %551, %552 : vector<1x1xf32>
    %cst_258 = arith.constant 2.000000e+00 : f32
    %554 = vector.broadcast %cst_258 : f32 to vector<1x1xf32>
    %555 = arith.subf %554, %553 : vector<1x1xf32>
    %556 = arith.mulf %552, %555 : vector<1x1xf32>
    %557 = vector.broadcast %556 : vector<1x1xf32> to vector<1x128xf32>
    %558 = arith.mulf %549, %557 : vector<1x128xf32>
    %559 = arith.truncf %558 : vector<1x128xf32> to vector<1x128xbf16>
    %c0_259 = arith.constant 0 : index
    %c0_260 = arith.constant 0 : index
    %560 = vector.load %arg3[%c0_259, %c0_260] : memref<128x128xbf16, #tpu.memory_space<vmem>>, vector<128x128xbf16>
    %cst_261 = arith.constant dense<0.000000e+00> : vector<1x128xf32>
    %561 = tpu.matmul %559, %560, %cst_261 {dimension_numbers = #tpu.dot_dimension_numbers<[1], [0], [0], [1], [0, 0, 1, 1], [], []>} : vector<1x128xbf16>, vector<128x128xbf16>, vector<1x128xf32> -> vector<1x128xf32>
    %562 = vector.extract_strided_slice %537 {offsets = [0, 128], sizes = [1, 128], strides = [1, 1]} : vector<1x256xf32> to vector<1x128xf32>
    %c0_262 = arith.constant 0 : index
    %c128_263 = arith.constant 128 : index
    %563 = vector.load %arg8[%c0_262, %c128_263] : memref<1x1408xf32, #tpu.memory_space<vmem>>, vector<1x128xf32>
    %564 = arith.addf %562, %563 : vector<1x128xf32>
    %565 = arith.truncf %561 : vector<1x128xf32> to vector<1x128xbf16>
    %c0_264 = arith.constant 0 : index
    %c0_265 = arith.constant 0 : index
    %566 = vector.load %arg5[%c0_264, %c0_265] : memref<128x128xbf16, #tpu.memory_space<vmem>>, vector<128x128xbf16>
    %cst_266 = arith.constant dense<0.000000e+00> : vector<1x128xf32>
    %567 = tpu.matmul %565, %566, %cst_266 {dimension_numbers = #tpu.dot_dimension_numbers<[1], [0], [0], [1], [0, 0, 1, 1], [], []>} : vector<1x128xbf16>, vector<128x128xbf16>, vector<1x128xf32> -> vector<1x128xf32>
    %568 = arith.addf %564, %567 : vector<1x128xf32>
    %cst_267 = arith.constant 0.000000e+00 : f32
    %569 = vector.broadcast %cst_267 : f32 to vector<1x128xf32>
    %570 = arith.maximumf %568, %569 : vector<1x128xf32>
    %571 = tpu.concatenate %570, %491 in 1 : vector<1x128xf32>, vector<1x128xf32> -> vector<1x256xf32>
    %572 = arith.truncf %571 : vector<1x256xf32> to vector<1x256xbf16>
    %c0_268 = arith.constant 0 : index
    %c0_269 = arith.constant 0 : index
    %573 = vector.load %arg6[%c0_268, %c0_269] : memref<512x512xbf16, #tpu.memory_space<vmem>>, vector<256x512xbf16>
    %cst_270 = arith.constant dense<0.000000e+00> : vector<1x512xf32>
    %574 = tpu.matmul %572, %573, %cst_270 {dimension_numbers = #tpu.dot_dimension_numbers<[1], [0], [0], [1], [0, 0, 1, 1], [], []>} : vector<1x256xbf16>, vector<256x512xbf16>, vector<1x512xf32> -> vector<1x512xf32>
    %575 = vector.extract_strided_slice %574 {offsets = [0, 0], sizes = [1, 256], strides = [1, 1]} : vector<1x512xf32> to vector<1x256xf32>
    %c0_271 = arith.constant 0 : index
    %c256_272 = arith.constant 256 : index
    %576 = vector.load %arg8[%c0_271, %c256_272] : memref<1x1408xf32, #tpu.memory_space<vmem>>, vector<1x256xf32>
    %577 = arith.addf %575, %576 : vector<1x256xf32>
    %578 = arith.negf %577 : vector<1x256xf32>
    %579 = math.exp %578 : vector<1x256xf32>
    %cst_273 = arith.constant 1.000000e+00 : f32
    %580 = vector.broadcast %cst_273 : f32 to vector<1x256xf32>
    %581 = arith.addf %580, %579 : vector<1x256xf32>
    %582 = arith.divf %580, %581 : vector<1x256xf32>
    %583 = vector.extract_strided_slice %582 {offsets = [0, 0], sizes = [1, 128], strides = [1, 1]} : vector<1x256xf32> to vector<1x128xf32>
    %584 = vector.extract_strided_slice %582 {offsets = [0, 128], sizes = [1, 128], strides = [1, 1]} : vector<1x256xf32> to vector<1x128xf32>
    %585 = vector.extract_strided_slice %574 {offsets = [0, 256], sizes = [1, 128], strides = [1, 1]} : vector<1x512xf32> to vector<1x128xf32>
    %c0_274 = arith.constant 0 : index
    %c512_275 = arith.constant 512 : index
    %586 = vector.load %arg8[%c0_274, %c512_275] : memref<1x1408xf32, #tpu.memory_space<vmem>>, vector<1x128xf32>
    %587 = arith.addf %585, %586 : vector<1x128xf32>
    %588 = vector.extract_strided_slice %574 {offsets = [0, 384], sizes = [1, 128], strides = [1, 1]} : vector<1x512xf32> to vector<1x128xf32>
    %c0_276 = arith.constant 0 : index
    %c640_277 = arith.constant 640 : index
    %589 = vector.load %arg8[%c0_276, %c640_277] : memref<1x1408xf32, #tpu.memory_space<vmem>>, vector<1x128xf32>
    %590 = arith.addf %588, %589 : vector<1x128xf32>
    %591 = arith.mulf %583, %590 : vector<1x128xf32>
    %592 = arith.addf %587, %591 : vector<1x128xf32>
    %593 = math.tanh %592 : vector<1x128xf32>
    %cst_278 = arith.constant 1.000000e+00 : f32
    %594 = vector.broadcast %cst_278 : f32 to vector<1x128xf32>
    %595 = arith.subf %594, %584 : vector<1x128xf32>
    %596 = arith.mulf %595, %593 : vector<1x128xf32>
    %597 = arith.mulf %584, %491 : vector<1x128xf32>
    %598 = arith.addf %596, %597 : vector<1x128xf32>
    %599 = tpu.concatenate %598, %519 in 1 : vector<1x128xf32>, vector<1x128xf32> -> vector<1x256xf32>
    %600 = arith.truncf %599 : vector<1x256xf32> to vector<1x256xbf16>
    %c256_279 = arith.constant 256 : index
    %c0_280 = arith.constant 0 : index
    %601 = vector.load %arg6[%c256_279, %c0_280] : memref<512x512xbf16, #tpu.memory_space<vmem>>, vector<256x512xbf16>
    %cst_281 = arith.constant dense<0.000000e+00> : vector<1x512xf32>
    %602 = tpu.matmul %600, %601, %cst_281 {dimension_numbers = #tpu.dot_dimension_numbers<[1], [0], [0], [1], [0, 0, 1, 1], [], []>} : vector<1x256xbf16>, vector<256x512xbf16>, vector<1x512xf32> -> vector<1x512xf32>
    %603 = vector.extract_strided_slice %602 {offsets = [0, 0], sizes = [1, 256], strides = [1, 1]} : vector<1x512xf32> to vector<1x256xf32>
    %c0_282 = arith.constant 0 : index
    %c768_283 = arith.constant 768 : index
    %604 = vector.load %arg8[%c0_282, %c768_283] : memref<1x1408xf32, #tpu.memory_space<vmem>>, vector<1x256xf32>
    %605 = arith.addf %603, %604 : vector<1x256xf32>
    %606 = arith.negf %605 : vector<1x256xf32>
    %607 = math.exp %606 : vector<1x256xf32>
    %cst_284 = arith.constant 1.000000e+00 : f32
    %608 = vector.broadcast %cst_284 : f32 to vector<1x256xf32>
    %609 = arith.addf %608, %607 : vector<1x256xf32>
    %610 = arith.divf %608, %609 : vector<1x256xf32>
    %611 = vector.extract_strided_slice %610 {offsets = [0, 0], sizes = [1, 128], strides = [1, 1]} : vector<1x256xf32> to vector<1x128xf32>
    %612 = vector.extract_strided_slice %610 {offsets = [0, 128], sizes = [1, 128], strides = [1, 1]} : vector<1x256xf32> to vector<1x128xf32>
    %613 = vector.extract_strided_slice %602 {offsets = [0, 256], sizes = [1, 128], strides = [1, 1]} : vector<1x512xf32> to vector<1x128xf32>
    %c0_285 = arith.constant 0 : index
    %c1024_286 = arith.constant 1024 : index
    %614 = vector.load %arg8[%c0_285, %c1024_286] : memref<1x1408xf32, #tpu.memory_space<vmem>>, vector<1x128xf32>
    %615 = arith.addf %613, %614 : vector<1x128xf32>
    %616 = vector.extract_strided_slice %602 {offsets = [0, 384], sizes = [1, 128], strides = [1, 1]} : vector<1x512xf32> to vector<1x128xf32>
    %c0_287 = arith.constant 0 : index
    %c1152_288 = arith.constant 1152 : index
    %617 = vector.load %arg8[%c0_287, %c1152_288] : memref<1x1408xf32, #tpu.memory_space<vmem>>, vector<1x128xf32>
    %618 = arith.addf %616, %617 : vector<1x128xf32>
    %619 = arith.mulf %611, %618 : vector<1x128xf32>
    %620 = arith.addf %615, %619 : vector<1x128xf32>
    %621 = math.tanh %620 : vector<1x128xf32>
    %cst_289 = arith.constant 1.000000e+00 : f32
    %622 = vector.broadcast %cst_289 : f32 to vector<1x128xf32>
    %623 = arith.subf %622, %612 : vector<1x128xf32>
    %624 = arith.mulf %623, %621 : vector<1x128xf32>
    %625 = arith.mulf %612, %519 : vector<1x128xf32>
    %626 = arith.addf %624, %625 : vector<1x128xf32>
    %627 = arith.truncf %626 : vector<1x128xf32> to vector<1x128xbf16>
    %c0_290 = arith.constant 0 : index
    %c0_291 = arith.constant 0 : index
    %628 = vector.load %arg7[%c0_290, %c0_291] : memref<128x128xbf16, #tpu.memory_space<vmem>>, vector<128x128xbf16>
    %cst_292 = arith.constant dense<0.000000e+00> : vector<1x128xf32>
    %629 = tpu.matmul %627, %628, %cst_292 {dimension_numbers = #tpu.dot_dimension_numbers<[1], [0], [0], [1], [0, 0, 1, 1], [], []>} : vector<1x128xbf16>, vector<128x128xbf16>, vector<1x128xf32> -> vector<1x128xf32>
    %c0_293 = arith.constant 0 : index
    %c1280_294 = arith.constant 1280 : index
    %630 = vector.load %arg8[%c0_293, %c1280_294] : memref<1x1408xf32, #tpu.memory_space<vmem>>, vector<1x128xf32>
    %631 = arith.addf %629, %630 : vector<1x128xf32>
    %cst_295 = arith.constant dense<0xFF800000> : vector<1xf32>
    %632 = vector.multi_reduction <maximumf>, %631, %cst_295 [1] : vector<1x128xf32> to vector<1xf32>
    %633 = vector.shape_cast %632 : vector<1xf32> to vector<1x1xf32>
    %634 = vector.broadcast %633 : vector<1x1xf32> to vector<1x128xf32>
    %635 = arith.subf %631, %634 : vector<1x128xf32>
    %636 = math.exp %635 : vector<1x128xf32>
    %cst_296 = arith.constant dense<0.000000e+00> : vector<1xf32>
    %637 = vector.multi_reduction <add>, %636, %cst_296 [1] : vector<1x128xf32> to vector<1xf32>
    %638 = vector.shape_cast %637 : vector<1xf32> to vector<1x1xf32>
    %639 = math.log %638 : vector<1x1xf32>
    %640 = vector.broadcast %639 : vector<1x1xf32> to vector<1x128xf32>
    %641 = arith.subf %635, %640 : vector<1x128xf32>
    %c5_297 = arith.constant 5 : index
    %c0_298 = arith.constant 0 : index
    %642 = vector.load %arg9[%c5_297, %c0_298] : memref<6x128xf32, #tpu.memory_space<vmem>>, vector<1x128xf32>
    tpu.vector_store %arg9[%c5_297, %c0_298], %641 {strides = array<i32>} : memref<6x128xf32, #tpu.memory_space<vmem>>, vector<1x128xf32>,
    %c5_299 = arith.constant 5 : index
    %c0_300 = arith.constant 0 : index
    %643 = vector.load %arg10[%c5_299, %c0_300] : memref<6x128xf32, #tpu.memory_space<vmem>>, vector<1x128xf32>
    tpu.vector_store %arg10[%c5_299, %c0_300], %558 {strides = array<i32>} : memref<6x128xf32, #tpu.memory_space<vmem>>, vector<1x128xf32>,
    %c0_301 = arith.constant 0 : index
    %c0_302 = arith.constant 0 : index
    %644 = vector.load %arg11[%c0_301, %c0_302] : memref<2x128xf32, #tpu.memory_space<vmem>>, vector<1x128xf32>
    tpu.vector_store %arg11[%c0_301, %c0_302], %598 {strides = array<i32>} : memref<2x128xf32, #tpu.memory_space<vmem>>, vector<1x128xf32>,
    %c1_303 = arith.constant 1 : index
    %c0_304 = arith.constant 0 : index
    %645 = vector.load %arg11[%c1_303, %c0_304] : memref<2x128xf32, #tpu.memory_space<vmem>>, vector<1x128xf32>
    tpu.vector_store %arg11[%c1_303, %c0_304], %626 {strides = array<i32>} : memref<2x128xf32, #tpu.memory_space<vmem>>, vector<1x128xf32>,
    return
  }
  func.func @transform_0(%arg0: i32) -> (i32, i32) {
    %c0_i32 = arith.constant 0 : i32
    %c0_i32_0 = arith.constant 0 : i32
    %c0_i32_1 = arith.constant 0 : i32
    return %c0_i32, %c0_i32_0 : i32, i32
  }
  func.func @transform_1(%arg0: i32) -> (i32, i32) {
    %c0_i32 = arith.constant 0 : i32
    %c0_i32_0 = arith.constant 0 : i32
    %c0_i32_1 = arith.constant 0 : i32
    return %c0_i32, %c0_i32_0 : i32, i32
  }
  func.func @transform_2(%arg0: i32) -> (i32, i32) {
    %c0_i32 = arith.constant 0 : i32
    %c0_i32_0 = arith.constant 0 : i32
    %c0_i32_1 = arith.constant 0 : i32
    return %c0_i32, %c0_i32_0 : i32, i32
  }
  func.func @transform_3(%arg0: i32) -> (i32, i32) {
    %c0_i32 = arith.constant 0 : i32
    %c0_i32_0 = arith.constant 0 : i32
    %c0_i32_1 = arith.constant 0 : i32
    return %c0_i32, %c0_i32_0 : i32, i32
  }
  func.func @transform_4(%arg0: i32) -> (i32, i32) {
    %c0_i32 = arith.constant 0 : i32
    %c0_i32_0 = arith.constant 0 : i32
    %c0_i32_1 = arith.constant 0 : i32
    return %c0_i32, %c0_i32_0 : i32, i32
  }
  func.func @transform_5(%arg0: i32) -> (i32, i32) {
    %c0_i32 = arith.constant 0 : i32
    %c0_i32_0 = arith.constant 0 : i32
    %c0_i32_1 = arith.constant 0 : i32
    return %c0_i32, %c0_i32_0 : i32, i32
  }
  func.func @transform_6(%arg0: i32) -> (i32, i32) {
    %c0_i32 = arith.constant 0 : i32
    %c0_i32_0 = arith.constant 0 : i32
    %c0_i32_1 = arith.constant 0 : i32
    return %c0_i32, %c0_i32_0 : i32, i32
  }
  func.func @transform_7(%arg0: i32) -> (i32, i32) {
    %c0_i32 = arith.constant 0 : i32
    %c0_i32_0 = arith.constant 0 : i32
    %c0_i32_1 = arith.constant 0 : i32
    return %c0_i32, %c0_i32_0 : i32, i32
  }
  func.func @transform_8(%arg0: i32) -> (i32, i32) {
    %c0_i32 = arith.constant 0 : i32
    %c0_i32_0 = arith.constant 0 : i32
    %c0_i32_1 = arith.constant 0 : i32
    return %c0_i32, %c0_i32_0 : i32, i32
  }
  func.func @transform_9(%arg0: i32) -> (i32, i32) {
    %c0_i32 = arith.constant 0 : i32
    %c0_i32_0 = arith.constant 0 : i32
    %c0_i32_1 = arith.constant 0 : i32
    return %c0_i32, %c0_i32_0 : i32, i32
  }
  func.func @transform_10(%arg0: i32) -> (i32, i32) {
    %c0_i32 = arith.constant 0 : i32
    %c0_i32_0 = arith.constant 0 : i32
    %c0_i32_1 = arith.constant 0 : i32
    return %c0_i32, %c0_i32_0 : i32, i32
  }
}

</mosaic_0001>

<bundles_post_ra>
// kernel: _decode_impl.1
= control target key start
LH: loop header
LB: loop body
LE: loop exit
PB: predicated region body
PF: predicated region fallthrough
CT: control target
= control target key end

     0   :  { %16 = vsyncpa [#allocation3], 0  ;;  %s13553_s0 = inlined_call_operand.vmem [shape: f32[6,256], index: 0, kind: input, shape index: {}]   ;;  %s13554_s1 = inlined_call_operand.vmem [shape: f32[2,128], index: 1, kind: input, shape index: {}]   ;;  %s13555_s2 = inlined_call_operand.vmem [shape: bf16[128,128], index: 2, kind: input, shape index: {}]   ;;  %s13556_s3 = inlined_call_operand.vmem [shape: bf16[128,128], index: 3, kind: input, shape index: {}]   ;;  %s13557_s4 = inlined_call_operand.vmem [shape: bf16[128,128], index: 4, kind: input, shape index: {}]   ;;  %s13558_s5 = inlined_call_operand.hbm [shape: bf16[512,512], index: 5, kind: input, shape index: {}]   ;;  %s13559_s6 = inlined_call_operand.vmem [shape: bf16[128,128], index: 6, kind: input, shape index: {}]   ;;  %s13560_s7 = inlined_call_operand.vmem [shape: f32[1,1408], index: 7, kind: input, shape index: {}]   ;;  %s13561_s8 = inlined_call_operand.hbm [shape: f32[6,128], index: 8, kind: output, shape index: {0}]   ;;  %s13562_s9 = inlined_call_operand.hbm [shape: f32[6,128], index: 9, kind: output, shape index: {1}]   ;;  %s13563_s10 = inlined_call_operand.hbm [shape: f32[2,128], index: 10, kind: output, shape index: {2}]  }
   0x1   :  { %17 = vsyncpa [#allocation4], 0 }
   0x2   :  { %18 = vsyncpa [#allocation7], 0  ;;  %s12206_s13 = smov [#allocation2]   ;;  %s12112_s17 = scalar_lea.hbm %s13558_s5, 16384 }
   0x3   :  { %s34_s14 = sshll.u32 %s12206_s13, 4  ;;  %p12113_p0 = scmp.ne.s32.totalorder %s13558_s5, %s12112_s17  ;;  %s35_s14 = int_to_ptr.vmem [resolvable:$true] %s34_s14 }
   0x4   :  { %p12116_p1 = scmp.lt.u32.totalorder %s12112_s17, %s13558_s5 }
   0x6   :  { %p12118_p2 = pnand %p12116_p1, %p12113_p0 }
   0x8   :  { %12121 = shalt.err (!%p12118_p2)
}
   0x9   :  { %s12122_s22 = scalar_lea.vmem %s35_s14, 16384  ;;  %p12127_p4 = scmp.lt.s32.totalorder %s35_s14, %s35_s14 }
   0xa   :  { %p12123_p3 = scmp.ne.s32.totalorder %s35_s14, %s12122_s22  ;;  %p12128_p5 = scmp.lt.s32.totalorder %s12122_s22, %s12122_s22 }
   0xc   :  { %p12129_p6 = por %p12128_p5, %p12127_p4 }
   0xe   :  { %p12130_p7 = pnand %p12129_p6, %p12123_p3 }
  0x10   :  { %12133 = shalt.err (!%p12130_p7)
}
  0x11   :  { %s12207_s23 = smov 256   ;;  %s12208_s24 = smov 16  }
  0x12   :  { %40 = dma.hbm_to_vmem [thread:$0]  %s13558_s5, 16384, %s35_s14, [#allocation3], %s12207_s23, %s12207_s23, %s12208_s24  }
  0x13   :  { %12200 = dma.done.wait [#allocation3], 16384  }
  0x14   :  { %12201 = vsyncadd [#allocation3], 4294950912  ;;  %v12209_v0 = vmov 0.0   ;;  %vm12210_vm0 = vmmov 0   ;;  %v10598_v1 = vld [vmem:[%s13556_s3] sm:$0xff]   ;;  %v10599_v2 = vld [vmem:[%s13556_s3 + $0x8] sm:$0xff]  }
  0x15   :  { %10110 = vmatprep.subr.bf16.mxu0 %v12209_v0  ;;  %10126 = vmatprep.mubr.msk.bf16.mxu0 %vm12210_vm0, %v12209_v0  ;;  %v10600_v3 = vld [vmem:[%s13556_s3 + $0x10] sm:$0xff]   ;;  %v10601_v4 = vld [vmem:[%s13556_s3 + $0x18] sm:$0xff]   ;;  %v10602_v5 = vld [vmem:[%s13556_s3 + $0x20] sm:$0xff]   ;;  %vm160_vm1 = vcmask 1040384  }
  0x16   :  { %10130 = vmatprep.subr.bf16.mxu1 %v12209_v0  ;;  %10146 = vmatprep.mubr.msk.bf16.mxu1 %vm12210_vm0, %v12209_v0  ;;  %v10603_v6 = vld [vmem:[%s13556_s3 + $0x28] sm:$0xff]   ;;  %v10604_v7 = vld [vmem:[%s13556_s3 + $0x30] sm:$0xff]   ;;  %v10605_v8 = vld [vmem:[%s13556_s3 + $0x38] sm:$0xff]  }
  0x17   :  { %10111 = vmatpush3.bf16.msra.mxu0 %v10598_v1  ;;  %v49_v9 = vld [vmem:[%s13554_s1] sm:$0x1]  ;;  %v10607_v21 = vld [vmem:[%s13555_s2 + $0x8] sm:$0xff]   ;;  %v10608_v22 = vld [vmem:[%s13555_s2 + $0x10] sm:$0xff]  }
  0x18   :  { %10112 = vmatprep.subr.bf16.mxu0 %v12209_v0  ;;  %v12321_v10 = vpack.c.bf16 %v49_v9, %v49_v9  ;;  %v51_v11 = vld [vmem:[%s13553_s0] ss:$8 sm:$0x3]  ;;  %v10609_v28 = vld [vmem:[%s13555_s2 + $0x18] sm:$0xff]   ;;  %v10612_v31 = vld [vmem:[%s13555_s2 + $0x30] sm:$0xff]  }
  0x19   :  { %v52_v12 = vld [vmem:[%s13560_s7] sm:$0x1]  ;;  %v10611_v30 = vld [vmem:[%s13555_s2 + $0x28] sm:$0xff]   ;;  %v10613_v32 = vld [vmem:[%s13555_s2 + $0x38] sm:$0xff]  }
  0x1a   :  { %v53_v13 = vadd.f32 %v52_v12, %v51_v11  ;;  %v10606_v20 = vld [vmem:[%s13555_s2] sm:$0xff]   ;;  %v10615_v34 = vld [vmem:[%s13557_s4 + $0x8] sm:$0xff]   ;;  %v10616_v35 = vld [vmem:[%s13557_s4 + $0x10] sm:$0xff]  }
  0x1b   :  { %10113 = vmatpush3.bf16.msra.mxu0 %v10599_v2  ;;  %10131 = vmatpush3.bf16.msra.mxu1 %v10606_v20  ;;  %v10610_v29 = vld [vmem:[%s13555_s2 + $0x20] sm:$0xff]   ;;  %v10617_v36 = vld [vmem:[%s13557_s4 + $0x18] sm:$0xff]   ;;  %v10619_v38 = vld [vmem:[%s13557_s4 + $0x28] sm:$0xff]  }
  0x1c   :  { %10114 = vmatprep.subr.bf16.mxu0 %v12209_v0  ;;  %10132 = vmatprep.subr.bf16.mxu1 %v12209_v0  ;;  %v10614_v33 = vld [vmem:[%s13557_s4] sm:$0xff]   ;;  %v10620_v39 = vld [vmem:[%s13557_s4 + $0x30] sm:$0xff]   ;;  %v10621_v47 = vld [vmem:[%s13557_s4 + $0x38] sm:$0xff]  }
  0x1d   :  { %v10618_v37 = vld [vmem:[%s13557_s4 + $0x20] sm:$0xff]   ;;  %v10627_v50 = vld [vmem:[#allocation2 + $0xc] ss:$16 sps:$4 sm:$0xff]  }
  0x1e   :  { %v10622_v48 = vld [vmem:[#allocation2] ss:$16 sps:$4 sm:$0xff]   ;;  %v10624_v49 = vld [vmem:[#allocation2 + $0x4] ss:$16 sps:$4 sm:$0xff]  }
  0x1f   :  { %10115 = vmatpush3.bf16.msra.mxu0 %v10600_v3  ;;  %10133 = vmatpush3.bf16.msra.mxu1 %v10607_v21  ;;  %v10630_v51 = vld [vmem:[#allocation2 + $0x24] ss:$16 sps:$4 sm:$0xff]   ;;  %v10628_v52 = vld [vmem:[#allocation2 + $0x20] ss:$16 sps:$4 sm:$0xff]   ;;  %v10633_v21 = vld [vmem:[#allocation2 + $0x2c] ss:$16 sps:$4 sm:$0xff]  }
  0x20   :  { %10116 = vmatprep.subr.bf16.mxu0 %v12209_v0  ;;  %10134 = vmatprep.subr.bf16.mxu1 %v12209_v0  ;;  %v10636_v53 = vld [vmem:[#allocation2 + $0x44] ss:$16 sps:$4 sm:$0xff]   ;;  %v10634_v54 = vld [vmem:[#allocation2 + $0x40] ss:$16 sps:$4 sm:$0xff]  }
  0x21   :  { %v10642_v55 = vld [vmem:[#allocation2 + $0x64] ss:$16 sps:$4 sm:$0xff]   ;;  %v10640_v56 = vld [vmem:[#allocation2 + $0x60] ss:$16 sps:$4 sm:$0xff]  }
  0x22   :  { %v10648_v57 = vld [vmem:[#allocation2 + $0x84] ss:$16 sps:$4 sm:$0xff]   ;;  %v10646_v58 = vld [vmem:[#allocation2 + $0x80] ss:$16 sps:$4 sm:$0xff]  }
  0x23   :  { %10117 = vmatpush3.bf16.msra.mxu0 %v10601_v4  ;;  %10135 = vmatpush3.bf16.msra.mxu1 %v10608_v22  ;;  %v10654_v59 = vld [vmem:[#allocation2 + $0xa4] ss:$16 sps:$4 sm:$0xff]   ;;  %v10652_v60 = vld [vmem:[#allocation2 + $0xa0] ss:$16 sps:$4 sm:$0xff]  }
  0x24   :  { %10118 = vmatprep.subr.bf16.mxu0 %v12209_v0  ;;  %10136 = vmatprep.subr.bf16.mxu1 %v12209_v0  ;;  %v10660_v61 = vld [vmem:[#allocation2 + $0xc4] ss:$16 sps:$4 sm:$0xff]   ;;  %v10658_v62 = vld [vmem:[#allocation2 + $0xc0] ss:$16 sps:$4 sm:$0xff]  }
  0x25   :  { %v10666_v63 = vld [vmem:[#allocation2 + $0xe4] ss:$16 sps:$4 sm:$0xff]   ;;  %v10664_v1 = vld [vmem:[#allocation2 + $0xe0] ss:$16 sps:$4 sm:$0xff]  }
  0x26   :  { %v10672_v2 = vld [vmem:[#allocation2 + $0x104] ss:$16 sps:$4 sm:$0xff]   ;;  %v10670_v3 = vld [vmem:[#allocation2 + $0x100] ss:$16 sps:$4 sm:$0xff]  }
  0x27   :  { %10119 = vmatpush3.bf16.msra.mxu0 %v10602_v5  ;;  %10137 = vmatpush3.bf16.msra.mxu1 %v10609_v28  ;;  %v10678_v4 = vld [vmem:[#allocation2 + $0x124] ss:$16 sps:$4 sm:$0xff]   ;;  %v10676_v5 = vld [vmem:[#allocation2 + $0x120] ss:$16 sps:$4 sm:$0xff]   ;;  %v10643_v28 = vld [vmem:[#allocation2 + $0x68] ss:$16 sps:$4 sm:$0xff]  }
  0x28   :  { %10120 = vmatprep.subr.bf16.mxu0 %v12209_v0  ;;  %10138 = vmatprep.subr.bf16.mxu1 %v12209_v0  ;;  %v10688_v9 = vld [vmem:[#allocation2 + $0x160] ss:$16 sps:$4 sm:$0xff]   ;;  %v10696_v11 = vld [vmem:[#allocation2 + $0x184] ss:$16 sps:$4 sm:$0xff]  }
  0x29   :  { %v10694_v12 = vld [vmem:[#allocation2 + $0x180] ss:$16 sps:$4 sm:$0xff]  }
  0x2b   :  { %10121 = vmatpush3.bf16.msra.mxu0 %v10603_v6  ;;  %10139 = vmatpush3.bf16.msra.mxu1 %v10610_v29  ;;  %v10684_v6 = vld [vmem:[#allocation2 + $0x144] ss:$16 sps:$4 sm:$0xff]   ;;  %v10651_v29 = vld [vmem:[#allocation2 + $0x8c] ss:$16 sps:$4 sm:$0xff]  }
  0x2c   :  { %10122 = vmatprep.subr.bf16.mxu0 %v12209_v0  ;;  %10140 = vmatprep.subr.bf16.mxu1 %v12209_v0 }
  0x2f   :  { %10123 = vmatpush3.bf16.msra.mxu0 %v10604_v7  ;;  %10141 = vmatpush3.bf16.msra.mxu1 %v10611_v30  ;;  %v10682_v7 = vld [vmem:[#allocation2 + $0x140] ss:$16 sps:$4 sm:$0xff]   ;;  %v10649_v30 = vld [vmem:[#allocation2 + $0x88] ss:$16 sps:$4 sm:$0xff]  }
  0x30   :  { %10124 = vmatprep.subr.bf16.mxu0 %v12209_v0  ;;  %10142 = vmatprep.subr.bf16.mxu1 %v12209_v0 }
  0x33   :  { %10125 = vmatpush3.bf16.msra.mxu0 %v10605_v8  ;;  %10143 = vmatpush3.bf16.msra.mxu1 %v10612_v31  ;;  %v10690_v8 = vld [vmem:[#allocation2 + $0x164] ss:$16 sps:$4 sm:$0xff]   ;;  %v10657_v31 = vld [vmem:[#allocation2 + $0xac] ss:$16 sps:$4 sm:$0xff]  }
  0x34   :  { %10150 = vmatprep.subr.bf16.mxu0 %v12209_v0  ;;  %10144 = vmatprep.subr.bf16.mxu1 %v12209_v0 }
  0x36   :  { %10127 = vmatmul.mubr.bf16.vlgmr.msra.gmra.mrb[0].mxu0 %v12321_v10 }
  0x37   :  { %10166 = vmatprep.mubr.msk.bf16.mxu0 %vm12210_vm0, %v12209_v0  ;;  %10145 = vmatpush3.bf16.msra.mxu1 %v10613_v32  ;;  %v10655_v32 = vld [vmem:[#allocation2 + $0xa8] ss:$16 sps:$4 sm:$0xff]  }
  0x38   :  { %10151 = vmatpush3.bf16.msra.mxu0 %v10614_v33  ;;  %777 = vmatprep.subr.bf16.mxu1 %v10624_v49  ;;  %v10663_v33 = vld [vmem:[#allocation2 + $0xcc] ss:$16 sps:$4 sm:$0xff]   ;;  %v10709_v49 = vld [vmem:[#allocation2 + $0x1c8] ss:$16 sps:$4 sm:$0xff]  }
  0x39   :  { %10152 = vmatprep.subr.bf16.mxu0 %v12209_v0 }
  0x3c   :  { %10153 = vmatpush3.bf16.msra.mxu0 %v10615_v34  ;;  %v10669_v34 = vld [vmem:[#allocation2 + $0xec] ss:$16 sps:$4 sm:$0xff]  }
  0x3d   :  { %10154 = vmatprep.subr.bf16.mxu0 %v12209_v0 }
  0x40   :  { %10155 = vmatpush3.bf16.msra.mxu0 %v10616_v35  ;;  %v10667_v35 = vld [vmem:[#allocation2 + $0xe8] ss:$16 sps:$4 sm:$0xff]  }
  0x41   :  { %10156 = vmatprep.subr.bf16.mxu0 %v12209_v0 }
  0x44   :  { %10157 = vmatpush3.bf16.msra.mxu0 %v10617_v36  ;;  %v10675_v36 = vld [vmem:[#allocation2 + $0x10c] ss:$16 sps:$4 sm:$0xff]  }
  0x45   :  { %10158 = vmatprep.subr.bf16.mxu0 %v12209_v0 }
  0x48   :  { %10159 = vmatpush3.bf16.msra.mxu0 %v10618_v37  ;;  %v10673_v37 = vld [vmem:[#allocation2 + $0x108] ss:$16 sps:$4 sm:$0xff]  }
  0x49   :  { %10160 = vmatprep.subr.bf16.mxu0 %v12209_v0 }
  0x4c   :  { %10161 = vmatpush3.bf16.msra.mxu0 %v10619_v38  ;;  %v10681_v38 = vld [vmem:[#allocation2 + $0x12c] ss:$16 sps:$4 sm:$0xff]  }
  0x4d   :  { %10162 = vmatprep.subr.bf16.mxu0 %v12209_v0 }
  0x50   :  { %10163 = vmatpush3.bf16.msra.mxu0 %v10620_v39  ;;  %v10679_v39 = vld [vmem:[#allocation2 + $0x128] ss:$16 sps:$4 sm:$0xff]  }
  0x51   :  { %10164 = vmatprep.subr.bf16.mxu0 %v12209_v0 }
  0x54   :  { %10165 = vmatpush3.bf16.msra.mxu0 %v10621_v47  ;;  %v10703_v47 = vld [vmem:[#allocation2 + $0x1a8] ss:$16 sps:$4 sm:$0xff]  }
  0x55   :  { %818 = vmatprep.subr.bf16.mxu0 %v10627_v50  ;;  %v10714_v50 = vld [vmem:[#allocation2 + $0x1e4] ss:$16 sps:$4 sm:$0xff]  }
 0x109   :  { %v153_v14 = vpop.f32.mrb[0].mxu0 }
 0x10a   :  { %v159_v15 = vadd.f32 %v153_v14, %v53_v13  ;;  %v10128_v16 = vpop.f32.mrb[1].mxu0  ;;  %v10702_v13 = vld [vmem:[#allocation2 + $0x1a4] ss:$16 sps:$4 sm:$0xff]   ;;  %v10700_v14 = vld [vmem:[#allocation2 + $0x1a0] ss:$16 sps:$4 sm:$0xff]  }
 0x10b   :  { %v156_v17 = vpop.f32.mrb[2].mxu0  ;;  %v10706_v16 = vld [vmem:[#allocation2 + $0x1c0] ss:$16 sps:$4 sm:$0xff]  }
 0x10c   :  { %v10129_v18 = vpop.f32.mrb[3].mxu0  ;;  %v161_v19 = vsel %vm160_vm1, %v159_v15, -inf }
 0x10d   :  { %162 = vmax.xlane.f32.xlu0 %v161_v19  ;;  %v10625_v18 = vld [vmem:[#allocation2 + $0x8] ss:$16 sps:$4 sm:$0xff]  }
 0x19a   :  { %v163_v23 = vpop.xlane.xlu0 %162 }
 0x19b   :  { %v164_v24 = vsub.f32 %v159_v15, %v163_v23  ;;  %v10708_v15 = vld [vmem:[#allocation2 + $0x1c4] ss:$16 sps:$4 sm:$0xff]  }
 0x19d   :  { %v165_v25 = vmul.f32 1.442695, %v164_v24  ;;  %v10631_v24 = vld [vmem:[#allocation2 + $0x28] ss:$16 sps:$4 sm:$0xff]  }
 0x19f   :  { %11942 = vpow2.f32 %v165_v25  ;;  %v10639_v25 = vld [vmem:[#allocation2 + $0x4c] ss:$16 sps:$4 sm:$0xff]  }
 0x1a9   :  { %v11943_v26 = vpop.eup %11942 }
 0x1aa   :  { %v167_v27 = vsel %vm160_vm1, %v11943_v26, 0.0 }
 0x1ab   :  { %168 = vadd.xlane.f32.xlu0 %v167_v27  ;;  %v10645_v27 = vld [vmem:[#allocation2 + $0x6c] ss:$16 sps:$4 sm:$0xff]  }
 0x238   :  { %v169_v40 = vpop.xlane.xlu0 %168 }
 0x239   :  { %11944 = vrcp.f32 %v169_v40 }
 0x243   :  { %v11945_v41 = vpop.eup %11944 }
 0x244   :  { %v171_v42 = vmul.f32 %v11945_v41, %v169_v40  ;;  %v10687_v40 = vld [vmem:[#allocation2 + $0x14c] ss:$16 sps:$4 sm:$0xff]  }
 0x246   :  { %v172_v43 = vsub.f32 2.0, %v171_v42  ;;  %v10693_v42 = vld [vmem:[#allocation2 + $0x16c] ss:$16 sps:$4 sm:$0xff]  }
 0x248   :  { %v173_v44 = vmul.f32 %v11945_v41, %v172_v43  ;;  %v10685_v41 = vld [vmem:[#allocation2 + $0x148] ss:$16 sps:$4 sm:$0xff]  }
 0x249   :  { %v10691_v43 = vld [vmem:[#allocation2 + $0x168] ss:$16 sps:$4 sm:$0xff]  }
 0x24a   :  { %v174_v45 = vmul.f32 %v11943_v26, %v173_v44  ;;  %v10637_v26 = vld [vmem:[#allocation2 + $0x48] ss:$16 sps:$4 sm:$0xff]   ;;  %v10699_v44 = vld [vmem:[#allocation2 + $0x18c] ss:$16 sps:$4 sm:$0xff]  }
 0x24c   :  { %v175_v46 = vpack.c.bf16 %v174_v45, %v174_v45  ;;  %1520 = vst [vmem:[#allocation6] sm:$0x1] %v174_v45  ;;  %v10697_v45 = vld [vmem:[#allocation2 + $0x188] ss:$16 sps:$4 sm:$0xff]  }
 0x24e   :  { %10147 = vmatmul.mubr.bf16.vlgmr.msra.gmra.mrb[0].mxu1 %v175_v46  ;;  %v10705_v46 = vld [vmem:[#allocation2 + $0x1ac] ss:$16 sps:$4 sm:$0xff]  }
 0x24f   :  { %809 = vmatprep.mubr.bf16.mxu1 %v12321_v10  ;;  %778 = vmatpush1.bf16.msra.mxu1 %v10622_v48  ;;  %v10711_v48 = vld [vmem:[#allocation2 + $0x1cc] ss:$16 sps:$4 sm:$0xff]  }
 0x250   :  { %779 = vmatprep.subr.bf16.mxu1 %v10630_v51  ;;  %v10717_v51 = vld [vmem:[#allocation2 + $0x1ec] ss:$16 sps:$4 sm:$0xff]  }
 0x253   :  { %780 = vmatpush1.bf16.msra.mxu1 %v10628_v52  ;;  %v10712_v52 = vld [vmem:[#allocation2 + $0x1e0] ss:$16 sps:$4 sm:$0xff]  }
 0x254   :  { %781 = vmatprep.subr.bf16.mxu1 %v10636_v53  ;;  %v10715_v53 = vld [vmem:[#allocation2 + $0x1e8] ss:$16 sps:$4 sm:$0xff]  }
 0x257   :  { %782 = vmatpush1.bf16.msra.mxu1 %v10634_v54  ;;  %v10720_v54 = vld [vmem:[#allocation2 + $0x20c] ss:$16 sps:$4 sm:$0xff]  }
 0x258   :  { %783 = vmatprep.subr.bf16.mxu1 %v10642_v55  ;;  %v10723_v55 = vld [vmem:[#allocation2 + $0x204] ss:$16 sps:$4 sm:$0xff]  }
 0x25b   :  { %784 = vmatpush1.bf16.msra.mxu1 %v10640_v56  ;;  %v12110_v56 = vld [vmem:[%s13553_s0] ss:$8 sm:$0x3] }
 0x25c   :  { %785 = vmatprep.subr.bf16.mxu1 %v10648_v57  ;;  %v282_v57 = vrot.slane %v12110_v56, 1  ;;  %v10801_v56 = vld [vmem:[#allocation2 + $0x3a4] ss:$16 sps:$4 sm:$0xff]  }
 0x25f   :  { %786 = vmatpush1.bf16.msra.mxu1 %v10646_v58  ;;  %v280_v58 = vld [vmem:[%s13560_s7 + $0x1] sm:$0x1] }
 0x260   :  { %787 = vmatprep.subr.bf16.mxu1 %v10654_v59  ;;  %v284_v59 = vadd.f32 %v282_v57, %v280_v58  ;;  %v10799_v57 = vld [vmem:[#allocation2 + $0x3a0] ss:$16 sps:$4 sm:$0xff]   ;;  %v10804_v58 = vld [vmem:[#allocation2 + $0x3cc] ss:$16 sps:$4 sm:$0xff]  }
 0x263   :  { %788 = vmatpush1.bf16.msra.mxu1 %v10652_v60 }
 0x264   :  { %789 = vmatprep.subr.bf16.mxu1 %v10660_v61 }
 0x267   :  { %790 = vmatpush1.bf16.msra.mxu1 %v10658_v62 }
 0x268   :  { %791 = vmatprep.subr.bf16.mxu1 %v10666_v63 }
 0x26b   :  { %792 = vmatpush1.bf16.msra.mxu1 %v10664_v1 }
 0x26c   :  { %793 = vmatprep.subr.bf16.mxu1 %v10672_v2 }
 0x26f   :  { %794 = vmatpush1.bf16.msra.mxu1 %v10670_v3  ;;  %v10718_v3 = vld [vmem:[#allocation2 + $0x208] ss:$16 sps:$4 sm:$0xff]  }
 0x270   :  { %795 = vmatprep.subr.bf16.mxu1 %v10678_v4  ;;  %v10721_v4 = vld [vmem:[#allocation2 + $0x200] ss:$16 sps:$4 sm:$0xff]  }
 0x273   :  { %796 = vmatpush1.bf16.msra.mxu1 %v10676_v5 }
 0x274   :  { %797 = vmatprep.subr.bf16.mxu1 %v10684_v6  ;;  %v10726_v6 = vld [vmem:[#allocation2 + $0x22c] ss:$16 sps:$4 sm:$0xff]  }
 0x277   :  { %798 = vmatpush1.bf16.msra.mxu1 %v10682_v7  ;;  %v10729_v7 = vld [vmem:[#allocation2 + $0x224] ss:$16 sps:$4 sm:$0xff]  }
 0x278   :  { %799 = vmatprep.subr.bf16.mxu1 %v10690_v8  ;;  %v10724_v8 = vld [vmem:[#allocation2 + $0x228] ss:$16 sps:$4 sm:$0xff]  }
 0x27b   :  { %800 = vmatpush1.bf16.msra.mxu1 %v10688_v9  ;;  %v10727_v9 = vld [vmem:[#allocation2 + $0x220] ss:$16 sps:$4 sm:$0xff]  }
 0x27c   :  { %801 = vmatprep.subr.bf16.mxu1 %v10696_v11  ;;  %v10732_v11 = vld [vmem:[#allocation2 + $0x24c] ss:$16 sps:$4 sm:$0xff]  }
 0x27f   :  { %802 = vmatpush1.bf16.msra.mxu1 %v10694_v12  ;;  %v10735_v12 = vld [vmem:[#allocation2 + $0x244] ss:$16 sps:$4 sm:$0xff]  }
 0x280   :  { %803 = vmatprep.subr.bf16.mxu1 %v10702_v13  ;;  %v10730_v13 = vld [vmem:[#allocation2 + $0x248] ss:$16 sps:$4 sm:$0xff]  }
 0x283   :  { %804 = vmatpush1.bf16.msra.mxu1 %v10700_v14  ;;  %v10733_v14 = vld [vmem:[#allocation2 + $0x240] ss:$16 sps:$4 sm:$0xff]  }
 0x284   :  { %805 = vmatprep.subr.bf16.mxu1 %v10708_v15  ;;  %v10738_v15 = vld [vmem:[#allocation2 + $0x26c] ss:$16 sps:$4 sm:$0xff]  }
 0x287   :  { %806 = vmatpush1.bf16.msra.mxu1 %v10706_v16  ;;  %v10741_v16 = vld [vmem:[#allocation2 + $0x264] ss:$16 sps:$4 sm:$0xff]  }
 0x288   :  { %807 = vmatprep.subr.bf16.mxu1 %v10714_v50  ;;  %v10792_v50 = vld [vmem:[#allocation2 + $0x38c] ss:$16 sps:$4 sm:$0xff]  }
 0x28b   :  { %808 = vmatpush1.bf16.msra.mxu1 %v10712_v52  ;;  %v10795_v52 = vld [vmem:[#allocation2 + $0x384] ss:$16 sps:$4 sm:$0xff]  }
 0x28c   :  { %1282 = vmatprep.subr.bf16.mxu1 %v10723_v55  ;;  %v10796_v55 = vld [vmem:[#allocation2 + $0x3a8] ss:$16 sps:$4 sm:$0xff]  }
 0x321   :  { %v274_v17 = vpop.f32.mrb[0].mxu1 }
 0x322   :  { %v285_v19 = vpack.c.bf16 %v274_v17, %v274_v17  ;;  %v10148_v20 = vpop.f32.mrb[1].mxu1  ;;  %v10736_v17 = vld [vmem:[#allocation2 + $0x268] ss:$16 sps:$4 sm:$0xff]  }
 0x323   :  { %v277_v22 = vpop.f32.mrb[2].mxu1  ;;  %v10742_v20 = vld [vmem:[#allocation2 + $0x288] ss:$16 sps:$4 sm:$0xff]  }
 0x324   :  { %v10149_v23 = vpop.f32.mrb[3].mxu1  ;;  %10167 = vmatmul.mubr.bf16.vlgmr.msra.gmra.mrb[4].mxu0 %v285_v19  ;;  %v10744_v19 = vld [vmem:[#allocation2 + $0x28c] ss:$16 sps:$4 sm:$0xff]   ;;  %v10745_v22 = vld [vmem:[#allocation2 + $0x280] ss:$16 sps:$4 sm:$0xff]  }
 0x325   :  { %819 = vmatpush1.bf16.msra.mxu0 %v10625_v18  ;;  %850 = vmatprep.mubr.bf16.mxu0 %v12321_v10  ;;  %v10661_v10 = vld [vmem:[#allocation2 + $0xc8] ss:$16 sps:$4 sm:$0xff]   ;;  %v10739_v18 = vld [vmem:[#allocation2 + $0x260] ss:$16 sps:$4 sm:$0xff]   ;;  %v10750_v23 = vld [vmem:[#allocation2 + $0x2ac] ss:$16 sps:$4 sm:$0xff]  }
 0x326   :  { %820 = vmatprep.subr.bf16.mxu0 %v10633_v21  ;;  %v10747_v21 = vld [vmem:[#allocation2 + $0x284] ss:$16 sps:$4 sm:$0xff]  }
 0x329   :  { %821 = vmatpush1.bf16.msra.mxu0 %v10631_v24  ;;  %v10748_v24 = vld [vmem:[#allocation2 + $0x2a8] ss:$16 sps:$4 sm:$0xff]  }
 0x32a   :  { %822 = vmatprep.subr.bf16.mxu0 %v10639_v25  ;;  %v10753_v25 = vld [vmem:[#allocation2 + $0x2a4] ss:$16 sps:$4 sm:$0xff]  }
 0x32d   :  { %823 = vmatpush1.bf16.msra.mxu0 %v10637_v26  ;;  %v10751_v26 = vld [vmem:[#allocation2 + $0x2a0] ss:$16 sps:$4 sm:$0xff]  }
 0x32e   :  { %824 = vmatprep.subr.bf16.mxu0 %v10645_v27  ;;  %v10756_v27 = vld [vmem:[#allocation2 + $0x2cc] ss:$16 sps:$4 sm:$0xff]  }
 0x331   :  { %825 = vmatpush1.bf16.msra.mxu0 %v10643_v28  ;;  %v10754_v28 = vld [vmem:[#allocation2 + $0x2c8] ss:$16 sps:$4 sm:$0xff]  }
 0x332   :  { %826 = vmatprep.subr.bf16.mxu0 %v10651_v29  ;;  %v10759_v29 = vld [vmem:[#allocation2 + $0x2c4] ss:$16 sps:$4 sm:$0xff]  }
 0x335   :  { %827 = vmatpush1.bf16.msra.mxu0 %v10649_v30  ;;  %v10757_v30 = vld [vmem:[#allocation2 + $0x2c0] ss:$16 sps:$4 sm:$0xff]  }
 0x336   :  { %828 = vmatprep.subr.bf16.mxu0 %v10657_v31  ;;  %v10762_v31 = vld [vmem:[#allocation2 + $0x2ec] ss:$16 sps:$4 sm:$0xff]  }
 0x339   :  { %829 = vmatpush1.bf16.msra.mxu0 %v10655_v32  ;;  %v10760_v32 = vld [vmem:[#allocation2 + $0x2e8] ss:$16 sps:$4 sm:$0xff]  }
 0x33a   :  { %830 = vmatprep.subr.bf16.mxu0 %v10663_v33  ;;  %v10765_v33 = vld [vmem:[#allocation2 + $0x2e4] ss:$16 sps:$4 sm:$0xff]  }
 0x33d   :  { %831 = vmatpush1.bf16.msra.mxu0 %v10661_v10  ;;  %v10763_v10 = vld [vmem:[#allocation2 + $0x2e0] ss:$16 sps:$4 sm:$0xff]  }
 0x33e   :  { %832 = vmatprep.subr.bf16.mxu0 %v10669_v34  ;;  %v10768_v34 = vld [vmem:[#allocation2 + $0x30c] ss:$16 sps:$4 sm:$0xff]  }
 0x341   :  { %833 = vmatpush1.bf16.msra.mxu0 %v10667_v35  ;;  %v10766_v35 = vld [vmem:[#allocation2 + $0x308] ss:$16 sps:$4 sm:$0xff]  }
 0x342   :  { %834 = vmatprep.subr.bf16.mxu0 %v10675_v36  ;;  %v10771_v36 = vld [vmem:[#allocation2 + $0x304] ss:$16 sps:$4 sm:$0xff]  }
 0x345   :  { %835 = vmatpush1.bf16.msra.mxu0 %v10673_v37  ;;  %v10769_v37 = vld [vmem:[#allocation2 + $0x300] ss:$16 sps:$4 sm:$0xff]  }
 0x346   :  { %836 = vmatprep.subr.bf16.mxu0 %v10681_v38  ;;  %v10774_v38 = vld [vmem:[#allocation2 + $0x32c] ss:$16 sps:$4 sm:$0xff]  }
 0x349   :  { %837 = vmatpush1.bf16.msra.mxu0 %v10679_v39  ;;  %v10772_v39 = vld [vmem:[#allocation2 + $0x328] ss:$16 sps:$4 sm:$0xff]  }
 0x34a   :  { %838 = vmatprep.subr.bf16.mxu0 %v10687_v40  ;;  %v10777_v40 = vld [vmem:[#allocation2 + $0x324] ss:$16 sps:$4 sm:$0xff]  }
 0x34d   :  { %839 = vmatpush1.bf16.msra.mxu0 %v10685_v41  ;;  %v10775_v41 = vld [vmem:[#allocation2 + $0x320] ss:$16 sps:$4 sm:$0xff]  }
 0x34e   :  { %840 = vmatprep.subr.bf16.mxu0 %v10693_v42  ;;  %v10780_v42 = vld [vmem:[#allocation2 + $0x34c] ss:$16 sps:$4 sm:$0xff]  }
 0x351   :  { %841 = vmatpush1.bf16.msra.mxu0 %v10691_v43  ;;  %v10778_v43 = vld [vmem:[#allocation2 + $0x348] ss:$16 sps:$4 sm:$0xff]  }
 0x352   :  { %842 = vmatprep.subr.bf16.mxu0 %v10699_v44  ;;  %v10783_v44 = vld [vmem:[#allocation2 + $0x344] ss:$16 sps:$4 sm:$0xff]  }
 0x355   :  { %843 = vmatpush1.bf16.msra.mxu0 %v10697_v45  ;;  %v10781_v45 = vld [vmem:[#allocation2 + $0x340] ss:$16 sps:$4 sm:$0xff]  }
 0x356   :  { %844 = vmatprep.subr.bf16.mxu0 %v10705_v46  ;;  %v10786_v46 = vld [vmem:[#allocation2 + $0x36c] ss:$16 sps:$4 sm:$0xff]  }
 0x359   :  { %845 = vmatpush1.bf16.msra.mxu0 %v10703_v47  ;;  %v10784_v47 = vld [vmem:[#allocation2 + $0x368] ss:$16 sps:$4 sm:$0xff]  }
 0x35a   :  { %846 = vmatprep.subr.bf16.mxu0 %v10711_v48  ;;  %v10789_v48 = vld [vmem:[#allocation2 + $0x364] ss:$16 sps:$4 sm:$0xff]  }
 0x35d   :  { %847 = vmatpush1.bf16.msra.mxu0 %v10709_v49  ;;  %v10787_v49 = vld [vmem:[#allocation2 + $0x360] ss:$16 sps:$4 sm:$0xff]  }
 0x35e   :  { %848 = vmatprep.subr.bf16.mxu0 %v10717_v51  ;;  %v10790_v51 = vld [vmem:[#allocation2 + $0x388] ss:$16 sps:$4 sm:$0xff]  }
 0x361   :  { %849 = vmatpush1.bf16.msra.mxu0 %v10715_v53  ;;  %v10793_v53 = vld [vmem:[#allocation2 + $0x380] ss:$16 sps:$4 sm:$0xff]  }
 0x362   :  { %1323 = vmatprep.subr.bf16.mxu0 %v10720_v54  ;;  %v10798_v54 = vld [vmem:[#allocation2 + $0x3ac] ss:$16 sps:$4 sm:$0xff]  }
 0x3f7   :  { %v384_v60 = vpop.f32.mrb[4].mxu0 }
 0x3f8   :  { %v390_v61 = vadd.f32 %v384_v60, %v284_v59  ;;  %v10168_v62 = vpop.f32.mrb[5].mxu0  ;;  %v10807_v59 = vld [vmem:[#allocation2 + $0x3c4] ss:$16 sps:$4 sm:$0xff]   ;;  %v12408_v60 = vld [vmem:[%s13554_s1 + $0x1] sm:$0x1] }
 0x3f9   :  { %v387_v63 = vpop.f32.mrb[6].mxu0  ;;  %v897_v62 = vpack.c.bf16 %v12408_v60, %v12408_v60 }
 0x3fa   :  { %v391_v1 = vmax.f32 %v390_v61, 0.0  ;;  %v10169_v2 = vpop.f32.mrb[7].mxu0  ;;  %v10802_v61 = vld [vmem:[#allocation2 + $0x3c8] ss:$16 sps:$4 sm:$0xff]   ;;  %v10805_v63 = vld [vmem:[#allocation2 + $0x3c0] ss:$16 sps:$4 sm:$0xff]  }
 0x3fb   :  { %v10813_v2 = vld [vmem:[#allocation2 + $0x3e4] ss:$16 sps:$4 sm:$0xff]  }
 0x3fc   :  { %v392_v5 = vpack.c.bf16 %v391_v1, %v391_v1  ;;  %v10810_v1 = vld [vmem:[#allocation2 + $0x3ec] ss:$16 sps:$4 sm:$0xff]  }
 0x3fe   :  { %810 = vmatmul.mubr.bf16.vlgmr.msra.gmra.mrb[4].mxu1 %v392_v5  ;;  %851 = vmatmul.mubr.bf16.vlgmr.msra.gmra.mrb[8].mxu0 %v392_v5  ;;  %v861_v5 = vlaneseq }
 0x3ff   :  { %1324 = vmatpush1.bf16.msra.mxu0 %v10718_v3  ;;  %1283 = vmatpush1.bf16.msra.mxu1 %v10721_v4  ;;  %v10808_v3 = vld [vmem:[#allocation2 + $0x3e8] ss:$16 sps:$4 sm:$0xff]   ;;  %v10811_v4 = vld [vmem:[#allocation2 + $0x3e0] ss:$16 sps:$4 sm:$0xff]  }
 0x400   :  { %1325 = vmatprep.subr.bf16.mxu0 %v10726_v6  ;;  %1284 = vmatprep.subr.bf16.mxu1 %v10729_v7  ;;  %v862_v6 = vshrl.u32 %v861_v5, 7 }
 0x401   :  { %1314 = vmatprep.mubr.bf16.mxu1 %v897_v62  ;;  %1355 = vmatprep.mubr.bf16.mxu0 %v897_v62 }
 0x402   :  { %v12414_v7 = vsub.s32 0, %v862_v6 }
 0x403   :  { %1326 = vmatpush1.bf16.msra.mxu0 %v10724_v8  ;;  %1285 = vmatpush1.bf16.msra.mxu1 %v10727_v9  ;;  %v859_v8 = vld [vmem:[%s13560_s7 + $0x2] sm:$0x3]  ;;  %v12419_v9 = vsub.s32 1, %v862_v6 }
 0x404   :  { %1327 = vmatprep.subr.bf16.mxu0 %v10732_v11  ;;  %1286 = vmatprep.subr.bf16.mxu1 %v10735_v12  ;;  %v864_v11 = vrot.slane %v859_v8, %v12414_v7 }
 0x407   :  { %1328 = vmatpush1.bf16.msra.mxu0 %v10730_v13  ;;  %1287 = vmatpush1.bf16.msra.mxu1 %v10733_v14  ;;  %v868_v14 = vrot.slane %v859_v8, %v12419_v9 }
 0x408   :  { %1329 = vmatprep.subr.bf16.mxu0 %v10738_v15  ;;  %1288 = vmatprep.subr.bf16.mxu1 %v10741_v16 }
 0x40b   :  { %1330 = vmatpush1.bf16.msra.mxu0 %v10736_v17  ;;  %1289 = vmatpush1.bf16.msra.mxu1 %v10739_v18 }
 0x40c   :  { %1331 = vmatprep.subr.bf16.mxu0 %v10744_v19  ;;  %1290 = vmatprep.subr.bf16.mxu1 %v10747_v21 }
 0x40f   :  { %1332 = vmatpush1.bf16.msra.mxu0 %v10742_v20  ;;  %1291 = vmatpush1.bf16.msra.mxu1 %v10745_v22 }
 0x410   :  { %1333 = vmatprep.subr.bf16.mxu0 %v10750_v23  ;;  %1292 = vmatprep.subr.bf16.mxu1 %v10753_v25 }
 0x413   :  { %1334 = vmatpush1.bf16.msra.mxu0 %v10748_v24  ;;  %1293 = vmatpush1.bf16.msra.mxu1 %v10751_v26 }
 0x414   :  { %1335 = vmatprep.subr.bf16.mxu0 %v10756_v27  ;;  %1294 = vmatprep.subr.bf16.mxu1 %v10759_v29 }
 0x417   :  { %1336 = vmatpush1.bf16.msra.mxu0 %v10754_v28  ;;  %1295 = vmatpush1.bf16.msra.mxu1 %v10757_v30  ;;  %v887_v28 = vld [vmem:[%s13560_s7 + $0x5] sm:$0x1]  ;;  %v885_v30 = vld [vmem:[%s13560_s7 + $0x4] sm:$0x1] }
 0x418   :  { %1337 = vmatprep.subr.bf16.mxu0 %v10762_v31  ;;  %1296 = vmatprep.subr.bf16.mxu1 %v10765_v33 }
 0x41b   :  { %1338 = vmatpush1.bf16.msra.mxu0 %v10760_v32  ;;  %1297 = vmatpush1.bf16.msra.mxu1 %v10763_v10 }
 0x41c   :  { %1339 = vmatprep.subr.bf16.mxu0 %v10768_v34  ;;  %1298 = vmatprep.subr.bf16.mxu1 %v10771_v36 }
 0x41f   :  { %1340 = vmatpush1.bf16.msra.mxu0 %v10766_v35  ;;  %1299 = vmatpush1.bf16.msra.mxu1 %v10769_v37 }
 0x420   :  { %1341 = vmatprep.subr.bf16.mxu0 %v10774_v38  ;;  %1300 = vmatprep.subr.bf16.mxu1 %v10777_v40  ;;  %v12111_v38 = vld [vmem:[%s13554_s1] sm:$0x1] }
 0x423   :  { %1342 = vmatpush1.bf16.msra.mxu0 %v10772_v39  ;;  %1301 = vmatpush1.bf16.msra.mxu1 %v10775_v41 }
 0x424   :  { %1343 = vmatprep.subr.bf16.mxu0 %v10780_v42  ;;  %1302 = vmatprep.subr.bf16.mxu1 %v10783_v44  ;;  %v10814_v42 = vld [vmem:[%s13556_s3] sm:$0xff]   ;;  %v10815_v44 = vld [vmem:[%s13556_s3 + $0x8] sm:$0xff]  }
 0x427   :  { %1344 = vmatpush1.bf16.msra.mxu0 %v10778_v43  ;;  %1303 = vmatpush1.bf16.msra.mxu1 %v10781_v45  ;;  %v10816_v45 = vld [vmem:[%s13556_s3 + $0x10] sm:$0xff]  }
 0x428   :  { %1345 = vmatprep.subr.bf16.mxu0 %v10786_v46  ;;  %1304 = vmatprep.subr.bf16.mxu1 %v10789_v48  ;;  %v10817_v46 = vld [vmem:[%s13556_s3 + $0x18] sm:$0xff]   ;;  %v10819_v48 = vld [vmem:[%s13556_s3 + $0x28] sm:$0xff]  }
 0x42b   :  { %1346 = vmatpush1.bf16.msra.mxu0 %v10784_v47  ;;  %1305 = vmatpush1.bf16.msra.mxu1 %v10787_v49  ;;  %v10818_v47 = vld [vmem:[%s13556_s3 + $0x20] sm:$0xff]   ;;  %v10820_v49 = vld [vmem:[%s13556_s3 + $0x30] sm:$0xff]  }
 0x42c   :  { %1347 = vmatprep.subr.bf16.mxu0 %v10792_v50  ;;  %1306 = vmatprep.subr.bf16.mxu1 %v10795_v52  ;;  %v10821_v50 = vld [vmem:[%s13556_s3 + $0x38] sm:$0xff]   ;;  %v10823_v52 = vld [vmem:[%s13559_s6 + $0x8] sm:$0xff]  }
 0x42f   :  { %1348 = vmatpush1.bf16.msra.mxu0 %v10790_v51  ;;  %1307 = vmatpush1.bf16.msra.mxu1 %v10793_v53  ;;  %v10822_v51 = vld [vmem:[%s13559_s6] sm:$0xff]   ;;  %v10824_v53 = vld [vmem:[%s13559_s6 + $0x10] sm:$0xff]  }
 0x430   :  { %1349 = vmatprep.subr.bf16.mxu0 %v10798_v54  ;;  %1308 = vmatprep.subr.bf16.mxu1 %v10801_v56  ;;  %v10825_v54 = vld [vmem:[%s13559_s6 + $0x18] sm:$0xff]   ;;  %v10827_v56 = vld [vmem:[%s13559_s6 + $0x28] sm:$0xff]  }
 0x433   :  { %1350 = vmatpush1.bf16.msra.mxu0 %v10796_v55  ;;  %1309 = vmatpush1.bf16.msra.mxu1 %v10799_v57  ;;  %v10826_v55 = vld [vmem:[%s13559_s6 + $0x20] sm:$0xff]   ;;  %v10828_v57 = vld [vmem:[%s13559_s6 + $0x30] sm:$0xff]  }
 0x434   :  { %1351 = vmatprep.subr.bf16.mxu0 %v10804_v58  ;;  %1310 = vmatprep.subr.bf16.mxu1 %v10807_v59  ;;  %v10829_v58 = vld [vmem:[%s13559_s6 + $0x38] sm:$0xff]   ;;  %v1364_v59 = vld [vmem:[%s13560_s7 + $0x6] sm:$0x3] }
 0x437   :  { %1352 = vmatpush1.bf16.msra.mxu0 %v10802_v61  ;;  %1311 = vmatpush1.bf16.msra.mxu1 %v10805_v63  ;;  %v1369_v61 = vrot.slane %v1364_v59, %v12414_v7 }
 0x438   :  { %1353 = vmatprep.subr.bf16.mxu0 %v10810_v1  ;;  %1312 = vmatprep.subr.bf16.mxu1 %v10813_v2  ;;  %v1373_v1 = vrot.slane %v1364_v59, %v12419_v9  ;;  %v10842_v59 = vld [vmem:[%s13557_s4 + $0x20] sm:$0xff]  }
 0x43b   :  { %1354 = vmatpush1.bf16.msra.mxu0 %v10808_v3  ;;  %1313 = vmatpush1.bf16.msra.mxu1 %v10811_v4 }
 0x43c   :  { %10190 = vmatprep.subr.bf16.mxu0 %v12209_v0  ;;  %10170 = vmatprep.subr.bf16.mxu1 %v12209_v0 }
 0x4d1   :  { %v811_v12 = vpop.f32.mrb[4].mxu1  ;;  %v852_v13 = vpop.f32.mrb[8].mxu0 }
 0x4d2   :  { %v871_v15 = vadd.f32 %v864_v11, %v811_v12  ;;  %v813_v16 = vpop.f32.mrb[5].mxu1  ;;  %v854_v17 = vpop.f32.mrb[9].mxu0  ;;  %v886_v33 = vadd.f32 %v885_v30, %v852_v13 }
 0x4d3   :  { %v815_v18 = vpop.f32.mrb[6].mxu1  ;;  %v856_v19 = vpop.f32.mrb[10].mxu0  ;;  %v872_v23 = vadd.f32 %v868_v14, %v813_v16  ;;  %v888_v31 = vadd.f32 %v887_v28, %v854_v17 }
 0x4d4   :  { %v8993_v20 = vmul.f32 -1.442695, %v871_v15  ;;  %v816_v21 = vpop.f32.mrb[7].mxu1  ;;  %v857_v22 = vpop.f32.mrb[11].mxu0  ;;  %v1392_v18 = vld [vmem:[%s13560_s7 + $0x9] sm:$0x1] }
 0x4d5   :  { %v8994_v24 = vmul.f32 -1.442695, %v872_v23  ;;  %v1390_v19 = vld [vmem:[%s13560_s7 + $0x8] sm:$0x1]  ;;  %v1523_v22 = vld [vmem:[%s13560_s7] sm:$0x1] }
 0x4d6   :  { %11946 = vpow2.f32 %v8993_v20  ;;  %v12525_v21 = vld [vmem:[%s13553_s0 + $0x1] ss:$8 sm:$0x3] }
 0x4d7   :  { %11948 = vpow2.f32 %v8994_v24 }
 0x4e0   :  { %v11947_v25 = vpop.eup %11946 }
 0x4e1   :  { %v879_v26 = vadd.f32 1.0, %v11947_v25  ;;  %v11949_v27 = vpop.eup %11948 }
 0x4e2   :  { %v880_v29 = vadd.f32 1.0, %v11949_v27  ;;  %v1524_v27 = vadd.f32 %v12525_v21, %v1523_v22  ;;  %v10858_v22 = vld [vmem:[#allocation2 + $0x40] ss:$16 sps:$4 sm:$0xff]  }
 0x4e3   :  { %11950 = vrcp.f32 %v879_v26 }
 0x4e4   :  { %11952 = vrcp.f32 %v880_v29 }
 0x4ed   :  { %v11951_v32 = vpop.eup %11950 }
 0x4ee   :  { %v889_v10 = vmul.f32 %v11951_v32, %v888_v31  ;;  %v11953_v35 = vpop.eup %11952 }
 0x4ef   :  { %v892_v36 = vsub.f32 1.0, %v11953_v35  ;;  %v894_v39 = vmul.f32 %v12111_v38, %v11953_v35 }
 0x4f0   :  { %v890_v34 = vadd.f32 %v889_v10, %v886_v33 }
 0x4f2   :  { %11954 = vtanh.f32 %v890_v34 }
 0x4fc   :  { %v11955_v37 = vpop.eup %11954 }
 0x4fd   :  { %v893_v40 = vmul.f32 %v11955_v37, %v892_v36 }
 0x4ff   :  { %v12432_v41 = vadd.f32 %v894_v39, %v893_v40 }
 0x501   :  { %v12439_v43 = vpack.c.bf16 %v12432_v41, %v12432_v41 }
 0x503   :  { %1315 = vmatmul.mubr.bf16.vlgmr.msra.gmra.mrb[8].mxu1 %v12439_v43  ;;  %1356 = vmatmul.mubr.bf16.vlgmr.msra.gmra.mrb[12].mxu0 %v12439_v43 }
 0x504   :  { %10191 = vmatpush3.bf16.msra.mxu0 %v10814_v42  ;;  %10206 = vmatprep.mubr.msk.bf16.mxu0 %vm12210_vm0, %v12209_v0  ;;  %v10830_v42 = vld [vmem:[%s13555_s2] sm:$0xff]  }
 0x505   :  { %10192 = vmatprep.subr.bf16.mxu0 %v12209_v0  ;;  %10186 = vmatprep.mubr.msk.bf16.mxu1 %vm12210_vm0, %v12209_v0 }
 0x506   :  { %10171 = vmatpush3.bf16.msra.mxu1 %v10822_v51  ;;  %v10834_v51 = vld [vmem:[%s13555_s2 + $0x20] sm:$0xff]  }
 0x507   :  { %10172 = vmatprep.subr.bf16.mxu1 %v12209_v0 }
 0x508   :  { %10193 = vmatpush3.bf16.msra.mxu0 %v10815_v44  ;;  %v10832_v44 = vld [vmem:[%s13555_s2 + $0x10] sm:$0xff]  }
 0x509   :  { %10194 = vmatprep.subr.bf16.mxu0 %v12209_v0 }
 0x50a   :  { %10173 = vmatpush3.bf16.msra.mxu1 %v10823_v52  ;;  %v10835_v52 = vld [vmem:[%s13555_s2 + $0x28] sm:$0xff]  }
 0x50b   :  { %10174 = vmatprep.subr.bf16.mxu1 %v12209_v0 }
 0x50c   :  { %10195 = vmatpush3.bf16.msra.mxu0 %v10816_v45 }
 0x50d   :  { %10196 = vmatprep.subr.bf16.mxu0 %v12209_v0 }
 0x50e   :  { %10175 = vmatpush3.bf16.msra.mxu1 %v10824_v53  ;;  %v10836_v53 = vld [vmem:[%s13555_s2 + $0x30] sm:$0xff]  }
 0x50f   :  { %10176 = vmatprep.subr.bf16.mxu1 %v12209_v0 }
 0x510   :  { %10197 = vmatpush3.bf16.msra.mxu0 %v10817_v46 }
 0x511   :  { %10198 = vmatprep.subr.bf16.mxu0 %v12209_v0 }
 0x512   :  { %10177 = vmatpush3.bf16.msra.mxu1 %v10825_v54  ;;  %v10837_v54 = vld [vmem:[%s13555_s2 + $0x38] sm:$0xff]  }
 0x513   :  { %10178 = vmatprep.subr.bf16.mxu1 %v12209_v0 }
 0x514   :  { %10199 = vmatpush3.bf16.msra.mxu0 %v10818_v47 }
 0x515   :  { %10200 = vmatprep.subr.bf16.mxu0 %v12209_v0 }
 0x516   :  { %10179 = vmatpush3.bf16.msra.mxu1 %v10826_v55  ;;  %v10838_v55 = vld [vmem:[%s13557_s4] sm:$0xff]  }
 0x517   :  { %10180 = vmatprep.subr.bf16.mxu1 %v12209_v0 }
 0x518   :  { %10201 = vmatpush3.bf16.msra.mxu0 %v10819_v48 }
 0x519   :  { %10202 = vmatprep.subr.bf16.mxu0 %v12209_v0 }
 0x51a   :  { %10181 = vmatpush3.bf16.msra.mxu1 %v10827_v56  ;;  %v10839_v56 = vld [vmem:[%s13557_s4 + $0x8] sm:$0xff]  }
 0x51b   :  { %10182 = vmatprep.subr.bf16.mxu1 %v12209_v0 }
 0x51c   :  { %10203 = vmatpush3.bf16.msra.mxu0 %v10820_v49 }
 0x51d   :  { %10204 = vmatprep.subr.bf16.mxu0 %v12209_v0 }
 0x51e   :  { %10183 = vmatpush3.bf16.msra.mxu1 %v10828_v57  ;;  %v10840_v57 = vld [vmem:[%s13557_s4 + $0x10] sm:$0xff]  }
 0x51f   :  { %10184 = vmatprep.subr.bf16.mxu1 %v12209_v0 }
 0x520   :  { %10205 = vmatpush3.bf16.msra.mxu0 %v10821_v50  ;;  %v10833_v50 = vld [vmem:[%s13555_s2 + $0x18] sm:$0xff]  }
 0x521   :  { %10230 = vmatprep.subr.bf16.mxu0 %v12209_v0 }
 0x522   :  { %10185 = vmatpush3.bf16.msra.mxu1 %v10829_v58  ;;  %v10841_v58 = vld [vmem:[%s13557_s4 + $0x18] sm:$0xff]  }
 0x523   :  { %10207 = vmatmul.mubr.bf16.vlgmr.msra.gmra.mrb[16].mxu0 %v12439_v43  ;;  %10210 = vmatprep.subr.bf16.mxu1 %v12209_v0 }
 0x524   :  { %10246 = vmatprep.mubr.msk.bf16.mxu0 %vm12210_vm0, %v12209_v0  ;;  %10231 = vmatpush3.bf16.msra.mxu0 %v10838_v55 }
 0x525   :  { %10232 = vmatprep.subr.bf16.mxu0 %v12209_v0 }
 0x528   :  { %10233 = vmatpush3.bf16.msra.mxu0 %v10839_v56  ;;  %v10855_v56 = vld [vmem:[#allocation2 + $0x28] ss:$16 sps:$4 sm:$0xff]  }
 0x529   :  { %10234 = vmatprep.subr.bf16.mxu0 %v12209_v0 }
 0x52c   :  { %10235 = vmatpush3.bf16.msra.mxu0 %v10840_v57  ;;  %v10863_v57 = vld [vmem:[#allocation2 + $0x4c] ss:$16 sps:$4 sm:$0xff]  }
 0x52d   :  { %10236 = vmatprep.subr.bf16.mxu0 %v12209_v0 }
 0x530   :  { %10237 = vmatpush3.bf16.msra.mxu0 %v10841_v58  ;;  %v10861_v58 = vld [vmem:[#allocation2 + $0x48] ss:$16 sps:$4 sm:$0xff]  }
 0x531   :  { %10238 = vmatprep.subr.bf16.mxu0 %v12209_v0 }
 0x534   :  { %10239 = vmatpush3.bf16.msra.mxu0 %v10842_v59  ;;  %v10869_v59 = vld [vmem:[#allocation2 + $0x6c] ss:$16 sps:$4 sm:$0xff]  }
 0x535   :  { %10240 = vmatprep.subr.bf16.mxu0 %v12209_v0 }
 0x5d6   :  { %v1316_v62 = vpop.f32.mrb[8].mxu1  ;;  %v1357_v63 = vpop.f32.mrb[12].mxu0 }
 0x5d7   :  { %v1376_v2 = vadd.f32 %v1369_v61, %v1316_v62  ;;  %v1318_v3 = vpop.f32.mrb[9].mxu1  ;;  %v1359_v4 = vpop.f32.mrb[13].mxu0  ;;  %v1391_v25 = vadd.f32 %v1390_v19, %v1357_v63  ;;  %v10843_v61 = vld [vmem:[%s13557_s4 + $0x28] sm:$0xff]   ;;  %v10844_v62 = vld [vmem:[%s13557_s4 + $0x30] sm:$0xff]  }
 0x5d8   :  { %v1320_v5 = vpop.f32.mrb[10].mxu1  ;;  %v1361_v6 = vpop.f32.mrb[14].mxu0  ;;  %v1377_v13 = vadd.f32 %v1373_v1, %v1318_v3  ;;  %v1393_v23 = vadd.f32 %v1392_v18, %v1359_v4  ;;  %10241 = vmatpush3.bf16.msra.mxu0 %v10843_v61  ;;  %v10854_v18 = vld [vmem:[#allocation2 + $0x24] ss:$16 sps:$4 sm:$0xff]   ;;  %v10852_v19 = vld [vmem:[#allocation2 + $0x20] ss:$16 sps:$4 sm:$0xff]  }
 0x5d9   :  { %v9059_v8 = vmul.f32 -1.442695, %v1376_v2  ;;  %v1321_v11 = vpop.f32.mrb[11].mxu1  ;;  %v1362_v12 = vpop.f32.mrb[15].mxu0  ;;  %10242 = vmatprep.subr.bf16.mxu0 %v12209_v0  ;;  %v10867_v61 = vld [vmem:[#allocation2 + $0x68] ss:$16 sps:$4 sm:$0xff]  }
 0x5da   :  { %v9060_v14 = vmul.f32 -1.442695, %v1377_v13 }
 0x5db   :  { %11956 = vpow2.f32 %v9059_v8 }
 0x5dc   :  { %11958 = vpow2.f32 %v9060_v14  ;;  %10243 = vmatpush3.bf16.msra.mxu0 %v10844_v62  ;;  %v10845_v14 = vld [vmem:[%s13557_s4 + $0x38] sm:$0xff]  }
 0x5dd   :  { %10244 = vmatprep.subr.bf16.mxu0 %v12209_v0  ;;  %v10875_v62 = vld [vmem:[#allocation2 + $0x8c] ss:$16 sps:$4 sm:$0xff]  }
 0x5e0   :  { %10245 = vmatpush3.bf16.msra.mxu0 %v10845_v14  ;;  %v10911_v14 = vld [vmem:[#allocation2 + $0x14c] ss:$16 sps:$4 sm:$0xff]  }
 0x5e5   :  { %v11957_v15 = vpop.eup %11956 }
 0x5e6   :  { %v1384_v16 = vadd.f32 1.0, %v11957_v15  ;;  %v11959_v17 = vpop.eup %11958  ;;  %v10846_v15 = vld [vmem:[#allocation2] ss:$16 sps:$4 sm:$0xff]  }
 0x5e7   :  { %v1385_v20 = vadd.f32 1.0, %v11959_v17  ;;  %v10851_v17 = vld [vmem:[#allocation2 + $0xc] ss:$16 sps:$4 sm:$0xff]  }
 0x5e8   :  { %11960 = vrcp.f32 %v1384_v16  ;;  %v10848_v16 = vld [vmem:[#allocation2 + $0x4] ss:$16 sps:$4 sm:$0xff]   ;;  %2287 = vmatprep.subr.bf16.mxu0 %v10851_v17  ;;  %v10915_v17 = vld [vmem:[#allocation2 + $0x168] ss:$16 sps:$4 sm:$0xff]  }
 0x5e9   :  { %11962 = vrcp.f32 %v1385_v20  ;;  %v10860_v20 = vld [vmem:[#allocation2 + $0x44] ss:$16 sps:$4 sm:$0xff]  }
 0x5f2   :  { %v11961_v24 = vpop.eup %11960 }
 0x5f3   :  { %v1394_v26 = vmul.f32 %v11961_v24, %v1393_v23  ;;  %v11963_v34 = vpop.eup %11962  ;;  %v10866_v23 = vld [vmem:[#allocation2 + $0x64] ss:$16 sps:$4 sm:$0xff]   ;;  %v10864_v24 = vld [vmem:[#allocation2 + $0x60] ss:$16 sps:$4 sm:$0xff]  }
 0x5f4   :  { %v1397_v35 = vsub.f32 1.0, %v11963_v34  ;;  %v1399_v38 = vmul.f32 %v11963_v34, %v12408_v60  ;;  %v10831_v60 = vld [vmem:[%s13555_s2 + $0x8] sm:$0xff]   ;;  %v10902_v34 = vld [vmem:[#allocation2 + $0x124] ss:$16 sps:$4 sm:$0xff]  }
 0x5f5   :  { %v1395_v28 = vadd.f32 %v1394_v26, %v1391_v25  ;;  %v10872_v25 = vld [vmem:[#allocation2 + $0x84] ss:$16 sps:$4 sm:$0xff]   ;;  %v10870_v26 = vld [vmem:[#allocation2 + $0x80] ss:$16 sps:$4 sm:$0xff]  }
 0x5f6   :  { %v1623_v29 = vpop.f32.mrb[16].mxu0 }
 0x5f7   :  { %11964 = vtanh.f32 %v1395_v28  ;;  %v1629_v30 = vadd.f32 %v1623_v29, %v1524_v27  ;;  %v10208_v31 = vpop.f32.mrb[17].mxu0  ;;  %v10878_v27 = vld [vmem:[#allocation2 + $0xa4] ss:$16 sps:$4 sm:$0xff]   ;;  %v10876_v28 = vld [vmem:[#allocation2 + $0xa0] ss:$16 sps:$4 sm:$0xff]  }
 0x5f8   :  { %v1626_v32 = vpop.f32.mrb[18].mxu0  ;;  %v10884_v29 = vld [vmem:[#allocation2 + $0xc4] ss:$16 sps:$4 sm:$0xff]  }
 0x5f9   :  { %v10209_v33 = vpop.f32.mrb[19].mxu0  ;;  %v1630_v10 = vsel %vm160_vm1, %v1629_v30, -inf  ;;  %v10890_v31 = vld [vmem:[#allocation2 + $0xe4] ss:$16 sps:$4 sm:$0xff]   ;;  %v10888_v32 = vld [vmem:[#allocation2 + $0xe0] ss:$16 sps:$4 sm:$0xff]  }
 0x5fa   :  { %1631 = vmax.xlane.f32.xlu1 %v1630_v10  ;;  %v10896_v33 = vld [vmem:[#allocation2 + $0x104] ss:$16 sps:$4 sm:$0xff]   ;;  %v10894_v10 = vld [vmem:[#allocation2 + $0x100] ss:$16 sps:$4 sm:$0xff]  }
 0x601   :  { %v11965_v36 = vpop.eup %11964 }
 0x602   :  { %v1398_v37 = vmul.f32 %v11965_v36, %v1397_v35  ;;  %v10900_v35 = vld [vmem:[#allocation2 + $0x120] ss:$16 sps:$4 sm:$0xff]   ;;  %v10908_v36 = vld [vmem:[#allocation2 + $0x144] ss:$16 sps:$4 sm:$0xff]  }
 0x604   :  { %v12533_v39 = vadd.f32 %v1399_v38, %v1398_v37  ;;  %v10906_v37 = vld [vmem:[#allocation2 + $0x140] ss:$16 sps:$4 sm:$0xff]   ;;  %v10914_v38 = vld [vmem:[#allocation2 + $0x164] ss:$16 sps:$4 sm:$0xff]  }
 0x606   :  { %v12537_v40 = vpack.c.bf16 %v12533_v39, %v12533_v39 }
 0x608   :  { %10187 = vmatmul.mubr.bf16.vlgmr.msra.gmra.mrb[12].mxu1 %v12537_v40 }
 0x609   :  { %10226 = vmatprep.mubr.msk.bf16.mxu1 %vm12210_vm0, %v12209_v0  ;;  %10211 = vmatpush3.bf16.msra.mxu1 %v10830_v42  ;;  %v10912_v42 = vld [vmem:[#allocation2 + $0x160] ss:$16 sps:$4 sm:$0xff]  }
 0x60a   :  { %10212 = vmatprep.subr.bf16.mxu1 %v12209_v0 }
 0x60d   :  { %10213 = vmatpush3.bf16.msra.mxu1 %v10831_v60  ;;  %v10920_v60 = vld [vmem:[#allocation2 + $0x184] ss:$16 sps:$4 sm:$0xff]  }
 0x60e   :  { %10214 = vmatprep.subr.bf16.mxu1 %v12209_v0 }
 0x611   :  { %10215 = vmatpush3.bf16.msra.mxu1 %v10832_v44  ;;  %v10918_v44 = vld [vmem:[#allocation2 + $0x180] ss:$16 sps:$4 sm:$0xff]  }
 0x612   :  { %10216 = vmatprep.subr.bf16.mxu1 %v12209_v0 }
 0x615   :  { %10217 = vmatpush3.bf16.msra.mxu1 %v10833_v50  ;;  %v10849_v50 = vld [vmem:[#allocation2 + $0x8] ss:$16 sps:$4 sm:$0xff]  }
 0x616   :  { %10218 = vmatprep.subr.bf16.mxu1 %v12209_v0 }
 0x619   :  { %10219 = vmatpush3.bf16.msra.mxu1 %v10834_v51 }
 0x61a   :  { %10220 = vmatprep.subr.bf16.mxu1 %v12209_v0 }
 0x61d   :  { %10221 = vmatpush3.bf16.msra.mxu1 %v10835_v52 }
 0x61e   :  { %10222 = vmatprep.subr.bf16.mxu1 %v12209_v0 }
 0x621   :  { %10223 = vmatpush3.bf16.msra.mxu1 %v10836_v53  ;;  %v10857_v53 = vld [vmem:[#allocation2 + $0x2c] ss:$16 sps:$4 sm:$0xff]  }
 0x622   :  { %10224 = vmatprep.subr.bf16.mxu1 %v12209_v0 }
 0x625   :  { %10225 = vmatpush3.bf16.msra.mxu1 %v10837_v54 }
 0x626   :  { %2246 = vmatprep.subr.bf16.mxu1 %v10848_v16  ;;  %v10917_v16 = vld [vmem:[#allocation2 + $0x16c] ss:$16 sps:$4 sm:$0xff]  }
 0x687   :  { %v1632_v45 = vpop.xlane.xlu1 %1631 }
 0x688   :  { %v1633_v46 = vsub.f32 %v1629_v30, %v1632_v45  ;;  %v10882_v30 = vld [vmem:[#allocation2 + $0xc0] ss:$16 sps:$4 sm:$0xff]   ;;  %v10926_v45 = vld [vmem:[#allocation2 + $0x1a4] ss:$16 sps:$4 sm:$0xff]  }
 0x68a   :  { %v1634_v47 = vmul.f32 1.442695, %v1633_v46  ;;  %v10924_v46 = vld [vmem:[#allocation2 + $0x1a0] ss:$16 sps:$4 sm:$0xff]  }
 0x68c   :  { %11966 = vpow2.f32 %v1634_v47  ;;  %v10932_v47 = vld [vmem:[#allocation2 + $0x1c4] ss:$16 sps:$4 sm:$0xff]  }
 0x696   :  { %v11967_v48 = vpop.eup %11966 }
 0x697   :  { %v1636_v49 = vsel %vm160_vm1, %v11967_v48, 0.0 }
 0x698   :  { %1637 = vadd.xlane.f32.xlu1 %v1636_v49 }
 0x6db   :  { %v12602_v63 = vpop.f32.mrb[12].mxu1 }
 0x6dc   :  { %v10188_v1 = vpop.f32.mrb[13].mxu1 }
 0x6dd   :  { %v1504_v2 = vpop.f32.mrb[14].mxu1  ;;  %v10873_v1 = vld [vmem:[#allocation2 + $0x88] ss:$16 sps:$4 sm:$0xff]  }
 0x6de   :  { %v10189_v3 = vpop.f32.mrb[15].mxu1  ;;  %v10881_v2 = vld [vmem:[#allocation2 + $0xac] ss:$16 sps:$4 sm:$0xff]  }
 0x6df   :  { %v10879_v3 = vld [vmem:[#allocation2 + $0xa8] ss:$16 sps:$4 sm:$0xff]  }
 0x725   :  { %v1638_v4 = vpop.xlane.xlu1 %1637 }
 0x726   :  { %11968 = vrcp.f32 %v1638_v4 }
 0x730   :  { %v11969_v5 = vpop.eup %11968 }
 0x731   :  { %v1640_v6 = vmul.f32 %v11969_v5, %v1638_v4  ;;  %v10885_v4 = vld [vmem:[#allocation2 + $0xc8] ss:$16 sps:$4 sm:$0xff]  }
 0x733   :  { %v1641_v8 = vsub.f32 2.0, %v1640_v6  ;;  %v10891_v6 = vld [vmem:[#allocation2 + $0xe8] ss:$16 sps:$4 sm:$0xff]  }
 0x735   :  { %v1642_v11 = vmul.f32 %v11969_v5, %v1641_v8  ;;  %v10893_v5 = vld [vmem:[#allocation2 + $0xec] ss:$16 sps:$4 sm:$0xff]  }
 0x736   :  { %v10899_v8 = vld [vmem:[#allocation2 + $0x10c] ss:$16 sps:$4 sm:$0xff]  }
 0x737   :  { %v1643_v12 = vmul.f32 %v11967_v48, %v1642_v11  ;;  %v10930_v48 = vld [vmem:[#allocation2 + $0x1c0] ss:$16 sps:$4 sm:$0xff]   ;;  %v10897_v11 = vld [vmem:[#allocation2 + $0x108] ss:$16 sps:$4 sm:$0xff]  }
 0x739   :  { %2988 = vst [vmem:[#allocation6 + $0x1] sm:$0x1] %v1643_v12  ;;  %v1644_v13 = vpack.c.bf16 %v1643_v12, %v1643_v12  ;;  %v10905_v12 = vld [vmem:[#allocation2 + $0x12c] ss:$16 sps:$4 sm:$0xff]  }
 0x73b   :  { %10227 = vmatmul.mubr.bf16.vlgmr.msra.gmra.mrb[16].mxu1 %v1644_v13  ;;  %v10903_v13 = vld [vmem:[#allocation2 + $0x128] ss:$16 sps:$4 sm:$0xff]  }
 0x73c   :  { %2278 = vmatprep.mubr.bf16.mxu1 %v12439_v43  ;;  %2247 = vmatpush1.bf16.msra.mxu1 %v10846_v15  ;;  %v10909_v15 = vld [vmem:[#allocation2 + $0x148] ss:$16 sps:$4 sm:$0xff]  }
 0x73d   :  { %2248 = vmatprep.subr.bf16.mxu1 %v10854_v18  ;;  %v10923_v18 = vld [vmem:[#allocation2 + $0x18c] ss:$16 sps:$4 sm:$0xff]  }
 0x740   :  { %2249 = vmatpush1.bf16.msra.mxu1 %v10852_v19  ;;  %v10921_v19 = vld [vmem:[#allocation2 + $0x188] ss:$16 sps:$4 sm:$0xff]  }
 0x741   :  { %2250 = vmatprep.subr.bf16.mxu1 %v10860_v20  ;;  %v10929_v20 = vld [vmem:[#allocation2 + $0x1ac] ss:$16 sps:$4 sm:$0xff]  }
 0x744   :  { %2251 = vmatpush1.bf16.msra.mxu1 %v10858_v22  ;;  %v10927_v22 = vld [vmem:[#allocation2 + $0x1a8] ss:$16 sps:$4 sm:$0xff]  }
 0x745   :  { %2252 = vmatprep.subr.bf16.mxu1 %v10866_v23  ;;  %v10935_v23 = vld [vmem:[#allocation2 + $0x1cc] ss:$16 sps:$4 sm:$0xff]  }
 0x748   :  { %2253 = vmatpush1.bf16.msra.mxu1 %v10864_v24  ;;  %v10933_v24 = vld [vmem:[#allocation2 + $0x1c8] ss:$16 sps:$4 sm:$0xff]  }
 0x749   :  { %2254 = vmatprep.subr.bf16.mxu1 %v10872_v25  ;;  %v10938_v25 = vld [vmem:[#allocation2 + $0x1e4] ss:$16 sps:$4 sm:$0xff]  }
 0x74c   :  { %2255 = vmatpush1.bf16.msra.mxu1 %v10870_v26  ;;  %v10941_v26 = vld [vmem:[#allocation2 + $0x1ec] ss:$16 sps:$4 sm:$0xff]  }
 0x74d   :  { %2256 = vmatprep.subr.bf16.mxu1 %v10878_v27  ;;  %v10936_v27 = vld [vmem:[#allocation2 + $0x1e0] ss:$16 sps:$4 sm:$0xff]  }
 0x750   :  { %2257 = vmatpush1.bf16.msra.mxu1 %v10876_v28  ;;  %v10939_v28 = vld [vmem:[#allocation2 + $0x1e8] ss:$16 sps:$4 sm:$0xff]  }
 0x751   :  { %2258 = vmatprep.subr.bf16.mxu1 %v10884_v29  ;;  %v10944_v29 = vld [vmem:[#allocation2 + $0x20c] ss:$16 sps:$4 sm:$0xff]  }
 0x754   :  { %2259 = vmatpush1.bf16.msra.mxu1 %v10882_v30  ;;  %v10947_v30 = vld [vmem:[#allocation2 + $0x204] ss:$16 sps:$4 sm:$0xff]  }
 0x755   :  { %2260 = vmatprep.subr.bf16.mxu1 %v10890_v31  ;;  %v1751_v31 = vrot.slane %v12525_v21, 1  ;;  %v10948_v21 = vld [vmem:[#allocation2 + $0x228] ss:$16 sps:$4 sm:$0xff]  }
 0x758   :  { %2261 = vmatpush1.bf16.msra.mxu1 %v10888_v32  ;;  %v1749_v32 = vld [vmem:[%s13560_s7 + $0x1] sm:$0x1] }
 0x759   :  { %2262 = vmatprep.subr.bf16.mxu1 %v10896_v33  ;;  %v1753_v33 = vadd.f32 %v1751_v31, %v1749_v32  ;;  %v11019_v31 = vld [vmem:[#allocation2 + $0x384] ss:$16 sps:$4 sm:$0xff]   ;;  %v11017_v32 = vld [vmem:[#allocation2 + $0x380] ss:$16 sps:$4 sm:$0xff]  }
 0x75c   :  { %2263 = vmatpush1.bf16.msra.mxu1 %v10894_v10 }
 0x75d   :  { %2264 = vmatprep.subr.bf16.mxu1 %v10902_v34 }
 0x760   :  { %2265 = vmatpush1.bf16.msra.mxu1 %v10900_v35 }
 0x761   :  { %2266 = vmatprep.subr.bf16.mxu1 %v10908_v36 }
 0x764   :  { %2267 = vmatpush1.bf16.msra.mxu1 %v10906_v37 }
 0x765   :  { %2268 = vmatprep.subr.bf16.mxu1 %v10914_v38 }
 0x768   :  { %2269 = vmatpush1.bf16.msra.mxu1 %v10912_v42 }
 0x769   :  { %2270 = vmatprep.subr.bf16.mxu1 %v10920_v60  ;;  %v10942_v60 = vld [vmem:[#allocation2 + $0x208] ss:$16 sps:$4 sm:$0xff]  }
 0x76c   :  { %2271 = vmatpush1.bf16.msra.mxu1 %v10918_v44  ;;  %v10945_v44 = vld [vmem:[#allocation2 + $0x200] ss:$16 sps:$4 sm:$0xff]  }
 0x76d   :  { %2272 = vmatprep.subr.bf16.mxu1 %v10926_v45  ;;  %v10950_v45 = vld [vmem:[#allocation2 + $0x22c] ss:$16 sps:$4 sm:$0xff]  }
 0x770   :  { %2273 = vmatpush1.bf16.msra.mxu1 %v10924_v46  ;;  %v10953_v46 = vld [vmem:[#allocation2 + $0x224] ss:$16 sps:$4 sm:$0xff]  }
 0x771   :  { %2274 = vmatprep.subr.bf16.mxu1 %v10932_v47  ;;  %v10951_v47 = vld [vmem:[#allocation2 + $0x220] ss:$16 sps:$4 sm:$0xff]  }
 0x774   :  { %2275 = vmatpush1.bf16.msra.mxu1 %v10930_v48  ;;  %v10956_v48 = vld [vmem:[#allocation2 + $0x24c] ss:$16 sps:$4 sm:$0xff]  }
 0x775   :  { %2276 = vmatprep.subr.bf16.mxu1 %v10938_v25  ;;  %v11010_v25 = vld [vmem:[#allocation2 + $0x36c] ss:$16 sps:$4 sm:$0xff]  }
 0x778   :  { %2277 = vmatpush1.bf16.msra.mxu1 %v10936_v27  ;;  %v11013_v27 = vld [vmem:[#allocation2 + $0x364] ss:$16 sps:$4 sm:$0xff]  }
 0x779   :  { %2750 = vmatprep.subr.bf16.mxu1 %v10947_v30  ;;  %v11014_v30 = vld [vmem:[#allocation2 + $0x388] ss:$16 sps:$4 sm:$0xff]  }
 0x80e   :  { %v1743_v49 = vpop.f32.mrb[16].mxu1 }
 0x80f   :  { %v1754_v51 = vpack.c.bf16 %v1743_v49, %v1743_v49  ;;  %v10228_v52 = vpop.f32.mrb[17].mxu1  ;;  %v10959_v49 = vld [vmem:[#allocation2 + $0x244] ss:$16 sps:$4 sm:$0xff]  }
 0x810   :  { %v1746_v54 = vpop.f32.mrb[18].mxu1  ;;  %v10962_v52 = vld [vmem:[#allocation2 + $0x26c] ss:$16 sps:$4 sm:$0xff]  }
 0x811   :  { %v10229_v55 = vpop.f32.mrb[19].mxu1  ;;  %10247 = vmatmul.mubr.bf16.vlgmr.msra.gmra.mrb[20].mxu0 %v1754_v51  ;;  %v10957_v51 = vld [vmem:[#allocation2 + $0x240] ss:$16 sps:$4 sm:$0xff]   ;;  %v10960_v54 = vld [vmem:[#allocation2 + $0x268] ss:$16 sps:$4 sm:$0xff]  }
 0x812   :  { %2319 = vmatprep.mubr.bf16.mxu0 %v12439_v43  ;;  %2288 = vmatpush1.bf16.msra.mxu0 %v10849_v50  ;;  %v10887_v43 = vld [vmem:[#allocation2 + $0xcc] ss:$16 sps:$4 sm:$0xff]   ;;  %v10954_v50 = vld [vmem:[#allocation2 + $0x248] ss:$16 sps:$4 sm:$0xff]  }
 0x813   :  { %2289 = vmatprep.subr.bf16.mxu0 %v10857_v53  ;;  %v10965_v53 = vld [vmem:[#allocation2 + $0x264] ss:$16 sps:$4 sm:$0xff]   ;;  %v10968_v55 = vld [vmem:[#allocation2 + $0x28c] ss:$16 sps:$4 sm:$0xff]  }
 0x816   :  { %2290 = vmatpush1.bf16.msra.mxu0 %v10855_v56  ;;  %v10966_v56 = vld [vmem:[#allocation2 + $0x288] ss:$16 sps:$4 sm:$0xff]  }
 0x817   :  { %2291 = vmatprep.subr.bf16.mxu0 %v10863_v57  ;;  %v10971_v57 = vld [vmem:[#allocation2 + $0x284] ss:$16 sps:$4 sm:$0xff]  }
 0x81a   :  { %2292 = vmatpush1.bf16.msra.mxu0 %v10861_v58  ;;  %v10969_v58 = vld [vmem:[#allocation2 + $0x280] ss:$16 sps:$4 sm:$0xff]  }
 0x81b   :  { %2293 = vmatprep.subr.bf16.mxu0 %v10869_v59  ;;  %v10974_v59 = vld [vmem:[#allocation2 + $0x2ac] ss:$16 sps:$4 sm:$0xff]  }
 0x81e   :  { %2294 = vmatpush1.bf16.msra.mxu0 %v10867_v61  ;;  %v10972_v61 = vld [vmem:[#allocation2 + $0x2a8] ss:$16 sps:$4 sm:$0xff]  }
 0x81f   :  { %2295 = vmatprep.subr.bf16.mxu0 %v10875_v62  ;;  %v10977_v62 = vld [vmem:[#allocation2 + $0x2a4] ss:$16 sps:$4 sm:$0xff]  }
 0x822   :  { %2296 = vmatpush1.bf16.msra.mxu0 %v10873_v1  ;;  %v10975_v1 = vld [vmem:[#allocation2 + $0x2a0] ss:$16 sps:$4 sm:$0xff]  }
 0x823   :  { %2297 = vmatprep.subr.bf16.mxu0 %v10881_v2  ;;  %v10980_v2 = vld [vmem:[#allocation2 + $0x2cc] ss:$16 sps:$4 sm:$0xff]  }
 0x826   :  { %2298 = vmatpush1.bf16.msra.mxu0 %v10879_v3  ;;  %v10978_v3 = vld [vmem:[#allocation2 + $0x2c8] ss:$16 sps:$4 sm:$0xff]  }
 0x827   :  { %2299 = vmatprep.subr.bf16.mxu0 %v10887_v43  ;;  %v10983_v43 = vld [vmem:[#allocation2 + $0x2c4] ss:$16 sps:$4 sm:$0xff]  }
 0x82a   :  { %2300 = vmatpush1.bf16.msra.mxu0 %v10885_v4  ;;  %v10981_v4 = vld [vmem:[#allocation2 + $0x2c0] ss:$16 sps:$4 sm:$0xff]  }
 0x82b   :  { %2301 = vmatprep.subr.bf16.mxu0 %v10893_v5  ;;  %v10986_v5 = vld [vmem:[#allocation2 + $0x2ec] ss:$16 sps:$4 sm:$0xff]  }
 0x82e   :  { %2302 = vmatpush1.bf16.msra.mxu0 %v10891_v6  ;;  %v10984_v6 = vld [vmem:[#allocation2 + $0x2e8] ss:$16 sps:$4 sm:$0xff]  }
 0x82f   :  { %2303 = vmatprep.subr.bf16.mxu0 %v10899_v8  ;;  %v10989_v8 = vld [vmem:[#allocation2 + $0x2e4] ss:$16 sps:$4 sm:$0xff]  }
 0x832   :  { %2304 = vmatpush1.bf16.msra.mxu0 %v10897_v11  ;;  %v10987_v11 = vld [vmem:[#allocation2 + $0x2e0] ss:$16 sps:$4 sm:$0xff]  }
 0x833   :  { %2305 = vmatprep.subr.bf16.mxu0 %v10905_v12  ;;  %v10992_v12 = vld [vmem:[#allocation2 + $0x30c] ss:$16 sps:$4 sm:$0xff]  }
 0x836   :  { %2306 = vmatpush1.bf16.msra.mxu0 %v10903_v13  ;;  %v10990_v13 = vld [vmem:[#allocation2 + $0x308] ss:$16 sps:$4 sm:$0xff]  }
 0x837   :  { %2307 = vmatprep.subr.bf16.mxu0 %v10911_v14  ;;  %v10995_v14 = vld [vmem:[#allocation2 + $0x304] ss:$16 sps:$4 sm:$0xff]  }
 0x83a   :  { %2308 = vmatpush1.bf16.msra.mxu0 %v10909_v15  ;;  %v10993_v15 = vld [vmem:[#allocation2 + $0x300] ss:$16 sps:$4 sm:$0xff]  }
 0x83b   :  { %2309 = vmatprep.subr.bf16.mxu0 %v10917_v16  ;;  %v10998_v16 = vld [vmem:[#allocation2 + $0x32c] ss:$16 sps:$4 sm:$0xff]  }
 0x83e   :  { %2310 = vmatpush1.bf16.msra.mxu0 %v10915_v17  ;;  %v10996_v17 = vld [vmem:[#allocation2 + $0x328] ss:$16 sps:$4 sm:$0xff]  }
 0x83f   :  { %2311 = vmatprep.subr.bf16.mxu0 %v10923_v18  ;;  %v11001_v18 = vld [vmem:[#allocation2 + $0x324] ss:$16 sps:$4 sm:$0xff]  }
 0x842   :  { %2312 = vmatpush1.bf16.msra.mxu0 %v10921_v19  ;;  %v10999_v19 = vld [vmem:[#allocation2 + $0x320] ss:$16 sps:$4 sm:$0xff]  }
 0x843   :  { %2313 = vmatprep.subr.bf16.mxu0 %v10929_v20  ;;  %v11004_v20 = vld [vmem:[#allocation2 + $0x34c] ss:$16 sps:$4 sm:$0xff]  }
 0x846   :  { %2314 = vmatpush1.bf16.msra.mxu0 %v10927_v22  ;;  %v11002_v22 = vld [vmem:[#allocation2 + $0x348] ss:$16 sps:$4 sm:$0xff]  }
 0x847   :  { %2315 = vmatprep.subr.bf16.mxu0 %v10935_v23  ;;  %v11007_v23 = vld [vmem:[#allocation2 + $0x344] ss:$16 sps:$4 sm:$0xff]  }
 0x84a   :  { %2316 = vmatpush1.bf16.msra.mxu0 %v10933_v24  ;;  %v11005_v24 = vld [vmem:[#allocation2 + $0x340] ss:$16 sps:$4 sm:$0xff]  }
 0x84b   :  { %2317 = vmatprep.subr.bf16.mxu0 %v10941_v26  ;;  %v11008_v26 = vld [vmem:[#allocation2 + $0x368] ss:$16 sps:$4 sm:$0xff]  }
 0x84e   :  { %2318 = vmatpush1.bf16.msra.mxu0 %v10939_v28  ;;  %v11011_v28 = vld [vmem:[#allocation2 + $0x360] ss:$16 sps:$4 sm:$0xff]  }
 0x84f   :  { %2791 = vmatprep.subr.bf16.mxu0 %v10944_v29  ;;  %v11016_v29 = vld [vmem:[#allocation2 + $0x38c] ss:$16 sps:$4 sm:$0xff]  }
 0x8e4   :  { %v1853_v10 = vpop.f32.mrb[20].mxu0 }
 0x8e5   :  { %v1859_v34 = vadd.f32 %v1853_v10, %v1753_v33  ;;  %v10248_v35 = vpop.f32.mrb[21].mxu0  ;;  %v11022_v33 = vld [vmem:[#allocation2 + $0x3ac] ss:$16 sps:$4 sm:$0xff]   ;;  %v11020_v10 = vld [vmem:[#allocation2 + $0x3a8] ss:$16 sps:$4 sm:$0xff]  }
 0x8e6   :  { %v1856_v36 = vpop.f32.mrb[22].mxu0  ;;  %v11023_v35 = vld [vmem:[#allocation2 + $0x3a0] ss:$16 sps:$4 sm:$0xff]  }
 0x8e7   :  { %v1860_v37 = vmax.f32 %v1859_v34, 0.0  ;;  %v10249_v38 = vpop.f32.mrb[23].mxu0  ;;  %v11025_v34 = vld [vmem:[#allocation2 + $0x3a4] ss:$16 sps:$4 sm:$0xff]   ;;  %v11028_v36 = vld [vmem:[#allocation2 + $0x3cc] ss:$16 sps:$4 sm:$0xff]  }
 0x8e8   :  { %v11026_v38 = vld [vmem:[#allocation2 + $0x3c8] ss:$16 sps:$4 sm:$0xff]  }
 0x8e9   :  { %v1861_v42 = vpack.c.bf16 %v1860_v37, %v1860_v37  ;;  %v11031_v37 = vld [vmem:[#allocation2 + $0x3c4] ss:$16 sps:$4 sm:$0xff]  }
 0x8eb   :  { %2279 = vmatmul.mubr.bf16.vlgmr.msra.gmra.mrb[20].mxu1 %v1861_v42  ;;  %2320 = vmatmul.mubr.bf16.vlgmr.msra.gmra.mrb[24].mxu0 %v1861_v42  ;;  %v11029_v42 = vld [vmem:[#allocation2 + $0x3c0] ss:$16 sps:$4 sm:$0xff]  }
 0x8ec   :  { %2782 = vmatprep.mubr.bf16.mxu1 %v12537_v40  ;;  %2823 = vmatprep.mubr.bf16.mxu0 %v12537_v40  ;;  %v10963_v40 = vld [vmem:[#allocation2 + $0x260] ss:$16 sps:$4 sm:$0xff]  }
 0x8ed   :  { %2792 = vmatpush1.bf16.msra.mxu0 %v10942_v60  ;;  %2751 = vmatpush1.bf16.msra.mxu1 %v10945_v44  ;;  %v11034_v60 = vld [vmem:[#allocation2 + $0x3ec] ss:$16 sps:$4 sm:$0xff]   ;;  %v11037_v44 = vld [vmem:[#allocation2 + $0x3e4] ss:$16 sps:$4 sm:$0xff]  }
 0x8ee   :  { %2793 = vmatprep.subr.bf16.mxu0 %v10950_v45  ;;  %2752 = vmatprep.subr.bf16.mxu1 %v10953_v46  ;;  %v11032_v45 = vld [vmem:[#allocation2 + $0x3e8] ss:$16 sps:$4 sm:$0xff]   ;;  %v11035_v46 = vld [vmem:[#allocation2 + $0x3e0] ss:$16 sps:$4 sm:$0xff]  }
 0x8f1   :  { %2794 = vmatpush1.bf16.msra.mxu0 %v10948_v21  ;;  %2753 = vmatpush1.bf16.msra.mxu1 %v10951_v47  ;;  %v2328_v21 = vld [vmem:[%s13560_s7 + $0x2] sm:$0x3] }
 0x8f2   :  { %2795 = vmatprep.subr.bf16.mxu0 %v10956_v48  ;;  %2754 = vmatprep.subr.bf16.mxu1 %v10959_v49  ;;  %v2333_v47 = vrot.slane %v2328_v21, %v12414_v7 }
 0x8f5   :  { %2796 = vmatpush1.bf16.msra.mxu0 %v10954_v50  ;;  %2755 = vmatpush1.bf16.msra.mxu1 %v10957_v51  ;;  %v2337_v50 = vrot.slane %v2328_v21, %v12419_v9 }
 0x8f6   :  { %2797 = vmatprep.subr.bf16.mxu0 %v10962_v52  ;;  %2756 = vmatprep.subr.bf16.mxu1 %v10965_v53 }
 0x8f9   :  { %2798 = vmatpush1.bf16.msra.mxu0 %v10960_v54  ;;  %2757 = vmatpush1.bf16.msra.mxu1 %v10963_v40 }
 0x8fa   :  { %2799 = vmatprep.subr.bf16.mxu0 %v10968_v55  ;;  %2758 = vmatprep.subr.bf16.mxu1 %v10971_v57 }
 0x8fd   :  { %2800 = vmatpush1.bf16.msra.mxu0 %v10966_v56  ;;  %2759 = vmatpush1.bf16.msra.mxu1 %v10969_v58 }
 0x8fe   :  { %2801 = vmatprep.subr.bf16.mxu0 %v10974_v59  ;;  %2760 = vmatprep.subr.bf16.mxu1 %v10977_v62 }
 0x901   :  { %2802 = vmatpush1.bf16.msra.mxu0 %v10972_v61  ;;  %2761 = vmatpush1.bf16.msra.mxu1 %v10975_v1 }
 0x902   :  { %2803 = vmatprep.subr.bf16.mxu0 %v10980_v2  ;;  %2762 = vmatprep.subr.bf16.mxu1 %v10983_v43  ;;  %v2356_v2 = vld [vmem:[%s13560_s7 + $0x5] sm:$0x1]  ;;  %v2354_v43 = vld [vmem:[%s13560_s7 + $0x4] sm:$0x1] }
 0x905   :  { %2804 = vmatpush1.bf16.msra.mxu0 %v10978_v3  ;;  %2763 = vmatpush1.bf16.msra.mxu1 %v10981_v4 }
 0x906   :  { %2805 = vmatprep.subr.bf16.mxu0 %v10986_v5  ;;  %2764 = vmatprep.subr.bf16.mxu1 %v10989_v8 }
 0x909   :  { %2806 = vmatpush1.bf16.msra.mxu0 %v10984_v6  ;;  %2765 = vmatpush1.bf16.msra.mxu1 %v10987_v11 }
 0x90a   :  { %2807 = vmatprep.subr.bf16.mxu0 %v10992_v12  ;;  %2766 = vmatprep.subr.bf16.mxu1 %v10995_v14 }
 0x90d   :  { %2808 = vmatpush1.bf16.msra.mxu0 %v10990_v13  ;;  %2767 = vmatpush1.bf16.msra.mxu1 %v10993_v15 }
 0x90e   :  { %2809 = vmatprep.subr.bf16.mxu0 %v10998_v16  ;;  %2768 = vmatprep.subr.bf16.mxu1 %v11001_v18  ;;  %v11038_v18 = vld [vmem:[%s13556_s3] sm:$0xff]  }
 0x911   :  { %2810 = vmatpush1.bf16.msra.mxu0 %v10996_v17  ;;  %2769 = vmatpush1.bf16.msra.mxu1 %v10999_v19 }
 0x912   :  { %2811 = vmatprep.subr.bf16.mxu0 %v11004_v20  ;;  %2770 = vmatprep.subr.bf16.mxu1 %v11007_v23  ;;  %v11040_v20 = vld [vmem:[%s13556_s3 + $0x10] sm:$0xff]   ;;  %v11042_v23 = vld [vmem:[%s13556_s3 + $0x20] sm:$0xff]  }
 0x915   :  { %2812 = vmatpush1.bf16.msra.mxu0 %v11002_v22  ;;  %2771 = vmatpush1.bf16.msra.mxu1 %v11005_v24  ;;  %v11041_v22 = vld [vmem:[%s13556_s3 + $0x18] sm:$0xff]   ;;  %v11043_v24 = vld [vmem:[%s13556_s3 + $0x28] sm:$0xff]  }
 0x916   :  { %2813 = vmatprep.subr.bf16.mxu0 %v11010_v25  ;;  %2772 = vmatprep.subr.bf16.mxu1 %v11013_v27  ;;  %v11044_v25 = vld [vmem:[%s13556_s3 + $0x30] sm:$0xff]   ;;  %v11046_v27 = vld [vmem:[%s13559_s6] sm:$0xff]  }
 0x919   :  { %2814 = vmatpush1.bf16.msra.mxu0 %v11008_v26  ;;  %2773 = vmatpush1.bf16.msra.mxu1 %v11011_v28  ;;  %v11045_v26 = vld [vmem:[%s13556_s3 + $0x38] sm:$0xff]   ;;  %v11047_v28 = vld [vmem:[%s13559_s6 + $0x8] sm:$0xff]  }
 0x91a   :  { %2815 = vmatprep.subr.bf16.mxu0 %v11016_v29  ;;  %2774 = vmatprep.subr.bf16.mxu1 %v11019_v31  ;;  %v11048_v29 = vld [vmem:[%s13559_s6 + $0x10] sm:$0xff]   ;;  %v11050_v31 = vld [vmem:[%s13559_s6 + $0x20] sm:$0xff]  }
 0x91d   :  { %2816 = vmatpush1.bf16.msra.mxu0 %v11014_v30  ;;  %2775 = vmatpush1.bf16.msra.mxu1 %v11017_v32  ;;  %v11049_v30 = vld [vmem:[%s13559_s6 + $0x18] sm:$0xff]   ;;  %v11051_v32 = vld [vmem:[%s13559_s6 + $0x28] sm:$0xff]  }
 0x91e   :  { %2817 = vmatprep.subr.bf16.mxu0 %v11022_v33  ;;  %2776 = vmatprep.subr.bf16.mxu1 %v11025_v34  ;;  %v11052_v33 = vld [vmem:[%s13559_s6 + $0x30] sm:$0xff]   ;;  %v2832_v34 = vld [vmem:[%s13560_s7 + $0x6] sm:$0x3] }
 0x921   :  { %2818 = vmatpush1.bf16.msra.mxu0 %v11020_v10  ;;  %2777 = vmatpush1.bf16.msra.mxu1 %v11023_v35  ;;  %v11053_v10 = vld [vmem:[%s13559_s6 + $0x38] sm:$0xff]   ;;  %v2837_v35 = vrot.slane %v2832_v34, %v12414_v7 }
 0x922   :  { %2819 = vmatprep.subr.bf16.mxu0 %v11028_v36  ;;  %2778 = vmatprep.subr.bf16.mxu1 %v11031_v37 }
 0x925   :  { %2820 = vmatpush1.bf16.msra.mxu0 %v11026_v38  ;;  %2779 = vmatpush1.bf16.msra.mxu1 %v11029_v42  ;;  %v2841_v38 = vrot.slane %v2832_v34, %v12419_v9  ;;  %v11065_v34 = vld [vmem:[%s13557_s4 + $0x18] sm:$0xff]  }
 0x926   :  { %2821 = vmatprep.subr.bf16.mxu0 %v11034_v60  ;;  %2780 = vmatprep.subr.bf16.mxu1 %v11037_v44 }
 0x929   :  { %2822 = vmatpush1.bf16.msra.mxu0 %v11032_v45  ;;  %2781 = vmatpush1.bf16.msra.mxu1 %v11035_v46 }
 0x92a   :  { %10270 = vmatprep.subr.bf16.mxu0 %v12209_v0  ;;  %10250 = vmatprep.subr.bf16.mxu1 %v12209_v0 }
 0x9be   :  { %v2280_v48 = vpop.f32.mrb[20].mxu1  ;;  %v2321_v49 = vpop.f32.mrb[24].mxu0 }
 0x9bf   :  { %v2340_v51 = vadd.f32 %v2333_v47, %v2280_v48  ;;  %v2282_v52 = vpop.f32.mrb[21].mxu1  ;;  %v2323_v53 = vpop.f32.mrb[25].mxu0  ;;  %v2355_v6 = vadd.f32 %v2354_v43, %v2321_v49 }
 0x9c0   :  { %v2284_v54 = vpop.f32.mrb[22].mxu1  ;;  %v2325_v40 = vpop.f32.mrb[26].mxu0  ;;  %v2341_v58 = vadd.f32 %v2337_v50, %v2282_v52  ;;  %v2357_v4 = vadd.f32 %v2356_v2, %v2323_v53 }
 0x9c1   :  { %v9158_v55 = vmul.f32 -1.442695, %v2340_v51  ;;  %v2285_v56 = vpop.f32.mrb[23].mxu1  ;;  %v2326_v57 = vpop.f32.mrb[27].mxu0  ;;  %v2860_v54 = vld [vmem:[%s13560_s7 + $0x9] sm:$0x1] }
 0x9c2   :  { %v9159_v59 = vmul.f32 -1.442695, %v2341_v58  ;;  %v2858_v40 = vld [vmem:[%s13560_s7 + $0x8] sm:$0x1]  ;;  %v2991_v57 = vld [vmem:[%s13560_s7] sm:$0x1] }
 0x9c3   :  { %11970 = vpow2.f32 %v9158_v55  ;;  %v12722_v56 = vld [vmem:[%s13553_s0 + $0x2] ss:$8 sm:$0x3] }
 0x9c4   :  { %11972 = vpow2.f32 %v9159_v59 }
 0x9cd   :  { %v11971_v61 = vpop.eup %11970 }
 0x9ce   :  { %v2348_v62 = vadd.f32 1.0, %v11971_v61  ;;  %v11973_v1 = vpop.eup %11972 }
 0x9cf   :  { %v2349_v3 = vadd.f32 1.0, %v11973_v1  ;;  %v2992_v1 = vadd.f32 %v12722_v56, %v2991_v57  ;;  %v11084_v57 = vld [vmem:[#allocation2 + $0x44] ss:$16 sps:$4 sm:$0xff]  }
 0x9d0   :  { %11974 = vrcp.f32 %v2348_v62 }
 0x9d1   :  { %11976 = vrcp.f32 %v2349_v3 }
 0x9da   :  { %v11975_v5 = vpop.eup %11974 }
 0x9db   :  { %v2358_v8 = vmul.f32 %v11975_v5, %v2357_v4  ;;  %v11977_v12 = vpop.eup %11976 }
 0x9dc   :  { %v2361_v13 = vsub.f32 1.0, %v11977_v12  ;;  %v2363_v15 = vmul.f32 %v11977_v12, %v12432_v41  ;;  %v11039_v41 = vld [vmem:[%s13556_s3 + $0x8] sm:$0xff]  }
 0x9dd   :  { %v2359_v11 = vadd.f32 %v2358_v8, %v2355_v6 }
 0x9df   :  { %11978 = vtanh.f32 %v2359_v11 }
 0x9e9   :  { %v11979_v14 = vpop.eup %11978 }
 0x9ea   :  { %v2362_v16 = vmul.f32 %v11979_v14, %v2361_v13 }
 0x9ec   :  { %v12629_v17 = vadd.f32 %v2363_v15, %v2362_v16 }
 0x9ee   :  { %v12636_v19 = vpack.c.bf16 %v12629_v17, %v12629_v17 }
 0x9f0   :  { %2783 = vmatmul.mubr.bf16.vlgmr.msra.gmra.mrb[24].mxu1 %v12636_v19  ;;  %2824 = vmatmul.mubr.bf16.vlgmr.msra.gmra.mrb[28].mxu0 %v12636_v19 }
 0x9f1   :  { %10271 = vmatpush3.bf16.msra.mxu0 %v11038_v18  ;;  %10286 = vmatprep.mubr.msk.bf16.mxu0 %vm12210_vm0, %v12209_v0 }
 0x9f2   :  { %10272 = vmatprep.subr.bf16.mxu0 %v12209_v0  ;;  %10266 = vmatprep.mubr.msk.bf16.mxu1 %vm12210_vm0, %v12209_v0 }
 0x9f3   :  { %10251 = vmatpush3.bf16.msra.mxu1 %v11046_v27  ;;  %v11057_v27 = vld [vmem:[%s13555_s2 + $0x18] sm:$0xff]  }
 0x9f4   :  { %10252 = vmatprep.subr.bf16.mxu1 %v12209_v0 }
 0x9f5   :  { %10273 = vmatpush3.bf16.msra.mxu0 %v11039_v41  ;;  %v11054_v41 = vld [vmem:[%s13555_s2] sm:$0xff]  }
 0x9f6   :  { %10274 = vmatprep.subr.bf16.mxu0 %v12209_v0 }
 0x9f7   :  { %10253 = vmatpush3.bf16.msra.mxu1 %v11047_v28  ;;  %v11058_v28 = vld [vmem:[%s13555_s2 + $0x20] sm:$0xff]  }
 0x9f8   :  { %10254 = vmatprep.subr.bf16.mxu1 %v12209_v0 }
 0x9f9   :  { %10275 = vmatpush3.bf16.msra.mxu0 %v11040_v20  ;;  %v11056_v20 = vld [vmem:[%s13555_s2 + $0x10] sm:$0xff]  }
 0x9fa   :  { %10276 = vmatprep.subr.bf16.mxu0 %v12209_v0 }
 0x9fb   :  { %10255 = vmatpush3.bf16.msra.mxu1 %v11048_v29  ;;  %v11059_v29 = vld [vmem:[%s13555_s2 + $0x28] sm:$0xff]  }
 0x9fc   :  { %10256 = vmatprep.subr.bf16.mxu1 %v12209_v0 }
 0x9fd   :  { %10277 = vmatpush3.bf16.msra.mxu0 %v11041_v22 }
 0x9fe   :  { %10278 = vmatprep.subr.bf16.mxu0 %v12209_v0 }
 0x9ff   :  { %10257 = vmatpush3.bf16.msra.mxu1 %v11049_v30  ;;  %v11060_v30 = vld [vmem:[%s13555_s2 + $0x30] sm:$0xff]  }
 0xa00   :  { %10258 = vmatprep.subr.bf16.mxu1 %v12209_v0 }
 0xa01   :  { %10279 = vmatpush3.bf16.msra.mxu0 %v11042_v23 }
 0xa02   :  { %10280 = vmatprep.subr.bf16.mxu0 %v12209_v0 }
 0xa03   :  { %10259 = vmatpush3.bf16.msra.mxu1 %v11050_v31  ;;  %v11061_v31 = vld [vmem:[%s13555_s2 + $0x38] sm:$0xff]  }
 0xa04   :  { %10260 = vmatprep.subr.bf16.mxu1 %v12209_v0 }
 0xa05   :  { %10281 = vmatpush3.bf16.msra.mxu0 %v11043_v24 }
 0xa06   :  { %10282 = vmatprep.subr.bf16.mxu0 %v12209_v0 }
 0xa07   :  { %10261 = vmatpush3.bf16.msra.mxu1 %v11051_v32  ;;  %v11062_v32 = vld [vmem:[%s13557_s4] sm:$0xff]  }
 0xa08   :  { %10262 = vmatprep.subr.bf16.mxu1 %v12209_v0 }
 0xa09   :  { %10283 = vmatpush3.bf16.msra.mxu0 %v11044_v25 }
 0xa0a   :  { %10284 = vmatprep.subr.bf16.mxu0 %v12209_v0 }
 0xa0b   :  { %10263 = vmatpush3.bf16.msra.mxu1 %v11052_v33  ;;  %v11063_v33 = vld [vmem:[%s13557_s4 + $0x8] sm:$0xff]  }
 0xa0c   :  { %10264 = vmatprep.subr.bf16.mxu1 %v12209_v0 }
 0xa0d   :  { %10285 = vmatpush3.bf16.msra.mxu0 %v11045_v26 }
 0xa0e   :  { %10310 = vmatprep.subr.bf16.mxu0 %v12209_v0 }
 0xa0f   :  { %10265 = vmatpush3.bf16.msra.mxu1 %v11053_v10  ;;  %v11064_v10 = vld [vmem:[%s13557_s4 + $0x10] sm:$0xff]  }
 0xa10   :  { %10287 = vmatmul.mubr.bf16.vlgmr.msra.gmra.mrb[32].mxu0 %v12636_v19  ;;  %10290 = vmatprep.subr.bf16.mxu1 %v12209_v0 }
 0xa11   :  { %10326 = vmatprep.mubr.msk.bf16.mxu0 %vm12210_vm0, %v12209_v0  ;;  %10311 = vmatpush3.bf16.msra.mxu0 %v11062_v32 }
 0xa12   :  { %10312 = vmatprep.subr.bf16.mxu0 %v12209_v0 }
 0xa15   :  { %10313 = vmatpush3.bf16.msra.mxu0 %v11063_v33 }
 0xa16   :  { %10314 = vmatprep.subr.bf16.mxu0 %v12209_v0 }
 0xa19   :  { %10315 = vmatpush3.bf16.msra.mxu0 %v11064_v10  ;;  %v11079_v10 = vld [vmem:[#allocation2 + $0x28] ss:$16 sps:$4 sm:$0xff]  }
 0xa1a   :  { %10316 = vmatprep.subr.bf16.mxu0 %v12209_v0 }
 0xa1d   :  { %10317 = vmatpush3.bf16.msra.mxu0 %v11065_v34  ;;  %v11087_v34 = vld [vmem:[#allocation2 + $0x4c] ss:$16 sps:$4 sm:$0xff]  }
 0xa1e   :  { %10318 = vmatprep.subr.bf16.mxu0 %v12209_v0 }
 0xac3   :  { %v2784_v36 = vpop.f32.mrb[24].mxu1  ;;  %v2825_v37 = vpop.f32.mrb[28].mxu0 }
 0xac4   :  { %v2844_v42 = vadd.f32 %v2837_v35, %v2784_v36  ;;  %v2786_v60 = vpop.f32.mrb[25].mxu1  ;;  %v2827_v44 = vpop.f32.mrb[29].mxu0  ;;  %v2859_v61 = vadd.f32 %v2858_v40, %v2825_v37  ;;  %v11066_v35 = vld [vmem:[%s13557_s4 + $0x20] sm:$0xff]   ;;  %v11067_v36 = vld [vmem:[%s13557_s4 + $0x28] sm:$0xff]   ;;  %v11068_v37 = vld [vmem:[%s13557_s4 + $0x30] sm:$0xff]  }
 0xac5   :  { %v2788_v45 = vpop.f32.mrb[26].mxu1  ;;  %v2829_v46 = vpop.f32.mrb[30].mxu0  ;;  %v2845_v49 = vadd.f32 %v2841_v38, %v2786_v60  ;;  %v2861_v58 = vadd.f32 %v2860_v54, %v2827_v44  ;;  %10319 = vmatpush3.bf16.msra.mxu0 %v11066_v35  ;;  %v11075_v54 = vld [vmem:[#allocation2 + $0xc] ss:$16 sps:$4 sm:$0xff]   ;;  %v11078_v40 = vld [vmem:[#allocation2 + $0x24] ss:$16 sps:$4 sm:$0xff]  }
 0xac6   :  { %v9224_v21 = vmul.f32 -1.442695, %v2844_v42  ;;  %v2789_v47 = vpop.f32.mrb[27].mxu1  ;;  %v2830_v48 = vpop.f32.mrb[31].mxu0  ;;  %10320 = vmatprep.subr.bf16.mxu0 %v12209_v0  ;;  %v11085_v35 = vld [vmem:[#allocation2 + $0x48] ss:$16 sps:$4 sm:$0xff]  }
 0xac7   :  { %v9225_v50 = vmul.f32 -1.442695, %v2845_v49 }
 0xac8   :  { %11980 = vpow2.f32 %v9224_v21 }
 0xac9   :  { %11982 = vpow2.f32 %v9225_v50  ;;  %10321 = vmatpush3.bf16.msra.mxu0 %v11067_v36  ;;  %v11093_v36 = vld [vmem:[#allocation2 + $0x6c] ss:$16 sps:$4 sm:$0xff]  }
 0xaca   :  { %10322 = vmatprep.subr.bf16.mxu0 %v12209_v0 }
 0xacd   :  { %10323 = vmatpush3.bf16.msra.mxu0 %v11068_v37  ;;  %v11091_v37 = vld [vmem:[#allocation2 + $0x68] ss:$16 sps:$4 sm:$0xff]  }
 0xace   :  { %10324 = vmatprep.subr.bf16.mxu0 %v12209_v0 }
 0xad2   :  { %v11981_v51 = vpop.eup %11980 }
 0xad3   :  { %v2852_v52 = vadd.f32 1.0, %v11981_v51  ;;  %v11983_v53 = vpop.eup %11982  ;;  %v11069_v51 = vld [vmem:[%s13557_s4 + $0x38] sm:$0xff]  }
 0xad4   :  { %v2853_v55 = vadd.f32 1.0, %v11983_v53  ;;  %10325 = vmatpush3.bf16.msra.mxu0 %v11069_v51  ;;  %v11072_v53 = vld [vmem:[#allocation2 + $0x4] ss:$16 sps:$4 sm:$0xff]   ;;  %v11127_v51 = vld [vmem:[#allocation2 + $0x128] ss:$16 sps:$4 sm:$0xff]  }
 0xad5   :  { %11984 = vrcp.f32 %v2852_v52  ;;  %v11070_v52 = vld [vmem:[#allocation2] ss:$16 sps:$4 sm:$0xff]   ;;  %3755 = vmatprep.subr.bf16.mxu0 %v11075_v54  ;;  %v11141_v54 = vld [vmem:[#allocation2 + $0x16c] ss:$16 sps:$4 sm:$0xff]  }
 0xad6   :  { %11986 = vrcp.f32 %v2853_v55  ;;  %v11076_v55 = vld [vmem:[#allocation2 + $0x20] ss:$16 sps:$4 sm:$0xff]  }
 0xadf   :  { %v11985_v59 = vpop.eup %11984 }
 0xae0   :  { %v2862_v62 = vmul.f32 %v11985_v59, %v2861_v58  ;;  %v11987_v11 = vpop.eup %11986  ;;  %v11082_v58 = vld [vmem:[#allocation2 + $0x40] ss:$16 sps:$4 sm:$0xff]   ;;  %v11090_v59 = vld [vmem:[#allocation2 + $0x64] ss:$16 sps:$4 sm:$0xff]  }
 0xae1   :  { %v2865_v12 = vsub.f32 1.0, %v11987_v11  ;;  %v2867_v15 = vmul.f32 %v11987_v11, %v12533_v39  ;;  %v11055_v39 = vld [vmem:[%s13555_s2 + $0x8] sm:$0xff]   ;;  %v11118_v11 = vld [vmem:[#allocation2 + $0x100] ss:$16 sps:$4 sm:$0xff]  }
 0xae2   :  { %v2863_v2 = vadd.f32 %v2862_v62, %v2859_v61  ;;  %v11088_v61 = vld [vmem:[#allocation2 + $0x60] ss:$16 sps:$4 sm:$0xff]   ;;  %v11096_v62 = vld [vmem:[#allocation2 + $0x84] ss:$16 sps:$4 sm:$0xff]  }
 0xae3   :  { %v3091_v3 = vpop.f32.mrb[32].mxu0 }
 0xae4   :  { %11988 = vtanh.f32 %v2863_v2  ;;  %v3097_v43 = vadd.f32 %v3091_v3, %v2992_v1  ;;  %v10288_v4 = vpop.f32.mrb[33].mxu0  ;;  %v11094_v1 = vld [vmem:[#allocation2 + $0x80] ss:$16 sps:$4 sm:$0xff]   ;;  %v11102_v2 = vld [vmem:[#allocation2 + $0xa4] ss:$16 sps:$4 sm:$0xff]  }
 0xae5   :  { %v3094_v5 = vpop.f32.mrb[34].mxu0  ;;  %v11100_v3 = vld [vmem:[#allocation2 + $0xa0] ss:$16 sps:$4 sm:$0xff]  }
 0xae6   :  { %v10289_v6 = vpop.f32.mrb[35].mxu0  ;;  %v3098_v8 = vsel %vm160_vm1, %v3097_v43, -inf  ;;  %v11106_v4 = vld [vmem:[#allocation2 + $0xc0] ss:$16 sps:$4 sm:$0xff]   ;;  %v11114_v5 = vld [vmem:[#allocation2 + $0xe4] ss:$16 sps:$4 sm:$0xff]  }
 0xae7   :  { %3099 = vmax.xlane.f32.xlu0 %v3098_v8  ;;  %v11112_v6 = vld [vmem:[#allocation2 + $0xe0] ss:$16 sps:$4 sm:$0xff]   ;;  %v11120_v8 = vld [vmem:[#allocation2 + $0x104] ss:$16 sps:$4 sm:$0xff]  }
 0xaee   :  { %v11989_v13 = vpop.eup %11988 }
 0xaef   :  { %v2866_v14 = vmul.f32 %v11989_v13, %v2865_v12  ;;  %v11126_v12 = vld [vmem:[#allocation2 + $0x124] ss:$16 sps:$4 sm:$0xff]   ;;  %v11124_v13 = vld [vmem:[#allocation2 + $0x120] ss:$16 sps:$4 sm:$0xff]  }
 0xaf1   :  { %v12730_v16 = vadd.f32 %v2867_v15, %v2866_v14  ;;  %v11132_v14 = vld [vmem:[#allocation2 + $0x144] ss:$16 sps:$4 sm:$0xff]   ;;  %v11130_v15 = vld [vmem:[#allocation2 + $0x140] ss:$16 sps:$4 sm:$0xff]  }
 0xaf3   :  { %v12734_v18 = vpack.c.bf16 %v12730_v16, %v12730_v16 }
 0xaf5   :  { %10267 = vmatmul.mubr.bf16.vlgmr.msra.gmra.mrb[28].mxu1 %v12734_v18 }
 0xaf6   :  { %10306 = vmatprep.mubr.msk.bf16.mxu1 %vm12210_vm0, %v12209_v0  ;;  %10291 = vmatpush3.bf16.msra.mxu1 %v11054_v41  ;;  %v11138_v41 = vld [vmem:[#allocation2 + $0x164] ss:$16 sps:$4 sm:$0xff]  }
 0xaf7   :  { %10292 = vmatprep.subr.bf16.mxu1 %v12209_v0 }
 0xafa   :  { %10293 = vmatpush3.bf16.msra.mxu1 %v11055_v39  ;;  %v11136_v39 = vld [vmem:[#allocation2 + $0x160] ss:$16 sps:$4 sm:$0xff]  }
 0xafb   :  { %10294 = vmatprep.subr.bf16.mxu1 %v12209_v0 }
 0xafe   :  { %10295 = vmatpush3.bf16.msra.mxu1 %v11056_v20  ;;  %v11144_v20 = vld [vmem:[#allocation2 + $0x184] ss:$16 sps:$4 sm:$0xff]  }
 0xaff   :  { %10296 = vmatprep.subr.bf16.mxu1 %v12209_v0 }
 0xb02   :  { %10297 = vmatpush3.bf16.msra.mxu1 %v11057_v27 }
 0xb03   :  { %10298 = vmatprep.subr.bf16.mxu1 %v12209_v0 }
 0xb06   :  { %10299 = vmatpush3.bf16.msra.mxu1 %v11058_v28  ;;  %v11073_v28 = vld [vmem:[#allocation2 + $0x8] ss:$16 sps:$4 sm:$0xff]  }
 0xb07   :  { %10300 = vmatprep.subr.bf16.mxu1 %v12209_v0 }
 0xb0a   :  { %10301 = vmatpush3.bf16.msra.mxu1 %v11059_v29 }
 0xb0b   :  { %10302 = vmatprep.subr.bf16.mxu1 %v12209_v0 }
 0xb0e   :  { %10303 = vmatpush3.bf16.msra.mxu1 %v11060_v30 }
 0xb0f   :  { %10304 = vmatprep.subr.bf16.mxu1 %v12209_v0 }
 0xb12   :  { %10305 = vmatpush3.bf16.msra.mxu1 %v11061_v31  ;;  %v11081_v31 = vld [vmem:[#allocation2 + $0x2c] ss:$16 sps:$4 sm:$0xff]  }
 0xb13   :  { %3714 = vmatprep.subr.bf16.mxu1 %v11072_v53  ;;  %v11133_v53 = vld [vmem:[#allocation2 + $0x148] ss:$16 sps:$4 sm:$0xff]  }
 0xb74   :  { %v3100_v22 = vpop.xlane.xlu0 %3099 }
 0xb75   :  { %v3101_v23 = vsub.f32 %v3097_v43, %v3100_v22  ;;  %v11108_v43 = vld [vmem:[#allocation2 + $0xc4] ss:$16 sps:$4 sm:$0xff]   ;;  %v11142_v22 = vld [vmem:[#allocation2 + $0x180] ss:$16 sps:$4 sm:$0xff]  }
 0xb77   :  { %v3102_v24 = vmul.f32 1.442695, %v3101_v23  ;;  %v11150_v23 = vld [vmem:[#allocation2 + $0x1a4] ss:$16 sps:$4 sm:$0xff]  }
 0xb79   :  { %11990 = vpow2.f32 %v3102_v24  ;;  %v11148_v24 = vld [vmem:[#allocation2 + $0x1a0] ss:$16 sps:$4 sm:$0xff]  }
 0xb83   :  { %v11991_v25 = vpop.eup %11990 }
 0xb84   :  { %v3104_v26 = vsel %vm160_vm1, %v11991_v25, 0.0 }
 0xb85   :  { %3105 = vadd.xlane.f32.xlu1 %v3104_v26  ;;  %v11154_v26 = vld [vmem:[#allocation2 + $0x1c0] ss:$16 sps:$4 sm:$0xff]  }
 0xbc8   :  { %v12799_v38 = vpop.f32.mrb[28].mxu1 }
 0xbc9   :  { %v10268_v42 = vpop.f32.mrb[29].mxu1 }
 0xbca   :  { %v2972_v60 = vpop.f32.mrb[30].mxu1  ;;  %v11099_v42 = vld [vmem:[#allocation2 + $0x8c] ss:$16 sps:$4 sm:$0xff]  }
 0xbcb   :  { %v10269_v44 = vpop.f32.mrb[31].mxu1  ;;  %v11097_v60 = vld [vmem:[#allocation2 + $0x88] ss:$16 sps:$4 sm:$0xff]  }
 0xbcc   :  { %v11105_v44 = vld [vmem:[#allocation2 + $0xac] ss:$16 sps:$4 sm:$0xff]  }
 0xc12   :  { %v3106_v45 = vpop.xlane.xlu1 %3105 }
 0xc13   :  { %11992 = vrcp.f32 %v3106_v45 }
 0xc1d   :  { %v11993_v46 = vpop.eup %11992 }
 0xc1e   :  { %v3108_v21 = vmul.f32 %v11993_v46, %v3106_v45  ;;  %v11103_v45 = vld [vmem:[#allocation2 + $0xa8] ss:$16 sps:$4 sm:$0xff]  }
 0xc20   :  { %v3109_v47 = vsub.f32 2.0, %v3108_v21  ;;  %v11117_v21 = vld [vmem:[#allocation2 + $0xec] ss:$16 sps:$4 sm:$0xff]  }
 0xc22   :  { %v3110_v48 = vmul.f32 %v11993_v46, %v3109_v47  ;;  %v11109_v46 = vld [vmem:[#allocation2 + $0xc8] ss:$16 sps:$4 sm:$0xff]  }
 0xc23   :  { %v11115_v47 = vld [vmem:[#allocation2 + $0xe8] ss:$16 sps:$4 sm:$0xff]  }
 0xc24   :  { %v3111_v49 = vmul.f32 %v11991_v25, %v3110_v48  ;;  %v11156_v25 = vld [vmem:[#allocation2 + $0x1c4] ss:$16 sps:$4 sm:$0xff]   ;;  %v11123_v48 = vld [vmem:[#allocation2 + $0x10c] ss:$16 sps:$4 sm:$0xff]  }
 0xc26   :  { %4456 = vst [vmem:[#allocation6 + $0x2] sm:$0x1] %v3111_v49  ;;  %v3112_v50 = vpack.c.bf16 %v3111_v49, %v3111_v49  ;;  %v11121_v49 = vld [vmem:[#allocation2 + $0x108] ss:$16 sps:$4 sm:$0xff]  }
 0xc28   :  { %10307 = vmatmul.mubr.bf16.vlgmr.msra.gmra.mrb[32].mxu1 %v3112_v50  ;;  %v11129_v50 = vld [vmem:[#allocation2 + $0x12c] ss:$16 sps:$4 sm:$0xff]  }
 0xc29   :  { %3746 = vmatprep.mubr.bf16.mxu1 %v12636_v19  ;;  %3715 = vmatpush1.bf16.msra.mxu1 %v11070_v52  ;;  %v11135_v52 = vld [vmem:[#allocation2 + $0x14c] ss:$16 sps:$4 sm:$0xff]  }
 0xc2a   :  { %3716 = vmatprep.subr.bf16.mxu1 %v11078_v40  ;;  %v11139_v40 = vld [vmem:[#allocation2 + $0x168] ss:$16 sps:$4 sm:$0xff]  }
 0xc2d   :  { %3717 = vmatpush1.bf16.msra.mxu1 %v11076_v55  ;;  %v11147_v55 = vld [vmem:[#allocation2 + $0x18c] ss:$16 sps:$4 sm:$0xff]  }
 0xc2e   :  { %3718 = vmatprep.subr.bf16.mxu1 %v11084_v57  ;;  %v11145_v57 = vld [vmem:[#allocation2 + $0x188] ss:$16 sps:$4 sm:$0xff]  }
 0xc31   :  { %3719 = vmatpush1.bf16.msra.mxu1 %v11082_v58  ;;  %v11153_v58 = vld [vmem:[#allocation2 + $0x1ac] ss:$16 sps:$4 sm:$0xff]  }
 0xc32   :  { %3720 = vmatprep.subr.bf16.mxu1 %v11090_v59  ;;  %v11151_v59 = vld [vmem:[#allocation2 + $0x1a8] ss:$16 sps:$4 sm:$0xff]  }
 0xc35   :  { %3721 = vmatpush1.bf16.msra.mxu1 %v11088_v61  ;;  %v11159_v61 = vld [vmem:[#allocation2 + $0x1cc] ss:$16 sps:$4 sm:$0xff]  }
 0xc36   :  { %3722 = vmatprep.subr.bf16.mxu1 %v11096_v62  ;;  %v11157_v62 = vld [vmem:[#allocation2 + $0x1c8] ss:$16 sps:$4 sm:$0xff]  }
 0xc39   :  { %3723 = vmatpush1.bf16.msra.mxu1 %v11094_v1  ;;  %v11162_v1 = vld [vmem:[#allocation2 + $0x1e4] ss:$16 sps:$4 sm:$0xff]  }
 0xc3a   :  { %3724 = vmatprep.subr.bf16.mxu1 %v11102_v2  ;;  %v11165_v2 = vld [vmem:[#allocation2 + $0x1ec] ss:$16 sps:$4 sm:$0xff]  }
 0xc3d   :  { %3725 = vmatpush1.bf16.msra.mxu1 %v11100_v3  ;;  %v11160_v3 = vld [vmem:[#allocation2 + $0x1e0] ss:$16 sps:$4 sm:$0xff]  }
 0xc3e   :  { %3726 = vmatprep.subr.bf16.mxu1 %v11108_v43  ;;  %v11163_v43 = vld [vmem:[#allocation2 + $0x1e8] ss:$16 sps:$4 sm:$0xff]  }
 0xc41   :  { %3727 = vmatpush1.bf16.msra.mxu1 %v11106_v4  ;;  %v11168_v4 = vld [vmem:[#allocation2 + $0x20c] ss:$16 sps:$4 sm:$0xff]  }
 0xc42   :  { %3728 = vmatprep.subr.bf16.mxu1 %v11114_v5  ;;  %v11171_v5 = vld [vmem:[#allocation2 + $0x204] ss:$16 sps:$4 sm:$0xff]  }
 0xc45   :  { %3729 = vmatpush1.bf16.msra.mxu1 %v11112_v6  ;;  %v3219_v6 = vrot.slane %v12722_v56, 1  ;;  %v11172_v56 = vld [vmem:[#allocation2 + $0x228] ss:$16 sps:$4 sm:$0xff]  }
 0xc46   :  { %3730 = vmatprep.subr.bf16.mxu1 %v11120_v8  ;;  %v3217_v8 = vld [vmem:[%s13560_s7 + $0x1] sm:$0x1] }
 0xc49   :  { %3731 = vmatpush1.bf16.msra.mxu1 %v11118_v11  ;;  %v3221_v11 = vadd.f32 %v3219_v6, %v3217_v8  ;;  %v11238_v6 = vld [vmem:[#allocation2 + $0x388] ss:$16 sps:$4 sm:$0xff]   ;;  %v11243_v8 = vld [vmem:[#allocation2 + $0x384] ss:$16 sps:$4 sm:$0xff]  }
 0xc4a   :  { %3732 = vmatprep.subr.bf16.mxu1 %v11126_v12 }
 0xc4d   :  { %3733 = vmatpush1.bf16.msra.mxu1 %v11124_v13 }
 0xc4e   :  { %3734 = vmatprep.subr.bf16.mxu1 %v11132_v14 }
 0xc51   :  { %3735 = vmatpush1.bf16.msra.mxu1 %v11130_v15 }
 0xc52   :  { %3736 = vmatprep.subr.bf16.mxu1 %v11138_v41 }
 0xc55   :  { %3737 = vmatpush1.bf16.msra.mxu1 %v11136_v39 }
 0xc56   :  { %3738 = vmatprep.subr.bf16.mxu1 %v11144_v20 }
 0xc59   :  { %3739 = vmatpush1.bf16.msra.mxu1 %v11142_v22  ;;  %v11166_v22 = vld [vmem:[#allocation2 + $0x208] ss:$16 sps:$4 sm:$0xff]  }
 0xc5a   :  { %3740 = vmatprep.subr.bf16.mxu1 %v11150_v23  ;;  %v11169_v23 = vld [vmem:[#allocation2 + $0x200] ss:$16 sps:$4 sm:$0xff]  }
 0xc5d   :  { %3741 = vmatpush1.bf16.msra.mxu1 %v11148_v24  ;;  %v11174_v24 = vld [vmem:[#allocation2 + $0x22c] ss:$16 sps:$4 sm:$0xff]  }
 0xc5e   :  { %3742 = vmatprep.subr.bf16.mxu1 %v11156_v25  ;;  %v11177_v25 = vld [vmem:[#allocation2 + $0x224] ss:$16 sps:$4 sm:$0xff]  }
 0xc61   :  { %3743 = vmatpush1.bf16.msra.mxu1 %v11154_v26  ;;  %v11175_v26 = vld [vmem:[#allocation2 + $0x220] ss:$16 sps:$4 sm:$0xff]  }
 0xc62   :  { %3744 = vmatprep.subr.bf16.mxu1 %v11162_v1  ;;  %v11229_v1 = vld [vmem:[#allocation2 + $0x340] ss:$16 sps:$4 sm:$0xff]  }
 0xc65   :  { %3745 = vmatpush1.bf16.msra.mxu1 %v11160_v3  ;;  %v11232_v3 = vld [vmem:[#allocation2 + $0x368] ss:$16 sps:$4 sm:$0xff]  }
 0xc66   :  { %4218 = vmatprep.subr.bf16.mxu1 %v11171_v5  ;;  %v11240_v5 = vld [vmem:[#allocation2 + $0x38c] ss:$16 sps:$4 sm:$0xff]  }
 0xcfb   :  { %v3211_v27 = vpop.f32.mrb[32].mxu1 }
 0xcfc   :  { %v3222_v29 = vpack.c.bf16 %v3211_v27, %v3211_v27  ;;  %v10308_v30 = vpop.f32.mrb[33].mxu1  ;;  %v11180_v27 = vld [vmem:[#allocation2 + $0x24c] ss:$16 sps:$4 sm:$0xff]  }
 0xcfd   :  { %v3214_v32 = vpop.f32.mrb[34].mxu1  ;;  %v11181_v30 = vld [vmem:[#allocation2 + $0x240] ss:$16 sps:$4 sm:$0xff]  }
 0xcfe   :  { %v10309_v33 = vpop.f32.mrb[35].mxu1  ;;  %10327 = vmatmul.mubr.bf16.vlgmr.msra.gmra.mrb[36].mxu0 %v3222_v29  ;;  %v11178_v29 = vld [vmem:[#allocation2 + $0x248] ss:$16 sps:$4 sm:$0xff]   ;;  %v11189_v32 = vld [vmem:[#allocation2 + $0x264] ss:$16 sps:$4 sm:$0xff]  }
 0xcff   :  { %3787 = vmatprep.mubr.bf16.mxu0 %v12636_v19  ;;  %3756 = vmatpush1.bf16.msra.mxu0 %v11073_v28  ;;  %v11111_v19 = vld [vmem:[#allocation2 + $0xcc] ss:$16 sps:$4 sm:$0xff]   ;;  %v11183_v28 = vld [vmem:[#allocation2 + $0x244] ss:$16 sps:$4 sm:$0xff]   ;;  %v11184_v33 = vld [vmem:[#allocation2 + $0x268] ss:$16 sps:$4 sm:$0xff]  }
 0xd00   :  { %3757 = vmatprep.subr.bf16.mxu0 %v11081_v31  ;;  %v11186_v31 = vld [vmem:[#allocation2 + $0x26c] ss:$16 sps:$4 sm:$0xff]  }
 0xd03   :  { %3758 = vmatpush1.bf16.msra.mxu0 %v11079_v10  ;;  %v11192_v10 = vld [vmem:[#allocation2 + $0x28c] ss:$16 sps:$4 sm:$0xff]  }
 0xd04   :  { %3759 = vmatprep.subr.bf16.mxu0 %v11087_v34  ;;  %v11190_v34 = vld [vmem:[#allocation2 + $0x288] ss:$16 sps:$4 sm:$0xff]  }
 0xd07   :  { %3760 = vmatpush1.bf16.msra.mxu0 %v11085_v35  ;;  %v11195_v35 = vld [vmem:[#allocation2 + $0x284] ss:$16 sps:$4 sm:$0xff]  }
 0xd08   :  { %3761 = vmatprep.subr.bf16.mxu0 %v11093_v36  ;;  %v11193_v36 = vld [vmem:[#allocation2 + $0x280] ss:$16 sps:$4 sm:$0xff]  }
 0xd0b   :  { %3762 = vmatpush1.bf16.msra.mxu0 %v11091_v37  ;;  %v11198_v37 = vld [vmem:[#allocation2 + $0x2ac] ss:$16 sps:$4 sm:$0xff]  }
 0xd0c   :  { %3763 = vmatprep.subr.bf16.mxu0 %v11099_v42  ;;  %v11196_v42 = vld [vmem:[#allocation2 + $0x2a8] ss:$16 sps:$4 sm:$0xff]  }
 0xd0f   :  { %3764 = vmatpush1.bf16.msra.mxu0 %v11097_v60  ;;  %v11201_v60 = vld [vmem:[#allocation2 + $0x2a4] ss:$16 sps:$4 sm:$0xff]  }
 0xd10   :  { %3765 = vmatprep.subr.bf16.mxu0 %v11105_v44  ;;  %v11199_v44 = vld [vmem:[#allocation2 + $0x2a0] ss:$16 sps:$4 sm:$0xff]  }
 0xd13   :  { %3766 = vmatpush1.bf16.msra.mxu0 %v11103_v45  ;;  %v11204_v45 = vld [vmem:[#allocation2 + $0x2cc] ss:$16 sps:$4 sm:$0xff]  }
 0xd14   :  { %3767 = vmatprep.subr.bf16.mxu0 %v11111_v19  ;;  %v11202_v19 = vld [vmem:[#allocation2 + $0x2c8] ss:$16 sps:$4 sm:$0xff]  }
 0xd17   :  { %3768 = vmatpush1.bf16.msra.mxu0 %v11109_v46  ;;  %v11207_v46 = vld [vmem:[#allocation2 + $0x2c4] ss:$16 sps:$4 sm:$0xff]  }
 0xd18   :  { %3769 = vmatprep.subr.bf16.mxu0 %v11117_v21  ;;  %v11205_v21 = vld [vmem:[#allocation2 + $0x2c0] ss:$16 sps:$4 sm:$0xff]  }
 0xd1b   :  { %3770 = vmatpush1.bf16.msra.mxu0 %v11115_v47  ;;  %v11210_v47 = vld [vmem:[#allocation2 + $0x2ec] ss:$16 sps:$4 sm:$0xff]  }
 0xd1c   :  { %3771 = vmatprep.subr.bf16.mxu0 %v11123_v48  ;;  %v11208_v48 = vld [vmem:[#allocation2 + $0x2e8] ss:$16 sps:$4 sm:$0xff]  }
 0xd1f   :  { %3772 = vmatpush1.bf16.msra.mxu0 %v11121_v49  ;;  %v11213_v49 = vld [vmem:[#allocation2 + $0x2e4] ss:$16 sps:$4 sm:$0xff]  }
 0xd20   :  { %3773 = vmatprep.subr.bf16.mxu0 %v11129_v50  ;;  %v11211_v50 = vld [vmem:[#allocation2 + $0x2e0] ss:$16 sps:$4 sm:$0xff]  }
 0xd23   :  { %3774 = vmatpush1.bf16.msra.mxu0 %v11127_v51  ;;  %v11216_v51 = vld [vmem:[#allocation2 + $0x30c] ss:$16 sps:$4 sm:$0xff]  }
 0xd24   :  { %3775 = vmatprep.subr.bf16.mxu0 %v11135_v52  ;;  %v11214_v52 = vld [vmem:[#allocation2 + $0x308] ss:$16 sps:$4 sm:$0xff]  }
 0xd27   :  { %3776 = vmatpush1.bf16.msra.mxu0 %v11133_v53  ;;  %v11219_v53 = vld [vmem:[#allocation2 + $0x304] ss:$16 sps:$4 sm:$0xff]  }
 0xd28   :  { %3777 = vmatprep.subr.bf16.mxu0 %v11141_v54  ;;  %v11217_v54 = vld [vmem:[#allocation2 + $0x300] ss:$16 sps:$4 sm:$0xff]  }
 0xd2b   :  { %3778 = vmatpush1.bf16.msra.mxu0 %v11139_v40  ;;  %v11222_v40 = vld [vmem:[#allocation2 + $0x32c] ss:$16 sps:$4 sm:$0xff]  }
 0xd2c   :  { %3779 = vmatprep.subr.bf16.mxu0 %v11147_v55  ;;  %v11220_v55 = vld [vmem:[#allocation2 + $0x328] ss:$16 sps:$4 sm:$0xff]  }
 0xd2f   :  { %3780 = vmatpush1.bf16.msra.mxu0 %v11145_v57  ;;  %v11225_v57 = vld [vmem:[#allocation2 + $0x324] ss:$16 sps:$4 sm:$0xff]  }
 0xd30   :  { %3781 = vmatprep.subr.bf16.mxu0 %v11153_v58  ;;  %v11223_v58 = vld [vmem:[#allocation2 + $0x320] ss:$16 sps:$4 sm:$0xff]  }
 0xd33   :  { %3782 = vmatpush1.bf16.msra.mxu0 %v11151_v59  ;;  %v11228_v59 = vld [vmem:[#allocation2 + $0x34c] ss:$16 sps:$4 sm:$0xff]  }
 0xd34   :  { %3783 = vmatprep.subr.bf16.mxu0 %v11159_v61  ;;  %v11226_v61 = vld [vmem:[#allocation2 + $0x348] ss:$16 sps:$4 sm:$0xff]  }
 0xd37   :  { %3784 = vmatpush1.bf16.msra.mxu0 %v11157_v62  ;;  %v11231_v62 = vld [vmem:[#allocation2 + $0x344] ss:$16 sps:$4 sm:$0xff]  }
 0xd38   :  { %3785 = vmatprep.subr.bf16.mxu0 %v11165_v2  ;;  %v11234_v2 = vld [vmem:[#allocation2 + $0x36c] ss:$16 sps:$4 sm:$0xff]  }
 0xd3b   :  { %3786 = vmatpush1.bf16.msra.mxu0 %v11163_v43  ;;  %v11237_v43 = vld [vmem:[#allocation2 + $0x364] ss:$16 sps:$4 sm:$0xff]  }
 0xd3c   :  { %4259 = vmatprep.subr.bf16.mxu0 %v11168_v4  ;;  %v11235_v4 = vld [vmem:[#allocation2 + $0x360] ss:$16 sps:$4 sm:$0xff]  }
 0xdd1   :  { %v3321_v12 = vpop.f32.mrb[36].mxu0 }
 0xdd2   :  { %v3327_v13 = vadd.f32 %v3321_v12, %v3221_v11  ;;  %v10328_v14 = vpop.f32.mrb[37].mxu0  ;;  %v11241_v11 = vld [vmem:[#allocation2 + $0x380] ss:$16 sps:$4 sm:$0xff]   ;;  %v11246_v12 = vld [vmem:[#allocation2 + $0x3ac] ss:$16 sps:$4 sm:$0xff]  }
 0xdd3   :  { %v3324_v15 = vpop.f32.mrb[38].mxu0  ;;  %v11249_v14 = vld [vmem:[#allocation2 + $0x3a4] ss:$16 sps:$4 sm:$0xff]  }
 0xdd4   :  { %v3328_v41 = vmax.f32 %v3327_v13, 0.0  ;;  %v10329_v39 = vpop.f32.mrb[39].mxu0  ;;  %v11244_v13 = vld [vmem:[#allocation2 + $0x3a8] ss:$16 sps:$4 sm:$0xff]   ;;  %v11247_v15 = vld [vmem:[#allocation2 + $0x3a0] ss:$16 sps:$4 sm:$0xff]  }
 0xdd5   :  { %v11255_v39 = vld [vmem:[#allocation2 + $0x3c4] ss:$16 sps:$4 sm:$0xff]  }
 0xdd6   :  { %v3329_v20 = vpack.c.bf16 %v3328_v41, %v3328_v41  ;;  %v11252_v41 = vld [vmem:[#allocation2 + $0x3cc] ss:$16 sps:$4 sm:$0xff]  }
 0xdd8   :  { %3747 = vmatmul.mubr.bf16.vlgmr.msra.gmra.mrb[36].mxu1 %v3329_v20  ;;  %3788 = vmatmul.mubr.bf16.vlgmr.msra.gmra.mrb[40].mxu0 %v3329_v20  ;;  %v11250_v20 = vld [vmem:[#allocation2 + $0x3c8] ss:$16 sps:$4 sm:$0xff]  }
 0xdd9   :  { %4250 = vmatprep.mubr.bf16.mxu1 %v12734_v18  ;;  %4291 = vmatprep.mubr.bf16.mxu0 %v12734_v18  ;;  %v11187_v18 = vld [vmem:[#allocation2 + $0x260] ss:$16 sps:$4 sm:$0xff]  }
 0xdda   :  { %4260 = vmatpush1.bf16.msra.mxu0 %v11166_v22  ;;  %4219 = vmatpush1.bf16.msra.mxu1 %v11169_v23  ;;  %v11253_v22 = vld [vmem:[#allocation2 + $0x3c0] ss:$16 sps:$4 sm:$0xff]   ;;  %v11258_v23 = vld [vmem:[#allocation2 + $0x3ec] ss:$16 sps:$4 sm:$0xff]  }
 0xddb   :  { %4261 = vmatprep.subr.bf16.mxu0 %v11174_v24  ;;  %4220 = vmatprep.subr.bf16.mxu1 %v11177_v25  ;;  %v11261_v24 = vld [vmem:[#allocation2 + $0x3e4] ss:$16 sps:$4 sm:$0xff]   ;;  %v11256_v25 = vld [vmem:[#allocation2 + $0x3e8] ss:$16 sps:$4 sm:$0xff]  }
 0xdde   :  { %4262 = vmatpush1.bf16.msra.mxu0 %v11172_v56  ;;  %4221 = vmatpush1.bf16.msra.mxu1 %v11175_v26  ;;  %v11259_v56 = vld [vmem:[#allocation2 + $0x3e0] ss:$16 sps:$4 sm:$0xff]  }
 0xddf   :  { %4263 = vmatprep.subr.bf16.mxu0 %v11180_v27  ;;  %4222 = vmatprep.subr.bf16.mxu1 %v11183_v28  ;;  %v3796_v26 = vld [vmem:[%s13560_s7 + $0x2] sm:$0x3] }
 0xde0   :  { %v3801_v27 = vrot.slane %v3796_v26, %v12414_v7 }
 0xde2   :  { %4264 = vmatpush1.bf16.msra.mxu0 %v11178_v29  ;;  %4223 = vmatpush1.bf16.msra.mxu1 %v11181_v30  ;;  %v3805_v30 = vrot.slane %v3796_v26, %v12419_v9 }
 0xde3   :  { %4265 = vmatprep.subr.bf16.mxu0 %v11186_v31  ;;  %4224 = vmatprep.subr.bf16.mxu1 %v11189_v32 }
 0xde6   :  { %4266 = vmatpush1.bf16.msra.mxu0 %v11184_v33  ;;  %4225 = vmatpush1.bf16.msra.mxu1 %v11187_v18 }
 0xde7   :  { %4267 = vmatprep.subr.bf16.mxu0 %v11192_v10  ;;  %4226 = vmatprep.subr.bf16.mxu1 %v11195_v35 }
 0xdea   :  { %4268 = vmatpush1.bf16.msra.mxu0 %v11190_v34  ;;  %4227 = vmatpush1.bf16.msra.mxu1 %v11193_v36 }
 0xdeb   :  { %4269 = vmatprep.subr.bf16.mxu0 %v11198_v37  ;;  %4228 = vmatprep.subr.bf16.mxu1 %v11201_v60 }
 0xdee   :  { %4270 = vmatpush1.bf16.msra.mxu0 %v11196_v42  ;;  %4229 = vmatpush1.bf16.msra.mxu1 %v11199_v44 }
 0xdef   :  { %4271 = vmatprep.subr.bf16.mxu0 %v11204_v45  ;;  %4230 = vmatprep.subr.bf16.mxu1 %v11207_v46 }
 0xdf2   :  { %4272 = vmatpush1.bf16.msra.mxu0 %v11202_v19  ;;  %4231 = vmatpush1.bf16.msra.mxu1 %v11205_v21  ;;  %v3824_v19 = vld [vmem:[%s13560_s7 + $0x5] sm:$0x1]  ;;  %v3822_v21 = vld [vmem:[%s13560_s7 + $0x4] sm:$0x1] }
 0xdf3   :  { %4273 = vmatprep.subr.bf16.mxu0 %v11210_v47  ;;  %4232 = vmatprep.subr.bf16.mxu1 %v11213_v49 }
 0xdf6   :  { %4274 = vmatpush1.bf16.msra.mxu0 %v11208_v48  ;;  %4233 = vmatpush1.bf16.msra.mxu1 %v11211_v50 }
 0xdf7   :  { %4275 = vmatprep.subr.bf16.mxu0 %v11216_v51  ;;  %4234 = vmatprep.subr.bf16.mxu1 %v11219_v53 }
 0xdfa   :  { %4276 = vmatpush1.bf16.msra.mxu0 %v11214_v52  ;;  %4235 = vmatpush1.bf16.msra.mxu1 %v11217_v54 }
 0xdfb   :  { %4277 = vmatprep.subr.bf16.mxu0 %v11222_v40  ;;  %4236 = vmatprep.subr.bf16.mxu1 %v11225_v57 }
 0xdfe   :  { %4278 = vmatpush1.bf16.msra.mxu0 %v11220_v55  ;;  %4237 = vmatpush1.bf16.msra.mxu1 %v11223_v58  ;;  %v11262_v58 = vld [vmem:[%s13556_s3] sm:$0xff]  }
 0xdff   :  { %4279 = vmatprep.subr.bf16.mxu0 %v11228_v59  ;;  %4238 = vmatprep.subr.bf16.mxu1 %v11231_v62  ;;  %v11265_v62 = vld [vmem:[%s13556_s3 + $0x18] sm:$0xff]  }
 0xe02   :  { %4280 = vmatpush1.bf16.msra.mxu0 %v11226_v61  ;;  %4239 = vmatpush1.bf16.msra.mxu1 %v11229_v1  ;;  %v11264_v61 = vld [vmem:[%s13556_s3 + $0x10] sm:$0xff]   ;;  %v11266_v1 = vld [vmem:[%s13556_s3 + $0x20] sm:$0xff]  }
 0xe03   :  { %4281 = vmatprep.subr.bf16.mxu0 %v11234_v2  ;;  %4240 = vmatprep.subr.bf16.mxu1 %v11237_v43  ;;  %v11267_v2 = vld [vmem:[%s13556_s3 + $0x28] sm:$0xff]   ;;  %v11269_v43 = vld [vmem:[%s13556_s3 + $0x38] sm:$0xff]  }
 0xe06   :  { %4282 = vmatpush1.bf16.msra.mxu0 %v11232_v3  ;;  %4241 = vmatpush1.bf16.msra.mxu1 %v11235_v4  ;;  %v11268_v3 = vld [vmem:[%s13556_s3 + $0x30] sm:$0xff]   ;;  %v11270_v4 = vld [vmem:[%s13559_s6] sm:$0xff]  }
 0xe07   :  { %4283 = vmatprep.subr.bf16.mxu0 %v11240_v5  ;;  %4242 = vmatprep.subr.bf16.mxu1 %v11243_v8  ;;  %v11271_v5 = vld [vmem:[%s13559_s6 + $0x8] sm:$0xff]   ;;  %v11273_v8 = vld [vmem:[%s13559_s6 + $0x18] sm:$0xff]  }
 0xe0a   :  { %4284 = vmatpush1.bf16.msra.mxu0 %v11238_v6  ;;  %4243 = vmatpush1.bf16.msra.mxu1 %v11241_v11  ;;  %v11272_v6 = vld [vmem:[%s13559_s6 + $0x10] sm:$0xff]   ;;  %v11274_v11 = vld [vmem:[%s13559_s6 + $0x20] sm:$0xff]  }
 0xe0b   :  { %4285 = vmatprep.subr.bf16.mxu0 %v11246_v12  ;;  %4244 = vmatprep.subr.bf16.mxu1 %v11249_v14  ;;  %v11275_v12 = vld [vmem:[%s13559_s6 + $0x28] sm:$0xff]   ;;  %v11277_v14 = vld [vmem:[%s13559_s6 + $0x38] sm:$0xff]  }
 0xe0e   :  { %4286 = vmatpush1.bf16.msra.mxu0 %v11244_v13  ;;  %4245 = vmatpush1.bf16.msra.mxu1 %v11247_v15  ;;  %v11276_v13 = vld [vmem:[%s13559_s6 + $0x30] sm:$0xff]   ;;  %v4300_v15 = vld [vmem:[%s13560_s7 + $0x6] sm:$0x3] }
 0xe0f   :  { %4287 = vmatprep.subr.bf16.mxu0 %v11252_v41  ;;  %4246 = vmatprep.subr.bf16.mxu1 %v11255_v39  ;;  %v4305_v41 = vrot.slane %v4300_v15, %v12414_v7 }
 0xe12   :  { %4288 = vmatpush1.bf16.msra.mxu0 %v11250_v20  ;;  %4247 = vmatpush1.bf16.msra.mxu1 %v11253_v22  ;;  %v4309_v22 = vrot.slane %v4300_v15, %v12419_v9  ;;  %v11288_v15 = vld [vmem:[%s13557_s4 + $0x10] sm:$0xff]  }
 0xe13   :  { %4289 = vmatprep.subr.bf16.mxu0 %v11258_v23  ;;  %4248 = vmatprep.subr.bf16.mxu1 %v11261_v24 }
 0xe16   :  { %4290 = vmatpush1.bf16.msra.mxu0 %v11256_v25  ;;  %4249 = vmatpush1.bf16.msra.mxu1 %v11259_v56 }
 0xe17   :  { %10350 = vmatprep.subr.bf16.mxu0 %v12209_v0  ;;  %10330 = vmatprep.subr.bf16.mxu1 %v12209_v0 }
 0xeab   :  { %v3748_v28 = vpop.f32.mrb[36].mxu1  ;;  %v3789_v29 = vpop.f32.mrb[40].mxu0 }
 0xeac   :  { %v3808_v31 = vadd.f32 %v3801_v27, %v3748_v28  ;;  %v3750_v32 = vpop.f32.mrb[37].mxu1  ;;  %v3791_v33 = vpop.f32.mrb[41].mxu0  ;;  %v3823_v49 = vadd.f32 %v3822_v21, %v3789_v29 }
 0xead   :  { %v3752_v18 = vpop.f32.mrb[38].mxu1  ;;  %v3793_v10 = vpop.f32.mrb[42].mxu0  ;;  %v3809_v37 = vadd.f32 %v3805_v30, %v3750_v32  ;;  %v3825_v47 = vadd.f32 %v3824_v19, %v3791_v33 }
 0xeae   :  { %v9323_v34 = vmul.f32 -1.442695, %v3808_v31  ;;  %v3753_v35 = vpop.f32.mrb[39].mxu1  ;;  %v3794_v36 = vpop.f32.mrb[43].mxu0  ;;  %v4328_v10 = vld [vmem:[%s13560_s7 + $0x9] sm:$0x1] }
 0xeaf   :  { %v9324_v42 = vmul.f32 -1.442695, %v3809_v37  ;;  %v12919_v36 = vld [vmem:[%s13553_s0 + $0x3] ss:$8 sm:$0x3] }
 0xeb0   :  { %11994 = vpow2.f32 %v9323_v34  ;;  %v4326_v34 = vld [vmem:[%s13560_s7 + $0x8] sm:$0x1]  ;;  %v4459_v37 = vld [vmem:[%s13560_s7] sm:$0x1] }
 0xeb1   :  { %11996 = vpow2.f32 %v9324_v42  ;;  %v4460_v19 = vadd.f32 %v12919_v36, %v4459_v37  ;;  %v11300_v37 = vld [vmem:[#allocation2 + $0x20] ss:$16 sps:$4 sm:$0xff]  }
 0xeba   :  { %v11995_v60 = vpop.eup %11994 }
 0xebb   :  { %v3816_v44 = vadd.f32 1.0, %v11995_v60  ;;  %v11997_v45 = vpop.eup %11996 }
 0xebc   :  { %v3817_v46 = vadd.f32 1.0, %v11997_v45 }
 0xebd   :  { %11998 = vrcp.f32 %v3816_v44 }
 0xebe   :  { %12000 = vrcp.f32 %v3817_v46 }
 0xec7   :  { %v11999_v48 = vpop.eup %11998 }
 0xec8   :  { %v3826_v50 = vmul.f32 %v11999_v48, %v3825_v47  ;;  %v12001_v52 = vpop.eup %12000 }
 0xec9   :  { %v3829_v53 = vsub.f32 1.0, %v12001_v52  ;;  %v3831_v40 = vmul.f32 %v12001_v52, %v12629_v17  ;;  %v11263_v17 = vld [vmem:[%s13556_s3 + $0x8] sm:$0xff]  }
 0xeca   :  { %v3827_v51 = vadd.f32 %v3826_v50, %v3823_v49 }
 0xecc   :  { %12002 = vtanh.f32 %v3827_v51 }
 0xed6   :  { %v12003_v54 = vpop.eup %12002 }
 0xed7   :  { %v3830_v55 = vmul.f32 %v12003_v54, %v3829_v53 }
 0xed9   :  { %v12826_v57 = vadd.f32 %v3831_v40, %v3830_v55 }
 0xedb   :  { %v12833_v59 = vpack.c.bf16 %v12826_v57, %v12826_v57 }
 0xedd   :  { %4251 = vmatmul.mubr.bf16.vlgmr.msra.gmra.mrb[40].mxu1 %v12833_v59  ;;  %4292 = vmatmul.mubr.bf16.vlgmr.msra.gmra.mrb[44].mxu0 %v12833_v59 }
 0xede   :  { %10351 = vmatpush3.bf16.msra.mxu0 %v11262_v58  ;;  %10366 = vmatprep.mubr.msk.bf16.mxu0 %vm12210_vm0, %v12209_v0 }
 0xedf   :  { %10352 = vmatprep.subr.bf16.mxu0 %v12209_v0  ;;  %10346 = vmatprep.mubr.msk.bf16.mxu1 %vm12210_vm0, %v12209_v0 }
 0xee0   :  { %10331 = vmatpush3.bf16.msra.mxu1 %v11270_v4 }
 0xee1   :  { %10332 = vmatprep.subr.bf16.mxu1 %v12209_v0 }
 0xee2   :  { %10353 = vmatpush3.bf16.msra.mxu0 %v11263_v17 }
 0xee3   :  { %10354 = vmatprep.subr.bf16.mxu0 %v12209_v0 }
 0xee4   :  { %10333 = vmatpush3.bf16.msra.mxu1 %v11271_v5  ;;  %v11281_v5 = vld [vmem:[%s13555_s2 + $0x18] sm:$0xff]  }
 0xee5   :  { %10334 = vmatprep.subr.bf16.mxu1 %v12209_v0 }
 0xee6   :  { %10355 = vmatpush3.bf16.msra.mxu0 %v11264_v61  ;;  %v11278_v61 = vld [vmem:[%s13555_s2] sm:$0xff]  }
 0xee7   :  { %10356 = vmatprep.subr.bf16.mxu0 %v12209_v0 }
 0xee8   :  { %10335 = vmatpush3.bf16.msra.mxu1 %v11272_v6  ;;  %v11282_v6 = vld [vmem:[%s13555_s2 + $0x20] sm:$0xff]  }
 0xee9   :  { %10336 = vmatprep.subr.bf16.mxu1 %v12209_v0 }
 0xeea   :  { %10357 = vmatpush3.bf16.msra.mxu0 %v11265_v62  ;;  %v11280_v62 = vld [vmem:[%s13555_s2 + $0x10] sm:$0xff]  }
 0xeeb   :  { %10358 = vmatprep.subr.bf16.mxu0 %v12209_v0 }
 0xeec   :  { %10337 = vmatpush3.bf16.msra.mxu1 %v11273_v8  ;;  %v11283_v8 = vld [vmem:[%s13555_s2 + $0x28] sm:$0xff]  }
 0xeed   :  { %10338 = vmatprep.subr.bf16.mxu1 %v12209_v0 }
 0xeee   :  { %10359 = vmatpush3.bf16.msra.mxu0 %v11266_v1 }
 0xeef   :  { %10360 = vmatprep.subr.bf16.mxu0 %v12209_v0 }
 0xef0   :  { %10339 = vmatpush3.bf16.msra.mxu1 %v11274_v11  ;;  %v11284_v11 = vld [vmem:[%s13555_s2 + $0x30] sm:$0xff]  }
 0xef1   :  { %10340 = vmatprep.subr.bf16.mxu1 %v12209_v0 }
 0xef2   :  { %10361 = vmatpush3.bf16.msra.mxu0 %v11267_v2 }
 0xef3   :  { %10362 = vmatprep.subr.bf16.mxu0 %v12209_v0 }
 0xef4   :  { %10341 = vmatpush3.bf16.msra.mxu1 %v11275_v12  ;;  %v11285_v12 = vld [vmem:[%s13555_s2 + $0x38] sm:$0xff]  }
 0xef5   :  { %10342 = vmatprep.subr.bf16.mxu1 %v12209_v0 }
 0xef6   :  { %10363 = vmatpush3.bf16.msra.mxu0 %v11268_v3 }
 0xef7   :  { %10364 = vmatprep.subr.bf16.mxu0 %v12209_v0 }
 0xef8   :  { %10343 = vmatpush3.bf16.msra.mxu1 %v11276_v13  ;;  %v11286_v13 = vld [vmem:[%s13557_s4] sm:$0xff]  }
 0xef9   :  { %10344 = vmatprep.subr.bf16.mxu1 %v12209_v0 }
 0xefa   :  { %10365 = vmatpush3.bf16.msra.mxu0 %v11269_v43 }
 0xefb   :  { %10390 = vmatprep.subr.bf16.mxu0 %v12209_v0 }
 0xefc   :  { %10345 = vmatpush3.bf16.msra.mxu1 %v11277_v14  ;;  %v11287_v14 = vld [vmem:[%s13557_s4 + $0x8] sm:$0xff]  }
 0xefd   :  { %10367 = vmatmul.mubr.bf16.vlgmr.msra.gmra.mrb[48].mxu0 %v12833_v59  ;;  %10370 = vmatprep.subr.bf16.mxu1 %v12209_v0 }
 0xefe   :  { %10406 = vmatprep.mubr.msk.bf16.mxu0 %vm12210_vm0, %v12209_v0  ;;  %10391 = vmatpush3.bf16.msra.mxu0 %v11286_v13  ;;  %v11305_v13 = vld [vmem:[#allocation2 + $0x2c] ss:$16 sps:$4 sm:$0xff]  }
 0xeff   :  { %10392 = vmatprep.subr.bf16.mxu0 %v12209_v0 }
 0xf02   :  { %10393 = vmatpush3.bf16.msra.mxu0 %v11287_v14 }
 0xf03   :  { %10394 = vmatprep.subr.bf16.mxu0 %v12209_v0 }
 0xf06   :  { %10395 = vmatpush3.bf16.msra.mxu0 %v11288_v15 }
 0xf07   :  { %10396 = vmatprep.subr.bf16.mxu0 %v12209_v0 }
 0xfb0   :  { %v4252_v39 = vpop.f32.mrb[40].mxu1  ;;  %v4293_v20 = vpop.f32.mrb[44].mxu0 }
 0xfb1   :  { %v4312_v23 = vadd.f32 %v4305_v41, %v4252_v39  ;;  %v4254_v24 = vpop.f32.mrb[41].mxu1  ;;  %v4295_v25 = vpop.f32.mrb[45].mxu0  ;;  %v4327_v44 = vadd.f32 %v4326_v34, %v4293_v20  ;;  %v11289_v41 = vld [vmem:[%s13557_s4 + $0x18] sm:$0xff]   ;;  %v11290_v39 = vld [vmem:[%s13557_s4 + $0x20] sm:$0xff]   ;;  %v11291_v20 = vld [vmem:[%s13557_s4 + $0x28] sm:$0xff]  }
 0xfb2   :  { %v4256_v56 = vpop.f32.mrb[42].mxu1  ;;  %v4297_v26 = vpop.f32.mrb[46].mxu0  ;;  %v4313_v30 = vadd.f32 %v4309_v22, %v4254_v24  ;;  %v4329_v42 = vadd.f32 %v4328_v10, %v4295_v25  ;;  %10397 = vmatpush3.bf16.msra.mxu0 %v11289_v41  ;;  %v11292_v22 = vld [vmem:[%s13557_s4 + $0x30] sm:$0xff]   ;;  %v11299_v34 = vld [vmem:[#allocation2 + $0xc] ss:$16 sps:$4 sm:$0xff]  }
 0xfb3   :  { %v9389_v27 = vmul.f32 -1.442695, %v4312_v23  ;;  %v4257_v28 = vpop.f32.mrb[43].mxu1  ;;  %v4298_v29 = vpop.f32.mrb[47].mxu0  ;;  %10398 = vmatprep.subr.bf16.mxu0 %v12209_v0  ;;  %v11296_v10 = vld [vmem:[#allocation2 + $0x4] ss:$16 sps:$4 sm:$0xff]  }
 0xfb4   :  { %v9390_v31 = vmul.f32 -1.442695, %v4313_v30  ;;  %v11303_v41 = vld [vmem:[#allocation2 + $0x28] ss:$16 sps:$4 sm:$0xff]  }
 0xfb5   :  { %12004 = vpow2.f32 %v9389_v27 }
 0xfb6   :  { %12006 = vpow2.f32 %v9390_v31  ;;  %10399 = vmatpush3.bf16.msra.mxu0 %v11290_v39  ;;  %v11311_v39 = vld [vmem:[#allocation2 + $0x4c] ss:$16 sps:$4 sm:$0xff]  }
 0xfb7   :  { %10400 = vmatprep.subr.bf16.mxu0 %v12209_v0 }
 0xfba   :  { %10401 = vmatpush3.bf16.msra.mxu0 %v11291_v20  ;;  %v11309_v20 = vld [vmem:[#allocation2 + $0x48] ss:$16 sps:$4 sm:$0xff]  }
 0xfbb   :  { %10402 = vmatprep.subr.bf16.mxu0 %v12209_v0 }
 0xfbe   :  { %10403 = vmatpush3.bf16.msra.mxu0 %v11292_v22  ;;  %v11317_v22 = vld [vmem:[#allocation2 + $0x6c] ss:$16 sps:$4 sm:$0xff]  }
 0xfbf   :  { %v12005_v32 = vpop.eup %12004  ;;  %10404 = vmatprep.subr.bf16.mxu0 %v12209_v0 }
 0xfc0   :  { %v4320_v33 = vadd.f32 1.0, %v12005_v32  ;;  %v12007_v18 = vpop.eup %12006 }
 0xfc1   :  { %v4321_v35 = vadd.f32 1.0, %v12007_v18  ;;  %v11294_v18 = vld [vmem:[#allocation2] ss:$16 sps:$4 sm:$0xff]  }
 0xfc2   :  { %12008 = vrcp.f32 %v4320_v33  ;;  %v11293_v33 = vld [vmem:[%s13557_s4 + $0x38] sm:$0xff]  }
 0xfc3   :  { %12010 = vrcp.f32 %v4321_v35  ;;  %10405 = vmatpush3.bf16.msra.mxu0 %v11293_v33  ;;  %v11302_v35 = vld [vmem:[#allocation2 + $0x24] ss:$16 sps:$4 sm:$0xff]   ;;  %v11353_v33 = vld [vmem:[#allocation2 + $0x12c] ss:$16 sps:$4 sm:$0xff]  }
 0xfc4   :  { %5223 = vmatprep.subr.bf16.mxu0 %v11299_v34  ;;  %v11357_v34 = vld [vmem:[#allocation2 + $0x148] ss:$16 sps:$4 sm:$0xff]  }
 0xfcc   :  { %v12009_v60 = vpop.eup %12008 }
 0xfcd   :  { %v4330_v45 = vmul.f32 %v12009_v60, %v4329_v42  ;;  %v12011_v52 = vpop.eup %12010  ;;  %v11308_v42 = vld [vmem:[#allocation2 + $0x44] ss:$16 sps:$4 sm:$0xff]   ;;  %v11306_v60 = vld [vmem:[#allocation2 + $0x40] ss:$16 sps:$4 sm:$0xff]  }
 0xfce   :  { %v4333_v53 = vsub.f32 1.0, %v12011_v52  ;;  %v4335_v55 = vmul.f32 %v12011_v52, %v12730_v16  ;;  %v11279_v16 = vld [vmem:[%s13555_s2 + $0x8] sm:$0xff]   ;;  %v11344_v52 = vld [vmem:[#allocation2 + $0x104] ss:$16 sps:$4 sm:$0xff]  }
 0xfcf   :  { %v4331_v46 = vadd.f32 %v4330_v45, %v4327_v44  ;;  %v11314_v44 = vld [vmem:[#allocation2 + $0x64] ss:$16 sps:$4 sm:$0xff]   ;;  %v11312_v45 = vld [vmem:[#allocation2 + $0x60] ss:$16 sps:$4 sm:$0xff]  }
 0xfd0   :  { %v4559_v21 = vpop.f32.mrb[48].mxu0 }
 0xfd1   :  { %12012 = vtanh.f32 %v4331_v46  ;;  %v4565_v47 = vadd.f32 %v4559_v21, %v4460_v19  ;;  %v10368_v48 = vpop.f32.mrb[49].mxu0  ;;  %v11320_v19 = vld [vmem:[#allocation2 + $0x84] ss:$16 sps:$4 sm:$0xff]   ;;  %v11318_v46 = vld [vmem:[#allocation2 + $0x80] ss:$16 sps:$4 sm:$0xff]  }
 0xfd2   :  { %v4562_v49 = vpop.f32.mrb[50].mxu0  ;;  %v11326_v21 = vld [vmem:[#allocation2 + $0xa4] ss:$16 sps:$4 sm:$0xff]  }
 0xfd3   :  { %v10369_v50 = vpop.f32.mrb[51].mxu0  ;;  %v4566_v51 = vsel %vm160_vm1, %v4565_v47, -inf  ;;  %v11332_v48 = vld [vmem:[#allocation2 + $0xc4] ss:$16 sps:$4 sm:$0xff]   ;;  %v11330_v49 = vld [vmem:[#allocation2 + $0xc0] ss:$16 sps:$4 sm:$0xff]  }
 0xfd4   :  { %4567 = vmax.xlane.f32.xlu0 %v4566_v51  ;;  %v11338_v50 = vld [vmem:[#allocation2 + $0xe4] ss:$16 sps:$4 sm:$0xff]   ;;  %v11336_v51 = vld [vmem:[#allocation2 + $0xe0] ss:$16 sps:$4 sm:$0xff]  }
 0xfdb   :  { %v12013_v54 = vpop.eup %12012 }
 0xfdc   :  { %v4334_v40 = vmul.f32 %v12013_v54, %v4333_v53  ;;  %v11342_v53 = vld [vmem:[#allocation2 + $0x100] ss:$16 sps:$4 sm:$0xff]   ;;  %v11350_v54 = vld [vmem:[#allocation2 + $0x124] ss:$16 sps:$4 sm:$0xff]  }
 0xfde   :  { %v12927_v58 = vadd.f32 %v4335_v55, %v4334_v40  ;;  %v11348_v40 = vld [vmem:[#allocation2 + $0x120] ss:$16 sps:$4 sm:$0xff]   ;;  %v11356_v55 = vld [vmem:[#allocation2 + $0x144] ss:$16 sps:$4 sm:$0xff]  }
 0xfe0   :  { %v12931_v17 = vpack.c.bf16 %v12927_v58, %v12927_v58 }
 0xfe2   :  { %10347 = vmatmul.mubr.bf16.vlgmr.msra.gmra.mrb[44].mxu1 %v12931_v17 }
 0xfe3   :  { %10386 = vmatprep.mubr.msk.bf16.mxu1 %vm12210_vm0, %v12209_v0  ;;  %10371 = vmatpush3.bf16.msra.mxu1 %v11278_v61  ;;  %v11354_v61 = vld [vmem:[#allocation2 + $0x140] ss:$16 sps:$4 sm:$0xff]  }
 0xfe4   :  { %10372 = vmatprep.subr.bf16.mxu1 %v12209_v0 }
 0xfe7   :  { %10373 = vmatpush3.bf16.msra.mxu1 %v11279_v16  ;;  %v11362_v16 = vld [vmem:[#allocation2 + $0x164] ss:$16 sps:$4 sm:$0xff]  }
 0xfe8   :  { %10374 = vmatprep.subr.bf16.mxu1 %v12209_v0 }
 0xfeb   :  { %10375 = vmatpush3.bf16.msra.mxu1 %v11280_v62  ;;  %v11360_v62 = vld [vmem:[#allocation2 + $0x160] ss:$16 sps:$4 sm:$0xff]  }
 0xfec   :  { %10376 = vmatprep.subr.bf16.mxu1 %v12209_v0 }
 0xfef   :  { %10377 = vmatpush3.bf16.msra.mxu1 %v11281_v5  ;;  %v11378_v5 = vld [vmem:[#allocation2 + $0x1c0] ss:$16 sps:$4 sm:$0xff]  }
 0xff0   :  { %10378 = vmatprep.subr.bf16.mxu1 %v12209_v0 }
 0xff3   :  { %10379 = vmatpush3.bf16.msra.mxu1 %v11282_v6 }
 0xff4   :  { %10380 = vmatprep.subr.bf16.mxu1 %v12209_v0 }
 0xff7   :  { %10381 = vmatpush3.bf16.msra.mxu1 %v11283_v8  ;;  %v11297_v8 = vld [vmem:[#allocation2 + $0x8] ss:$16 sps:$4 sm:$0xff]  }
 0xff8   :  { %10382 = vmatprep.subr.bf16.mxu1 %v12209_v0 }
 0xffb   :  { %10383 = vmatpush3.bf16.msra.mxu1 %v11284_v11 }
 0xffc   :  { %10384 = vmatprep.subr.bf16.mxu1 %v12209_v0 }
 0xfff   :  { %10385 = vmatpush3.bf16.msra.mxu1 %v11285_v12 }
0x1000   :  { %5182 = vmatprep.subr.bf16.mxu1 %v11296_v10  ;;  %v11359_v10 = vld [vmem:[#allocation2 + $0x14c] ss:$16 sps:$4 sm:$0xff]  }
0x1061   :  { %v4568_v1 = vpop.xlane.xlu0 %4567 }
0x1062   :  { %v4569_v2 = vsub.f32 %v4565_v47, %v4568_v1  ;;  %v11324_v47 = vld [vmem:[#allocation2 + $0xa0] ss:$16 sps:$4 sm:$0xff]   ;;  %v11368_v1 = vld [vmem:[#allocation2 + $0x184] ss:$16 sps:$4 sm:$0xff]  }
0x1064   :  { %v4570_v3 = vmul.f32 1.442695, %v4569_v2  ;;  %v11366_v2 = vld [vmem:[#allocation2 + $0x180] ss:$16 sps:$4 sm:$0xff]  }
0x1066   :  { %12014 = vpow2.f32 %v4570_v3  ;;  %v11374_v3 = vld [vmem:[#allocation2 + $0x1a4] ss:$16 sps:$4 sm:$0xff]  }
0x1070   :  { %v12015_v43 = vpop.eup %12014 }
0x1071   :  { %v4572_v4 = vsel %vm160_vm1, %v12015_v43, 0.0 }
0x1072   :  { %4573 = vadd.xlane.f32.xlu1 %v4572_v4  ;;  %v11380_v4 = vld [vmem:[#allocation2 + $0x1c4] ss:$16 sps:$4 sm:$0xff]  }
0x10b5   :  { %v12996_v23 = vpop.f32.mrb[44].mxu1 }
0x10b6   :  { %v10348_v24 = vpop.f32.mrb[45].mxu1 }
0x10b7   :  { %v4440_v25 = vpop.f32.mrb[46].mxu1  ;;  %v11315_v24 = vld [vmem:[#allocation2 + $0x68] ss:$16 sps:$4 sm:$0xff]  }
0x10b8   :  { %v10349_v56 = vpop.f32.mrb[47].mxu1  ;;  %v11323_v25 = vld [vmem:[#allocation2 + $0x8c] ss:$16 sps:$4 sm:$0xff]  }
0x10b9   :  { %v11321_v56 = vld [vmem:[#allocation2 + $0x88] ss:$16 sps:$4 sm:$0xff]  }
0x10ff   :  { %v4574_v26 = vpop.xlane.xlu1 %4573 }
0x1100   :  { %12016 = vrcp.f32 %v4574_v26 }
0x110a   :  { %v12017_v27 = vpop.eup %12016 }
0x110b   :  { %v4576_v28 = vmul.f32 %v12017_v27, %v4574_v26  ;;  %v11329_v26 = vld [vmem:[#allocation2 + $0xac] ss:$16 sps:$4 sm:$0xff]  }
0x110d   :  { %v4577_v29 = vsub.f32 2.0, %v4576_v28  ;;  %v11333_v28 = vld [vmem:[#allocation2 + $0xc8] ss:$16 sps:$4 sm:$0xff]  }
0x110f   :  { %v4578_v30 = vmul.f32 %v12017_v27, %v4577_v29  ;;  %v11327_v27 = vld [vmem:[#allocation2 + $0xa8] ss:$16 sps:$4 sm:$0xff]   ;;  %v11341_v29 = vld [vmem:[#allocation2 + $0xec] ss:$16 sps:$4 sm:$0xff]  }
0x1111   :  { %v4579_v31 = vmul.f32 %v12015_v43, %v4578_v30  ;;  %v11372_v43 = vld [vmem:[#allocation2 + $0x1a0] ss:$16 sps:$4 sm:$0xff]   ;;  %v11339_v30 = vld [vmem:[#allocation2 + $0xe8] ss:$16 sps:$4 sm:$0xff]  }
0x1113   :  { %5924 = vst [vmem:[#allocation6 + $0x3] sm:$0x1] %v4579_v31  ;;  %v4580_v32 = vpack.c.bf16 %v4579_v31, %v4579_v31  ;;  %v11347_v31 = vld [vmem:[#allocation2 + $0x10c] ss:$16 sps:$4 sm:$0xff]  }
0x1115   :  { %10387 = vmatmul.mubr.bf16.vlgmr.msra.gmra.mrb[48].mxu1 %v4580_v32  ;;  %v11345_v32 = vld [vmem:[#allocation2 + $0x108] ss:$16 sps:$4 sm:$0xff]  }
0x1116   :  { %5214 = vmatprep.mubr.bf16.mxu1 %v12833_v59  ;;  %5183 = vmatpush1.bf16.msra.mxu1 %v11294_v18  ;;  %v11351_v18 = vld [vmem:[#allocation2 + $0x128] ss:$16 sps:$4 sm:$0xff]  }
0x1117   :  { %5184 = vmatprep.subr.bf16.mxu1 %v11302_v35  ;;  %v11365_v35 = vld [vmem:[#allocation2 + $0x16c] ss:$16 sps:$4 sm:$0xff]  }
0x111a   :  { %5185 = vmatpush1.bf16.msra.mxu1 %v11300_v37  ;;  %v11363_v37 = vld [vmem:[#allocation2 + $0x168] ss:$16 sps:$4 sm:$0xff]  }
0x111b   :  { %5186 = vmatprep.subr.bf16.mxu1 %v11308_v42  ;;  %v11371_v42 = vld [vmem:[#allocation2 + $0x18c] ss:$16 sps:$4 sm:$0xff]  }
0x111e   :  { %5187 = vmatpush1.bf16.msra.mxu1 %v11306_v60  ;;  %v11369_v60 = vld [vmem:[#allocation2 + $0x188] ss:$16 sps:$4 sm:$0xff]  }
0x111f   :  { %5188 = vmatprep.subr.bf16.mxu1 %v11314_v44  ;;  %v11377_v44 = vld [vmem:[#allocation2 + $0x1ac] ss:$16 sps:$4 sm:$0xff]  }
0x1122   :  { %5189 = vmatpush1.bf16.msra.mxu1 %v11312_v45  ;;  %v11375_v45 = vld [vmem:[#allocation2 + $0x1a8] ss:$16 sps:$4 sm:$0xff]  }
0x1123   :  { %5190 = vmatprep.subr.bf16.mxu1 %v11320_v19  ;;  %v11383_v19 = vld [vmem:[#allocation2 + $0x1cc] ss:$16 sps:$4 sm:$0xff]  }
0x1126   :  { %5191 = vmatpush1.bf16.msra.mxu1 %v11318_v46  ;;  %v11381_v46 = vld [vmem:[#allocation2 + $0x1c8] ss:$16 sps:$4 sm:$0xff]  }
0x1127   :  { %5192 = vmatprep.subr.bf16.mxu1 %v11326_v21  ;;  %v11386_v21 = vld [vmem:[#allocation2 + $0x1e4] ss:$16 sps:$4 sm:$0xff]  }
0x112a   :  { %5193 = vmatpush1.bf16.msra.mxu1 %v11324_v47  ;;  %v11389_v47 = vld [vmem:[#allocation2 + $0x1ec] ss:$16 sps:$4 sm:$0xff]  }
0x112b   :  { %5194 = vmatprep.subr.bf16.mxu1 %v11332_v48  ;;  %v11384_v48 = vld [vmem:[#allocation2 + $0x1e0] ss:$16 sps:$4 sm:$0xff]  }
0x112e   :  { %5195 = vmatpush1.bf16.msra.mxu1 %v11330_v49  ;;  %v11387_v49 = vld [vmem:[#allocation2 + $0x1e8] ss:$16 sps:$4 sm:$0xff]  }
0x112f   :  { %5196 = vmatprep.subr.bf16.mxu1 %v11338_v50  ;;  %v11392_v50 = vld [vmem:[#allocation2 + $0x20c] ss:$16 sps:$4 sm:$0xff]  }
0x1132   :  { %5197 = vmatpush1.bf16.msra.mxu1 %v11336_v51  ;;  %v11395_v51 = vld [vmem:[#allocation2 + $0x204] ss:$16 sps:$4 sm:$0xff]  }
0x1133   :  { %5198 = vmatprep.subr.bf16.mxu1 %v11344_v52  ;;  %v4687_v52 = vrot.slane %v12919_v36, 1  ;;  %v11396_v36 = vld [vmem:[#allocation2 + $0x228] ss:$16 sps:$4 sm:$0xff]  }
0x1136   :  { %5199 = vmatpush1.bf16.msra.mxu1 %v11342_v53  ;;  %v4685_v53 = vld [vmem:[%s13560_s7 + $0x1] sm:$0x1] }
0x1137   :  { %5200 = vmatprep.subr.bf16.mxu1 %v11350_v54  ;;  %v4689_v54 = vadd.f32 %v4687_v52, %v4685_v53  ;;  %v11464_v52 = vld [vmem:[#allocation2 + $0x38c] ss:$16 sps:$4 sm:$0xff]   ;;  %v11462_v53 = vld [vmem:[#allocation2 + $0x388] ss:$16 sps:$4 sm:$0xff]  }
0x113a   :  { %5201 = vmatpush1.bf16.msra.mxu1 %v11348_v40 }
0x113b   :  { %5202 = vmatprep.subr.bf16.mxu1 %v11356_v55 }
0x113e   :  { %5203 = vmatpush1.bf16.msra.mxu1 %v11354_v61 }
0x113f   :  { %5204 = vmatprep.subr.bf16.mxu1 %v11362_v16 }
0x1142   :  { %5205 = vmatpush1.bf16.msra.mxu1 %v11360_v62 }
0x1143   :  { %5206 = vmatprep.subr.bf16.mxu1 %v11368_v1 }
0x1146   :  { %5207 = vmatpush1.bf16.msra.mxu1 %v11366_v2 }
0x1147   :  { %5208 = vmatprep.subr.bf16.mxu1 %v11374_v3  ;;  %v11390_v3 = vld [vmem:[#allocation2 + $0x208] ss:$16 sps:$4 sm:$0xff]  }
0x114a   :  { %5209 = vmatpush1.bf16.msra.mxu1 %v11372_v43  ;;  %v11393_v43 = vld [vmem:[#allocation2 + $0x200] ss:$16 sps:$4 sm:$0xff]  }
0x114b   :  { %5210 = vmatprep.subr.bf16.mxu1 %v11380_v4  ;;  %v11398_v4 = vld [vmem:[#allocation2 + $0x22c] ss:$16 sps:$4 sm:$0xff]  }
0x114e   :  { %5211 = vmatpush1.bf16.msra.mxu1 %v11378_v5  ;;  %v11401_v5 = vld [vmem:[#allocation2 + $0x224] ss:$16 sps:$4 sm:$0xff]  }
0x114f   :  { %5212 = vmatprep.subr.bf16.mxu1 %v11386_v21  ;;  %v11455_v21 = vld [vmem:[#allocation2 + $0x344] ss:$16 sps:$4 sm:$0xff]  }
0x1152   :  { %5213 = vmatpush1.bf16.msra.mxu1 %v11384_v48  ;;  %v11458_v48 = vld [vmem:[#allocation2 + $0x36c] ss:$16 sps:$4 sm:$0xff]  }
0x1153   :  { %5686 = vmatprep.subr.bf16.mxu1 %v11395_v51  ;;  %v11459_v51 = vld [vmem:[#allocation2 + $0x360] ss:$16 sps:$4 sm:$0xff]  }
0x11e8   :  { %v4679_v6 = vpop.f32.mrb[48].mxu1 }
0x11e9   :  { %v4690_v11 = vpack.c.bf16 %v4679_v6, %v4679_v6  ;;  %v10388_v12 = vpop.f32.mrb[49].mxu1  ;;  %v11399_v6 = vld [vmem:[#allocation2 + $0x220] ss:$16 sps:$4 sm:$0xff]  }
0x11ea   :  { %v4682_v14 = vpop.f32.mrb[50].mxu1  ;;  %v11402_v12 = vld [vmem:[#allocation2 + $0x248] ss:$16 sps:$4 sm:$0xff]  }
0x11eb   :  { %v10389_v15 = vpop.f32.mrb[51].mxu1  ;;  %10407 = vmatmul.mubr.bf16.vlgmr.msra.gmra.mrb[52].mxu0 %v4690_v11  ;;  %v11407_v11 = vld [vmem:[#allocation2 + $0x244] ss:$16 sps:$4 sm:$0xff]   ;;  %v11410_v14 = vld [vmem:[#allocation2 + $0x26c] ss:$16 sps:$4 sm:$0xff]  }
0x11ec   :  { %5255 = vmatprep.mubr.bf16.mxu0 %v12833_v59  ;;  %5224 = vmatpush1.bf16.msra.mxu0 %v11297_v8  ;;  %v11335_v59 = vld [vmem:[#allocation2 + $0xcc] ss:$16 sps:$4 sm:$0xff]   ;;  %v11413_v15 = vld [vmem:[#allocation2 + $0x264] ss:$16 sps:$4 sm:$0xff]  }
0x11ed   :  { %5225 = vmatprep.subr.bf16.mxu0 %v11305_v13  ;;  %v11404_v8 = vld [vmem:[#allocation2 + $0x24c] ss:$16 sps:$4 sm:$0xff]   ;;  %v11405_v13 = vld [vmem:[#allocation2 + $0x240] ss:$16 sps:$4 sm:$0xff]  }
0x11f0   :  { %5226 = vmatpush1.bf16.msra.mxu0 %v11303_v41  ;;  %v11408_v41 = vld [vmem:[#allocation2 + $0x268] ss:$16 sps:$4 sm:$0xff]  }
0x11f1   :  { %5227 = vmatprep.subr.bf16.mxu0 %v11311_v39  ;;  %v11416_v39 = vld [vmem:[#allocation2 + $0x28c] ss:$16 sps:$4 sm:$0xff]  }
0x11f4   :  { %5228 = vmatpush1.bf16.msra.mxu0 %v11309_v20  ;;  %v11414_v20 = vld [vmem:[#allocation2 + $0x288] ss:$16 sps:$4 sm:$0xff]  }
0x11f5   :  { %5229 = vmatprep.subr.bf16.mxu0 %v11317_v22  ;;  %v11419_v22 = vld [vmem:[#allocation2 + $0x284] ss:$16 sps:$4 sm:$0xff]  }
0x11f8   :  { %5230 = vmatpush1.bf16.msra.mxu0 %v11315_v24  ;;  %v11417_v24 = vld [vmem:[#allocation2 + $0x280] ss:$16 sps:$4 sm:$0xff]  }
0x11f9   :  { %5231 = vmatprep.subr.bf16.mxu0 %v11323_v25  ;;  %v11422_v25 = vld [vmem:[#allocation2 + $0x2ac] ss:$16 sps:$4 sm:$0xff]  }
0x11fc   :  { %5232 = vmatpush1.bf16.msra.mxu0 %v11321_v56  ;;  %v11420_v56 = vld [vmem:[#allocation2 + $0x2a8] ss:$16 sps:$4 sm:$0xff]  }
0x11fd   :  { %5233 = vmatprep.subr.bf16.mxu0 %v11329_v26  ;;  %v11425_v26 = vld [vmem:[#allocation2 + $0x2a4] ss:$16 sps:$4 sm:$0xff]  }
0x1200   :  { %5234 = vmatpush1.bf16.msra.mxu0 %v11327_v27  ;;  %v11423_v27 = vld [vmem:[#allocation2 + $0x2a0] ss:$16 sps:$4 sm:$0xff]  }
0x1201   :  { %5235 = vmatprep.subr.bf16.mxu0 %v11335_v59  ;;  %v11428_v59 = vld [vmem:[#allocation2 + $0x2cc] ss:$16 sps:$4 sm:$0xff]  }
0x1204   :  { %5236 = vmatpush1.bf16.msra.mxu0 %v11333_v28  ;;  %v11426_v28 = vld [vmem:[#allocation2 + $0x2c8] ss:$16 sps:$4 sm:$0xff]  }
0x1205   :  { %5237 = vmatprep.subr.bf16.mxu0 %v11341_v29  ;;  %v11431_v29 = vld [vmem:[#allocation2 + $0x2c4] ss:$16 sps:$4 sm:$0xff]  }
0x1208   :  { %5238 = vmatpush1.bf16.msra.mxu0 %v11339_v30  ;;  %v11429_v30 = vld [vmem:[#allocation2 + $0x2c0] ss:$16 sps:$4 sm:$0xff]  }
0x1209   :  { %5239 = vmatprep.subr.bf16.mxu0 %v11347_v31  ;;  %v11434_v31 = vld [vmem:[#allocation2 + $0x2ec] ss:$16 sps:$4 sm:$0xff]  }
0x120c   :  { %5240 = vmatpush1.bf16.msra.mxu0 %v11345_v32  ;;  %v11432_v32 = vld [vmem:[#allocation2 + $0x2e8] ss:$16 sps:$4 sm:$0xff]  }
0x120d   :  { %5241 = vmatprep.subr.bf16.mxu0 %v11353_v33  ;;  %v11437_v33 = vld [vmem:[#allocation2 + $0x2e4] ss:$16 sps:$4 sm:$0xff]  }
0x1210   :  { %5242 = vmatpush1.bf16.msra.mxu0 %v11351_v18  ;;  %v11435_v18 = vld [vmem:[#allocation2 + $0x2e0] ss:$16 sps:$4 sm:$0xff]  }
0x1211   :  { %5243 = vmatprep.subr.bf16.mxu0 %v11359_v10  ;;  %v11440_v10 = vld [vmem:[#allocation2 + $0x30c] ss:$16 sps:$4 sm:$0xff]  }
0x1214   :  { %5244 = vmatpush1.bf16.msra.mxu0 %v11357_v34  ;;  %v11438_v34 = vld [vmem:[#allocation2 + $0x308] ss:$16 sps:$4 sm:$0xff]  }
0x1215   :  { %5245 = vmatprep.subr.bf16.mxu0 %v11365_v35  ;;  %v11443_v35 = vld [vmem:[#allocation2 + $0x304] ss:$16 sps:$4 sm:$0xff]  }
0x1218   :  { %5246 = vmatpush1.bf16.msra.mxu0 %v11363_v37  ;;  %v11441_v37 = vld [vmem:[#allocation2 + $0x300] ss:$16 sps:$4 sm:$0xff]  }
0x1219   :  { %5247 = vmatprep.subr.bf16.mxu0 %v11371_v42  ;;  %v11446_v42 = vld [vmem:[#allocation2 + $0x32c] ss:$16 sps:$4 sm:$0xff]  }
0x121c   :  { %5248 = vmatpush1.bf16.msra.mxu0 %v11369_v60  ;;  %v11444_v60 = vld [vmem:[#allocation2 + $0x328] ss:$16 sps:$4 sm:$0xff]  }
0x121d   :  { %5249 = vmatprep.subr.bf16.mxu0 %v11377_v44  ;;  %v11449_v44 = vld [vmem:[#allocation2 + $0x324] ss:$16 sps:$4 sm:$0xff]  }
0x1220   :  { %5250 = vmatpush1.bf16.msra.mxu0 %v11375_v45  ;;  %v11447_v45 = vld [vmem:[#allocation2 + $0x320] ss:$16 sps:$4 sm:$0xff]  }
0x1221   :  { %5251 = vmatprep.subr.bf16.mxu0 %v11383_v19  ;;  %v11452_v19 = vld [vmem:[#allocation2 + $0x34c] ss:$16 sps:$4 sm:$0xff]  }
0x1224   :  { %5252 = vmatpush1.bf16.msra.mxu0 %v11381_v46  ;;  %v11450_v46 = vld [vmem:[#allocation2 + $0x348] ss:$16 sps:$4 sm:$0xff]  }
0x1225   :  { %5253 = vmatprep.subr.bf16.mxu0 %v11389_v47  ;;  %v11453_v47 = vld [vmem:[#allocation2 + $0x340] ss:$16 sps:$4 sm:$0xff]  }
0x1228   :  { %5254 = vmatpush1.bf16.msra.mxu0 %v11387_v49  ;;  %v11456_v49 = vld [vmem:[#allocation2 + $0x368] ss:$16 sps:$4 sm:$0xff]  }
0x1229   :  { %5727 = vmatprep.subr.bf16.mxu0 %v11392_v50  ;;  %v11461_v50 = vld [vmem:[#allocation2 + $0x364] ss:$16 sps:$4 sm:$0xff]  }
0x12be   :  { %v4789_v40 = vpop.f32.mrb[52].mxu0 }
0x12bf   :  { %v4795_v55 = vadd.f32 %v4789_v40, %v4689_v54  ;;  %v10408_v61 = vpop.f32.mrb[53].mxu0  ;;  %v11467_v54 = vld [vmem:[#allocation2 + $0x384] ss:$16 sps:$4 sm:$0xff]   ;;  %v11465_v40 = vld [vmem:[#allocation2 + $0x380] ss:$16 sps:$4 sm:$0xff]  }
0x12c0   :  { %v4792_v16 = vpop.f32.mrb[54].mxu0  ;;  %v11468_v61 = vld [vmem:[#allocation2 + $0x3a8] ss:$16 sps:$4 sm:$0xff]  }
0x12c1   :  { %v4796_v62 = vmax.f32 %v4795_v55, 0.0  ;;  %v10409_v1 = vpop.f32.mrb[55].mxu0  ;;  %v11470_v55 = vld [vmem:[#allocation2 + $0x3ac] ss:$16 sps:$4 sm:$0xff]   ;;  %v11473_v16 = vld [vmem:[#allocation2 + $0x3a4] ss:$16 sps:$4 sm:$0xff]  }
0x12c2   :  { %v11476_v1 = vld [vmem:[#allocation2 + $0x3cc] ss:$16 sps:$4 sm:$0xff]  }
0x12c3   :  { %v4797_v2 = vpack.c.bf16 %v4796_v62, %v4796_v62  ;;  %v11471_v62 = vld [vmem:[#allocation2 + $0x3a0] ss:$16 sps:$4 sm:$0xff]  }
0x12c5   :  { %5215 = vmatmul.mubr.bf16.vlgmr.msra.gmra.mrb[52].mxu1 %v4797_v2  ;;  %5256 = vmatmul.mubr.bf16.vlgmr.msra.gmra.mrb[56].mxu0 %v4797_v2  ;;  %v11479_v2 = vld [vmem:[#allocation2 + $0x3c4] ss:$16 sps:$4 sm:$0xff]  }
0x12c6   :  { %5718 = vmatprep.mubr.bf16.mxu1 %v12931_v17  ;;  %5759 = vmatprep.mubr.bf16.mxu0 %v12931_v17  ;;  %v11411_v17 = vld [vmem:[#allocation2 + $0x260] ss:$16 sps:$4 sm:$0xff]  }
0x12c7   :  { %5728 = vmatpush1.bf16.msra.mxu0 %v11390_v3  ;;  %5687 = vmatpush1.bf16.msra.mxu1 %v11393_v43  ;;  %v11474_v3 = vld [vmem:[#allocation2 + $0x3c8] ss:$16 sps:$4 sm:$0xff]   ;;  %v11477_v43 = vld [vmem:[#allocation2 + $0x3c0] ss:$16 sps:$4 sm:$0xff]  }
0x12c8   :  { %5729 = vmatprep.subr.bf16.mxu0 %v11398_v4  ;;  %5688 = vmatprep.subr.bf16.mxu1 %v11401_v5  ;;  %v11482_v4 = vld [vmem:[#allocation2 + $0x3ec] ss:$16 sps:$4 sm:$0xff]   ;;  %v11485_v5 = vld [vmem:[#allocation2 + $0x3e4] ss:$16 sps:$4 sm:$0xff]  }
0x12cb   :  { %5730 = vmatpush1.bf16.msra.mxu0 %v11396_v36  ;;  %5689 = vmatpush1.bf16.msra.mxu1 %v11399_v6  ;;  %v11480_v36 = vld [vmem:[#allocation2 + $0x3e8] ss:$16 sps:$4 sm:$0xff]   ;;  %v11483_v6 = vld [vmem:[#allocation2 + $0x3e0] ss:$16 sps:$4 sm:$0xff]  }
0x12cc   :  { %5731 = vmatprep.subr.bf16.mxu0 %v11404_v8  ;;  %5690 = vmatprep.subr.bf16.mxu1 %v11407_v11  ;;  %v5264_v8 = vld [vmem:[%s13560_s7 + $0x2] sm:$0x3] }
0x12cd   :  { %v5269_v11 = vrot.slane %v5264_v8, %v12414_v7 }
0x12cf   :  { %5732 = vmatpush1.bf16.msra.mxu0 %v11402_v12  ;;  %5691 = vmatpush1.bf16.msra.mxu1 %v11405_v13 }
0x12d0   :  { %5733 = vmatprep.subr.bf16.mxu0 %v11410_v14  ;;  %5692 = vmatprep.subr.bf16.mxu1 %v11413_v15  ;;  %v5273_v14 = vrot.slane %v5264_v8, %v12419_v9 }
0x12d3   :  { %5734 = vmatpush1.bf16.msra.mxu0 %v11408_v41  ;;  %5693 = vmatpush1.bf16.msra.mxu1 %v11411_v17 }
0x12d4   :  { %5735 = vmatprep.subr.bf16.mxu0 %v11416_v39  ;;  %5694 = vmatprep.subr.bf16.mxu1 %v11419_v22 }
0x12d7   :  { %5736 = vmatpush1.bf16.msra.mxu0 %v11414_v20  ;;  %5695 = vmatpush1.bf16.msra.mxu1 %v11417_v24 }
0x12d8   :  { %5737 = vmatprep.subr.bf16.mxu0 %v11422_v25  ;;  %5696 = vmatprep.subr.bf16.mxu1 %v11425_v26 }
0x12db   :  { %5738 = vmatpush1.bf16.msra.mxu0 %v11420_v56  ;;  %5697 = vmatpush1.bf16.msra.mxu1 %v11423_v27 }
0x12dc   :  { %5739 = vmatprep.subr.bf16.mxu0 %v11428_v59  ;;  %5698 = vmatprep.subr.bf16.mxu1 %v11431_v29  ;;  %v5292_v29 = vld [vmem:[%s13560_s7 + $0x5] sm:$0x1] }
0x12df   :  { %5740 = vmatpush1.bf16.msra.mxu0 %v11426_v28  ;;  %5699 = vmatpush1.bf16.msra.mxu1 %v11429_v30 }
0x12e0   :  { %5741 = vmatprep.subr.bf16.mxu0 %v11434_v31  ;;  %5700 = vmatprep.subr.bf16.mxu1 %v11437_v33  ;;  %v5290_v31 = vld [vmem:[%s13560_s7 + $0x4] sm:$0x1] }
0x12e3   :  { %5742 = vmatpush1.bf16.msra.mxu0 %v11432_v32  ;;  %5701 = vmatpush1.bf16.msra.mxu1 %v11435_v18 }
0x12e4   :  { %5743 = vmatprep.subr.bf16.mxu0 %v11440_v10  ;;  %5702 = vmatprep.subr.bf16.mxu1 %v11443_v35 }
0x12e7   :  { %5744 = vmatpush1.bf16.msra.mxu0 %v11438_v34  ;;  %5703 = vmatpush1.bf16.msra.mxu1 %v11441_v37 }
0x12e8   :  { %5745 = vmatprep.subr.bf16.mxu0 %v11446_v42  ;;  %5704 = vmatprep.subr.bf16.mxu1 %v11449_v44 }
0x12eb   :  { %5746 = vmatpush1.bf16.msra.mxu0 %v11444_v60  ;;  %5705 = vmatpush1.bf16.msra.mxu1 %v11447_v45 }
0x12ec   :  { %5747 = vmatprep.subr.bf16.mxu0 %v11452_v19  ;;  %5706 = vmatprep.subr.bf16.mxu1 %v11455_v21  ;;  %v11486_v19 = vld [vmem:[%s13556_s3] sm:$0xff]   ;;  %v11488_v21 = vld [vmem:[%s13556_s3 + $0x10] sm:$0xff]  }
0x12ef   :  { %5748 = vmatpush1.bf16.msra.mxu0 %v11450_v46  ;;  %5707 = vmatpush1.bf16.msra.mxu1 %v11453_v47  ;;  %v11489_v47 = vld [vmem:[%s13556_s3 + $0x18] sm:$0xff]  }
0x12f0   :  { %5749 = vmatprep.subr.bf16.mxu0 %v11458_v48  ;;  %5708 = vmatprep.subr.bf16.mxu1 %v11461_v50  ;;  %v11490_v48 = vld [vmem:[%s13556_s3 + $0x20] sm:$0xff]   ;;  %v11492_v50 = vld [vmem:[%s13556_s3 + $0x30] sm:$0xff]  }
0x12f3   :  { %5750 = vmatpush1.bf16.msra.mxu0 %v11456_v49  ;;  %5709 = vmatpush1.bf16.msra.mxu1 %v11459_v51  ;;  %v11491_v49 = vld [vmem:[%s13556_s3 + $0x28] sm:$0xff]   ;;  %v11493_v51 = vld [vmem:[%s13556_s3 + $0x38] sm:$0xff]  }
0x12f4   :  { %5751 = vmatprep.subr.bf16.mxu0 %v11464_v52  ;;  %5710 = vmatprep.subr.bf16.mxu1 %v11467_v54  ;;  %v11494_v52 = vld [vmem:[%s13559_s6] sm:$0xff]   ;;  %v11496_v54 = vld [vmem:[%s13559_s6 + $0x10] sm:$0xff]  }
0x12f7   :  { %5752 = vmatpush1.bf16.msra.mxu0 %v11462_v53  ;;  %5711 = vmatpush1.bf16.msra.mxu1 %v11465_v40  ;;  %v11495_v53 = vld [vmem:[%s13559_s6 + $0x8] sm:$0xff]   ;;  %v11497_v40 = vld [vmem:[%s13559_s6 + $0x18] sm:$0xff]  }
0x12f8   :  { %5753 = vmatprep.subr.bf16.mxu0 %v11470_v55  ;;  %5712 = vmatprep.subr.bf16.mxu1 %v11473_v16  ;;  %v11498_v55 = vld [vmem:[%s13559_s6 + $0x20] sm:$0xff]   ;;  %v11500_v16 = vld [vmem:[%s13559_s6 + $0x30] sm:$0xff]  }
0x12fb   :  { %5754 = vmatpush1.bf16.msra.mxu0 %v11468_v61  ;;  %5713 = vmatpush1.bf16.msra.mxu1 %v11471_v62  ;;  %v11499_v61 = vld [vmem:[%s13559_s6 + $0x28] sm:$0xff]   ;;  %v11501_v62 = vld [vmem:[%s13559_s6 + $0x38] sm:$0xff]  }
0x12fc   :  { %5755 = vmatprep.subr.bf16.mxu0 %v11476_v1  ;;  %5714 = vmatprep.subr.bf16.mxu1 %v11479_v2  ;;  %v5768_v1 = vld [vmem:[%s13560_s7 + $0x6] sm:$0x3] }
0x12fd   :  { %v5773_v2 = vrot.slane %v5768_v1, %v12414_v7 }
0x12ff   :  { %5756 = vmatpush1.bf16.msra.mxu0 %v11474_v3  ;;  %5715 = vmatpush1.bf16.msra.mxu1 %v11477_v43 }
0x1300   :  { %5757 = vmatprep.subr.bf16.mxu0 %v11482_v4  ;;  %5716 = vmatprep.subr.bf16.mxu1 %v11485_v5  ;;  %v5777_v4 = vrot.slane %v5768_v1, %v12419_v9  ;;  %v11511_v1 = vld [vmem:[%s13557_s4 + $0x8] sm:$0xff]  }
0x1303   :  { %5758 = vmatpush1.bf16.msra.mxu0 %v11480_v36  ;;  %5717 = vmatpush1.bf16.msra.mxu1 %v11483_v6 }
0x1304   :  { %10430 = vmatprep.subr.bf16.mxu0 %v12209_v0  ;;  %10410 = vmatprep.subr.bf16.mxu1 %v12209_v0 }
0x1398   :  { %v5216_v12 = vpop.f32.mrb[52].mxu1  ;;  %v5257_v13 = vpop.f32.mrb[56].mxu0 }
0x1399   :  { %v5276_v15 = vadd.f32 %v5269_v11, %v5216_v12  ;;  %v5218_v41 = vpop.f32.mrb[53].mxu1  ;;  %v5259_v17 = vpop.f32.mrb[57].mxu0  ;;  %v5291_v18 = vadd.f32 %v5290_v31, %v5257_v13 }
0x139a   :  { %v5220_v39 = vpop.f32.mrb[54].mxu1  ;;  %v5261_v20 = vpop.f32.mrb[58].mxu0  ;;  %v5277_v56 = vadd.f32 %v5273_v14, %v5218_v41  ;;  %v5293_v32 = vadd.f32 %v5292_v29, %v5259_v17 }
0x139b   :  { %v9488_v22 = vmul.f32 -1.442695, %v5276_v15  ;;  %v5221_v24 = vpop.f32.mrb[55].mxu1  ;;  %v5262_v25 = vpop.f32.mrb[59].mxu0 }
0x139c   :  { %v9489_v26 = vmul.f32 -1.442695, %v5277_v56  ;;  %v5794_v24 = vld [vmem:[%s13560_s7 + $0x8] sm:$0x1] }
0x139d   :  { %12018 = vpow2.f32 %v9488_v22  ;;  %v5796_v22 = vld [vmem:[%s13560_s7 + $0x9] sm:$0x1]  ;;  %v13116_v56 = vld [vmem:[%s13553_s0 + $0x4] ss:$8 sm:$0x3] }
0x139e   :  { %12020 = vpow2.f32 %v9489_v26  ;;  %v5927_v26 = vld [vmem:[%s13560_s7] sm:$0x1] }
0x13a7   :  { %v12019_v27 = vpop.eup %12018 }
0x13a8   :  { %v5284_v59 = vadd.f32 1.0, %v12019_v27  ;;  %v12021_v28 = vpop.eup %12020 }
0x13a9   :  { %v5285_v30 = vadd.f32 1.0, %v12021_v28 }
0x13aa   :  { %12022 = vrcp.f32 %v5284_v59 }
0x13ab   :  { %12024 = vrcp.f32 %v5285_v30  ;;  %v5928_v30 = vadd.f32 %v13116_v56, %v5927_v26  ;;  %v11526_v26 = vld [vmem:[#allocation2 + $0x24] ss:$16 sps:$4 sm:$0xff]  }
0x13b4   :  { %v12023_v33 = vpop.eup %12022 }
0x13b5   :  { %v5294_v10 = vmul.f32 %v12023_v33, %v5293_v32  ;;  %v12025_v35 = vpop.eup %12024 }
0x13b6   :  { %v5297_v37 = vsub.f32 1.0, %v12025_v35  ;;  %v5299_v60 = vmul.f32 %v12025_v35, %v12826_v57  ;;  %v11487_v57 = vld [vmem:[%s13556_s3 + $0x8] sm:$0xff]  }
0x13b7   :  { %v5295_v34 = vadd.f32 %v5294_v10, %v5291_v18 }
0x13b9   :  { %12026 = vtanh.f32 %v5295_v34 }
0x13c3   :  { %v12027_v42 = vpop.eup %12026 }
0x13c4   :  { %v5298_v44 = vmul.f32 %v12027_v42, %v5297_v37 }
0x13c6   :  { %v13023_v45 = vadd.f32 %v5299_v60, %v5298_v44 }
0x13c8   :  { %v13030_v46 = vpack.c.bf16 %v13023_v45, %v13023_v45 }
0x13ca   :  { %5719 = vmatmul.mubr.bf16.vlgmr.msra.gmra.mrb[56].mxu1 %v13030_v46  ;;  %5760 = vmatmul.mubr.bf16.vlgmr.msra.gmra.mrb[60].mxu0 %v13030_v46 }
0x13cb   :  { %10431 = vmatpush3.bf16.msra.mxu0 %v11486_v19  ;;  %10446 = vmatprep.mubr.msk.bf16.mxu0 %vm12210_vm0, %v12209_v0 }
0x13cc   :  { %10432 = vmatprep.subr.bf16.mxu0 %v12209_v0  ;;  %10426 = vmatprep.mubr.msk.bf16.mxu1 %vm12210_vm0, %v12209_v0 }
0x13cd   :  { %10411 = vmatpush3.bf16.msra.mxu1 %v11494_v52 }
0x13ce   :  { %10412 = vmatprep.subr.bf16.mxu1 %v12209_v0 }
0x13cf   :  { %10433 = vmatpush3.bf16.msra.mxu0 %v11487_v57 }
0x13d0   :  { %10434 = vmatprep.subr.bf16.mxu0 %v12209_v0 }
0x13d1   :  { %10413 = vmatpush3.bf16.msra.mxu1 %v11495_v53 }
0x13d2   :  { %10414 = vmatprep.subr.bf16.mxu1 %v12209_v0 }
0x13d3   :  { %10435 = vmatpush3.bf16.msra.mxu0 %v11488_v21 }
0x13d4   :  { %10436 = vmatprep.subr.bf16.mxu0 %v12209_v0 }
0x13d5   :  { %10415 = vmatpush3.bf16.msra.mxu1 %v11496_v54  ;;  %v11505_v54 = vld [vmem:[%s13555_s2 + $0x18] sm:$0xff]  }
0x13d6   :  { %10416 = vmatprep.subr.bf16.mxu1 %v12209_v0 }
0x13d7   :  { %10437 = vmatpush3.bf16.msra.mxu0 %v11489_v47  ;;  %v11502_v47 = vld [vmem:[%s13555_s2] sm:$0xff]  }
0x13d8   :  { %10438 = vmatprep.subr.bf16.mxu0 %v12209_v0 }
0x13d9   :  { %10417 = vmatpush3.bf16.msra.mxu1 %v11497_v40  ;;  %v11506_v40 = vld [vmem:[%s13555_s2 + $0x20] sm:$0xff]  }
0x13da   :  { %10418 = vmatprep.subr.bf16.mxu1 %v12209_v0 }
0x13db   :  { %10439 = vmatpush3.bf16.msra.mxu0 %v11490_v48  ;;  %v11504_v48 = vld [vmem:[%s13555_s2 + $0x10] sm:$0xff]  }
0x13dc   :  { %10440 = vmatprep.subr.bf16.mxu0 %v12209_v0 }
0x13dd   :  { %10419 = vmatpush3.bf16.msra.mxu1 %v11498_v55  ;;  %v11507_v55 = vld [vmem:[%s13555_s2 + $0x28] sm:$0xff]  }
0x13de   :  { %10420 = vmatprep.subr.bf16.mxu1 %v12209_v0 }
0x13df   :  { %10441 = vmatpush3.bf16.msra.mxu0 %v11491_v49 }
0x13e0   :  { %10442 = vmatprep.subr.bf16.mxu0 %v12209_v0 }
0x13e1   :  { %10421 = vmatpush3.bf16.msra.mxu1 %v11499_v61  ;;  %v11508_v61 = vld [vmem:[%s13555_s2 + $0x30] sm:$0xff]  }
0x13e2   :  { %10422 = vmatprep.subr.bf16.mxu1 %v12209_v0 }
0x13e3   :  { %10443 = vmatpush3.bf16.msra.mxu0 %v11492_v50 }
0x13e4   :  { %10444 = vmatprep.subr.bf16.mxu0 %v12209_v0 }
0x13e5   :  { %10423 = vmatpush3.bf16.msra.mxu1 %v11500_v16  ;;  %v11509_v16 = vld [vmem:[%s13555_s2 + $0x38] sm:$0xff]  }
0x13e6   :  { %10424 = vmatprep.subr.bf16.mxu1 %v12209_v0 }
0x13e7   :  { %10445 = vmatpush3.bf16.msra.mxu0 %v11493_v51 }
0x13e8   :  { %10470 = vmatprep.subr.bf16.mxu0 %v12209_v0 }
0x13e9   :  { %10425 = vmatpush3.bf16.msra.mxu1 %v11501_v62  ;;  %v11510_v62 = vld [vmem:[%s13557_s4] sm:$0xff]  }
0x13ea   :  { %10447 = vmatmul.mubr.bf16.vlgmr.msra.gmra.mrb[64].mxu0 %v13030_v46  ;;  %10450 = vmatprep.subr.bf16.mxu1 %v12209_v0 }
0x13eb   :  { %10486 = vmatprep.mubr.msk.bf16.mxu0 %vm12210_vm0, %v12209_v0  ;;  %10471 = vmatpush3.bf16.msra.mxu0 %v11510_v62 }
0x13ec   :  { %10472 = vmatprep.subr.bf16.mxu0 %v12209_v0 }
0x13ef   :  { %10473 = vmatpush3.bf16.msra.mxu0 %v11511_v1  ;;  %v11529_v1 = vld [vmem:[#allocation2 + $0x2c] ss:$16 sps:$4 sm:$0xff]  }
0x13f0   :  { %10474 = vmatprep.subr.bf16.mxu0 %v12209_v0 }
0x149d   :  { %v5720_v3 = vpop.f32.mrb[56].mxu1  ;;  %v5761_v43 = vpop.f32.mrb[60].mxu0 }
0x149e   :  { %v5780_v5 = vadd.f32 %v5773_v2, %v5720_v3  ;;  %v5722_v36 = vpop.f32.mrb[57].mxu1  ;;  %v5763_v6 = vpop.f32.mrb[61].mxu0  ;;  %v5795_v28 = vadd.f32 %v5794_v24, %v5761_v43  ;;  %v11512_v2 = vld [vmem:[%s13557_s4 + $0x10] sm:$0xff]   ;;  %v11513_v3 = vld [vmem:[%s13557_s4 + $0x18] sm:$0xff]   ;;  %v11514_v43 = vld [vmem:[%s13557_s4 + $0x20] sm:$0xff]  }
0x149f   :  { %v5724_v8 = vpop.f32.mrb[58].mxu1  ;;  %v5765_v11 = vpop.f32.mrb[62].mxu0  ;;  %v5781_v15 = vadd.f32 %v5777_v4, %v5722_v36  ;;  %v5797_v27 = vadd.f32 %v5796_v22, %v5763_v6  ;;  %10475 = vmatpush3.bf16.msra.mxu0 %v11512_v2  ;;  %v11515_v4 = vld [vmem:[%s13557_s4 + $0x28] sm:$0xff]   ;;  %v11518_v22 = vld [vmem:[#allocation2] ss:$16 sps:$4 sm:$0xff]  }
0x14a0   :  { %v9554_v12 = vmul.f32 -1.442695, %v5780_v5  ;;  %v5725_v13 = vpop.f32.mrb[59].mxu1  ;;  %v5766_v14 = vpop.f32.mrb[63].mxu0  ;;  %10476 = vmatprep.subr.bf16.mxu0 %v12209_v0  ;;  %v11516_v5 = vld [vmem:[%s13557_s4 + $0x30] sm:$0xff]  }
0x14a1   :  { %v9555_v41 = vmul.f32 -1.442695, %v5781_v15  ;;  %v11520_v24 = vld [vmem:[#allocation2 + $0x4] ss:$16 sps:$4 sm:$0xff]  }
0x14a2   :  { %12028 = vpow2.f32 %v9554_v12 }
0x14a3   :  { %12030 = vpow2.f32 %v9555_v41  ;;  %10477 = vmatpush3.bf16.msra.mxu0 %v11513_v3 }
0x14a4   :  { %10478 = vmatprep.subr.bf16.mxu0 %v12209_v0 }
0x14a7   :  { %10479 = vmatpush3.bf16.msra.mxu0 %v11514_v43  ;;  %v11527_v43 = vld [vmem:[#allocation2 + $0x28] ss:$16 sps:$4 sm:$0xff]  }
0x14a8   :  { %10480 = vmatprep.subr.bf16.mxu0 %v12209_v0 }
0x14ab   :  { %10481 = vmatpush3.bf16.msra.mxu0 %v11515_v4  ;;  %v11535_v4 = vld [vmem:[#allocation2 + $0x4c] ss:$16 sps:$4 sm:$0xff]  }
0x14ac   :  { %v12029_v17 = vpop.eup %12028  ;;  %10482 = vmatprep.subr.bf16.mxu0 %v12209_v0 }
0x14ad   :  { %v5788_v39 = vadd.f32 1.0, %v12029_v17  ;;  %v12031_v20 = vpop.eup %12030 }
0x14ae   :  { %v5789_v25 = vadd.f32 1.0, %v12031_v20  ;;  %v11517_v20 = vld [vmem:[%s13557_s4 + $0x38] sm:$0xff]  }
0x14af   :  { %12032 = vrcp.f32 %v5788_v39  ;;  %10483 = vmatpush3.bf16.msra.mxu0 %v11516_v5  ;;  %v11533_v5 = vld [vmem:[#allocation2 + $0x48] ss:$16 sps:$4 sm:$0xff]  }
0x14b0   :  { %12034 = vrcp.f32 %v5789_v25  ;;  %10484 = vmatprep.subr.bf16.mxu0 %v12209_v0  ;;  %v11523_v25 = vld [vmem:[#allocation2 + $0xc] ss:$16 sps:$4 sm:$0xff]  }
0x14b3   :  { %10485 = vmatpush3.bf16.msra.mxu0 %v11517_v20  ;;  %v11569_v20 = vld [vmem:[#allocation2 + $0x108] ss:$16 sps:$4 sm:$0xff]  }
0x14b4   :  { %6691 = vmatprep.subr.bf16.mxu0 %v11523_v25  ;;  %v11583_v25 = vld [vmem:[#allocation2 + $0x14c] ss:$16 sps:$4 sm:$0xff]  }
0x14b9   :  { %v12033_v59 = vpop.eup %12032 }
0x14ba   :  { %v5798_v29 = vmul.f32 %v12033_v59, %v5797_v27  ;;  %v12035_v37 = vpop.eup %12034  ;;  %v11524_v27 = vld [vmem:[#allocation2 + $0x20] ss:$16 sps:$4 sm:$0xff]   ;;  %v11532_v59 = vld [vmem:[#allocation2 + $0x44] ss:$16 sps:$4 sm:$0xff]  }
0x14bb   :  { %v5801_v42 = vsub.f32 1.0, %v12035_v37  ;;  %v5803_v19 = vmul.f32 %v12035_v37, %v12927_v58  ;;  %v11503_v58 = vld [vmem:[%s13555_s2 + $0x8] sm:$0xff]   ;;  %v11560_v37 = vld [vmem:[#allocation2 + $0xe0] ss:$16 sps:$4 sm:$0xff]  }
0x14bc   :  { %v5799_v31 = vadd.f32 %v5798_v29, %v5795_v28  ;;  %v11530_v28 = vld [vmem:[#allocation2 + $0x40] ss:$16 sps:$4 sm:$0xff]   ;;  %v11538_v29 = vld [vmem:[#allocation2 + $0x64] ss:$16 sps:$4 sm:$0xff]  }
0x14bd   :  { %v6027_v32 = vpop.f32.mrb[64].mxu0 }
0x14be   :  { %12036 = vtanh.f32 %v5799_v31  ;;  %v6033_v33 = vadd.f32 %v6027_v32, %v5928_v30  ;;  %v10448_v18 = vpop.f32.mrb[65].mxu0  ;;  %v11536_v30 = vld [vmem:[#allocation2 + $0x60] ss:$16 sps:$4 sm:$0xff]   ;;  %v11544_v31 = vld [vmem:[#allocation2 + $0x84] ss:$16 sps:$4 sm:$0xff]  }
0x14bf   :  { %v6030_v10 = vpop.f32.mrb[66].mxu0  ;;  %v11542_v32 = vld [vmem:[#allocation2 + $0x80] ss:$16 sps:$4 sm:$0xff]  }
0x14c0   :  { %v10449_v34 = vpop.f32.mrb[67].mxu0  ;;  %v6034_v35 = vsel %vm160_vm1, %v6033_v33, -inf  ;;  %v11548_v18 = vld [vmem:[#allocation2 + $0xa0] ss:$16 sps:$4 sm:$0xff]   ;;  %v11556_v10 = vld [vmem:[#allocation2 + $0xc4] ss:$16 sps:$4 sm:$0xff]  }
0x14c1   :  { %6035 = vmax.xlane.f32.xlu0 %v6034_v35  ;;  %v11554_v34 = vld [vmem:[#allocation2 + $0xc0] ss:$16 sps:$4 sm:$0xff]   ;;  %v11562_v35 = vld [vmem:[#allocation2 + $0xe4] ss:$16 sps:$4 sm:$0xff]  }
0x14c8   :  { %v12037_v60 = vpop.eup %12036 }
0x14c9   :  { %v5802_v44 = vmul.f32 %v12037_v60, %v5801_v42  ;;  %v11568_v42 = vld [vmem:[#allocation2 + $0x104] ss:$16 sps:$4 sm:$0xff]   ;;  %v11566_v60 = vld [vmem:[#allocation2 + $0x100] ss:$16 sps:$4 sm:$0xff]  }
0x14cb   :  { %v13124_v57 = vadd.f32 %v5803_v19, %v5802_v44  ;;  %v11574_v44 = vld [vmem:[#allocation2 + $0x124] ss:$16 sps:$4 sm:$0xff]   ;;  %v11572_v19 = vld [vmem:[#allocation2 + $0x120] ss:$16 sps:$4 sm:$0xff]  }
0x14cd   :  { %v13128_v21 = vpack.c.bf16 %v13124_v57, %v13124_v57 }
0x14cf   :  { %10427 = vmatmul.mubr.bf16.vlgmr.msra.gmra.mrb[60].mxu1 %v13128_v21 }
0x14d0   :  { %10466 = vmatprep.mubr.msk.bf16.mxu1 %vm12210_vm0, %v12209_v0  ;;  %10451 = vmatpush3.bf16.msra.mxu1 %v11502_v47  ;;  %v11580_v47 = vld [vmem:[#allocation2 + $0x144] ss:$16 sps:$4 sm:$0xff]  }
0x14d1   :  { %10452 = vmatprep.subr.bf16.mxu1 %v12209_v0 }
0x14d4   :  { %10453 = vmatpush3.bf16.msra.mxu1 %v11503_v58  ;;  %v11578_v58 = vld [vmem:[#allocation2 + $0x140] ss:$16 sps:$4 sm:$0xff]  }
0x14d5   :  { %10454 = vmatprep.subr.bf16.mxu1 %v12209_v0 }
0x14d8   :  { %10455 = vmatpush3.bf16.msra.mxu1 %v11504_v48  ;;  %v11586_v48 = vld [vmem:[#allocation2 + $0x164] ss:$16 sps:$4 sm:$0xff]  }
0x14d9   :  { %10456 = vmatprep.subr.bf16.mxu1 %v12209_v0 }
0x14dc   :  { %10457 = vmatpush3.bf16.msra.mxu1 %v11505_v54  ;;  %v11604_v54 = vld [vmem:[#allocation2 + $0x1c4] ss:$16 sps:$4 sm:$0xff]  }
0x14dd   :  { %10458 = vmatprep.subr.bf16.mxu1 %v12209_v0 }
0x14e0   :  { %10459 = vmatpush3.bf16.msra.mxu1 %v11506_v40  ;;  %v11602_v40 = vld [vmem:[#allocation2 + $0x1c0] ss:$16 sps:$4 sm:$0xff]  }
0x14e1   :  { %10460 = vmatprep.subr.bf16.mxu1 %v12209_v0 }
0x14e4   :  { %10461 = vmatpush3.bf16.msra.mxu1 %v11507_v55 }
0x14e5   :  { %10462 = vmatprep.subr.bf16.mxu1 %v12209_v0 }
0x14e8   :  { %10463 = vmatpush3.bf16.msra.mxu1 %v11508_v61  ;;  %v11521_v61 = vld [vmem:[#allocation2 + $0x8] ss:$16 sps:$4 sm:$0xff]  }
0x14e9   :  { %10464 = vmatprep.subr.bf16.mxu1 %v12209_v0 }
0x14ec   :  { %10465 = vmatpush3.bf16.msra.mxu1 %v11509_v16 }
0x14ed   :  { %6650 = vmatprep.subr.bf16.mxu1 %v11520_v24  ;;  %v11575_v24 = vld [vmem:[#allocation2 + $0x128] ss:$16 sps:$4 sm:$0xff]  }
0x154e   :  { %v6036_v49 = vpop.xlane.xlu0 %6035 }
0x154f   :  { %v6037_v50 = vsub.f32 %v6033_v33, %v6036_v49  ;;  %v11550_v33 = vld [vmem:[#allocation2 + $0xa4] ss:$16 sps:$4 sm:$0xff]   ;;  %v11584_v49 = vld [vmem:[#allocation2 + $0x160] ss:$16 sps:$4 sm:$0xff]  }
0x1551   :  { %v6038_v51 = vmul.f32 1.442695, %v6037_v50  ;;  %v11592_v50 = vld [vmem:[#allocation2 + $0x184] ss:$16 sps:$4 sm:$0xff]  }
0x1553   :  { %12038 = vpow2.f32 %v6038_v51  ;;  %v11590_v51 = vld [vmem:[#allocation2 + $0x180] ss:$16 sps:$4 sm:$0xff]  }
0x155d   :  { %v12039_v52 = vpop.eup %12038 }
0x155e   :  { %v6040_v53 = vsel %vm160_vm1, %v12039_v52, 0.0 }
0x155f   :  { %6041 = vadd.xlane.f32.xlu1 %v6040_v53  ;;  %v11596_v53 = vld [vmem:[#allocation2 + $0x1a0] ss:$16 sps:$4 sm:$0xff]  }
0x15a2   :  { %v13193_v36 = vpop.f32.mrb[60].mxu1 }
0x15a3   :  { %v10428_v6 = vpop.f32.mrb[61].mxu1 }
0x15a4   :  { %v5908_v8 = vpop.f32.mrb[62].mxu1  ;;  %v11541_v6 = vld [vmem:[#allocation2 + $0x6c] ss:$16 sps:$4 sm:$0xff]  }
0x15a5   :  { %v10429_v11 = vpop.f32.mrb[63].mxu1  ;;  %v11539_v8 = vld [vmem:[#allocation2 + $0x68] ss:$16 sps:$4 sm:$0xff]  }
0x15a6   :  { %v11547_v11 = vld [vmem:[#allocation2 + $0x8c] ss:$16 sps:$4 sm:$0xff]  }
0x15ec   :  { %v6042_v12 = vpop.xlane.xlu1 %6041 }
0x15ed   :  { %12040 = vrcp.f32 %v6042_v12 }
0x15f7   :  { %v12041_v13 = vpop.eup %12040 }
0x15f8   :  { %v6044_v14 = vmul.f32 %v12041_v13, %v6042_v12  ;;  %v11545_v12 = vld [vmem:[#allocation2 + $0x88] ss:$16 sps:$4 sm:$0xff]  }
0x15fa   :  { %v6045_v15 = vsub.f32 2.0, %v6044_v14  ;;  %v11551_v14 = vld [vmem:[#allocation2 + $0xa8] ss:$16 sps:$4 sm:$0xff]  }
0x15fc   :  { %v6046_v41 = vmul.f32 %v12041_v13, %v6045_v15  ;;  %v11553_v13 = vld [vmem:[#allocation2 + $0xac] ss:$16 sps:$4 sm:$0xff]   ;;  %v11557_v15 = vld [vmem:[#allocation2 + $0xc8] ss:$16 sps:$4 sm:$0xff]  }
0x15fe   :  { %v6047_v17 = vmul.f32 %v12039_v52, %v6046_v41  ;;  %v11598_v52 = vld [vmem:[#allocation2 + $0x1a4] ss:$16 sps:$4 sm:$0xff]   ;;  %v11565_v41 = vld [vmem:[#allocation2 + $0xec] ss:$16 sps:$4 sm:$0xff]  }
0x1600   :  { %7392 = vst [vmem:[#allocation6 + $0x4] sm:$0x1] %v6047_v17  ;;  %v6048_v39 = vpack.c.bf16 %v6047_v17, %v6047_v17  ;;  %v11563_v17 = vld [vmem:[#allocation2 + $0xe8] ss:$16 sps:$4 sm:$0xff]  }
0x1602   :  { %10467 = vmatmul.mubr.bf16.vlgmr.msra.gmra.mrb[64].mxu1 %v6048_v39  ;;  %v11571_v39 = vld [vmem:[#allocation2 + $0x10c] ss:$16 sps:$4 sm:$0xff]  }
0x1603   :  { %6682 = vmatprep.mubr.bf16.mxu1 %v13030_v46  ;;  %6651 = vmatpush1.bf16.msra.mxu1 %v11518_v22  ;;  %v11577_v22 = vld [vmem:[#allocation2 + $0x12c] ss:$16 sps:$4 sm:$0xff]  }
0x1604   :  { %6652 = vmatprep.subr.bf16.mxu1 %v11526_v26  ;;  %v11581_v26 = vld [vmem:[#allocation2 + $0x148] ss:$16 sps:$4 sm:$0xff]  }
0x1607   :  { %6653 = vmatpush1.bf16.msra.mxu1 %v11524_v27  ;;  %v11589_v27 = vld [vmem:[#allocation2 + $0x16c] ss:$16 sps:$4 sm:$0xff]  }
0x1608   :  { %6654 = vmatprep.subr.bf16.mxu1 %v11532_v59  ;;  %v11587_v59 = vld [vmem:[#allocation2 + $0x168] ss:$16 sps:$4 sm:$0xff]  }
0x160b   :  { %6655 = vmatpush1.bf16.msra.mxu1 %v11530_v28  ;;  %v11595_v28 = vld [vmem:[#allocation2 + $0x18c] ss:$16 sps:$4 sm:$0xff]  }
0x160c   :  { %6656 = vmatprep.subr.bf16.mxu1 %v11538_v29  ;;  %v11593_v29 = vld [vmem:[#allocation2 + $0x188] ss:$16 sps:$4 sm:$0xff]  }
0x160f   :  { %6657 = vmatpush1.bf16.msra.mxu1 %v11536_v30  ;;  %v11601_v30 = vld [vmem:[#allocation2 + $0x1ac] ss:$16 sps:$4 sm:$0xff]  }
0x1610   :  { %6658 = vmatprep.subr.bf16.mxu1 %v11544_v31  ;;  %v11599_v31 = vld [vmem:[#allocation2 + $0x1a8] ss:$16 sps:$4 sm:$0xff]  }
0x1613   :  { %6659 = vmatpush1.bf16.msra.mxu1 %v11542_v32  ;;  %v11607_v32 = vld [vmem:[#allocation2 + $0x1cc] ss:$16 sps:$4 sm:$0xff]  }
0x1614   :  { %6660 = vmatprep.subr.bf16.mxu1 %v11550_v33  ;;  %v11605_v33 = vld [vmem:[#allocation2 + $0x1c8] ss:$16 sps:$4 sm:$0xff]  }
0x1617   :  { %6661 = vmatpush1.bf16.msra.mxu1 %v11548_v18  ;;  %v11610_v18 = vld [vmem:[#allocation2 + $0x1e4] ss:$16 sps:$4 sm:$0xff]  }
0x1618   :  { %6662 = vmatprep.subr.bf16.mxu1 %v11556_v10  ;;  %v11613_v10 = vld [vmem:[#allocation2 + $0x1ec] ss:$16 sps:$4 sm:$0xff]  }
0x161b   :  { %6663 = vmatpush1.bf16.msra.mxu1 %v11554_v34  ;;  %v11608_v34 = vld [vmem:[#allocation2 + $0x1e0] ss:$16 sps:$4 sm:$0xff]  }
0x161c   :  { %6664 = vmatprep.subr.bf16.mxu1 %v11562_v35  ;;  %v11611_v35 = vld [vmem:[#allocation2 + $0x1e8] ss:$16 sps:$4 sm:$0xff]  }
0x161f   :  { %6665 = vmatpush1.bf16.msra.mxu1 %v11560_v37  ;;  %v11616_v37 = vld [vmem:[#allocation2 + $0x20c] ss:$16 sps:$4 sm:$0xff]  }
0x1620   :  { %6666 = vmatprep.subr.bf16.mxu1 %v11568_v42  ;;  %v11619_v42 = vld [vmem:[#allocation2 + $0x204] ss:$16 sps:$4 sm:$0xff]  }
0x1623   :  { %6667 = vmatpush1.bf16.msra.mxu1 %v11566_v60  ;;  %v6155_v60 = vrot.slane %v13116_v56, 1  ;;  %v11620_v56 = vld [vmem:[#allocation2 + $0x228] ss:$16 sps:$4 sm:$0xff]  }
0x1624   :  { %6668 = vmatprep.subr.bf16.mxu1 %v11574_v44  ;;  %v6153_v44 = vld [vmem:[%s13560_s7 + $0x1] sm:$0x1] }
0x1627   :  { %6669 = vmatpush1.bf16.msra.mxu1 %v11572_v19  ;;  %v6157_v19 = vadd.f32 %v6155_v60, %v6153_v44  ;;  %v11683_v60 = vld [vmem:[#allocation2 + $0x360] ss:$16 sps:$4 sm:$0xff]   ;;  %v11688_v44 = vld [vmem:[#allocation2 + $0x38c] ss:$16 sps:$4 sm:$0xff]  }
0x1628   :  { %6670 = vmatprep.subr.bf16.mxu1 %v11580_v47 }
0x162b   :  { %6671 = vmatpush1.bf16.msra.mxu1 %v11578_v58 }
0x162c   :  { %6672 = vmatprep.subr.bf16.mxu1 %v11586_v48 }
0x162f   :  { %6673 = vmatpush1.bf16.msra.mxu1 %v11584_v49 }
0x1630   :  { %6674 = vmatprep.subr.bf16.mxu1 %v11592_v50 }
0x1633   :  { %6675 = vmatpush1.bf16.msra.mxu1 %v11590_v51 }
0x1634   :  { %6676 = vmatprep.subr.bf16.mxu1 %v11598_v52 }
0x1637   :  { %6677 = vmatpush1.bf16.msra.mxu1 %v11596_v53  ;;  %v11614_v53 = vld [vmem:[#allocation2 + $0x208] ss:$16 sps:$4 sm:$0xff]  }
0x1638   :  { %6678 = vmatprep.subr.bf16.mxu1 %v11604_v54  ;;  %v11617_v54 = vld [vmem:[#allocation2 + $0x200] ss:$16 sps:$4 sm:$0xff]  }
0x163b   :  { %6679 = vmatpush1.bf16.msra.mxu1 %v11602_v40  ;;  %v11622_v40 = vld [vmem:[#allocation2 + $0x22c] ss:$16 sps:$4 sm:$0xff]  }
0x163c   :  { %6680 = vmatprep.subr.bf16.mxu1 %v11610_v18  ;;  %v11674_v18 = vld [vmem:[#allocation2 + $0x348] ss:$16 sps:$4 sm:$0xff]  }
0x163f   :  { %6681 = vmatpush1.bf16.msra.mxu1 %v11608_v34  ;;  %v11677_v34 = vld [vmem:[#allocation2 + $0x340] ss:$16 sps:$4 sm:$0xff]  }
0x1640   :  { %7154 = vmatprep.subr.bf16.mxu1 %v11619_v42  ;;  %v11685_v42 = vld [vmem:[#allocation2 + $0x364] ss:$16 sps:$4 sm:$0xff]  }
0x16d5   :  { %v6147_v55 = vpop.f32.mrb[64].mxu1 }
0x16d6   :  { %v6158_v16 = vpack.c.bf16 %v6147_v55, %v6147_v55  ;;  %v10468_v62 = vpop.f32.mrb[65].mxu1  ;;  %v11625_v55 = vld [vmem:[#allocation2 + $0x224] ss:$16 sps:$4 sm:$0xff]  }
0x16d7   :  { %v6150_v2 = vpop.f32.mrb[66].mxu1  ;;  %v11631_v62 = vld [vmem:[#allocation2 + $0x244] ss:$16 sps:$4 sm:$0xff]  }
0x16d8   :  { %v10469_v3 = vpop.f32.mrb[67].mxu1  ;;  %10487 = vmatmul.mubr.bf16.vlgmr.msra.gmra.mrb[68].mxu0 %v6158_v16  ;;  %v11628_v16 = vld [vmem:[#allocation2 + $0x24c] ss:$16 sps:$4 sm:$0xff]   ;;  %v11629_v2 = vld [vmem:[#allocation2 + $0x240] ss:$16 sps:$4 sm:$0xff]  }
0x16d9   :  { %6723 = vmatprep.mubr.bf16.mxu0 %v13030_v46  ;;  %6692 = vmatpush1.bf16.msra.mxu0 %v11521_v61  ;;  %v11559_v46 = vld [vmem:[#allocation2 + $0xcc] ss:$16 sps:$4 sm:$0xff]   ;;  %v11623_v61 = vld [vmem:[#allocation2 + $0x220] ss:$16 sps:$4 sm:$0xff]  }
0x16da   :  { %6693 = vmatprep.subr.bf16.mxu0 %v11529_v1  ;;  %v11626_v1 = vld [vmem:[#allocation2 + $0x248] ss:$16 sps:$4 sm:$0xff]   ;;  %v11634_v3 = vld [vmem:[#allocation2 + $0x26c] ss:$16 sps:$4 sm:$0xff]  }
0x16dd   :  { %6694 = vmatpush1.bf16.msra.mxu0 %v11527_v43  ;;  %v11637_v43 = vld [vmem:[#allocation2 + $0x264] ss:$16 sps:$4 sm:$0xff]  }
0x16de   :  { %6695 = vmatprep.subr.bf16.mxu0 %v11535_v4  ;;  %v11632_v4 = vld [vmem:[#allocation2 + $0x268] ss:$16 sps:$4 sm:$0xff]  }
0x16e1   :  { %6696 = vmatpush1.bf16.msra.mxu0 %v11533_v5  ;;  %v11640_v5 = vld [vmem:[#allocation2 + $0x28c] ss:$16 sps:$4 sm:$0xff]  }
0x16e2   :  { %6697 = vmatprep.subr.bf16.mxu0 %v11541_v6  ;;  %v11638_v6 = vld [vmem:[#allocation2 + $0x288] ss:$16 sps:$4 sm:$0xff]  }
0x16e5   :  { %6698 = vmatpush1.bf16.msra.mxu0 %v11539_v8  ;;  %v11643_v8 = vld [vmem:[#allocation2 + $0x284] ss:$16 sps:$4 sm:$0xff]  }
0x16e6   :  { %6699 = vmatprep.subr.bf16.mxu0 %v11547_v11  ;;  %v11641_v11 = vld [vmem:[#allocation2 + $0x280] ss:$16 sps:$4 sm:$0xff]  }
0x16e9   :  { %6700 = vmatpush1.bf16.msra.mxu0 %v11545_v12  ;;  %v11646_v12 = vld [vmem:[#allocation2 + $0x2ac] ss:$16 sps:$4 sm:$0xff]  }
0x16ea   :  { %6701 = vmatprep.subr.bf16.mxu0 %v11553_v13  ;;  %v11644_v13 = vld [vmem:[#allocation2 + $0x2a8] ss:$16 sps:$4 sm:$0xff]  }
0x16ed   :  { %6702 = vmatpush1.bf16.msra.mxu0 %v11551_v14  ;;  %v11649_v14 = vld [vmem:[#allocation2 + $0x2a4] ss:$16 sps:$4 sm:$0xff]  }
0x16ee   :  { %6703 = vmatprep.subr.bf16.mxu0 %v11559_v46  ;;  %v11647_v46 = vld [vmem:[#allocation2 + $0x2a0] ss:$16 sps:$4 sm:$0xff]  }
0x16f1   :  { %6704 = vmatpush1.bf16.msra.mxu0 %v11557_v15  ;;  %v11652_v15 = vld [vmem:[#allocation2 + $0x2cc] ss:$16 sps:$4 sm:$0xff]  }
0x16f2   :  { %6705 = vmatprep.subr.bf16.mxu0 %v11565_v41  ;;  %v11650_v41 = vld [vmem:[#allocation2 + $0x2c8] ss:$16 sps:$4 sm:$0xff]  }
0x16f5   :  { %6706 = vmatpush1.bf16.msra.mxu0 %v11563_v17  ;;  %v11655_v17 = vld [vmem:[#allocation2 + $0x2c4] ss:$16 sps:$4 sm:$0xff]  }
0x16f6   :  { %6707 = vmatprep.subr.bf16.mxu0 %v11571_v39  ;;  %v11653_v39 = vld [vmem:[#allocation2 + $0x2c0] ss:$16 sps:$4 sm:$0xff]  }
0x16f9   :  { %6708 = vmatpush1.bf16.msra.mxu0 %v11569_v20  ;;  %v11658_v20 = vld [vmem:[#allocation2 + $0x2ec] ss:$16 sps:$4 sm:$0xff]  }
0x16fa   :  { %6709 = vmatprep.subr.bf16.mxu0 %v11577_v22  ;;  %v11656_v22 = vld [vmem:[#allocation2 + $0x2e8] ss:$16 sps:$4 sm:$0xff]  }
0x16fd   :  { %6710 = vmatpush1.bf16.msra.mxu0 %v11575_v24  ;;  %v11661_v24 = vld [vmem:[#allocation2 + $0x2e4] ss:$16 sps:$4 sm:$0xff]  }
0x16fe   :  { %6711 = vmatprep.subr.bf16.mxu0 %v11583_v25  ;;  %v11659_v25 = vld [vmem:[#allocation2 + $0x2e0] ss:$16 sps:$4 sm:$0xff]  }
0x1701   :  { %6712 = vmatpush1.bf16.msra.mxu0 %v11581_v26  ;;  %v11664_v26 = vld [vmem:[#allocation2 + $0x30c] ss:$16 sps:$4 sm:$0xff]  }
0x1702   :  { %6713 = vmatprep.subr.bf16.mxu0 %v11589_v27  ;;  %v11662_v27 = vld [vmem:[#allocation2 + $0x308] ss:$16 sps:$4 sm:$0xff]  }
0x1705   :  { %6714 = vmatpush1.bf16.msra.mxu0 %v11587_v59  ;;  %v11667_v59 = vld [vmem:[#allocation2 + $0x304] ss:$16 sps:$4 sm:$0xff]  }
0x1706   :  { %6715 = vmatprep.subr.bf16.mxu0 %v11595_v28  ;;  %v11665_v28 = vld [vmem:[#allocation2 + $0x300] ss:$16 sps:$4 sm:$0xff]  }
0x1709   :  { %6716 = vmatpush1.bf16.msra.mxu0 %v11593_v29  ;;  %v11670_v29 = vld [vmem:[#allocation2 + $0x32c] ss:$16 sps:$4 sm:$0xff]  }
0x170a   :  { %6717 = vmatprep.subr.bf16.mxu0 %v11601_v30  ;;  %v11668_v30 = vld [vmem:[#allocation2 + $0x328] ss:$16 sps:$4 sm:$0xff]  }
0x170d   :  { %6718 = vmatpush1.bf16.msra.mxu0 %v11599_v31  ;;  %v11673_v31 = vld [vmem:[#allocation2 + $0x324] ss:$16 sps:$4 sm:$0xff]  }
0x170e   :  { %6719 = vmatprep.subr.bf16.mxu0 %v11607_v32  ;;  %v11671_v32 = vld [vmem:[#allocation2 + $0x320] ss:$16 sps:$4 sm:$0xff]  }
0x1711   :  { %6720 = vmatpush1.bf16.msra.mxu0 %v11605_v33  ;;  %v11676_v33 = vld [vmem:[#allocation2 + $0x34c] ss:$16 sps:$4 sm:$0xff]  }
0x1712   :  { %6721 = vmatprep.subr.bf16.mxu0 %v11613_v10  ;;  %v11679_v10 = vld [vmem:[#allocation2 + $0x344] ss:$16 sps:$4 sm:$0xff]  }
0x1715   :  { %6722 = vmatpush1.bf16.msra.mxu0 %v11611_v35  ;;  %v11682_v35 = vld [vmem:[#allocation2 + $0x36c] ss:$16 sps:$4 sm:$0xff]  }
0x1716   :  { %7195 = vmatprep.subr.bf16.mxu0 %v11616_v37  ;;  %v11680_v37 = vld [vmem:[#allocation2 + $0x368] ss:$16 sps:$4 sm:$0xff]  }
0x17ab   :  { %v6257_v47 = vpop.f32.mrb[68].mxu0 }
0x17ac   :  { %v6263_v58 = vadd.f32 %v6257_v47, %v6157_v19  ;;  %v10488_v48 = vpop.f32.mrb[69].mxu0  ;;  %v11686_v19 = vld [vmem:[#allocation2 + $0x388] ss:$16 sps:$4 sm:$0xff]   ;;  %v11691_v47 = vld [vmem:[#allocation2 + $0x384] ss:$16 sps:$4 sm:$0xff]  }
0x17ad   :  { %v6260_v49 = vpop.f32.mrb[70].mxu0  ;;  %v11694_v48 = vld [vmem:[#allocation2 + $0x3ac] ss:$16 sps:$4 sm:$0xff]  }
0x17ae   :  { %v6264_v50 = vmax.f32 %v6263_v58, 0.0  ;;  %v10489_v51 = vpop.f32.mrb[71].mxu0  ;;  %v11689_v58 = vld [vmem:[#allocation2 + $0x380] ss:$16 sps:$4 sm:$0xff]   ;;  %v11692_v49 = vld [vmem:[#allocation2 + $0x3a8] ss:$16 sps:$4 sm:$0xff]  }
0x17af   :  { %v11695_v51 = vld [vmem:[#allocation2 + $0x3a0] ss:$16 sps:$4 sm:$0xff]  }
0x17b0   :  { %v6265_v52 = vpack.c.bf16 %v6264_v50, %v6264_v50  ;;  %v11697_v50 = vld [vmem:[#allocation2 + $0x3a4] ss:$16 sps:$4 sm:$0xff]  }
0x17b2   :  { %6683 = vmatmul.mubr.bf16.vlgmr.msra.gmra.mrb[68].mxu1 %v6265_v52  ;;  %6724 = vmatmul.mubr.bf16.vlgmr.msra.gmra.mrb[72].mxu0 %v6265_v52  ;;  %v11700_v52 = vld [vmem:[#allocation2 + $0x3cc] ss:$16 sps:$4 sm:$0xff]  }
0x17b3   :  { %7186 = vmatprep.mubr.bf16.mxu1 %v13128_v21  ;;  %7227 = vmatprep.mubr.bf16.mxu0 %v13128_v21  ;;  %v11635_v21 = vld [vmem:[#allocation2 + $0x260] ss:$16 sps:$4 sm:$0xff]  }
0x17b4   :  { %7196 = vmatpush1.bf16.msra.mxu0 %v11614_v53  ;;  %7155 = vmatpush1.bf16.msra.mxu1 %v11617_v54  ;;  %v11703_v53 = vld [vmem:[#allocation2 + $0x3c4] ss:$16 sps:$4 sm:$0xff]   ;;  %v11698_v54 = vld [vmem:[#allocation2 + $0x3c8] ss:$16 sps:$4 sm:$0xff]  }
0x17b5   :  { %7197 = vmatprep.subr.bf16.mxu0 %v11622_v40  ;;  %7156 = vmatprep.subr.bf16.mxu1 %v11625_v55  ;;  %v11701_v40 = vld [vmem:[#allocation2 + $0x3c0] ss:$16 sps:$4 sm:$0xff]   ;;  %v11706_v55 = vld [vmem:[#allocation2 + $0x3ec] ss:$16 sps:$4 sm:$0xff]  }
0x17b8   :  { %7198 = vmatpush1.bf16.msra.mxu0 %v11620_v56  ;;  %7157 = vmatpush1.bf16.msra.mxu1 %v11623_v61  ;;  %v11709_v56 = vld [vmem:[#allocation2 + $0x3e4] ss:$16 sps:$4 sm:$0xff]   ;;  %v11704_v61 = vld [vmem:[#allocation2 + $0x3e8] ss:$16 sps:$4 sm:$0xff]  }
0x17b9   :  { %7199 = vmatprep.subr.bf16.mxu0 %v11628_v16  ;;  %7158 = vmatprep.subr.bf16.mxu1 %v11631_v62  ;;  %v11707_v16 = vld [vmem:[#allocation2 + $0x3e0] ss:$16 sps:$4 sm:$0xff]  }
0x17ba   :  { %v6732_v62 = vld [vmem:[%s13560_s7 + $0x2] sm:$0x3] }
0x17bc   :  { %7200 = vmatpush1.bf16.msra.mxu0 %v11626_v1  ;;  %7159 = vmatpush1.bf16.msra.mxu1 %v11629_v2  ;;  %v6737_v1 = vrot.slane %v6732_v62, %v12414_v7 }
0x17bd   :  { %7201 = vmatprep.subr.bf16.mxu0 %v11634_v3  ;;  %7160 = vmatprep.subr.bf16.mxu1 %v11637_v43  ;;  %v6741_v43 = vrot.slane %v6732_v62, %v12419_v9 }
0x17c0   :  { %7202 = vmatpush1.bf16.msra.mxu0 %v11632_v4  ;;  %7161 = vmatpush1.bf16.msra.mxu1 %v11635_v21 }
0x17c1   :  { %7203 = vmatprep.subr.bf16.mxu0 %v11640_v5  ;;  %7162 = vmatprep.subr.bf16.mxu1 %v11643_v8 }
0x17c4   :  { %7204 = vmatpush1.bf16.msra.mxu0 %v11638_v6  ;;  %7163 = vmatpush1.bf16.msra.mxu1 %v11641_v11 }
0x17c5   :  { %7205 = vmatprep.subr.bf16.mxu0 %v11646_v12  ;;  %7164 = vmatprep.subr.bf16.mxu1 %v11649_v14 }
0x17c8   :  { %7206 = vmatpush1.bf16.msra.mxu0 %v11644_v13  ;;  %7165 = vmatpush1.bf16.msra.mxu1 %v11647_v46 }
0x17c9   :  { %7207 = vmatprep.subr.bf16.mxu0 %v11652_v15  ;;  %7166 = vmatprep.subr.bf16.mxu1 %v11655_v17 }
0x17cc   :  { %7208 = vmatpush1.bf16.msra.mxu0 %v11650_v41  ;;  %7167 = vmatpush1.bf16.msra.mxu1 %v11653_v39  ;;  %v6760_v39 = vld [vmem:[%s13560_s7 + $0x5] sm:$0x1] }
0x17cd   :  { %7209 = vmatprep.subr.bf16.mxu0 %v11658_v20  ;;  %7168 = vmatprep.subr.bf16.mxu1 %v11661_v24 }
0x17d0   :  { %7210 = vmatpush1.bf16.msra.mxu0 %v11656_v22  ;;  %7169 = vmatpush1.bf16.msra.mxu1 %v11659_v25  ;;  %v6758_v22 = vld [vmem:[%s13560_s7 + $0x4] sm:$0x1] }
0x17d1   :  { %7211 = vmatprep.subr.bf16.mxu0 %v11664_v26  ;;  %7170 = vmatprep.subr.bf16.mxu1 %v11667_v59 }
0x17d4   :  { %7212 = vmatpush1.bf16.msra.mxu0 %v11662_v27  ;;  %7171 = vmatpush1.bf16.msra.mxu1 %v11665_v28 }
0x17d5   :  { %7213 = vmatprep.subr.bf16.mxu0 %v11670_v29  ;;  %7172 = vmatprep.subr.bf16.mxu1 %v11673_v31 }
0x17d8   :  { %7214 = vmatpush1.bf16.msra.mxu0 %v11668_v30  ;;  %7173 = vmatpush1.bf16.msra.mxu1 %v11671_v32 }
0x17d9   :  { %7215 = vmatprep.subr.bf16.mxu0 %v11676_v33  ;;  %7174 = vmatprep.subr.bf16.mxu1 %v11679_v10 }
0x17dc   :  { %7216 = vmatpush1.bf16.msra.mxu0 %v11674_v18  ;;  %7175 = vmatpush1.bf16.msra.mxu1 %v11677_v34  ;;  %v11710_v18 = vld [vmem:[%s13556_s3] sm:$0xff]   ;;  %v11712_v34 = vld [vmem:[%s13556_s3 + $0x10] sm:$0xff]  }
0x17dd   :  { %7217 = vmatprep.subr.bf16.mxu0 %v11682_v35  ;;  %7176 = vmatprep.subr.bf16.mxu1 %v11685_v42  ;;  %v11713_v35 = vld [vmem:[%s13556_s3 + $0x18] sm:$0xff]   ;;  %v11715_v42 = vld [vmem:[%s13556_s3 + $0x28] sm:$0xff]  }
0x17e0   :  { %7218 = vmatpush1.bf16.msra.mxu0 %v11680_v37  ;;  %7177 = vmatpush1.bf16.msra.mxu1 %v11683_v60  ;;  %v11714_v37 = vld [vmem:[%s13556_s3 + $0x20] sm:$0xff]   ;;  %v11716_v60 = vld [vmem:[%s13556_s3 + $0x30] sm:$0xff]  }
0x17e1   :  { %7219 = vmatprep.subr.bf16.mxu0 %v11688_v44  ;;  %7178 = vmatprep.subr.bf16.mxu1 %v11691_v47  ;;  %v11717_v44 = vld [vmem:[%s13556_s3 + $0x38] sm:$0xff]   ;;  %v11719_v47 = vld [vmem:[%s13559_s6 + $0x8] sm:$0xff]  }
0x17e4   :  { %7220 = vmatpush1.bf16.msra.mxu0 %v11686_v19  ;;  %7179 = vmatpush1.bf16.msra.mxu1 %v11689_v58  ;;  %v11718_v19 = vld [vmem:[%s13559_s6] sm:$0xff]   ;;  %v11720_v58 = vld [vmem:[%s13559_s6 + $0x10] sm:$0xff]  }
0x17e5   :  { %7221 = vmatprep.subr.bf16.mxu0 %v11694_v48  ;;  %7180 = vmatprep.subr.bf16.mxu1 %v11697_v50  ;;  %v11721_v48 = vld [vmem:[%s13559_s6 + $0x18] sm:$0xff]   ;;  %v11723_v50 = vld [vmem:[%s13559_s6 + $0x28] sm:$0xff]  }
0x17e8   :  { %7222 = vmatpush1.bf16.msra.mxu0 %v11692_v49  ;;  %7181 = vmatpush1.bf16.msra.mxu1 %v11695_v51  ;;  %v11722_v49 = vld [vmem:[%s13559_s6 + $0x20] sm:$0xff]   ;;  %v11724_v51 = vld [vmem:[%s13559_s6 + $0x30] sm:$0xff]  }
0x17e9   :  { %7223 = vmatprep.subr.bf16.mxu0 %v11700_v52  ;;  %7182 = vmatprep.subr.bf16.mxu1 %v11703_v53  ;;  %v11725_v52 = vld [vmem:[%s13559_s6 + $0x38] sm:$0xff]   ;;  %v7236_v53 = vld [vmem:[%s13560_s7 + $0x6] sm:$0x3] }
0x17ec   :  { %7224 = vmatpush1.bf16.msra.mxu0 %v11698_v54  ;;  %7183 = vmatpush1.bf16.msra.mxu1 %v11701_v40  ;;  %v7241_v54 = vrot.slane %v7236_v53, %v12414_v7 }
0x17ed   :  { %7225 = vmatprep.subr.bf16.mxu0 %v11706_v55  ;;  %7184 = vmatprep.subr.bf16.mxu1 %v11709_v56  ;;  %v7245_v56 = vrot.slane %v7236_v53, %v12419_v9 }
0x17f0   :  { %7226 = vmatpush1.bf16.msra.mxu0 %v11704_v61  ;;  %7185 = vmatpush1.bf16.msra.mxu1 %v11707_v16 }
0x17f1   :  { %10510 = vmatprep.subr.bf16.mxu0 %v12209_v0  ;;  %10490 = vmatprep.subr.bf16.mxu1 %v12209_v0 }
0x1885   :  { %v6684_v2 = vpop.f32.mrb[68].mxu1  ;;  %v6725_v3 = vpop.f32.mrb[72].mxu0 }
0x1886   :  { %v6744_v4 = vadd.f32 %v6737_v1, %v6684_v2  ;;  %v6686_v21 = vpop.f32.mrb[69].mxu1  ;;  %v6727_v5 = vpop.f32.mrb[73].mxu0  ;;  %v6759_v26 = vadd.f32 %v6758_v22, %v6725_v3 }
0x1887   :  { %v6688_v6 = vpop.f32.mrb[70].mxu1  ;;  %v6729_v8 = vpop.f32.mrb[74].mxu0  ;;  %v6745_v14 = vadd.f32 %v6741_v43, %v6686_v21  ;;  %v6761_v24 = vadd.f32 %v6760_v39, %v6727_v5 }
0x1888   :  { %v9653_v11 = vmul.f32 -1.442695, %v6744_v4  ;;  %v6689_v12 = vpop.f32.mrb[71].mxu1  ;;  %v6730_v13 = vpop.f32.mrb[75].mxu0 }
0x1889   :  { %v9654_v46 = vmul.f32 -1.442695, %v6745_v14  ;;  %v7264_v12 = vld [vmem:[%s13560_s7 + $0x9] sm:$0x1]  ;;  %v7262_v13 = vld [vmem:[%s13560_s7 + $0x8] sm:$0x1] }
0x188a   :  { %12042 = vpow2.f32 %v9653_v11 }
0x188b   :  { %12044 = vpow2.f32 %v9654_v46  ;;  %v13313_v46 = vld [vmem:[%s13553_s0 + $0x5] ss:$8 sm:$0x3] }
0x1894   :  { %v12043_v15 = vpop.eup %12042 }
0x1895   :  { %v6752_v41 = vadd.f32 1.0, %v12043_v15  ;;  %v12045_v17 = vpop.eup %12044  ;;  %v7395_v15 = vld [vmem:[%s13560_s7] sm:$0x1] }
0x1896   :  { %v6753_v20 = vadd.f32 1.0, %v12045_v17  ;;  %v7396_v22 = vadd.f32 %v13313_v46, %v7395_v15 }
0x1897   :  { %12046 = vrcp.f32 %v6752_v41 }
0x1898   :  { %12048 = vrcp.f32 %v6753_v20 }
0x18a1   :  { %v12047_v25 = vpop.eup %12046 }
0x18a2   :  { %v6762_v27 = vmul.f32 %v12047_v25, %v6761_v24  ;;  %v12049_v28 = vpop.eup %12048  ;;  %v1418_v25 = vld [vmem:[%s13560_s7 + $0xa] sm:$0x1] }
0x18a3   :  { %v6765_v29 = vsub.f32 1.0, %v12049_v28  ;;  %v6767_v31 = vmul.f32 %v12049_v28, %v13023_v45  ;;  %v11711_v45 = vld [vmem:[%s13556_s3 + $0x8] sm:$0xff]  }
0x18a4   :  { %v6763_v59 = vadd.f32 %v6762_v27, %v6759_v26 }
0x18a6   :  { %12050 = vtanh.f32 %v6763_v59 }
0x18b0   :  { %v12051_v30 = vpop.eup %12050 }
0x18b1   :  { %v6766_v32 = vmul.f32 %v12051_v30, %v6765_v29  ;;  %v1502_v29 = vadd.f32 %v12602_v63, %v1418_v25  ;;  %v11737_v25 = vld [vmem:[%s13557_s4 + $0x18] sm:$0xff]  }
0x18b3   :  { %v13220_v33 = vadd.f32 %v6767_v31, %v6766_v32  ;;  %v4354_v32 = vld [vmem:[%s13560_s7 + $0xa] sm:$0x1] }
0x18b5   :  { %v13227_v10 = vpack.c.bf16 %v13220_v33, %v13220_v33 }
0x18b7   :  { %7187 = vmatmul.mubr.bf16.vlgmr.msra.gmra.mrb[72].mxu1 %v13227_v10  ;;  %7228 = vmatmul.mubr.bf16.vlgmr.msra.gmra.mrb[76].mxu0 %v13227_v10 }
0x18b8   :  { %10511 = vmatpush3.bf16.msra.mxu0 %v11710_v18  ;;  %10526 = vmatprep.mubr.msk.bf16.mxu0 %vm12210_vm0, %v12209_v0 }
0x18b9   :  { %10512 = vmatprep.subr.bf16.mxu0 %v12209_v0  ;;  %10506 = vmatprep.mubr.msk.bf16.mxu1 %vm12210_vm0, %v12209_v0 }
0x18ba   :  { %10491 = vmatpush3.bf16.msra.mxu1 %v11718_v19 }
0x18bb   :  { %10492 = vmatprep.subr.bf16.mxu1 %v12209_v0 }
0x18bc   :  { %10513 = vmatpush3.bf16.msra.mxu0 %v11711_v45  ;;  %v4438_v45 = vadd.f32 %v12996_v23, %v4354_v32  ;;  %v11726_v23 = vld [vmem:[%s13555_s2] sm:$0xff]  }
0x18bd   :  { %10514 = vmatprep.subr.bf16.mxu0 %v12209_v0 }
0x18be   :  { %10493 = vmatpush3.bf16.msra.mxu1 %v11719_v47  ;;  %v11728_v47 = vld [vmem:[%s13555_s2 + $0x10] sm:$0xff]  }
0x18bf   :  { %10494 = vmatprep.subr.bf16.mxu1 %v12209_v0 }
0x18c0   :  { %10515 = vmatpush3.bf16.msra.mxu0 %v11712_v34  ;;  %v1507_v34 = vsel %vm160_vm1, %v1502_v29, -inf }
0x18c1   :  { %10516 = vmatprep.subr.bf16.mxu0 %v12209_v0 }
0x18c2   :  { %10495 = vmatpush3.bf16.msra.mxu1 %v11720_v58 }
0x18c3   :  { %10496 = vmatprep.subr.bf16.mxu1 %v12209_v0 }
0x18c4   :  { %10517 = vmatpush3.bf16.msra.mxu0 %v11713_v35 }
0x18c5   :  { %10518 = vmatprep.subr.bf16.mxu0 %v12209_v0 }
0x18c6   :  { %10497 = vmatpush3.bf16.msra.mxu1 %v11721_v48 }
0x18c7   :  { %10498 = vmatprep.subr.bf16.mxu1 %v12209_v0 }
0x18c8   :  { %10519 = vmatpush3.bf16.msra.mxu0 %v11714_v37 }
0x18c9   :  { %10520 = vmatprep.subr.bf16.mxu0 %v12209_v0 }
0x18ca   :  { %10499 = vmatpush3.bf16.msra.mxu1 %v11722_v49 }
0x18cb   :  { %10500 = vmatprep.subr.bf16.mxu1 %v12209_v0 }
0x18cc   :  { %10521 = vmatpush3.bf16.msra.mxu0 %v11715_v42  ;;  %v4443_v42 = vsel %vm160_vm1, %v4438_v45, -inf }
0x18cd   :  { %10522 = vmatprep.subr.bf16.mxu0 %v12209_v0 }
0x18ce   :  { %10501 = vmatpush3.bf16.msra.mxu1 %v11723_v50  ;;  %v2886_v50 = vld [vmem:[%s13560_s7 + $0xa] sm:$0x1] }
0x18cf   :  { %10502 = vmatprep.subr.bf16.mxu1 %v12209_v0 }
0x18d0   :  { %10523 = vmatpush3.bf16.msra.mxu0 %v11716_v60 }
0x18d1   :  { %10524 = vmatprep.subr.bf16.mxu0 %v12209_v0 }
0x18d2   :  { %10503 = vmatpush3.bf16.msra.mxu1 %v11724_v51 }
0x18d3   :  { %10504 = vmatprep.subr.bf16.mxu1 %v12209_v0 }
0x18d4   :  { %10525 = vmatpush3.bf16.msra.mxu0 %v11717_v44 }
0x18d5   :  { %10550 = vmatprep.subr.bf16.mxu0 %v12209_v0 }
0x18d6   :  { %10505 = vmatpush3.bf16.msra.mxu1 %v11725_v52  ;;  %v13358_v52 = vadd.f32 %v12799_v38, %v2886_v50  ;;  %v11729_v38 = vld [vmem:[%s13555_s2 + $0x18] sm:$0xff]  }
0x18d7   :  { %10527 = vmatmul.mubr.bf16.vlgmr.msra.gmra.mrb[80].mxu0 %v13227_v10  ;;  %10530 = vmatprep.subr.bf16.mxu1 %v12209_v0 }
0x18d8   :  { %10566 = vmatprep.mubr.msk.bf16.mxu0 %vm12210_vm0, %v12209_v0 }
0x198a   :  { %v7188_v40 = vpop.f32.mrb[72].mxu1  ;;  %v7229_v55 = vpop.f32.mrb[76].mxu0 }
0x198b   :  { %v7248_v61 = vadd.f32 %v7241_v54, %v7188_v40  ;;  %v7190_v16 = vpop.f32.mrb[73].mxu1  ;;  %v7231_v62 = vpop.f32.mrb[77].mxu0  ;;  %v7263_v39 = vadd.f32 %v7262_v13, %v7229_v55  ;;  %v5822_v54 = vld [vmem:[%s13560_s7 + $0xa] sm:$0x1]  ;;  %v2975_v55 = vsel %vm160_vm1, %v13358_v52, -inf }
0x198c   :  { %v7192_v1 = vpop.f32.mrb[74].mxu1  ;;  %v7233_v2 = vpop.f32.mrb[78].mxu0  ;;  %v7249_v21 = vadd.f32 %v7245_v56, %v7190_v16  ;;  %v7265_v41 = vadd.f32 %v7264_v12, %v7231_v62  ;;  %v13366_v40 = vadd.f32 %v13193_v36, %v5822_v54  ;;  %v11730_v36 = vld [vmem:[%s13555_s2 + $0x20] sm:$0xff]   ;;  %v11732_v16 = vld [vmem:[%s13555_s2 + $0x30] sm:$0xff]   ;;  %v11733_v62 = vld [vmem:[%s13555_s2 + $0x38] sm:$0xff]  }
0x198d   :  { %v9719_v3 = vmul.f32 -1.442695, %v7248_v61  ;;  %v7193_v43 = vpop.f32.mrb[75].mxu1  ;;  %v7234_v4 = vpop.f32.mrb[79].mxu0  ;;  %v11731_v61 = vld [vmem:[%s13555_s2 + $0x28] sm:$0xff]  }
0x198e   :  { %v9720_v5 = vmul.f32 -1.442695, %v7249_v21  ;;  %v5911_v56 = vsel %vm160_vm1, %v13366_v40, -inf  ;;  %v11744_v54 = vld [vmem:[#allocation2 + $0x4] ss:$16 sps:$4 sm:$0xff]  }
0x198f   :  { %12052 = vpow2.f32 %v9719_v3 }
0x1990   :  { %12054 = vpow2.f32 %v9720_v5  ;;  %v7290_v5 = vld [vmem:[%s13560_s7 + $0xa] sm:$0x1] }
0x1999   :  { %v12053_v6 = vpop.eup %12052 }
0x199a   :  { %v7256_v8 = vadd.f32 1.0, %v12053_v6  ;;  %v12055_v11 = vpop.eup %12054 }
0x199b   :  { %v7257_v14 = vadd.f32 1.0, %v12055_v11 }
0x199c   :  { %12056 = vrcp.f32 %v7256_v8 }
0x199d   :  { %12058 = vrcp.f32 %v7257_v14 }
0x19a6   :  { %v12057_v17 = vpop.eup %12056 }
0x19a7   :  { %v7266_v20 = vmul.f32 %v12057_v17, %v7265_v41  ;;  %v12059_v18 = vpop.eup %12058 }
0x19a8   :  { %v7269_v35 = vsub.f32 1.0, %v12059_v18  ;;  %v7271_v60 = vmul.f32 %v12059_v18, %v13124_v57  ;;  %v11727_v57 = vld [vmem:[%s13555_s2 + $0x8] sm:$0xff]  }
0x19a9   :  { %v7267_v24 = vadd.f32 %v7266_v20, %v7263_v39  ;;  %v11734_v20 = vld [vmem:[%s13557_s4] sm:$0xff]  }
0x19aa   :  { %v7495_v26 = vpop.f32.mrb[80].mxu0  ;;  %10551 = vmatpush3.bf16.msra.mxu0 %v11734_v20  ;;  %v11814_v20 = vld [vmem:[#allocation2 + $0x180] ss:$16 sps:$4 sm:$0xff]  }
0x19ab   :  { %12060 = vtanh.f32 %v7267_v24  ;;  %v7501_v27 = vadd.f32 %v7495_v26, %v7396_v22  ;;  %v10528_v59 = vpop.f32.mrb[81].mxu0  ;;  %v11735_v22 = vld [vmem:[%s13557_s4 + $0x8] sm:$0xff]   ;;  %10552 = vmatprep.subr.bf16.mxu0 %v12209_v0  ;;  %v11736_v24 = vld [vmem:[%s13557_s4 + $0x10] sm:$0xff]   ;;  %v11738_v26 = vld [vmem:[%s13557_s4 + $0x20] sm:$0xff]  }
0x19ac   :  { %v7498_v28 = vpop.f32.mrb[82].mxu0  ;;  %v11740_v59 = vld [vmem:[%s13557_s4 + $0x30] sm:$0xff]  }
0x19ad   :  { %v10529_v30 = vpop.f32.mrb[83].mxu0  ;;  %v7502_v31 = vsel %vm160_vm1, %v7501_v27, -inf }
0x19ae   :  { %7503 = vmax.xlane.f32.xlu0 %v7502_v31  ;;  %10553 = vmatpush3.bf16.msra.mxu0 %v11735_v22  ;;  %v11822_v22 = vld [vmem:[#allocation2 + $0x1a4] ss:$16 sps:$4 sm:$0xff]  }
0x19af   :  { %10554 = vmatprep.subr.bf16.mxu0 %v12209_v0 }
0x19b2   :  { %1508 = vmax.xlane.f32.xlu0 %v1507_v34  ;;  %10555 = vmatpush3.bf16.msra.mxu0 %v11736_v24  ;;  %v11820_v24 = vld [vmem:[#allocation2 + $0x1a0] ss:$16 sps:$4 sm:$0xff]  }
0x19b3   :  { %10556 = vmatprep.subr.bf16.mxu0 %v12209_v0 }
0x19b5   :  { %v12061_v37 = vpop.eup %12060 }
0x19b6   :  { %4444 = vmax.xlane.f32.xlu0 %v4443_v42  ;;  %v7270_v63 = vmul.f32 %v12061_v37, %v7269_v35  ;;  %10557 = vmatpush3.bf16.msra.mxu0 %v11737_v25  ;;  %v11828_v25 = vld [vmem:[#allocation2 + $0x1c4] ss:$16 sps:$4 sm:$0xff]  }
0x19b7   :  { %10558 = vmatprep.subr.bf16.mxu0 %v12209_v0 }
0x19b8   :  { %v13331_v44 = vadd.f32 %v7271_v60, %v7270_v63 }
0x19ba   :  { %v13335_v19 = vpack.c.bf16 %v13331_v44, %v13331_v44  ;;  %10559 = vmatpush3.bf16.msra.mxu0 %v11738_v26  ;;  %v11826_v26 = vld [vmem:[#allocation2 + $0x1c0] ss:$16 sps:$4 sm:$0xff]  }
0x19bb   :  { %10560 = vmatprep.subr.bf16.mxu0 %v12209_v0 }
0x19bc   :  { %10507 = vmatmul.mubr.bf16.vlgmr.msra.gmra.mrb[76].mxu1 %v13335_v19 }
0x19bd   :  { %10546 = vmatprep.mubr.msk.bf16.mxu1 %vm12210_vm0, %v12209_v0  ;;  %10531 = vmatpush3.bf16.msra.mxu1 %v11726_v23 }
0x19be   :  { %10532 = vmatprep.subr.bf16.mxu1 %v12209_v0 }
0x19c1   :  { %10533 = vmatpush3.bf16.msra.mxu1 %v11727_v57 }
0x19c2   :  { %10534 = vmatprep.subr.bf16.mxu1 %v12209_v0 }
0x19c5   :  { %10535 = vmatpush3.bf16.msra.mxu1 %v11728_v47 }
0x19c6   :  { %10536 = vmatprep.subr.bf16.mxu1 %v12209_v0 }
0x19c9   :  { %10537 = vmatpush3.bf16.msra.mxu1 %v11729_v38  ;;  %v11748_v38 = vld [vmem:[#allocation2 + $0x20] ss:$16 sps:$4 sm:$0xff]  }
0x19ca   :  { %10538 = vmatprep.subr.bf16.mxu1 %v12209_v0 }
0x19cd   :  { %10539 = vmatpush3.bf16.msra.mxu1 %v11730_v36  ;;  %v11756_v36 = vld [vmem:[#allocation2 + $0x44] ss:$16 sps:$4 sm:$0xff]  }
0x19ce   :  { %10540 = vmatprep.subr.bf16.mxu1 %v12209_v0 }
0x19d1   :  { %10541 = vmatpush3.bf16.msra.mxu1 %v11731_v61  ;;  %v11754_v61 = vld [vmem:[#allocation2 + $0x40] ss:$16 sps:$4 sm:$0xff]  }
0x19d2   :  { %10542 = vmatprep.subr.bf16.mxu1 %v12209_v0 }
0x19d5   :  { %10543 = vmatpush3.bf16.msra.mxu1 %v11732_v16  ;;  %v11762_v16 = vld [vmem:[#allocation2 + $0x64] ss:$16 sps:$4 sm:$0xff]  }
0x19d6   :  { %10544 = vmatprep.subr.bf16.mxu1 %v12209_v0 }
0x19d9   :  { %10545 = vmatpush3.bf16.msra.mxu1 %v11733_v62  ;;  %v11760_v62 = vld [vmem:[#allocation2 + $0x60] ss:$16 sps:$4 sm:$0xff]  }
0x19da   :  { %8118 = vmatprep.subr.bf16.mxu1 %v11744_v54  ;;  %v11793_v54 = vld [vmem:[#allocation2 + $0x108] ss:$16 sps:$4 sm:$0xff]  }
0x1a3b   :  { %v7504_v58 = vpop.xlane.xlu0 %7503 }
0x1a3c   :  { %v7505_v48 = vsub.f32 %v7501_v27, %v7504_v58  ;;  %v11739_v27 = vld [vmem:[%s13557_s4 + $0x28] sm:$0xff]  }
0x1a3d   :  { %10561 = vmatpush3.bf16.msra.mxu0 %v11739_v27 }
0x1a3e   :  { %v7506_v49 = vmul.f32 1.442695, %v7505_v48  ;;  %10562 = vmatprep.subr.bf16.mxu0 %v12209_v0 }
0x1a3f   :  { %v1509_v1 = vpop.xlane.xlu0 %1508 }
0x1a40   :  { %12062 = vpow2.f32 %v7506_v49  ;;  %v13391_v2 = vsub.f32 %v1502_v29, %v1509_v1  ;;  %v11768_v1 = vld [vmem:[#allocation2 + $0x84] ss:$16 sps:$4 sm:$0xff]  }
0x1a41   :  { %10563 = vmatpush3.bf16.msra.mxu0 %v11740_v59 }
0x1a42   :  { %v1511_v43 = vmul.f32 1.442695, %v13391_v2  ;;  %10564 = vmatprep.subr.bf16.mxu0 %v12209_v0 }
0x1a43   :  { %v4445_v3 = vpop.xlane.xlu0 %4444 }
0x1a44   :  { %v13394_v4 = vsub.f32 %v4438_v45, %v4445_v3  ;;  %12064 = vpow2.f32 %v1511_v43  ;;  %v11774_v3 = vld [vmem:[#allocation2 + $0xa4] ss:$16 sps:$4 sm:$0xff]   ;;  %v11772_v43 = vld [vmem:[#allocation2 + $0xa0] ss:$16 sps:$4 sm:$0xff]  }
0x1a46   :  { %v4447_v21 = vmul.f32 1.442695, %v13394_v4 }
0x1a48   :  { %12066 = vpow2.f32 %v4447_v21  ;;  %v11778_v21 = vld [vmem:[#allocation2 + $0xc0] ss:$16 sps:$4 sm:$0xff]  }
0x1a4a   :  { %v13355_v51 = vpop.eup %12062 }
0x1a4b   :  { %v7508_v53 = vsel %vm160_vm1, %v13355_v51, 0.0 }
0x1a4c   :  { %7509 = vadd.xlane.f32.xlu1 %v7508_v53  ;;  %v11742_v53 = vld [vmem:[#allocation2] ss:$16 sps:$4 sm:$0xff]  }
0x1a4e   :  { %v12065_v15 = vpop.eup %12064 }
0x1a4f   :  { %v1513_v41 = vsel %vm160_vm1, %v12065_v15, 0.0  ;;  %v11802_v15 = vld [vmem:[#allocation2 + $0x140] ss:$16 sps:$4 sm:$0xff]  }
0x1a50   :  { %2976 = vmax.xlane.f32.xlu1 %v2975_v55  ;;  %v11747_v55 = vld [vmem:[#allocation2 + $0xc] ss:$16 sps:$4 sm:$0xff]  }
0x1a52   :  { %v12067_v17 = vpop.eup %12066 }
0x1a53   :  { %v4449_v39 = vsel %vm160_vm1, %v12067_v17, 0.0  ;;  %v11808_v17 = vld [vmem:[#allocation2 + $0x160] ss:$16 sps:$4 sm:$0xff]  }
0x1a54   :  { %5912 = vmax.xlane.f32.xlu1 %v5911_v56  ;;  %v11750_v56 = vld [vmem:[#allocation2 + $0x24] ss:$16 sps:$4 sm:$0xff]  }
0x1a8f   :  { %v7373_v6 = vpop.f32.mrb[76].mxu1 }
0x1a90   :  { %v7374_v8 = vadd.f32 %v7373_v6, %v7290_v5  ;;  %v10508_v11 = vpop.f32.mrb[77].mxu1  ;;  %v11786_v5 = vld [vmem:[#allocation2 + $0xe4] ss:$16 sps:$4 sm:$0xff]   ;;  %v11784_v6 = vld [vmem:[#allocation2 + $0xe0] ss:$16 sps:$4 sm:$0xff]  }
0x1a91   :  { %v7376_v12 = vpop.f32.mrb[78].mxu1  ;;  %v11790_v11 = vld [vmem:[#allocation2 + $0x100] ss:$16 sps:$4 sm:$0xff]  }
0x1a92   :  { %v10509_v13 = vpop.f32.mrb[79].mxu1  ;;  %v7379_v14 = vsel %vm160_vm1, %v7374_v8, -inf  ;;  %v11798_v12 = vld [vmem:[#allocation2 + $0x124] ss:$16 sps:$4 sm:$0xff]  }
0x1a93   :  { %7380 = vmax.xlane.f32.xlu0 %v7379_v14  ;;  %v11796_v13 = vld [vmem:[#allocation2 + $0x120] ss:$16 sps:$4 sm:$0xff]   ;;  %v11804_v14 = vld [vmem:[#allocation2 + $0x144] ss:$16 sps:$4 sm:$0xff]  }
0x1a97   :  { %1514 = vadd.xlane.f32.xlu0 %v1513_v41  ;;  %v11810_v41 = vld [vmem:[#allocation2 + $0x164] ss:$16 sps:$4 sm:$0xff]  }
0x1a9b   :  { %4450 = vadd.xlane.f32.xlu0 %v4449_v39  ;;  %v11816_v39 = vld [vmem:[#allocation2 + $0x184] ss:$16 sps:$4 sm:$0xff]  }
0x1ad9   :  { %v7510_v28 = vpop.xlane.xlu1 %7509 }
0x1ada   :  { %12068 = vrcp.f32 %v7510_v28 }
0x1ae4   :  { %v12069_v29 = vpop.eup %12068 }
0x1ae5   :  { %v7512_v30 = vmul.f32 %v12069_v29, %v7510_v28  ;;  %v11745_v28 = vld [vmem:[#allocation2 + $0x8] ss:$16 sps:$4 sm:$0xff]  }
0x1ae7   :  { %v7513_v31 = vsub.f32 2.0, %v7512_v30 }
0x1ae9   :  { %v7514_v32 = vmul.f32 %v12069_v29, %v7513_v31  ;;  %v11753_v31 = vld [vmem:[#allocation2 + $0x2c] ss:$16 sps:$4 sm:$0xff]  }
0x1aeb   :  { %v7515_v18 = vmul.f32 %v13355_v51, %v7514_v32  ;;  %v11741_v51 = vld [vmem:[%s13557_s4 + $0x38] sm:$0xff]  }
0x1aec   :  { %10565 = vmatpush3.bf16.msra.mxu0 %v11741_v51  ;;  %v11789_v51 = vld [vmem:[#allocation2 + $0xec] ss:$16 sps:$4 sm:$0xff]  }
0x1aed   :  { %8860 = vst [vmem:[#allocation6 + $0x5] sm:$0x1] %v7515_v18  ;;  %v7516_v45 = vpack.c.bf16 %v7515_v18, %v7515_v18  ;;  %8159 = vmatprep.subr.bf16.mxu0 %v11747_v55  ;;  %v11801_v55 = vld [vmem:[#allocation2 + $0x12c] ss:$16 sps:$4 sm:$0xff]  }
0x1aef   :  { %10547 = vmatmul.mubr.bf16.vlgmr.msra.gmra.mrb[80].mxu1 %v7516_v45  ;;  %v11751_v45 = vld [vmem:[#allocation2 + $0x28] ss:$16 sps:$4 sm:$0xff]  }
0x1af0   :  { %8150 = vmatprep.mubr.bf16.mxu1 %v13227_v10  ;;  %8119 = vmatpush1.bf16.msra.mxu1 %v11742_v53  ;;  %v11787_v53 = vld [vmem:[#allocation2 + $0xe8] ss:$16 sps:$4 sm:$0xff]  }
0x1af1   :  { %8120 = vmatprep.subr.bf16.mxu1 %v11750_v56  ;;  %v11799_v56 = vld [vmem:[#allocation2 + $0x128] ss:$16 sps:$4 sm:$0xff]  }
0x1af4   :  { %8121 = vmatpush1.bf16.msra.mxu1 %v11748_v38  ;;  %v11807_v38 = vld [vmem:[#allocation2 + $0x14c] ss:$16 sps:$4 sm:$0xff]  }
0x1af5   :  { %8122 = vmatprep.subr.bf16.mxu1 %v11756_v36  ;;  %v11805_v36 = vld [vmem:[#allocation2 + $0x148] ss:$16 sps:$4 sm:$0xff]  }
0x1af8   :  { %8123 = vmatpush1.bf16.msra.mxu1 %v11754_v61  ;;  %v11813_v61 = vld [vmem:[#allocation2 + $0x16c] ss:$16 sps:$4 sm:$0xff]  }
0x1af9   :  { %8124 = vmatprep.subr.bf16.mxu1 %v11762_v16  ;;  %v11811_v16 = vld [vmem:[#allocation2 + $0x168] ss:$16 sps:$4 sm:$0xff]  }
0x1afc   :  { %8125 = vmatpush1.bf16.msra.mxu1 %v11760_v62  ;;  %v11819_v62 = vld [vmem:[#allocation2 + $0x18c] ss:$16 sps:$4 sm:$0xff]  }
0x1afd   :  { %8126 = vmatprep.subr.bf16.mxu1 %v11768_v1  ;;  %v11817_v1 = vld [vmem:[#allocation2 + $0x188] ss:$16 sps:$4 sm:$0xff]  }
0x1b20   :  { %v7381_v34 = vpop.xlane.xlu0 %7380 }
0x1b21   :  { %v13433_v35 = vsub.f32 %v7374_v8, %v7381_v34  ;;  %v11792_v8 = vld [vmem:[#allocation2 + $0x104] ss:$16 sps:$4 sm:$0xff]   ;;  %v11759_v34 = vld [vmem:[#allocation2 + $0x4c] ss:$16 sps:$4 sm:$0xff]  }
0x1b23   :  { %v7383_v37 = vmul.f32 1.442695, %v13433_v35 }
0x1b24   :  { %v1515_v42 = vpop.xlane.xlu0 %1514 }
0x1b25   :  { %12070 = vpow2.f32 %v7383_v37 }
0x1b26   :  { %12072 = vlog2.f32 %v1515_v42 }
0x1b28   :  { %v4451_v63 = vpop.xlane.xlu0 %4450 }
0x1b29   :  { %12074 = vlog2.f32 %v4451_v63  ;;  %v11757_v63 = vld [vmem:[#allocation2 + $0x48] ss:$16 sps:$4 sm:$0xff]  }
0x1b2f   :  { %v12071_v60 = vpop.eup %12070 }
0x1b30   :  { %v12073_v23 = vpop.eup %12072  ;;  %v7385_v57 = vsel %vm160_vm1, %v12071_v60, 0.0  ;;  %v11765_v60 = vld [vmem:[#allocation2 + $0x6c] ss:$16 sps:$4 sm:$0xff]  }
0x1b31   :  { %v1517_v47 = vmul.f32 0.6931472, %v12073_v23  ;;  %7386 = vadd.xlane.f32.xlu0 %v7385_v57  ;;  %v11763_v57 = vld [vmem:[#allocation2 + $0x68] ss:$16 sps:$4 sm:$0xff]  }
0x1b33   :  { %v12075_v58 = vpop.eup %12074  ;;  %v1518_v48 = vsub.f32 %v13391_v2, %v1517_v47  ;;  %v11766_v2 = vld [vmem:[#allocation2 + $0x80] ss:$16 sps:$4 sm:$0xff]   ;;  %v11771_v47 = vld [vmem:[#allocation2 + $0x8c] ss:$16 sps:$4 sm:$0xff]  }
0x1b34   :  { %v4453_v49 = vmul.f32 0.6931472, %v12075_v58  ;;  %8127 = vmatpush1.bf16.msra.mxu1 %v11766_v2  ;;  %v11769_v58 = vld [vmem:[#allocation2 + $0x88] ss:$16 sps:$4 sm:$0xff]   ;;  %v11825_v2 = vld [vmem:[#allocation2 + $0x1ac] ss:$16 sps:$4 sm:$0xff]  }
0x1b35   :  { %1519 = vst [vmem:[#allocation5] sm:$0x1] %v1518_v48  ;;  %8128 = vmatprep.subr.bf16.mxu1 %v11774_v3  ;;  %v11775_v48 = vld [vmem:[#allocation2 + $0xa8] ss:$16 sps:$4 sm:$0xff]  }
0x1b36   :  { %v4454_v50 = vsub.f32 %v13394_v4, %v4453_v49  ;;  %v11780_v4 = vld [vmem:[#allocation2 + $0xc4] ss:$16 sps:$4 sm:$0xff]   ;;  %v11783_v49 = vld [vmem:[#allocation2 + $0xcc] ss:$16 sps:$4 sm:$0xff]   ;;  %v11823_v3 = vld [vmem:[#allocation2 + $0x1a8] ss:$16 sps:$4 sm:$0xff]  }
0x1b38   :  { %4455 = vst [vmem:[#allocation5 + $0x2] sm:$0x1] %v4454_v50  ;;  %8129 = vmatpush1.bf16.msra.mxu1 %v11772_v43  ;;  %v11781_v50 = vld [vmem:[#allocation2 + $0xc8] ss:$16 sps:$4 sm:$0xff]   ;;  %v11831_v43 = vld [vmem:[#allocation2 + $0x1cc] ss:$16 sps:$4 sm:$0xff]  }
0x1b39   :  { %8130 = vmatprep.subr.bf16.mxu1 %v11780_v4  ;;  %v11829_v4 = vld [vmem:[#allocation2 + $0x1c8] ss:$16 sps:$4 sm:$0xff]  }
0x1b3c   :  { %8131 = vmatpush1.bf16.msra.mxu1 %v11778_v21  ;;  %v11834_v21 = vld [vmem:[#allocation2 + $0x1e4] ss:$16 sps:$4 sm:$0xff]  }
0x1b3d   :  { %8132 = vmatprep.subr.bf16.mxu1 %v11786_v5  ;;  %v11837_v5 = vld [vmem:[#allocation2 + $0x1ec] ss:$16 sps:$4 sm:$0xff]  }
0x1b40   :  { %8133 = vmatpush1.bf16.msra.mxu1 %v11784_v6  ;;  %v11832_v6 = vld [vmem:[#allocation2 + $0x1e0] ss:$16 sps:$4 sm:$0xff]  }
0x1b41   :  { %8134 = vmatprep.subr.bf16.mxu1 %v11792_v8  ;;  %v11835_v8 = vld [vmem:[#allocation2 + $0x1e8] ss:$16 sps:$4 sm:$0xff]  }
0x1b44   :  { %8135 = vmatpush1.bf16.msra.mxu1 %v11790_v11  ;;  %v11840_v11 = vld [vmem:[#allocation2 + $0x204] ss:$16 sps:$4 sm:$0xff]  }
0x1b45   :  { %8136 = vmatprep.subr.bf16.mxu1 %v11798_v12  ;;  %v11843_v12 = vld [vmem:[#allocation2 + $0x20c] ss:$16 sps:$4 sm:$0xff]  }
0x1b48   :  { %8137 = vmatpush1.bf16.msra.mxu1 %v11796_v13  ;;  %v7623_v13 = vrot.slane %v13313_v46, 1  ;;  %v11844_v46 = vld [vmem:[#allocation2 + $0x220] ss:$16 sps:$4 sm:$0xff]  }
0x1b49   :  { %8138 = vmatprep.subr.bf16.mxu1 %v11804_v14  ;;  %v7621_v14 = vld [vmem:[%s13560_s7 + $0x1] sm:$0x1] }
0x1b4c   :  { %8139 = vmatpush1.bf16.msra.mxu1 %v11802_v15  ;;  %v7625_v15 = vadd.f32 %v7623_v13, %v7621_v14  ;;  %v11915_v13 = vld [vmem:[#allocation2 + $0x38c] ss:$16 sps:$4 sm:$0xff]   ;;  %v11910_v14 = vld [vmem:[#allocation2 + $0x380] ss:$16 sps:$4 sm:$0xff]  }
0x1b4d   :  { %8140 = vmatprep.subr.bf16.mxu1 %v11810_v41 }
0x1b50   :  { %8141 = vmatpush1.bf16.msra.mxu1 %v11808_v17 }
0x1b51   :  { %8142 = vmatprep.subr.bf16.mxu1 %v11816_v39 }
0x1b54   :  { %8143 = vmatpush1.bf16.msra.mxu1 %v11814_v20 }
0x1b55   :  { %8144 = vmatprep.subr.bf16.mxu1 %v11822_v22 }
0x1b58   :  { %8145 = vmatpush1.bf16.msra.mxu1 %v11820_v24 }
0x1b59   :  { %8146 = vmatprep.subr.bf16.mxu1 %v11828_v25 }
0x1b5c   :  { %8147 = vmatpush1.bf16.msra.mxu1 %v11826_v26  ;;  %v11838_v26 = vld [vmem:[#allocation2 + $0x200] ss:$16 sps:$4 sm:$0xff]  }
0x1b5d   :  { %8148 = vmatprep.subr.bf16.mxu1 %v11834_v21  ;;  %v11901_v21 = vld [vmem:[#allocation2 + $0x348] ss:$16 sps:$4 sm:$0xff]  }
0x1b60   :  { %8149 = vmatpush1.bf16.msra.mxu1 %v11832_v6  ;;  %v11909_v6 = vld [vmem:[#allocation2 + $0x36c] ss:$16 sps:$4 sm:$0xff]  }
0x1b61   :  { %8622 = vmatprep.subr.bf16.mxu1 %v11840_v11  ;;  %v11907_v11 = vld [vmem:[#allocation2 + $0x368] ss:$16 sps:$4 sm:$0xff]  }
0x1bbe   :  { %v7387_v27 = vpop.xlane.xlu0 %7386 }
0x1bbf   :  { %12076 = vlog2.f32 %v7387_v27  ;;  %v11841_v27 = vld [vmem:[#allocation2 + $0x208] ss:$16 sps:$4 sm:$0xff]  }
0x1bc2   :  { %v7615_v59 = vpop.f32.mrb[80].mxu1 }
0x1bc3   :  { %v7626_v29 = vpack.c.bf16 %v7615_v59, %v7615_v59  ;;  %v10548_v30 = vpop.f32.mrb[81].mxu1  ;;  %v11846_v59 = vld [vmem:[#allocation2 + $0x224] ss:$16 sps:$4 sm:$0xff]  }
0x1bc4   :  { %v7618_v32 = vpop.f32.mrb[82].mxu1  ;;  %v11852_v30 = vld [vmem:[#allocation2 + $0x244] ss:$16 sps:$4 sm:$0xff]  }
0x1bc5   :  { %v10549_v18 = vpop.f32.mrb[83].mxu1  ;;  %10567 = vmatmul.mubr.bf16.vlgmr.msra.gmra.mrb[84].mxu0 %v7626_v29  ;;  %v11847_v29 = vld [vmem:[#allocation2 + $0x228] ss:$16 sps:$4 sm:$0xff]   ;;  %v11850_v32 = vld [vmem:[#allocation2 + $0x240] ss:$16 sps:$4 sm:$0xff]  }
0x1bc6   :  { %8191 = vmatprep.mubr.bf16.mxu0 %v13227_v10  ;;  %8160 = vmatpush1.bf16.msra.mxu0 %v11745_v28  ;;  %v11777_v10 = vld [vmem:[#allocation2 + $0xac] ss:$16 sps:$4 sm:$0xff]   ;;  %v11853_v18 = vld [vmem:[#allocation2 + $0x248] ss:$16 sps:$4 sm:$0xff]  }
0x1bc7   :  { %8161 = vmatprep.subr.bf16.mxu0 %v11753_v31  ;;  %v11849_v28 = vld [vmem:[#allocation2 + $0x22c] ss:$16 sps:$4 sm:$0xff]  }
0x1bc8   :  { %v11855_v31 = vld [vmem:[#allocation2 + $0x24c] ss:$16 sps:$4 sm:$0xff]  }
0x1bc9   :  { %v12077_v37 = vpop.eup %12076 }
0x1bca   :  { %v7389_v42 = vmul.f32 0.6931472, %v12077_v37  ;;  %8162 = vmatpush1.bf16.msra.mxu0 %v11751_v45  ;;  %v11858_v45 = vld [vmem:[#allocation2 + $0x264] ss:$16 sps:$4 sm:$0xff]   ;;  %v11856_v37 = vld [vmem:[#allocation2 + $0x260] ss:$16 sps:$4 sm:$0xff]  }
0x1bcb   :  { %8163 = vmatprep.subr.bf16.mxu0 %v11759_v34  ;;  %v11861_v34 = vld [vmem:[#allocation2 + $0x26c] ss:$16 sps:$4 sm:$0xff]  }
0x1bcc   :  { %v7390_v23 = vsub.f32 %v13433_v35, %v7389_v42  ;;  %v11795_v35 = vld [vmem:[#allocation2 + $0x10c] ss:$16 sps:$4 sm:$0xff]   ;;  %v11864_v42 = vld [vmem:[#allocation2 + $0x284] ss:$16 sps:$4 sm:$0xff]  }
0x1bce   :  { %7391 = vst [vmem:[#allocation5 + $0x4] sm:$0x1] %v7390_v23  ;;  %8164 = vmatpush1.bf16.msra.mxu0 %v11757_v63  ;;  %v11867_v63 = vld [vmem:[#allocation2 + $0x28c] ss:$16 sps:$4 sm:$0xff]   ;;  %v11865_v23 = vld [vmem:[#allocation2 + $0x288] ss:$16 sps:$4 sm:$0xff]  }
0x1bcf   :  { %8165 = vmatprep.subr.bf16.mxu0 %v11765_v60  ;;  %v11862_v60 = vld [vmem:[#allocation2 + $0x280] ss:$16 sps:$4 sm:$0xff]  }
0x1bd2   :  { %8166 = vmatpush1.bf16.msra.mxu0 %v11763_v57  ;;  %v11870_v57 = vld [vmem:[#allocation2 + $0x2a4] ss:$16 sps:$4 sm:$0xff]  }
0x1bd3   :  { %8167 = vmatprep.subr.bf16.mxu0 %v11771_v47  ;;  %v11873_v47 = vld [vmem:[#allocation2 + $0x2ac] ss:$16 sps:$4 sm:$0xff]  }
0x1bd6   :  { %8168 = vmatpush1.bf16.msra.mxu0 %v11769_v58  ;;  %v11868_v58 = vld [vmem:[#allocation2 + $0x2a0] ss:$16 sps:$4 sm:$0xff]  }
0x1bd7   :  { %8169 = vmatprep.subr.bf16.mxu0 %v11777_v10  ;;  %v11871_v10 = vld [vmem:[#allocation2 + $0x2a8] ss:$16 sps:$4 sm:$0xff]  }
0x1bda   :  { %8170 = vmatpush1.bf16.msra.mxu0 %v11775_v48  ;;  %v11876_v48 = vld [vmem:[#allocation2 + $0x2c4] ss:$16 sps:$4 sm:$0xff]  }
0x1bdb   :  { %8171 = vmatprep.subr.bf16.mxu0 %v11783_v49  ;;  %v11879_v49 = vld [vmem:[#allocation2 + $0x2cc] ss:$16 sps:$4 sm:$0xff]  }
0x1bde   :  { %8172 = vmatpush1.bf16.msra.mxu0 %v11781_v50  ;;  %v11874_v50 = vld [vmem:[#allocation2 + $0x2c0] ss:$16 sps:$4 sm:$0xff]  }
0x1bdf   :  { %8173 = vmatprep.subr.bf16.mxu0 %v11789_v51  ;;  %v11877_v51 = vld [vmem:[#allocation2 + $0x2c8] ss:$16 sps:$4 sm:$0xff]  }
0x1be2   :  { %8174 = vmatpush1.bf16.msra.mxu0 %v11787_v53  ;;  %v11882_v53 = vld [vmem:[#allocation2 + $0x2e4] ss:$16 sps:$4 sm:$0xff]  }
0x1be3   :  { %8175 = vmatprep.subr.bf16.mxu0 %v11795_v35  ;;  %v11885_v35 = vld [vmem:[#allocation2 + $0x2ec] ss:$16 sps:$4 sm:$0xff]  }
0x1be6   :  { %8176 = vmatpush1.bf16.msra.mxu0 %v11793_v54  ;;  %v11880_v54 = vld [vmem:[#allocation2 + $0x2e0] ss:$16 sps:$4 sm:$0xff]  }
0x1be7   :  { %8177 = vmatprep.subr.bf16.mxu0 %v11801_v55  ;;  %v11883_v55 = vld [vmem:[#allocation2 + $0x2e8] ss:$16 sps:$4 sm:$0xff]  }
0x1bea   :  { %8178 = vmatpush1.bf16.msra.mxu0 %v11799_v56  ;;  %v11888_v56 = vld [vmem:[#allocation2 + $0x304] ss:$16 sps:$4 sm:$0xff]  }
0x1beb   :  { %8179 = vmatprep.subr.bf16.mxu0 %v11807_v38  ;;  %v11891_v38 = vld [vmem:[#allocation2 + $0x30c] ss:$16 sps:$4 sm:$0xff]  }
0x1bee   :  { %8180 = vmatpush1.bf16.msra.mxu0 %v11805_v36  ;;  %v11886_v36 = vld [vmem:[#allocation2 + $0x300] ss:$16 sps:$4 sm:$0xff]  }
0x1bef   :  { %8181 = vmatprep.subr.bf16.mxu0 %v11813_v61  ;;  %v11889_v61 = vld [vmem:[#allocation2 + $0x308] ss:$16 sps:$4 sm:$0xff]  }
0x1bf2   :  { %8182 = vmatpush1.bf16.msra.mxu0 %v11811_v16  ;;  %v11894_v16 = vld [vmem:[#allocation2 + $0x324] ss:$16 sps:$4 sm:$0xff]  }
0x1bf3   :  { %8183 = vmatprep.subr.bf16.mxu0 %v11819_v62  ;;  %v11897_v62 = vld [vmem:[#allocation2 + $0x32c] ss:$16 sps:$4 sm:$0xff]  }
0x1bf6   :  { %8184 = vmatpush1.bf16.msra.mxu0 %v11817_v1  ;;  %v11892_v1 = vld [vmem:[#allocation2 + $0x320] ss:$16 sps:$4 sm:$0xff]  }
0x1bf7   :  { %8185 = vmatprep.subr.bf16.mxu0 %v11825_v2  ;;  %v11895_v2 = vld [vmem:[#allocation2 + $0x328] ss:$16 sps:$4 sm:$0xff]  }
0x1bfa   :  { %8186 = vmatpush1.bf16.msra.mxu0 %v11823_v3  ;;  %v11900_v3 = vld [vmem:[#allocation2 + $0x344] ss:$16 sps:$4 sm:$0xff]  }
0x1bfb   :  { %8187 = vmatprep.subr.bf16.mxu0 %v11831_v43  ;;  %v11903_v43 = vld [vmem:[#allocation2 + $0x34c] ss:$16 sps:$4 sm:$0xff]  }
0x1bfe   :  { %8188 = vmatpush1.bf16.msra.mxu0 %v11829_v4  ;;  %v11898_v4 = vld [vmem:[#allocation2 + $0x340] ss:$16 sps:$4 sm:$0xff]  }
0x1bff   :  { %8189 = vmatprep.subr.bf16.mxu0 %v11837_v5  ;;  %v11906_v5 = vld [vmem:[#allocation2 + $0x364] ss:$16 sps:$4 sm:$0xff]  }
0x1c02   :  { %8190 = vmatpush1.bf16.msra.mxu0 %v11835_v8  ;;  %v11904_v8 = vld [vmem:[#allocation2 + $0x360] ss:$16 sps:$4 sm:$0xff]  }
0x1c03   :  { %8663 = vmatprep.subr.bf16.mxu0 %v11843_v12  ;;  %v11912_v12 = vld [vmem:[#allocation2 + $0x384] ss:$16 sps:$4 sm:$0xff]  }
0x1c98   :  { %v7725_v41 = vpop.f32.mrb[84].mxu0 }
0x1c99   :  { %v7731_v17 = vadd.f32 %v7725_v41, %v7625_v15  ;;  %v10568_v39 = vpop.f32.mrb[85].mxu0  ;;  %v11913_v15 = vld [vmem:[#allocation2 + $0x388] ss:$16 sps:$4 sm:$0xff]   ;;  %v11918_v41 = vld [vmem:[#allocation2 + $0x3a4] ss:$16 sps:$4 sm:$0xff]  }
0x1c9a   :  { %v7728_v20 = vpop.f32.mrb[86].mxu0  ;;  %v11916_v39 = vld [vmem:[#allocation2 + $0x3a0] ss:$16 sps:$4 sm:$0xff]  }
0x1c9b   :  { %v7732_v22 = vmax.f32 %v7731_v17, 0.0  ;;  %v10569_v24 = vpop.f32.mrb[87].mxu0  ;;  %v11921_v17 = vld [vmem:[#allocation2 + $0x3ac] ss:$16 sps:$4 sm:$0xff]   ;;  %v11919_v20 = vld [vmem:[#allocation2 + $0x3a8] ss:$16 sps:$4 sm:$0xff]  }
0x1c9c   :  { %v11927_v24 = vld [vmem:[#allocation2 + $0x3cc] ss:$16 sps:$4 sm:$0xff]  }
0x1c9d   :  { %v7733_v25 = vpack.c.bf16 %v7732_v22, %v7732_v22  ;;  %v11924_v22 = vld [vmem:[#allocation2 + $0x3c4] ss:$16 sps:$4 sm:$0xff]  }
0x1c9f   :  { %8151 = vmatmul.mubr.bf16.vlgmr.msra.gmra.mrb[84].mxu1 %v7733_v25  ;;  %8192 = vmatmul.mubr.bf16.vlgmr.msra.gmra.mrb[88].mxu0 %v7733_v25  ;;  %v11922_v25 = vld [vmem:[#allocation2 + $0x3c0] ss:$16 sps:$4 sm:$0xff]  }
0x1ca0   :  { %8654 = vmatprep.mubr.bf16.mxu1 %v13335_v19  ;;  %8695 = vmatprep.mubr.bf16.mxu0 %v13335_v19  ;;  %v11859_v19 = vld [vmem:[#allocation2 + $0x268] ss:$16 sps:$4 sm:$0xff]  }
0x1ca1   :  { %8623 = vmatpush1.bf16.msra.mxu1 %v11838_v26  ;;  %8664 = vmatpush1.bf16.msra.mxu0 %v11841_v27  ;;  %v11925_v26 = vld [vmem:[#allocation2 + $0x3c8] ss:$16 sps:$4 sm:$0xff]   ;;  %v11930_v27 = vld [vmem:[#allocation2 + $0x3e4] ss:$16 sps:$4 sm:$0xff]  }
0x1ca2   :  { %8624 = vmatprep.subr.bf16.mxu1 %v11846_v59  ;;  %8665 = vmatprep.subr.bf16.mxu0 %v11849_v28  ;;  %v11933_v59 = vld [vmem:[#allocation2 + $0x3ec] ss:$16 sps:$4 sm:$0xff]   ;;  %v11928_v28 = vld [vmem:[#allocation2 + $0x3e0] ss:$16 sps:$4 sm:$0xff]  }
0x1ca5   :  { %8625 = vmatpush1.bf16.msra.mxu1 %v11844_v46  ;;  %8666 = vmatpush1.bf16.msra.mxu0 %v11847_v29  ;;  %v11931_v46 = vld [vmem:[#allocation2 + $0x3e8] ss:$16 sps:$4 sm:$0xff]   ;;  %v8200_v29 = vld [vmem:[%s13560_s7 + $0x2] sm:$0x3] }
0x1ca6   :  { %8626 = vmatprep.subr.bf16.mxu1 %v11852_v30  ;;  %8667 = vmatprep.subr.bf16.mxu0 %v11855_v31  ;;  %v8205_v30 = vrot.slane %v8200_v29, %v12414_v7 }
0x1ca9   :  { %8627 = vmatpush1.bf16.msra.mxu1 %v11850_v32  ;;  %8668 = vmatpush1.bf16.msra.mxu0 %v11853_v18  ;;  %v8209_v18 = vrot.slane %v8200_v29, %v12419_v9  ;;  %v8730_v29 = vld [vmem:[%s13560_s7 + $0x8] sm:$0x1] }
0x1caa   :  { %8628 = vmatprep.subr.bf16.mxu1 %v11858_v45  ;;  %8669 = vmatprep.subr.bf16.mxu0 %v11861_v34 }
0x1cad   :  { %8629 = vmatpush1.bf16.msra.mxu1 %v11856_v37  ;;  %8670 = vmatpush1.bf16.msra.mxu0 %v11859_v19 }
0x1cae   :  { %8630 = vmatprep.subr.bf16.mxu1 %v11864_v42  ;;  %8671 = vmatprep.subr.bf16.mxu0 %v11867_v63 }
0x1cb1   :  { %8631 = vmatpush1.bf16.msra.mxu1 %v11862_v60  ;;  %8672 = vmatpush1.bf16.msra.mxu0 %v11865_v23 }
0x1cb2   :  { %8632 = vmatprep.subr.bf16.mxu1 %v11870_v57  ;;  %8673 = vmatprep.subr.bf16.mxu0 %v11873_v47 }
0x1cb5   :  { %8633 = vmatpush1.bf16.msra.mxu1 %v11868_v58  ;;  %8674 = vmatpush1.bf16.msra.mxu0 %v11871_v10 }
0x1cb6   :  { %8634 = vmatprep.subr.bf16.mxu1 %v11876_v48  ;;  %8675 = vmatprep.subr.bf16.mxu0 %v11879_v49  ;;  %v8228_v49 = vld [vmem:[%s13560_s7 + $0x5] sm:$0x1] }
0x1cb9   :  { %8635 = vmatpush1.bf16.msra.mxu1 %v11874_v50  ;;  %8676 = vmatpush1.bf16.msra.mxu0 %v11877_v51  ;;  %v8226_v51 = vld [vmem:[%s13560_s7 + $0x4] sm:$0x1] }
0x1cba   :  { %8636 = vmatprep.subr.bf16.mxu1 %v11882_v53  ;;  %8677 = vmatprep.subr.bf16.mxu0 %v11885_v35 }
0x1cbd   :  { %8637 = vmatpush1.bf16.msra.mxu1 %v11880_v54  ;;  %8678 = vmatpush1.bf16.msra.mxu0 %v11883_v55 }
0x1cbe   :  { %8638 = vmatprep.subr.bf16.mxu1 %v11888_v56  ;;  %8679 = vmatprep.subr.bf16.mxu0 %v11891_v38 }
0x1cc1   :  { %8639 = vmatpush1.bf16.msra.mxu1 %v11886_v36  ;;  %8680 = vmatpush1.bf16.msra.mxu0 %v11889_v61 }
0x1cc2   :  { %8640 = vmatprep.subr.bf16.mxu1 %v11894_v16  ;;  %8681 = vmatprep.subr.bf16.mxu0 %v11897_v62 }
0x1cc5   :  { %8641 = vmatpush1.bf16.msra.mxu1 %v11892_v1  ;;  %8682 = vmatpush1.bf16.msra.mxu0 %v11895_v2 }
0x1cc6   :  { %8642 = vmatprep.subr.bf16.mxu1 %v11900_v3  ;;  %8683 = vmatprep.subr.bf16.mxu0 %v11903_v43  ;;  %v11934_v3 = vld [vmem:[%s13559_s6] sm:$0xff]   ;;  %v11935_v43 = vld [vmem:[%s13559_s6 + $0x8] sm:$0xff]  }
0x1cc9   :  { %8643 = vmatpush1.bf16.msra.mxu1 %v11898_v4  ;;  %8684 = vmatpush1.bf16.msra.mxu0 %v11901_v21  ;;  %v11937_v4 = vld [vmem:[%s13559_s6 + $0x18] sm:$0xff]   ;;  %v11938_v21 = vld [vmem:[%s13559_s6 + $0x20] sm:$0xff]  }
0x1cca   :  { %8644 = vmatprep.subr.bf16.mxu1 %v11906_v5  ;;  %8685 = vmatprep.subr.bf16.mxu0 %v11909_v6  ;;  %v11939_v5 = vld [vmem:[%s13559_s6 + $0x28] sm:$0xff]   ;;  %v11940_v6 = vld [vmem:[%s13559_s6 + $0x30] sm:$0xff]  }
0x1ccd   :  { %8645 = vmatpush1.bf16.msra.mxu1 %v11904_v8  ;;  %8686 = vmatpush1.bf16.msra.mxu0 %v11907_v11  ;;  %v11941_v8 = vld [vmem:[%s13559_s6 + $0x38] sm:$0xff]   ;;  %v8704_v11 = vld [vmem:[%s13560_s7 + $0x6] sm:$0x3] }
0x1cce   :  { %8646 = vmatprep.subr.bf16.mxu1 %v11912_v12  ;;  %8687 = vmatprep.subr.bf16.mxu0 %v11915_v13  ;;  %v8709_v12 = vrot.slane %v8704_v11, %v12414_v7 }
0x1cd1   :  { %8647 = vmatpush1.bf16.msra.mxu1 %v11910_v14  ;;  %8688 = vmatpush1.bf16.msra.mxu0 %v11913_v15  ;;  %v8713_v15 = vrot.slane %v8704_v11, %v12419_v9  ;;  %v8732_v9 = vld [vmem:[%s13560_s7 + $0x9] sm:$0x1] }
0x1cd2   :  { %8648 = vmatprep.subr.bf16.mxu1 %v11918_v41  ;;  %8689 = vmatprep.subr.bf16.mxu0 %v11921_v17 }
0x1cd5   :  { %8649 = vmatpush1.bf16.msra.mxu1 %v11916_v39  ;;  %8690 = vmatpush1.bf16.msra.mxu0 %v11919_v20 }
0x1cd6   :  { %8650 = vmatprep.subr.bf16.mxu1 %v11924_v22  ;;  %8691 = vmatprep.subr.bf16.mxu0 %v11927_v24 }
0x1cd9   :  { %8651 = vmatpush1.bf16.msra.mxu1 %v11922_v25  ;;  %8692 = vmatpush1.bf16.msra.mxu0 %v11925_v26 }
0x1cda   :  { %8652 = vmatprep.subr.bf16.mxu1 %v11930_v27  ;;  %8693 = vmatprep.subr.bf16.mxu0 %v11933_v59 }
0x1cdd   :  { %8653 = vmatpush1.bf16.msra.mxu1 %v11928_v28  ;;  %8694 = vmatpush1.bf16.msra.mxu0 %v11931_v46 }
0x1cde   :  { %10570 = vmatprep.subr.bf16.mxu1 %v12209_v0 }
0x1d72   :  { %v8152_v31 = vpop.f32.mrb[84].mxu1  ;;  %v8193_v32 = vpop.f32.mrb[88].mxu0 }
0x1d73   :  { %v8212_v45 = vadd.f32 %v8205_v30, %v8152_v31  ;;  %v8154_v34 = vpop.f32.mrb[85].mxu1  ;;  %v8195_v37 = vpop.f32.mrb[89].mxu0  ;;  %v8227_v54 = vadd.f32 %v8226_v51, %v8193_v32 }
0x1d74   :  { %v8156_v19 = vpop.f32.mrb[86].mxu1  ;;  %v8197_v42 = vpop.f32.mrb[90].mxu0  ;;  %v8213_v57 = vadd.f32 %v8209_v18, %v8154_v34  ;;  %v8229_v53 = vadd.f32 %v8228_v49, %v8195_v37 }
0x1d75   :  { %v9818_v63 = vmul.f32 -1.442695, %v8212_v45  ;;  %v8157_v60 = vpop.f32.mrb[87].mxu1  ;;  %v8198_v23 = vpop.f32.mrb[91].mxu0 }
0x1d76   :  { %v9819_v47 = vmul.f32 -1.442695, %v8213_v57  ;;  %v2977_v57 = vpop.xlane.xlu1 %2976 }
0x1d77   :  { %12078 = vpow2.f32 %v9818_v63 }
0x1d78   :  { %12080 = vpow2.f32 %v9819_v47  ;;  %v2978_v47 = vsub.f32 %v13358_v52, %v2977_v57 }
0x1d81   :  { %v12079_v58 = vpop.eup %12078 }
0x1d82   :  { %v8220_v10 = vadd.f32 1.0, %v12079_v58  ;;  %v12081_v48 = vpop.eup %12080  ;;  %v5913_v58 = vpop.xlane.xlu1 %5912 }
0x1d83   :  { %v8221_v50 = vadd.f32 1.0, %v12081_v48  ;;  %v5914_v48 = vsub.f32 %v13366_v40, %v5913_v58 }
0x1d84   :  { %12082 = vrcp.f32 %v8220_v10  ;;  %v2979_v10 = vmul.f32 1.442695, %v2978_v47 }
0x1d85   :  { %12084 = vrcp.f32 %v8221_v50  ;;  %v5915_v49 = vmul.f32 1.442695, %v5914_v48  ;;  %v8758_v50 = vld [vmem:[%s13560_s7 + $0xa] sm:$0x1]  ;;  %s12211_s7 = smov [#allocation6]  }
0x1d86   :  { %s8879_s24 = sshll.u32 %s12211_s7, 4  ;;  %s8880_s24 = int_to_ptr.vmem [resolvable:$true] %s8879_s24 }
0x1d87   :  { %s12134_s25 = scalar_lea.vmem %s8880_s24, 128  ;;  %p12139_p9 = scmp.lt.s32.totalorder %s8880_s24, %s8880_s24 }
0x1d88   :  { %p12135_p8 = scmp.ne.s32.totalorder %s8880_s24, %s12134_s25  ;;  %p12140_p10 = scmp.lt.s32.totalorder %s12134_s25, %s12134_s25 }
0x1d8a   :  { %p12141_p11 = por %p12140_p10, %p12139_p9 }
0x1d8c   :  { %p12142_p12 = pnand %p12141_p11, %p12135_p8 }
0x1d8e   :  { %v12083_v35 = vpop.eup %12082 }
0x1d8f   :  { %v8230_v55 = vmul.f32 %v12083_v35, %v8229_v53  ;;  %v12085_v38 = vpop.eup %12084 }
0x1d90   :  { %v8233_v36 = vsub.f32 1.0, %v12085_v38  ;;  %v8235_v62 = vmul.f32 %v12085_v38, %v13220_v33  ;;  %v11936_v33 = vld [vmem:[%s13559_s6 + $0x10] sm:$0xff]  }
0x1d91   :  { %v8231_v56 = vadd.f32 %v8230_v55, %v8227_v54 }
0x1d93   :  { %12086 = vtanh.f32 %v8231_v56 }
0x1d9d   :  { %v12087_v61 = vpop.eup %12086 }
0x1d9e   :  { %v8234_v16 = vmul.f32 %v12087_v61, %v8233_v36 }
0x1da0   :  { %v8236_v1 = vadd.f32 %v8235_v62, %v8234_v16 }
0x1da2   :  { %v8237_v2 = vpack.c.bf16 %v8236_v1, %v8236_v1  ;;  %8861 = vst [vmem:[#allocation8] sm:$0x1] %v8236_v1 }
0x1da4   :  { %8655 = vmatmul.mubr.bf16.vlgmr.msra.gmra.mrb[88].mxu1 %v8237_v2  ;;  %8696 = vmatmul.mubr.bf16.vlgmr.msra.gmra.mrb[92].mxu0 %v8237_v2 }
0x1da5   :  { %10586 = vmatprep.mubr.msk.bf16.mxu1 %vm12210_vm0, %v12209_v0  ;;  %10571 = vmatpush3.bf16.msra.mxu1 %v11934_v3 }
0x1da6   :  { %10572 = vmatprep.subr.bf16.mxu1 %v12209_v0 }
0x1da9   :  { %10573 = vmatpush3.bf16.msra.mxu1 %v11935_v43 }
0x1daa   :  { %10574 = vmatprep.subr.bf16.mxu1 %v12209_v0 }
0x1dad   :  { %10575 = vmatpush3.bf16.msra.mxu1 %v11936_v33 }
0x1dae   :  { %10576 = vmatprep.subr.bf16.mxu1 %v12209_v0 }
0x1db1   :  { %10577 = vmatpush3.bf16.msra.mxu1 %v11937_v4 }
0x1db2   :  { %10578 = vmatprep.subr.bf16.mxu1 %v12209_v0 }
0x1db5   :  { %10579 = vmatpush3.bf16.msra.mxu1 %v11938_v21 }
0x1db6   :  { %10580 = vmatprep.subr.bf16.mxu1 %v12209_v0 }
0x1db9   :  { %10581 = vmatpush3.bf16.msra.mxu1 %v11939_v5 }
0x1dba   :  { %10582 = vmatprep.subr.bf16.mxu1 %v12209_v0 }
0x1dbd   :  { %10583 = vmatpush3.bf16.msra.mxu1 %v11940_v6 }
0x1dbe   :  { %10584 = vmatprep.subr.bf16.mxu1 %v12209_v0 }
0x1dc1   :  { %10585 = vmatpush3.bf16.msra.mxu1 %v11941_v8 }
0x1e77   :  { %v8656_v13 = vpop.f32.mrb[88].mxu1  ;;  %v8697_v14 = vpop.f32.mrb[92].mxu0 }
0x1e78   :  { %v8716_v41 = vadd.f32 %v8709_v12, %v8656_v13  ;;  %v8658_v17 = vpop.f32.mrb[89].mxu1  ;;  %v8699_v39 = vpop.f32.mrb[93].mxu0  ;;  %v8731_v32 = vadd.f32 %v8730_v29, %v8697_v14 }
0x1e79   :  { %v8660_v20 = vpop.f32.mrb[90].mxu1  ;;  %v8701_v22 = vpop.f32.mrb[94].mxu0  ;;  %v8717_v0 = vadd.f32 %v8713_v15, %v8658_v17  ;;  %v8733_v30 = vadd.f32 %v8732_v9, %v8699_v39 }
0x1e7a   :  { %v9884_v24 = vmul.f32 -1.442695, %v8716_v41  ;;  %v8661_v25 = vpop.f32.mrb[91].mxu1  ;;  %v8702_v26 = vpop.f32.mrb[95].mxu0 }
0x1e7b   :  { %v9885_v27 = vmul.f32 -1.442695, %v8717_v0 }
0x1e7c   :  { %12088 = vpow2.f32 %v9884_v24 }
0x1e7d   :  { %12090 = vpow2.f32 %v9885_v27 }
0x1e86   :  { %v12089_v59 = vpop.eup %12088 }
0x1e87   :  { %v8724_v28 = vadd.f32 1.0, %v12089_v59  ;;  %v12091_v7 = vpop.eup %12090 }
0x1e88   :  { %v8725_v46 = vadd.f32 1.0, %v12091_v7 }
0x1e89   :  { %12092 = vrcp.f32 %v8724_v28 }
0x1e8a   :  { %12094 = vrcp.f32 %v8725_v46 }
0x1e93   :  { %v12093_v31 = vpop.eup %12092 }
0x1e94   :  { %v8734_v18 = vmul.f32 %v12093_v31, %v8733_v30  ;;  %v12095_v34 = vpop.eup %12094 }
0x1e95   :  { %v8737_v37 = vsub.f32 1.0, %v12095_v34  ;;  %v8739_v63 = vmul.f32 %v12095_v34, %v13331_v44 }
0x1e96   :  { %v8735_v45 = vadd.f32 %v8734_v18, %v8731_v32 }
0x1e98   :  { %12096 = vtanh.f32 %v8735_v45 }
0x1e99   :  { %12098 = vpow2.f32 %v2979_v10 }
0x1e9a   :  { %12100 = vpow2.f32 %v5915_v49 }
0x1ea2   :  { %v12097_v19 = vpop.eup %12096 }
0x1ea3   :  { %v8738_v42 = vmul.f32 %v12097_v19, %v8737_v37  ;;  %v12099_v56 = vpop.eup %12098 }
0x1ea4   :  { %v2981_v52 = vsel %vm160_vm1, %v12099_v56, 0.0  ;;  %v12101_v38 = vpop.eup %12100 }
0x1ea5   :  { %v8740_v60 = vadd.f32 %v8739_v63, %v8738_v42  ;;  %v5917_v40 = vsel %vm160_vm1, %v12101_v38, 0.0 }
0x1ea7   :  { %v8741_v23 = vpack.c.bf16 %v8740_v60, %v8740_v60  ;;  %8862 = vst [vmem:[#allocation8 + $0x1] sm:$0x1] %v8740_v60 }
0x1ea9   :  { %10587 = vmatmul.mubr.bf16.vlgmr.msra.gmra.mrb[92].mxu1 %v8741_v23 }
0x1f7c   :  { %v8841_v51 = vpop.f32.mrb[92].mxu1 }
0x1f7d   :  { %v8842_v44 = vadd.f32 %v8841_v51, %v8758_v50  ;;  %v10588_v53 = vpop.f32.mrb[93].mxu1 }
0x1f7e   :  { %v8844_v35 = vpop.f32.mrb[94].mxu1 }
0x1f7f   :  { %v10589_v54 = vpop.f32.mrb[95].mxu1  ;;  %v8847_v55 = vsel %vm160_vm1, %v8842_v44, -inf }
0x1f80   :  { %8848 = vmax.xlane.f32.xlu1 %v8847_v55 }
0x1f84   :  { %2982 = vadd.xlane.f32.xlu1 %v2981_v52 }
0x1f88   :  { %5918 = vadd.xlane.f32.xlu1 %v5917_v40 }
0x200d   :  { %v8849_v36 = vpop.xlane.xlu1 %8848 }
0x200e   :  { %v8850_v61 = vsub.f32 %v8842_v44, %v8849_v36 }
0x2010   :  { %v8851_v16 = vmul.f32 1.442695, %v8850_v61 }
0x2011   :  { %v2983_v62 = vpop.xlane.xlu1 %2982 }
0x2012   :  { %12102 = vpow2.f32 %v8851_v16 }
0x2013   :  { %12104 = vlog2.f32 %v2983_v62 }
0x2015   :  { %v5919_v1 = vpop.xlane.xlu1 %5918 }
0x2016   :  { %12106 = vlog2.f32 %v5919_v1 }
0x201c   :  { %v12103_v2 = vpop.eup %12102 }
0x201d   :  { %v12105_v3 = vpop.eup %12104  ;;  %v8853_v43 = vsel %vm160_vm1, %v12103_v2, 0.0 }
0x201e   :  { %v2985_v33 = vmul.f32 0.6931472, %v12105_v3  ;;  %8854 = vadd.xlane.f32.xlu1 %v8853_v43 }
0x2020   :  { %v12107_v4 = vpop.eup %12106  ;;  %v2986_v21 = vsub.f32 %v2978_v47, %v2985_v33 }
0x2021   :  { %v5921_v5 = vmul.f32 0.6931472, %v12107_v4 }
0x2022   :  { %2987 = vst [vmem:[#allocation5 + $0x1] sm:$0x1] %v2986_v21 }
0x2023   :  { %v5922_v6 = vsub.f32 %v5914_v48, %v5921_v5 }
0x2025   :  { %5923 = vst [vmem:[#allocation5 + $0x3] sm:$0x1] %v5922_v6 }
0x2026   :  { %12145 = shalt.err (!%p12142_p12)
}
0x2027   :  { %s12146_s3 = scalar_lea.hbm %s13562_s9, 128 }
0x2028   :  { %p12147_p13 = scmp.ne.s32.totalorder %s13562_s9, %s12146_s3  ;;  %p12150_p0 = scmp.lt.u32.totalorder %s12146_s3, %s13562_s9 }
0x202a   :  { %p12152_p1 = pnand %p12150_p0, %p12147_p13 }
0x202c   :  { %12155 = shalt.err (!%p12152_p1)
}
0x202d   :  { %8882 = dma.vmem_to_hbm [thread:$0]  %s8880_s24, 128, %s13562_s9, [#allocation7]  }
0x202e   :  { %s12212_s11 = smov [#allocation8]  }
0x202f   :  { %s8889_s12 = sshll.u32 %s12212_s11, 4  ;;  %s8890_s12 = int_to_ptr.vmem [resolvable:$true] %s8889_s12 }
0x2030   :  { %s12156_s13 = scalar_lea.vmem %s8890_s12, 32  ;;  %p12161_p3 = scmp.lt.s32.totalorder %s8890_s12, %s8890_s12 }
0x2031   :  { %p12157_p2 = scmp.ne.s32.totalorder %s8890_s12, %s12156_s13  ;;  %p12162_p4 = scmp.lt.s32.totalorder %s12156_s13, %s12156_s13 }
0x2033   :  { %p12163_p5 = por %p12162_p4, %p12161_p3 }
0x2035   :  { %p12164_p6 = pnand %p12163_p5, %p12157_p2 }
0x2037   :  { %12167 = shalt.err (!%p12164_p6)
}
0x2038   :  { %s12168_s15 = scalar_lea.hbm %s13563_s10, 32 }
0x2039   :  { %p12169_p7 = scmp.ne.s32.totalorder %s13563_s10, %s12168_s15  ;;  %p12172_p8 = scmp.lt.u32.totalorder %s12168_s15, %s13563_s10 }
0x203b   :  { %p12174_p9 = pnand %p12172_p8, %p12169_p7 }
0x203d   :  { %12177 = shalt.err (!%p12174_p9)
}
0x203e   :  { %8892 = dma.vmem_to_hbm [thread:$0]  %s8890_s12, 32, %s13563_s10, [#allocation7]  }
0x203f   :  { %s12213_s4 = smov [#allocation5]  }
0x2040   :  { %s8869_s20 = sshll.u32 %s12213_s4, 4  ;;  %s8870_s20 = int_to_ptr.vmem [resolvable:$true] %s8869_s20 }
0x2041   :  { %s12178_s21 = scalar_lea.vmem %s8870_s20, 128  ;;  %p12183_p11 = scmp.lt.s32.totalorder %s8870_s20, %s8870_s20 }
0x2042   :  { %p12179_p10 = scmp.ne.s32.totalorder %s8870_s20, %s12178_s21  ;;  %p12184_p12 = scmp.lt.s32.totalorder %s12178_s21, %s12178_s21 }
0x2044   :  { %p12185_p13 = por %p12184_p12, %p12183_p11 }
0x2046   :  { %p12186_p0 = pnand %p12185_p13, %p12179_p10 }
0x20ab   :  { %v8855_v8 = vpop.xlane.xlu1 %8854 }
0x20ac   :  { %12108 = vlog2.f32 %v8855_v8 }
0x20b6   :  { %v12109_v11 = vpop.eup %12108 }
0x20b7   :  { %v8857_v12 = vmul.f32 0.6931472, %v12109_v11 }
0x20b9   :  { %v8858_v13 = vsub.f32 %v8850_v61, %v8857_v12 }
0x20bb   :  { %8859 = vst [vmem:[#allocation5 + $0x5] sm:$0x1] %v8858_v13 }
0x20bc   :  { %12189 = shalt.err (!%p12186_p0)
}
0x20bd   :  { %s12190_s10 = scalar_lea.hbm %s13561_s8, 128 }
0x20be   :  { %p12191_p1 = scmp.ne.s32.totalorder %s13561_s8, %s12190_s10  ;;  %p12194_p2 = scmp.lt.u32.totalorder %s12190_s10, %s13561_s8 }
0x20c0   :  { %p12196_p3 = pnand %p12194_p2, %p12191_p1 }
0x20c2   :  { %12199 = shalt.err (!%p12196_p3)
}
0x20c3   :  { %8872 = dma.vmem_to_hbm [thread:$0]  %s8870_s20, 128, %s13561_s8, [#allocation4]  }
0x20c4   :  { %12202 = dma.done.wait [#allocation4], 128  }
0x20c5   :  { %12203 = vsyncadd [#allocation4], 4294967168 }
0x20c6   :  { %12204 = dma.done.wait [#allocation7], 160  }
0x20c7   :  { %12205 = vsyncadd [#allocation7], 4294967136 }
0x20c8   :  { %8902 = vsyncpa [#allocation3], 1 }
0x20c9   :  { %8903 = vsyncpa [#allocation4], 1 }
0x20ca   :  { %8904 = vsyncpa [#allocation7], 1 }

</bundles_post_ra>
